<compile_context>
chip_gen: v6e
topology: v6e:2x2x1
jax: 0.10.0
libtpu: 0.0.40
codegen_flags: <defaults>
</compile_context>

<pallas_src>
import numpy as np
import jax
import jax.numpy as jnp
from jax import lax
from jax.experimental import pallas as pl
from jax.experimental.pallas import tpu as pltpu

jax.config.update("jax_default_matmul_precision", "highest")

# Small synthetic stand-ins for utils.PIANO_KEYS and utils.CLIP_LENGTH * utils.FPS
PIANO_KEYS = 16
CLIP_FRAMES = 16
BN_EPS = 1e-5


# ---------------------------------------------------------------------------
# Fused Pallas kernel: conv stack + pool + bidirectional GRU + max-over-time
# ---------------------------------------------------------------------------
def make_concept_kernel(layer_cfg):
    """Build the fused Concept forward kernel (one batch element per grid step)."""

    def kernel(*refs):
        x_ref, o_ref = refs[0], refs[-1]
        idx = 1

        x = x_ref[0]                       # (Cin*H, W) activation tile, frames in lanes
        W = x.shape[1]

        # ------------------- ConvLayer stack (all in VMEM) -------------------
        for cfg in layer_cfg:
            band, bv, sc, sh = refs[idx], refs[idx + 1], refs[idx + 2], refs[idx + 3]
            idx += 4
            rows = x.shape[0]
            zcol = jnp.zeros((rows, 1), jnp.float32)
            xp = jnp.concatenate([zcol, x, zcol], axis=1)                 # zero-pad frames
            # stack the three frame shifts along K -> in-VMEM "im2col" (no HBM blowup)
            xcat = jnp.concatenate(
                [xp[:, 0:W], xp[:, 1:W + 1], xp[:, 2:W + 2]], axis=0)     # (3*Cin*H, W)
            y = jnp.dot(band[...], xcat, preferred_element_type=jnp.float32)  # (Cout*H, W)
            y = jnp.maximum(y + bv[...], 0.0)         # conv bias + ReLU (Dropout2d = id in eval)
            y = y * sc[...] + sh[...]                 # BatchNorm2d (eval) folded to scale/shift
            if cfg["has_pool"]:                       # AvgPool2d(2), separable (tiny matmuls)
                ph, pw = refs[idx], refs[idx + 1]
                idx += 2
                y = jnp.dot(ph[...], y, preferred_element_type=jnp.float32)   # pool over keys
                y = jnp.dot(y, pw[...], preferred_element_type=jnp.float32)   # pool over frames
                W = W // 2
            x = y

        # x is now (D, T), D = C_last*H_last with row order c*H + h (identical to the PyTorch
        # wrapper's view(B, W, C*H)).  One tiny transpose makes the whole GRU lane-dense.
        wihT, bih = refs[idx], refs[idx + 1]
        whhT_f, bhh_f = refs[idx + 2], refs[idx + 3]
        whhT_b, bhh_b = refs[idx + 4], refs[idx + 5]
        Hg = whhT_f.shape[0]
        T = x.shape[1]

        xT = jnp.transpose(x)                                              # (T, D)
        # Hoisted input projections: every timestep, both directions, ONE matmul.
        gi = jnp.dot(xT, wihT[...], preferred_element_type=jnp.float32) + bih[...]  # (T, 6*Hg)

        wf, bf = whhT_f[...], bhh_f[...]          # hoist weight reads out of the unrolled loop
        wb, bb = whhT_b[...], bhh_b[...]

        def cell(gi_t, h, whhT, bhh):
            # PyTorch GRU cell, gate order r, z, n; h is a (1, Hg) row vector (lane-dense).
            gh = jnp.dot(h, whhT, preferred_element_type=jnp.float32) + bhh      # (1, 3*Hg)
            r = jax.nn.sigmoid(gi_t[:, 0:Hg] + gh[:, 0:Hg])
            z = jax.nn.sigmoid(gi_t[:, Hg:2 * Hg] + gh[:, Hg:2 * Hg])
            n = jnp.tanh(gi_t[:, 2 * Hg:3 * Hg] + r * gh[:, 2 * Hg:3 * Hg])
            return (1.0 - z) * n + z * h

        h_f = jnp.zeros((1, Hg), jnp.float32)
        h_b = jnp.zeros((1, Hg), jnp.float32)
        m_f = jnp.full((1, Hg), -jnp.inf, jnp.float32)
        m_b = jnp.full((1, Hg), -jnp.inf, jnp.float32)
        # T is tiny here, so a static unroll is optimal; fwd and bwd recurrences are interleaved
        # in the same step so the scheduler can overlap their MXU/EUP latencies.
        # TODO(synk): at real clip lengths switch to lax.fori_loop(unroll=True) over a
        # VMEM-scratch-resident gi to bound vreg live ranges.
        for t in range(T):
            h_f = cell(gi[t:t + 1, 0:3 * Hg], h_f, wf, bf)
            h_b = cell(gi[T - 1 - t:T - t, 3 * Hg:6 * Hg], h_b, wb, bb)
            m_f = jnp.maximum(m_f, h_f)                 # AdaptiveMaxPool2d((C,1)) == max over time
            m_b = jnp.maximum(m_b, h_b)

        # Lane-dense store: (1, 2*Hg) row == the module's already-permuted (B, 1, C) output.
        o_ref[0] = jnp.concatenate([m_f, m_b], axis=1)

    return kernel


def concept_forward(x_nchw, kernel_ops, layer_cfg):
    B, C0, H, W = x_nchw.shape
    x2d = x_nchw.reshape(B, C0 * H, W)        # NCHW -> (B, C*H, W): pure reshape, no transpose
    Hg = kernel_ops[-4].shape[0]              # whhT_f has shape (Hg, 3*Hg)

    def const_spec(a):
        return pl.BlockSpec(a.shape, lambda b: (0,) * a.ndim)

    in_specs = [pl.BlockSpec((1, C0 * H, W), lambda b: (b, 0, 0))]
    in_specs += [const_spec(a) for a in kernel_ops]

    out = pl.pallas_call(
        make_concept_kernel(layer_cfg),
        out_shape=jax.ShapeDtypeStruct((B, 1, 2 * Hg), jnp.float32),
        grid=(B,),
        in_specs=in_specs,
        out_specs=pl.BlockSpec((1, 1, 2 * Hg), lambda b: (b, 0, 0)),
        compiler_params=pltpu.CompilerParams(dimension_semantics=("parallel",)),
    )(x2d, *kernel_ops)
    # Output is already (B, 1, C) — the module's permute(0, 2, 1) is folded into the store.
    return out


# ---------------------------------------------------------------------------
# Wrapper-side parameter preparation (weight preprocessing only, done once)
# ---------------------------------------------------------------------------
def conv_band_matrix(w_oihw, H):
    """OIHW 3x3 conv weights -> (Cout*H, 3*Cin*H) banded matrix for the (C*H, W) layout.

    Column block dx holds the kw=dx taps; within a block, column ci*H+hi couples input row
    (ci, hi) to output row (co, h) with coefficient w[co, ci, hi-h+1, dx] (zero outside the
    3-tap band).  Together with the zero-padded frame shifts this reproduces
    Conv2d(3x3, padding=1) exactly.
    """
    w = np.asarray(w_oihw, np.float32)
    cout, cin = w.shape[0], w.shape[1]
    band = np.zeros((cout * H, 3, cin * H), np.float32)
    for dy in range(3):
        for h in range(H):
            hi = h + dy - 1
            if 0 <= hi < H:
                for co in range(cout):
                    for ci in range(cin):
                        band[co * H + h, :, ci * H + hi] = w[co, ci, dy, :]
    return jnp.asarray(band.reshape(cout * H, 3 * cin * H))


def pool_rows_matrix(C, H):
    """(C*Ho, C*H) matrix averaging key pairs (the H half of AvgPool2d(2)); entries 0 / 0.5."""
    Ho = H // 2
    m = np.zeros((C * Ho, C * H), np.float32)
    for c in range(C):
        for ho in range(Ho):
            m[c * Ho + ho, c * H + 2 * ho] = 0.5
            m[c * Ho + ho, c * H + 2 * ho + 1] = 0.5
    return jnp.asarray(m)


def pool_cols_matrix(W):
    """(W, Wo) matrix averaging frame pairs (the W half of AvgPool2d(2)); entries 0 / 0.5."""
    Wo = W // 2
    m = np.zeros((W, Wo), np.float32)
    for wo in range(Wo):
        m[2 * wo, wo] = 0.5
        m[2 * wo + 1, wo] = 0.5
    return jnp.asarray(m)


def prepare_kernel_operands(params, layer_cfg, H, W):
    ops = []
    curH, curW = H, W
    for cfg, (w, b, scale, shift) in zip(layer_cfg, params["conv"]):
        cout = w.shape[0]
        ops.append(conv_band_matrix(w, curH))
        ops.append(jnp.repeat(b, curH).reshape(-1, 1))        # per-row (channel-major) bias
        ops.append(jnp.repeat(scale, curH).reshape(-1, 1))    # folded BN scale
        ops.append(jnp.repeat(shift, curH).reshape(-1, 1))    # folded BN shift
        if cfg["has_pool"]:
            ops.append(pool_rows_matrix(cout, curH))
            ops.append(pool_cols_matrix(curW))
            curH, curW = curH // 2, curW // 2
    g = params["gru"]
    # Pre-transposed GRU weights so every in-kernel matmul is the canonical (M,K)x(K,N) form
    # with the gate/hidden dimension in lanes.
    ops.append(jnp.concatenate([g["wih_f"], g["wih_b"]], axis=0).T)             # (D, 6*Hg)
    ops.append(jnp.concatenate([g["bih_f"], g["bih_b"]]).reshape(1, -1))        # (1, 6*Hg)
    ops.append(g["whh_f"].T)                                                    # (Hg, 3*Hg)
    ops.append(g["bhh_f"].reshape(1, -1))                                       # (1, 3*Hg)
    ops.append(g["whh_b"].T)
    ops.append(g["bhh_b"].reshape(1, -1))
    return ops


# ---------------------------------------------------------------------------
# Deterministic parameter init (PyTorch-shaped)
# ---------------------------------------------------------------------------
def init_params(key, layer_cfg):
    keys = jax.random.split(key, len(layer_cfg) + 1)
    conv = []
    for k, cfg in zip(keys[:-1], layer_cfg):
        cin, cout = cfg["in_channels"], cfg["out_channels"]
        k1, k2, k3, k4, k5, k6 = jax.random.split(k, 6)
        w = jax.random.normal(k1, (cout, cin, 3, 3), jnp.float32) * 0.1      # OIHW
        b = jax.random.normal(k2, (cout,), jnp.float32) * 0.05
        gamma = 1.0 + 0.1 * jax.random.normal(k3, (cout,), jnp.float32)
        beta = 0.1 * jax.random.normal(k4, (cout,), jnp.float32)
        rmean = 0.1 * jax.random.normal(k5, (cout,), jnp.float32)
        rvar = 1.0 + 0.1 * jnp.abs(jax.random.normal(k6, (cout,), jnp.float32))
        scale = gamma / jnp.sqrt(rvar + BN_EPS)
        shift = beta - rmean * scale
        conv.append((w, b, scale, shift))

    out_ch = layer_cfg[-1]["out_channels"]
    pool_prod = int(np.prod([2 for c in layer_cfg if c["has_pool"]] or [1]))
    D = out_ch * (PIANO_KEYS // pool_prod)
    Hg = out_ch // 2
    ks = jax.random.split(keys[-1], 8)
    s = 1.0 / float(np.sqrt(Hg))
    u = lambda kk, shp: jax.random.uniform(kk, shp, jnp.float32, -s, s)
    gru = dict(
        wih_f=u(ks[0], (3 * Hg, D)), whh_f=u(ks[1], (3 * Hg, Hg)),
        bih_f=u(ks[2], (3 * Hg,)), bhh_f=u(ks[3], (3 * Hg,)),
        wih_b=u(ks[4], (3 * Hg, D)), whh_b=u(ks[5], (3 * Hg, Hg)),
        bih_b=u(ks[6], (3 * Hg,)), bhh_b=u(ks[7], (3 * Hg,)),
    )
    return {"conv": conv, "gru": gru}


# ---------------------------------------------------------------------------
# Pure-JAX reference (same math, XLA ops) for a numerical sanity check
# ---------------------------------------------------------------------------
def reference_forward(x_nchw, params, layer_cfg):
    x = jnp.transpose(x_nchw, (0, 2, 3, 1))            # NHWC
    for cfg, (w, b, scale, shift) in zip(layer_cfg, params["conv"]):
        w_hwio = jnp.transpose(w, (2, 3, 1, 0))
        y = lax.conv_general_dilated(x, w_hwio, (1, 1), ((1, 1), (1, 1)),
                                     dimension_numbers=("NHWC", "HWIO", "NHWC"))
        y = jnp.maximum(y + b, 0.0) * scale + shift
        if cfg["has_pool"]:
            Bn, Hh, Ww, Cc = y.shape
            y = y.reshape(Bn, Hh // 2, 2, Ww // 2, 2, Cc).mean(axis=(2, 4))
        x = y
    B, Ho, Wo, C = x.shape
    seq = jnp.transpose(x, (0, 2, 3, 1)).reshape(B, Wo, C * Ho)
    g = params["gru"]
    Hg = g["whh_f"].shape[1]

    def run_dir(wih, whh, bih, bhh, reverse):
        def step(h, x_t):
            gi = x_t @ wih.T + bih
            gh = h @ whh.T + bhh
            r = jax.nn.sigmoid(gi[:, :Hg] + gh[:, :Hg])
            z = jax.nn.sigmoid(gi[:, Hg:2 * Hg] + gh[:, Hg:2 * Hg])
            n = jnp.tanh(gi[:, 2 * Hg:] + r * gh[:, 2 * Hg:])
            h = (1.0 - z) * n + z * h
            return h, h
        xs = jnp.transpose(seq, (1, 0, 2))
        if reverse:
            xs = xs[::-1]
        _, hs = lax.scan(step, jnp.zeros((B, Hg), jnp.float32), xs)
        return hs

    m_f = run_dir(g["wih_f"], g["whh_f"], g["bih_f"], g["bhh_f"], False).max(axis=0)
    m_b = run_dir(g["wih_b"], g["whh_b"], g["bih_b"], g["bhh_b"], True).max(axis=0)
    return jnp.concatenate([m_f, m_b], axis=-1).reshape(B, 1, -1)


if __name__ == "__main__":
    # Even number of ConvLayers, as asserted by Concept.create_convolutional_layers.
    layer_cfg = [
        dict(in_channels=1, out_channels=4, has_pool=False),
        dict(in_channels=4, out_channels=8, has_pool=True),
    ]
    B = 2
    key = jax.random.PRNGKey(0)
    kx, kp = jax.random.split(key)
    x = jax.random.normal(kx, (B, 1, PIANO_KEYS, CLIP_FRAMES), jnp.float32)  # NCHW

    params = init_params(kp, layer_cfg)
    kops = prepare_kernel_operands(params, layer_cfg, PIANO_KEYS, CLIP_FRAMES)

    out = concept_forward(x, kops, layer_cfg)
    out = jax.block_until_ready(out)

    ref = reference_forward(x, params, layer_cfg)
    np.testing.assert_allclose(np.asarray(out), np.asarray(ref), atol=2e-3, rtol=2e-3)
    assert out.shape == (B, 1, layer_cfg[-1]["out_channels"])
    print("KERNEL_OK")
</pallas_src>

<mosaic_0001>
module attributes {stable_mosaic.version = 11 : i64} {
  func.func @kernel(%arg0: i32, %arg1: memref<1x16x16xf32, #tpu.memory_space<vmem>>, %arg2: memref<64x48xf32, #tpu.memory_space<vmem>>, %arg3: memref<64x1xf32, #tpu.memory_space<vmem>>, %arg4: memref<64x1xf32, #tpu.memory_space<vmem>>, %arg5: memref<64x1xf32, #tpu.memory_space<vmem>>, %arg6: memref<128x192xf32, #tpu.memory_space<vmem>>, %arg7: memref<128x1xf32, #tpu.memory_space<vmem>>, %arg8: memref<128x1xf32, #tpu.memory_space<vmem>>, %arg9: memref<128x1xf32, #tpu.memory_space<vmem>>, %arg10: memref<64x128xf32, #tpu.memory_space<vmem>>, %arg11: memref<16x8xf32, #tpu.memory_space<vmem>>, %arg12: memref<64x24xf32, #tpu.memory_space<vmem>>, %arg13: memref<1x24xf32, #tpu.memory_space<vmem>>, %arg14: memref<4x12xf32, #tpu.memory_space<vmem>>, %arg15: memref<1x12xf32, #tpu.memory_space<vmem>>, %arg16: memref<4x12xf32, #tpu.memory_space<vmem>>, %arg17: memref<1x12xf32, #tpu.memory_space<vmem>>, %arg18: memref<1x1x8xf32, #tpu.memory_space<vmem>>) attributes {dimension_semantics = [#tpu.dimension_semantics<parallel>], iteration_bounds = array<i64: 2>, scalar_prefetch = 0 : i64, scratch_operands = 0 : i64, tpu.core_type = #tpu.core_type<tc>, window_params = [{transform_indices = @transform_0, window_bounds = array<i64: 1, 16, 16>}, {pipeline_mode = #tpu.pipeline_mode<synchronous>, transform_indices = @transform_1, window_bounds = array<i64: 64, 48>}, {pipeline_mode = #tpu.pipeline_mode<synchronous>, transform_indices = @transform_2, window_bounds = array<i64: 64, 1>}, {pipeline_mode = #tpu.pipeline_mode<synchronous>, transform_indices = @transform_3, window_bounds = array<i64: 64, 1>}, {pipeline_mode = #tpu.pipeline_mode<synchronous>, transform_indices = @transform_4, window_bounds = array<i64: 64, 1>}, {pipeline_mode = #tpu.pipeline_mode<synchronous>, transform_indices = @transform_5, window_bounds = array<i64: 128, 192>}, {pipeline_mode = #tpu.pipeline_mode<synchronous>, transform_indices = @transform_6, window_bounds = array<i64: 128, 1>}, {pipeline_mode = #tpu.pipeline_mode<synchronous>, transform_indices = @transform_7, window_bounds = array<i64: 128, 1>}, {pipeline_mode = #tpu.pipeline_mode<synchronous>, transform_indices = @transform_8, window_bounds = array<i64: 128, 1>}, {pipeline_mode = #tpu.pipeline_mode<synchronous>, transform_indices = @transform_9, window_bounds = array<i64: 64, 128>}, {pipeline_mode = #tpu.pipeline_mode<synchronous>, transform_indices = @transform_10, window_bounds = array<i64: 16, 8>}, {pipeline_mode = #tpu.pipeline_mode<synchronous>, transform_indices = @transform_11, window_bounds = array<i64: 64, 24>}, {pipeline_mode = #tpu.pipeline_mode<synchronous>, transform_indices = @transform_12, window_bounds = array<i64: 1, 24>}, {pipeline_mode = #tpu.pipeline_mode<synchronous>, transform_indices = @transform_13, window_bounds = array<i64: 4, 12>}, {pipeline_mode = #tpu.pipeline_mode<synchronous>, transform_indices = @transform_14, window_bounds = array<i64: 1, 12>}, {pipeline_mode = #tpu.pipeline_mode<synchronous>, transform_indices = @transform_15, window_bounds = array<i64: 4, 12>}, {pipeline_mode = #tpu.pipeline_mode<synchronous>, transform_indices = @transform_16, window_bounds = array<i64: 1, 12>}, {transform_indices = @transform_17, window_bounds = array<i64: 1, 1, 8>}]} {
    %c0 = arith.constant 0 : index
    %c0_0 = arith.constant 0 : index
    %c0_1 = arith.constant 0 : index
    %0 = vector.load %arg1[%c0, %c0_0, %c0_1] : memref<1x16x16xf32, #tpu.memory_space<vmem>>, vector<1x16x16xf32>
    %1 = vector.shape_cast %0 : vector<1x16x16xf32> to vector<16x16xf32>
    %cst = arith.constant 0.000000e+00 : f32
    %2 = vector.broadcast %cst : f32 to vector<16x1xf32>
    %3 = tpu.concatenate %2, %1, %2 in 1 : vector<16x1xf32>, vector<16x16xf32>, vector<16x1xf32> -> vector<16x18xf32>
    %4 = vector.extract_strided_slice %3 {offsets = [0, 0], sizes = [16, 16], strides = [1, 1]} : vector<16x18xf32> to vector<16x16xf32>
    %5 = vector.extract_strided_slice %3 {offsets = [0, 1], sizes = [16, 16], strides = [1, 1]} : vector<16x18xf32> to vector<16x16xf32>
    %6 = vector.extract_strided_slice %3 {offsets = [0, 2], sizes = [16, 16], strides = [1, 1]} : vector<16x18xf32> to vector<16x16xf32>
    %7 = tpu.concatenate %4, %5, %6 in 0 : vector<16x16xf32>, vector<16x16xf32>, vector<16x16xf32> -> vector<48x16xf32>
    %c0_2 = arith.constant 0 : index
    %c0_3 = arith.constant 0 : index
    %8 = vector.load %arg2[%c0_2, %c0_3] : memref<64x48xf32, #tpu.memory_space<vmem>>, vector<64x48xf32>
    %cst_4 = arith.constant dense<0.000000e+00> : vector<64x16xf32>
    %9 = tpu.matmul %8, %7, %cst_4 {dimension_numbers = #tpu.dot_dimension_numbers<[1], [0], [0], [1], [0, 0, 1, 1], [], []>, precision = #tpu.contract_precision<fp32>} : vector<64x48xf32>, vector<48x16xf32>, vector<64x16xf32> -> vector<64x16xf32>
    %c0_5 = arith.constant 0 : index
    %c0_6 = arith.constant 0 : index
    %10 = vector.load %arg3[%c0_5, %c0_6] : memref<64x1xf32, #tpu.memory_space<vmem>>, vector<64x1xf32>
    %11 = vector.broadcast %10 : vector<64x1xf32> to vector<64x16xf32>
    %12 = arith.addf %9, %11 : vector<64x16xf32>
    %cst_7 = arith.constant 0.000000e+00 : f32
    %13 = vector.broadcast %cst_7 : f32 to vector<64x16xf32>
    %14 = arith.maximumf %12, %13 : vector<64x16xf32>
    %c0_8 = arith.constant 0 : index
    %c0_9 = arith.constant 0 : index
    %15 = vector.load %arg4[%c0_8, %c0_9] : memref<64x1xf32, #tpu.memory_space<vmem>>, vector<64x1xf32>
    %16 = vector.broadcast %15 : vector<64x1xf32> to vector<64x16xf32>
    %17 = arith.mulf %14, %16 : vector<64x16xf32>
    %c0_10 = arith.constant 0 : index
    %c0_11 = arith.constant 0 : index
    %18 = vector.load %arg5[%c0_10, %c0_11] : memref<64x1xf32, #tpu.memory_space<vmem>>, vector<64x1xf32>
    %19 = vector.broadcast %18 : vector<64x1xf32> to vector<64x16xf32>
    %20 = arith.addf %17, %19 : vector<64x16xf32>
    %cst_12 = arith.constant 0.000000e+00 : f32
    %21 = vector.broadcast %cst_12 : f32 to vector<64x1xf32>
    %22 = tpu.concatenate %21, %20, %21 in 1 : vector<64x1xf32>, vector<64x16xf32>, vector<64x1xf32> -> vector<64x18xf32>
    %23 = vector.extract_strided_slice %22 {offsets = [0, 0], sizes = [64, 16], strides = [1, 1]} : vector<64x18xf32> to vector<64x16xf32>
    %24 = vector.extract_strided_slice %22 {offsets = [0, 1], sizes = [64, 16], strides = [1, 1]} : vector<64x18xf32> to vector<64x16xf32>
    %25 = vector.extract_strided_slice %22 {offsets = [0, 2], sizes = [64, 16], strides = [1, 1]} : vector<64x18xf32> to vector<64x16xf32>
    %26 = tpu.concatenate %23, %24, %25 in 0 : vector<64x16xf32>, vector<64x16xf32>, vector<64x16xf32> -> vector<192x16xf32>
    %c0_13 = arith.constant 0 : index
    %c0_14 = arith.constant 0 : index
    %27 = vector.load %arg6[%c0_13, %c0_14] : memref<128x192xf32, #tpu.memory_space<vmem>>, vector<128x192xf32>
    %cst_15 = arith.constant dense<0.000000e+00> : vector<128x16xf32>
    %28 = tpu.matmul %27, %26, %cst_15 {dimension_numbers = #tpu.dot_dimension_numbers<[1], [0], [0], [1], [0, 0, 1, 1], [], []>, precision = #tpu.contract_precision<fp32>} : vector<128x192xf32>, vector<192x16xf32>, vector<128x16xf32> -> vector<128x16xf32>
    %c0_16 = arith.constant 0 : index
    %c0_17 = arith.constant 0 : index
    %29 = vector.load %arg7[%c0_16, %c0_17] : memref<128x1xf32, #tpu.memory_space<vmem>>, vector<128x1xf32>
    %30 = vector.broadcast %29 : vector<128x1xf32> to vector<128x16xf32>
    %31 = arith.addf %28, %30 : vector<128x16xf32>
    %cst_18 = arith.constant 0.000000e+00 : f32
    %32 = vector.broadcast %cst_18 : f32 to vector<128x16xf32>
    %33 = arith.maximumf %31, %32 : vector<128x16xf32>
    %c0_19 = arith.constant 0 : index
    %c0_20 = arith.constant 0 : index
    %34 = vector.load %arg8[%c0_19, %c0_20] : memref<128x1xf32, #tpu.memory_space<vmem>>, vector<128x1xf32>
    %35 = vector.broadcast %34 : vector<128x1xf32> to vector<128x16xf32>
    %36 = arith.mulf %33, %35 : vector<128x16xf32>
    %c0_21 = arith.constant 0 : index
    %c0_22 = arith.constant 0 : index
    %37 = vector.load %arg9[%c0_21, %c0_22] : memref<128x1xf32, #tpu.memory_space<vmem>>, vector<128x1xf32>
    %38 = vector.broadcast %37 : vector<128x1xf32> to vector<128x16xf32>
    %39 = arith.addf %36, %38 : vector<128x16xf32>
    %c0_23 = arith.constant 0 : index
    %c0_24 = arith.constant 0 : index
    %40 = vector.load %arg10[%c0_23, %c0_24] : memref<64x128xf32, #tpu.memory_space<vmem>>, vector<64x128xf32>
    %cst_25 = arith.constant dense<0.000000e+00> : vector<64x16xf32>
    %41 = tpu.matmul %40, %39, %cst_25 {dimension_numbers = #tpu.dot_dimension_numbers<[1], [0], [0], [1], [0, 0, 1, 1], [], []>, precision = #tpu.contract_precision<fp32>} : vector<64x128xf32>, vector<128x16xf32>, vector<64x16xf32> -> vector<64x16xf32>
    %c0_26 = arith.constant 0 : index
    %c0_27 = arith.constant 0 : index
    %42 = vector.load %arg11[%c0_26, %c0_27] : memref<16x8xf32, #tpu.memory_space<vmem>>, vector<16x8xf32>
    %cst_28 = arith.constant dense<0.000000e+00> : vector<64x8xf32>
    %43 = tpu.matmul %41, %42, %cst_28 {dimension_numbers = #tpu.dot_dimension_numbers<[1], [0], [0], [1], [0, 0, 1, 1], [], []>, precision = #tpu.contract_precision<fp32>} : vector<64x16xf32>, vector<16x8xf32>, vector<64x8xf32> -> vector<64x8xf32>
    %44 = tpu.transpose %43, [1, 0] : vector<64x8xf32> -> vector<8x64xf32>
    %c0_29 = arith.constant 0 : index
    %c0_30 = arith.constant 0 : index
    %45 = vector.load %arg12[%c0_29, %c0_30] : memref<64x24xf32, #tpu.memory_space<vmem>>, vector<64x24xf32>
    %cst_31 = arith.constant dense<0.000000e+00> : vector<8x24xf32>
    %46 = tpu.matmul %44, %45, %cst_31 {dimension_numbers = #tpu.dot_dimension_numbers<[1], [0], [0], [1], [0, 0, 1, 1], [], []>, precision = #tpu.contract_precision<fp32>} : vector<8x64xf32>, vector<64x24xf32>, vector<8x24xf32> -> vector<8x24xf32>
    %c0_32 = arith.constant 0 : index
    %c0_33 = arith.constant 0 : index
    %47 = vector.load %arg13[%c0_32, %c0_33] : memref<1x24xf32, #tpu.memory_space<vmem>>, vector<1x24xf32>
    %48 = vector.broadcast %47 : vector<1x24xf32> to vector<8x24xf32>
    %49 = arith.addf %46, %48 : vector<8x24xf32>
    %c0_34 = arith.constant 0 : index
    %c0_35 = arith.constant 0 : index
    %50 = vector.load %arg14[%c0_34, %c0_35] : memref<4x12xf32, #tpu.memory_space<vmem>>, vector<4x12xf32>
    %c0_36 = arith.constant 0 : index
    %c0_37 = arith.constant 0 : index
    %51 = vector.load %arg15[%c0_36, %c0_37] : memref<1x12xf32, #tpu.memory_space<vmem>>, vector<1x12xf32>
    %c0_38 = arith.constant 0 : index
    %c0_39 = arith.constant 0 : index
    %52 = vector.load %arg16[%c0_38, %c0_39] : memref<4x12xf32, #tpu.memory_space<vmem>>, vector<4x12xf32>
    %c0_40 = arith.constant 0 : index
    %c0_41 = arith.constant 0 : index
    %53 = vector.load %arg17[%c0_40, %c0_41] : memref<1x12xf32, #tpu.memory_space<vmem>>, vector<1x12xf32>
    %cst_42 = arith.constant 0.000000e+00 : f32
    %54 = vector.broadcast %cst_42 : f32 to vector<1x4xf32>
    %cst_43 = arith.constant 0.000000e+00 : f32
    %55 = vector.broadcast %cst_43 : f32 to vector<1x4xf32>
    %cst_44 = arith.constant 0xFF800000 : f32
    %56 = vector.broadcast %cst_44 : f32 to vector<1x4xf32>
    %cst_45 = arith.constant 0xFF800000 : f32
    %57 = vector.broadcast %cst_45 : f32 to vector<1x4xf32>
    %58 = vector.extract_strided_slice %49 {offsets = [0, 0], sizes = [1, 12], strides = [1, 1]} : vector<8x24xf32> to vector<1x12xf32>
    %cst_46 = arith.constant dense<0.000000e+00> : vector<1x12xf32>
    %59 = tpu.matmul %54, %50, %cst_46 {dimension_numbers = #tpu.dot_dimension_numbers<[1], [0], [0], [1], [0, 0, 1, 1], [], []>, precision = #tpu.contract_precision<fp32>} : vector<1x4xf32>, vector<4x12xf32>, vector<1x12xf32> -> vector<1x12xf32>
    %60 = arith.addf %59, %51 : vector<1x12xf32>
    %61 = vector.extract_strided_slice %58 {offsets = [0, 0], sizes = [1, 4], strides = [1, 1]} : vector<1x12xf32> to vector<1x4xf32>
    %62 = vector.extract_strided_slice %60 {offsets = [0, 0], sizes = [1, 4], strides = [1, 1]} : vector<1x12xf32> to vector<1x4xf32>
    %63 = arith.addf %61, %62 : vector<1x4xf32>
    %64 = arith.negf %63 : vector<1x4xf32>
    %65 = math.exp %64 : vector<1x4xf32>
    %cst_47 = arith.constant 1.000000e+00 : f32
    %66 = vector.broadcast %cst_47 : f32 to vector<1x4xf32>
    %67 = arith.addf %66, %65 : vector<1x4xf32>
    %68 = arith.divf %66, %67 : vector<1x4xf32>
    %69 = vector.extract_strided_slice %58 {offsets = [0, 4], sizes = [1, 4], strides = [1, 1]} : vector<1x12xf32> to vector<1x4xf32>
    %70 = vector.extract_strided_slice %60 {offsets = [0, 4], sizes = [1, 4], strides = [1, 1]} : vector<1x12xf32> to vector<1x4xf32>
    %71 = arith.addf %69, %70 : vector<1x4xf32>
    %72 = arith.negf %71 : vector<1x4xf32>
    %73 = math.exp %72 : vector<1x4xf32>
    %cst_48 = arith.constant 1.000000e+00 : f32
    %74 = vector.broadcast %cst_48 : f32 to vector<1x4xf32>
    %75 = arith.addf %74, %73 : vector<1x4xf32>
    %76 = arith.divf %74, %75 : vector<1x4xf32>
    %77 = vector.extract_strided_slice %58 {offsets = [0, 8], sizes = [1, 4], strides = [1, 1]} : vector<1x12xf32> to vector<1x4xf32>
    %78 = vector.extract_strided_slice %60 {offsets = [0, 8], sizes = [1, 4], strides = [1, 1]} : vector<1x12xf32> to vector<1x4xf32>
    %79 = arith.mulf %68, %78 : vector<1x4xf32>
    %80 = arith.addf %77, %79 : vector<1x4xf32>
    %81 = math.tanh %80 : vector<1x4xf32>
    %cst_49 = arith.constant 1.000000e+00 : f32
    %82 = vector.broadcast %cst_49 : f32 to vector<1x4xf32>
    %83 = arith.subf %82, %76 : vector<1x4xf32>
    %84 = arith.mulf %83, %81 : vector<1x4xf32>
    %85 = arith.mulf %76, %54 : vector<1x4xf32>
    %86 = arith.addf %84, %85 : vector<1x4xf32>
    %87 = vector.extract_strided_slice %49 {offsets = [7, 12], sizes = [1, 12], strides = [1, 1]} : vector<8x24xf32> to vector<1x12xf32>
    %cst_50 = arith.constant dense<0.000000e+00> : vector<1x12xf32>
    %88 = tpu.matmul %55, %52, %cst_50 {dimension_numbers = #tpu.dot_dimension_numbers<[1], [0], [0], [1], [0, 0, 1, 1], [], []>, precision = #tpu.contract_precision<fp32>} : vector<1x4xf32>, vector<4x12xf32>, vector<1x12xf32> -> vector<1x12xf32>
    %89 = arith.addf %88, %53 : vector<1x12xf32>
    %90 = vector.extract_strided_slice %87 {offsets = [0, 0], sizes = [1, 4], strides = [1, 1]} : vector<1x12xf32> to vector<1x4xf32>
    %91 = vector.extract_strided_slice %89 {offsets = [0, 0], sizes = [1, 4], strides = [1, 1]} : vector<1x12xf32> to vector<1x4xf32>
    %92 = arith.addf %90, %91 : vector<1x4xf32>
    %93 = arith.negf %92 : vector<1x4xf32>
    %94 = math.exp %93 : vector<1x4xf32>
    %cst_51 = arith.constant 1.000000e+00 : f32
    %95 = vector.broadcast %cst_51 : f32 to vector<1x4xf32>
    %96 = arith.addf %95, %94 : vector<1x4xf32>
    %97 = arith.divf %95, %96 : vector<1x4xf32>
    %98 = vector.extract_strided_slice %87 {offsets = [0, 4], sizes = [1, 4], strides = [1, 1]} : vector<1x12xf32> to vector<1x4xf32>
    %99 = vector.extract_strided_slice %89 {offsets = [0, 4], sizes = [1, 4], strides = [1, 1]} : vector<1x12xf32> to vector<1x4xf32>
    %100 = arith.addf %98, %99 : vector<1x4xf32>
    %101 = arith.negf %100 : vector<1x4xf32>
    %102 = math.exp %101 : vector<1x4xf32>
    %cst_52 = arith.constant 1.000000e+00 : f32
    %103 = vector.broadcast %cst_52 : f32 to vector<1x4xf32>
    %104 = arith.addf %103, %102 : vector<1x4xf32>
    %105 = arith.divf %103, %104 : vector<1x4xf32>
    %106 = vector.extract_strided_slice %87 {offsets = [0, 8], sizes = [1, 4], strides = [1, 1]} : vector<1x12xf32> to vector<1x4xf32>
    %107 = vector.extract_strided_slice %89 {offsets = [0, 8], sizes = [1, 4], strides = [1, 1]} : vector<1x12xf32> to vector<1x4xf32>
    %108 = arith.mulf %97, %107 : vector<1x4xf32>
    %109 = arith.addf %106, %108 : vector<1x4xf32>
    %110 = math.tanh %109 : vector<1x4xf32>
    %cst_53 = arith.constant 1.000000e+00 : f32
    %111 = vector.broadcast %cst_53 : f32 to vector<1x4xf32>
    %112 = arith.subf %111, %105 : vector<1x4xf32>
    %113 = arith.mulf %112, %110 : vector<1x4xf32>
    %114 = arith.mulf %105, %55 : vector<1x4xf32>
    %115 = arith.addf %113, %114 : vector<1x4xf32>
    %116 = arith.maximumf %56, %86 : vector<1x4xf32>
    %117 = arith.maximumf %57, %115 : vector<1x4xf32>
    %118 = vector.extract_strided_slice %49 {offsets = [1, 0], sizes = [1, 12], strides = [1, 1]} : vector<8x24xf32> to vector<1x12xf32>
    %cst_54 = arith.constant dense<0.000000e+00> : vector<1x12xf32>
    %119 = tpu.matmul %86, %50, %cst_54 {dimension_numbers = #tpu.dot_dimension_numbers<[1], [0], [0], [1], [0, 0, 1, 1], [], []>, precision = #tpu.contract_precision<fp32>} : vector<1x4xf32>, vector<4x12xf32>, vector<1x12xf32> -> vector<1x12xf32>
    %120 = arith.addf %119, %51 : vector<1x12xf32>
    %121 = vector.extract_strided_slice %118 {offsets = [0, 0], sizes = [1, 4], strides = [1, 1]} : vector<1x12xf32> to vector<1x4xf32>
    %122 = vector.extract_strided_slice %120 {offsets = [0, 0], sizes = [1, 4], strides = [1, 1]} : vector<1x12xf32> to vector<1x4xf32>
    %123 = arith.addf %121, %122 : vector<1x4xf32>
    %124 = arith.negf %123 : vector<1x4xf32>
    %125 = math.exp %124 : vector<1x4xf32>
    %cst_55 = arith.constant 1.000000e+00 : f32
    %126 = vector.broadcast %cst_55 : f32 to vector<1x4xf32>
    %127 = arith.addf %126, %125 : vector<1x4xf32>
    %128 = arith.divf %126, %127 : vector<1x4xf32>
    %129 = vector.extract_strided_slice %118 {offsets = [0, 4], sizes = [1, 4], strides = [1, 1]} : vector<1x12xf32> to vector<1x4xf32>
    %130 = vector.extract_strided_slice %120 {offsets = [0, 4], sizes = [1, 4], strides = [1, 1]} : vector<1x12xf32> to vector<1x4xf32>
    %131 = arith.addf %129, %130 : vector<1x4xf32>
    %132 = arith.negf %131 : vector<1x4xf32>
    %133 = math.exp %132 : vector<1x4xf32>
    %cst_56 = arith.constant 1.000000e+00 : f32
    %134 = vector.broadcast %cst_56 : f32 to vector<1x4xf32>
    %135 = arith.addf %134, %133 : vector<1x4xf32>
    %136 = arith.divf %134, %135 : vector<1x4xf32>
    %137 = vector.extract_strided_slice %118 {offsets = [0, 8], sizes = [1, 4], strides = [1, 1]} : vector<1x12xf32> to vector<1x4xf32>
    %138 = vector.extract_strided_slice %120 {offsets = [0, 8], sizes = [1, 4], strides = [1, 1]} : vector<1x12xf32> to vector<1x4xf32>
    %139 = arith.mulf %128, %138 : vector<1x4xf32>
    %140 = arith.addf %137, %139 : vector<1x4xf32>
    %141 = math.tanh %140 : vector<1x4xf32>
    %cst_57 = arith.constant 1.000000e+00 : f32
    %142 = vector.broadcast %cst_57 : f32 to vector<1x4xf32>
    %143 = arith.subf %142, %136 : vector<1x4xf32>
    %144 = arith.mulf %143, %141 : vector<1x4xf32>
    %145 = arith.mulf %136, %86 : vector<1x4xf32>
    %146 = arith.addf %144, %145 : vector<1x4xf32>
    %147 = vector.extract_strided_slice %49 {offsets = [6, 12], sizes = [1, 12], strides = [1, 1]} : vector<8x24xf32> to vector<1x12xf32>
    %cst_58 = arith.constant dense<0.000000e+00> : vector<1x12xf32>
    %148 = tpu.matmul %115, %52, %cst_58 {dimension_numbers = #tpu.dot_dimension_numbers<[1], [0], [0], [1], [0, 0, 1, 1], [], []>, precision = #tpu.contract_precision<fp32>} : vector<1x4xf32>, vector<4x12xf32>, vector<1x12xf32> -> vector<1x12xf32>
    %149 = arith.addf %148, %53 : vector<1x12xf32>
    %150 = vector.extract_strided_slice %147 {offsets = [0, 0], sizes = [1, 4], strides = [1, 1]} : vector<1x12xf32> to vector<1x4xf32>
    %151 = vector.extract_strided_slice %149 {offsets = [0, 0], sizes = [1, 4], strides = [1, 1]} : vector<1x12xf32> to vector<1x4xf32>
    %152 = arith.addf %150, %151 : vector<1x4xf32>
    %153 = arith.negf %152 : vector<1x4xf32>
    %154 = math.exp %153 : vector<1x4xf32>
    %cst_59 = arith.constant 1.000000e+00 : f32
    %155 = vector.broadcast %cst_59 : f32 to vector<1x4xf32>
    %156 = arith.addf %155, %154 : vector<1x4xf32>
    %157 = arith.divf %155, %156 : vector<1x4xf32>
    %158 = vector.extract_strided_slice %147 {offsets = [0, 4], sizes = [1, 4], strides = [1, 1]} : vector<1x12xf32> to vector<1x4xf32>
    %159 = vector.extract_strided_slice %149 {offsets = [0, 4], sizes = [1, 4], strides = [1, 1]} : vector<1x12xf32> to vector<1x4xf32>
    %160 = arith.addf %158, %159 : vector<1x4xf32>
    %161 = arith.negf %160 : vector<1x4xf32>
    %162 = math.exp %161 : vector<1x4xf32>
    %cst_60 = arith.constant 1.000000e+00 : f32
    %163 = vector.broadcast %cst_60 : f32 to vector<1x4xf32>
    %164 = arith.addf %163, %162 : vector<1x4xf32>
    %165 = arith.divf %163, %164 : vector<1x4xf32>
    %166 = vector.extract_strided_slice %147 {offsets = [0, 8], sizes = [1, 4], strides = [1, 1]} : vector<1x12xf32> to vector<1x4xf32>
    %167 = vector.extract_strided_slice %149 {offsets = [0, 8], sizes = [1, 4], strides = [1, 1]} : vector<1x12xf32> to vector<1x4xf32>
    %168 = arith.mulf %157, %167 : vector<1x4xf32>
    %169 = arith.addf %166, %168 : vector<1x4xf32>
    %170 = math.tanh %169 : vector<1x4xf32>
    %cst_61 = arith.constant 1.000000e+00 : f32
    %171 = vector.broadcast %cst_61 : f32 to vector<1x4xf32>
    %172 = arith.subf %171, %165 : vector<1x4xf32>
    %173 = arith.mulf %172, %170 : vector<1x4xf32>
    %174 = arith.mulf %165, %115 : vector<1x4xf32>
    %175 = arith.addf %173, %174 : vector<1x4xf32>
    %176 = arith.maximumf %116, %146 : vector<1x4xf32>
    %177 = arith.maximumf %117, %175 : vector<1x4xf32>
    %178 = vector.extract_strided_slice %49 {offsets = [2, 0], sizes = [1, 12], strides = [1, 1]} : vector<8x24xf32> to vector<1x12xf32>
    %cst_62 = arith.constant dense<0.000000e+00> : vector<1x12xf32>
    %179 = tpu.matmul %146, %50, %cst_62 {dimension_numbers = #tpu.dot_dimension_numbers<[1], [0], [0], [1], [0, 0, 1, 1], [], []>, precision = #tpu.contract_precision<fp32>} : vector<1x4xf32>, vector<4x12xf32>, vector<1x12xf32> -> vector<1x12xf32>
    %180 = arith.addf %179, %51 : vector<1x12xf32>
    %181 = vector.extract_strided_slice %178 {offsets = [0, 0], sizes = [1, 4], strides = [1, 1]} : vector<1x12xf32> to vector<1x4xf32>
    %182 = vector.extract_strided_slice %180 {offsets = [0, 0], sizes = [1, 4], strides = [1, 1]} : vector<1x12xf32> to vector<1x4xf32>
    %183 = arith.addf %181, %182 : vector<1x4xf32>
    %184 = arith.negf %183 : vector<1x4xf32>
    %185 = math.exp %184 : vector<1x4xf32>
    %cst_63 = arith.constant 1.000000e+00 : f32
    %186 = vector.broadcast %cst_63 : f32 to vector<1x4xf32>
    %187 = arith.addf %186, %185 : vector<1x4xf32>
    %188 = arith.divf %186, %187 : vector<1x4xf32>
    %189 = vector.extract_strided_slice %178 {offsets = [0, 4], sizes = [1, 4], strides = [1, 1]} : vector<1x12xf32> to vector<1x4xf32>
    %190 = vector.extract_strided_slice %180 {offsets = [0, 4], sizes = [1, 4], strides = [1, 1]} : vector<1x12xf32> to vector<1x4xf32>
    %191 = arith.addf %189, %190 : vector<1x4xf32>
    %192 = arith.negf %191 : vector<1x4xf32>
    %193 = math.exp %192 : vector<1x4xf32>
    %cst_64 = arith.constant 1.000000e+00 : f32
    %194 = vector.broadcast %cst_64 : f32 to vector<1x4xf32>
    %195 = arith.addf %194, %193 : vector<1x4xf32>
    %196 = arith.divf %194, %195 : vector<1x4xf32>
    %197 = vector.extract_strided_slice %178 {offsets = [0, 8], sizes = [1, 4], strides = [1, 1]} : vector<1x12xf32> to vector<1x4xf32>
    %198 = vector.extract_strided_slice %180 {offsets = [0, 8], sizes = [1, 4], strides = [1, 1]} : vector<1x12xf32> to vector<1x4xf32>
    %199 = arith.mulf %188, %198 : vector<1x4xf32>
    %200 = arith.addf %197, %199 : vector<1x4xf32>
    %201 = math.tanh %200 : vector<1x4xf32>
    %cst_65 = arith.constant 1.000000e+00 : f32
    %202 = vector.broadcast %cst_65 : f32 to vector<1x4xf32>
    %203 = arith.subf %202, %196 : vector<1x4xf32>
    %204 = arith.mulf %203, %201 : vector<1x4xf32>
    %205 = arith.mulf %196, %146 : vector<1x4xf32>
    %206 = arith.addf %204, %205 : vector<1x4xf32>
    %207 = vector.extract_strided_slice %49 {offsets = [5, 12], sizes = [1, 12], strides = [1, 1]} : vector<8x24xf32> to vector<1x12xf32>
    %cst_66 = arith.constant dense<0.000000e+00> : vector<1x12xf32>
    %208 = tpu.matmul %175, %52, %cst_66 {dimension_numbers = #tpu.dot_dimension_numbers<[1], [0], [0], [1], [0, 0, 1, 1], [], []>, precision = #tpu.contract_precision<fp32>} : vector<1x4xf32>, vector<4x12xf32>, vector<1x12xf32> -> vector<1x12xf32>
    %209 = arith.addf %208, %53 : vector<1x12xf32>
    %210 = vector.extract_strided_slice %207 {offsets = [0, 0], sizes = [1, 4], strides = [1, 1]} : vector<1x12xf32> to vector<1x4xf32>
    %211 = vector.extract_strided_slice %209 {offsets = [0, 0], sizes = [1, 4], strides = [1, 1]} : vector<1x12xf32> to vector<1x4xf32>
    %212 = arith.addf %210, %211 : vector<1x4xf32>
    %213 = arith.negf %212 : vector<1x4xf32>
    %214 = math.exp %213 : vector<1x4xf32>
    %cst_67 = arith.constant 1.000000e+00 : f32
    %215 = vector.broadcast %cst_67 : f32 to vector<1x4xf32>
    %216 = arith.addf %215, %214 : vector<1x4xf32>
    %217 = arith.divf %215, %216 : vector<1x4xf32>
    %218 = vector.extract_strided_slice %207 {offsets = [0, 4], sizes = [1, 4], strides = [1, 1]} : vector<1x12xf32> to vector<1x4xf32>
    %219 = vector.extract_strided_slice %209 {offsets = [0, 4], sizes = [1, 4], strides = [1, 1]} : vector<1x12xf32> to vector<1x4xf32>
    %220 = arith.addf %218, %219 : vector<1x4xf32>
    %221 = arith.negf %220 : vector<1x4xf32>
    %222 = math.exp %221 : vector<1x4xf32>
    %cst_68 = arith.constant 1.000000e+00 : f32
    %223 = vector.broadcast %cst_68 : f32 to vector<1x4xf32>
    %224 = arith.addf %223, %222 : vector<1x4xf32>
    %225 = arith.divf %223, %224 : vector<1x4xf32>
    %226 = vector.extract_strided_slice %207 {offsets = [0, 8], sizes = [1, 4], strides = [1, 1]} : vector<1x12xf32> to vector<1x4xf32>
    %227 = vector.extract_strided_slice %209 {offsets = [0, 8], sizes = [1, 4], strides = [1, 1]} : vector<1x12xf32> to vector<1x4xf32>
    %228 = arith.mulf %217, %227 : vector<1x4xf32>
    %229 = arith.addf %226, %228 : vector<1x4xf32>
    %230 = math.tanh %229 : vector<1x4xf32>
    %cst_69 = arith.constant 1.000000e+00 : f32
    %231 = vector.broadcast %cst_69 : f32 to vector<1x4xf32>
    %232 = arith.subf %231, %225 : vector<1x4xf32>
    %233 = arith.mulf %232, %230 : vector<1x4xf32>
    %234 = arith.mulf %225, %175 : vector<1x4xf32>
    %235 = arith.addf %233, %234 : vector<1x4xf32>
    %236 = arith.maximumf %176, %206 : vector<1x4xf32>
    %237 = arith.maximumf %177, %235 : vector<1x4xf32>
    %238 = vector.extract_strided_slice %49 {offsets = [3, 0], sizes = [1, 12], strides = [1, 1]} : vector<8x24xf32> to vector<1x12xf32>
    %cst_70 = arith.constant dense<0.000000e+00> : vector<1x12xf32>
    %239 = tpu.matmul %206, %50, %cst_70 {dimension_numbers = #tpu.dot_dimension_numbers<[1], [0], [0], [1], [0, 0, 1, 1], [], []>, precision = #tpu.contract_precision<fp32>} : vector<1x4xf32>, vector<4x12xf32>, vector<1x12xf32> -> vector<1x12xf32>
    %240 = arith.addf %239, %51 : vector<1x12xf32>
    %241 = vector.extract_strided_slice %238 {offsets = [0, 0], sizes = [1, 4], strides = [1, 1]} : vector<1x12xf32> to vector<1x4xf32>
    %242 = vector.extract_strided_slice %240 {offsets = [0, 0], sizes = [1, 4], strides = [1, 1]} : vector<1x12xf32> to vector<1x4xf32>
    %243 = arith.addf %241, %242 : vector<1x4xf32>
    %244 = arith.negf %243 : vector<1x4xf32>
    %245 = math.exp %244 : vector<1x4xf32>
    %cst_71 = arith.constant 1.000000e+00 : f32
    %246 = vector.broadcast %cst_71 : f32 to vector<1x4xf32>
    %247 = arith.addf %246, %245 : vector<1x4xf32>
    %248 = arith.divf %246, %247 : vector<1x4xf32>
    %249 = vector.extract_strided_slice %238 {offsets = [0, 4], sizes = [1, 4], strides = [1, 1]} : vector<1x12xf32> to vector<1x4xf32>
    %250 = vector.extract_strided_slice %240 {offsets = [0, 4], sizes = [1, 4], strides = [1, 1]} : vector<1x12xf32> to vector<1x4xf32>
    %251 = arith.addf %249, %250 : vector<1x4xf32>
    %252 = arith.negf %251 : vector<1x4xf32>
    %253 = math.exp %252 : vector<1x4xf32>
    %cst_72 = arith.constant 1.000000e+00 : f32
    %254 = vector.broadcast %cst_72 : f32 to vector<1x4xf32>
    %255 = arith.addf %254, %253 : vector<1x4xf32>
    %256 = arith.divf %254, %255 : vector<1x4xf32>
    %257 = vector.extract_strided_slice %238 {offsets = [0, 8], sizes = [1, 4], strides = [1, 1]} : vector<1x12xf32> to vector<1x4xf32>
    %258 = vector.extract_strided_slice %240 {offsets = [0, 8], sizes = [1, 4], strides = [1, 1]} : vector<1x12xf32> to vector<1x4xf32>
    %259 = arith.mulf %248, %258 : vector<1x4xf32>
    %260 = arith.addf %257, %259 : vector<1x4xf32>
    %261 = math.tanh %260 : vector<1x4xf32>
    %cst_73 = arith.constant 1.000000e+00 : f32
    %262 = vector.broadcast %cst_73 : f32 to vector<1x4xf32>
    %263 = arith.subf %262, %256 : vector<1x4xf32>
    %264 = arith.mulf %263, %261 : vector<1x4xf32>
    %265 = arith.mulf %256, %206 : vector<1x4xf32>
    %266 = arith.addf %264, %265 : vector<1x4xf32>
    %267 = vector.extract_strided_slice %49 {offsets = [4, 12], sizes = [1, 12], strides = [1, 1]} : vector<8x24xf32> to vector<1x12xf32>
    %cst_74 = arith.constant dense<0.000000e+00> : vector<1x12xf32>
    %268 = tpu.matmul %235, %52, %cst_74 {dimension_numbers = #tpu.dot_dimension_numbers<[1], [0], [0], [1], [0, 0, 1, 1], [], []>, precision = #tpu.contract_precision<fp32>} : vector<1x4xf32>, vector<4x12xf32>, vector<1x12xf32> -> vector<1x12xf32>
    %269 = arith.addf %268, %53 : vector<1x12xf32>
    %270 = vector.extract_strided_slice %267 {offsets = [0, 0], sizes = [1, 4], strides = [1, 1]} : vector<1x12xf32> to vector<1x4xf32>
    %271 = vector.extract_strided_slice %269 {offsets = [0, 0], sizes = [1, 4], strides = [1, 1]} : vector<1x12xf32> to vector<1x4xf32>
    %272 = arith.addf %270, %271 : vector<1x4xf32>
    %273 = arith.negf %272 : vector<1x4xf32>
    %274 = math.exp %273 : vector<1x4xf32>
    %cst_75 = arith.constant 1.000000e+00 : f32
    %275 = vector.broadcast %cst_75 : f32 to vector<1x4xf32>
    %276 = arith.addf %275, %274 : vector<1x4xf32>
    %277 = arith.divf %275, %276 : vector<1x4xf32>
    %278 = vector.extract_strided_slice %267 {offsets = [0, 4], sizes = [1, 4], strides = [1, 1]} : vector<1x12xf32> to vector<1x4xf32>
    %279 = vector.extract_strided_slice %269 {offsets = [0, 4], sizes = [1, 4], strides = [1, 1]} : vector<1x12xf32> to vector<1x4xf32>
    %280 = arith.addf %278, %279 : vector<1x4xf32>
    %281 = arith.negf %280 : vector<1x4xf32>
    %282 = math.exp %281 : vector<1x4xf32>
    %cst_76 = arith.constant 1.000000e+00 : f32
    %283 = vector.broadcast %cst_76 : f32 to vector<1x4xf32>
    %284 = arith.addf %283, %282 : vector<1x4xf32>
    %285 = arith.divf %283, %284 : vector<1x4xf32>
    %286 = vector.extract_strided_slice %267 {offsets = [0, 8], sizes = [1, 4], strides = [1, 1]} : vector<1x12xf32> to vector<1x4xf32>
    %287 = vector.extract_strided_slice %269 {offsets = [0, 8], sizes = [1, 4], strides = [1, 1]} : vector<1x12xf32> to vector<1x4xf32>
    %288 = arith.mulf %277, %287 : vector<1x4xf32>
    %289 = arith.addf %286, %288 : vector<1x4xf32>
    %290 = math.tanh %289 : vector<1x4xf32>
    %cst_77 = arith.constant 1.000000e+00 : f32
    %291 = vector.broadcast %cst_77 : f32 to vector<1x4xf32>
    %292 = arith.subf %291, %285 : vector<1x4xf32>
    %293 = arith.mulf %292, %290 : vector<1x4xf32>
    %294 = arith.mulf %285, %235 : vector<1x4xf32>
    %295 = arith.addf %293, %294 : vector<1x4xf32>
    %296 = arith.maximumf %236, %266 : vector<1x4xf32>
    %297 = arith.maximumf %237, %295 : vector<1x4xf32>
    %298 = vector.extract_strided_slice %49 {offsets = [4, 0], sizes = [1, 12], strides = [1, 1]} : vector<8x24xf32> to vector<1x12xf32>
    %cst_78 = arith.constant dense<0.000000e+00> : vector<1x12xf32>
    %299 = tpu.matmul %266, %50, %cst_78 {dimension_numbers = #tpu.dot_dimension_numbers<[1], [0], [0], [1], [0, 0, 1, 1], [], []>, precision = #tpu.contract_precision<fp32>} : vector<1x4xf32>, vector<4x12xf32>, vector<1x12xf32> -> vector<1x12xf32>
    %300 = arith.addf %299, %51 : vector<1x12xf32>
    %301 = vector.extract_strided_slice %298 {offsets = [0, 0], sizes = [1, 4], strides = [1, 1]} : vector<1x12xf32> to vector<1x4xf32>
    %302 = vector.extract_strided_slice %300 {offsets = [0, 0], sizes = [1, 4], strides = [1, 1]} : vector<1x12xf32> to vector<1x4xf32>
    %303 = arith.addf %301, %302 : vector<1x4xf32>
    %304 = arith.negf %303 : vector<1x4xf32>
    %305 = math.exp %304 : vector<1x4xf32>
    %cst_79 = arith.constant 1.000000e+00 : f32
    %306 = vector.broadcast %cst_79 : f32 to vector<1x4xf32>
    %307 = arith.addf %306, %305 : vector<1x4xf32>
    %308 = arith.divf %306, %307 : vector<1x4xf32>
    %309 = vector.extract_strided_slice %298 {offsets = [0, 4], sizes = [1, 4], strides = [1, 1]} : vector<1x12xf32> to vector<1x4xf32>
    %310 = vector.extract_strided_slice %300 {offsets = [0, 4], sizes = [1, 4], strides = [1, 1]} : vector<1x12xf32> to vector<1x4xf32>
    %311 = arith.addf %309, %310 : vector<1x4xf32>
    %312 = arith.negf %311 : vector<1x4xf32>
    %313 = math.exp %312 : vector<1x4xf32>
    %cst_80 = arith.constant 1.000000e+00 : f32
    %314 = vector.broadcast %cst_80 : f32 to vector<1x4xf32>
    %315 = arith.addf %314, %313 : vector<1x4xf32>
    %316 = arith.divf %314, %315 : vector<1x4xf32>
    %317 = vector.extract_strided_slice %298 {offsets = [0, 8], sizes = [1, 4], strides = [1, 1]} : vector<1x12xf32> to vector<1x4xf32>
    %318 = vector.extract_strided_slice %300 {offsets = [0, 8], sizes = [1, 4], strides = [1, 1]} : vector<1x12xf32> to vector<1x4xf32>
    %319 = arith.mulf %308, %318 : vector<1x4xf32>
    %320 = arith.addf %317, %319 : vector<1x4xf32>
    %321 = math.tanh %320 : vector<1x4xf32>
    %cst_81 = arith.constant 1.000000e+00 : f32
    %322 = vector.broadcast %cst_81 : f32 to vector<1x4xf32>
    %323 = arith.subf %322, %316 : vector<1x4xf32>
    %324 = arith.mulf %323, %321 : vector<1x4xf32>
    %325 = arith.mulf %316, %266 : vector<1x4xf32>
    %326 = arith.addf %324, %325 : vector<1x4xf32>
    %327 = vector.extract_strided_slice %49 {offsets = [3, 12], sizes = [1, 12], strides = [1, 1]} : vector<8x24xf32> to vector<1x12xf32>
    %cst_82 = arith.constant dense<0.000000e+00> : vector<1x12xf32>
    %328 = tpu.matmul %295, %52, %cst_82 {dimension_numbers = #tpu.dot_dimension_numbers<[1], [0], [0], [1], [0, 0, 1, 1], [], []>, precision = #tpu.contract_precision<fp32>} : vector<1x4xf32>, vector<4x12xf32>, vector<1x12xf32> -> vector<1x12xf32>
    %329 = arith.addf %328, %53 : vector<1x12xf32>
    %330 = vector.extract_strided_slice %327 {offsets = [0, 0], sizes = [1, 4], strides = [1, 1]} : vector<1x12xf32> to vector<1x4xf32>
    %331 = vector.extract_strided_slice %329 {offsets = [0, 0], sizes = [1, 4], strides = [1, 1]} : vector<1x12xf32> to vector<1x4xf32>
    %332 = arith.addf %330, %331 : vector<1x4xf32>
    %333 = arith.negf %332 : vector<1x4xf32>
    %334 = math.exp %333 : vector<1x4xf32>
    %cst_83 = arith.constant 1.000000e+00 : f32
    %335 = vector.broadcast %cst_83 : f32 to vector<1x4xf32>
    %336 = arith.addf %335, %334 : vector<1x4xf32>
    %337 = arith.divf %335, %336 : vector<1x4xf32>
    %338 = vector.extract_strided_slice %327 {offsets = [0, 4], sizes = [1, 4], strides = [1, 1]} : vector<1x12xf32> to vector<1x4xf32>
    %339 = vector.extract_strided_slice %329 {offsets = [0, 4], sizes = [1, 4], strides = [1, 1]} : vector<1x12xf32> to vector<1x4xf32>
    %340 = arith.addf %338, %339 : vector<1x4xf32>
    %341 = arith.negf %340 : vector<1x4xf32>
    %342 = math.exp %341 : vector<1x4xf32>
    %cst_84 = arith.constant 1.000000e+00 : f32
    %343 = vector.broadcast %cst_84 : f32 to vector<1x4xf32>
    %344 = arith.addf %343, %342 : vector<1x4xf32>
    %345 = arith.divf %343, %344 : vector<1x4xf32>
    %346 = vector.extract_strided_slice %327 {offsets = [0, 8], sizes = [1, 4], strides = [1, 1]} : vector<1x12xf32> to vector<1x4xf32>
    %347 = vector.extract_strided_slice %329 {offsets = [0, 8], sizes = [1, 4], strides = [1, 1]} : vector<1x12xf32> to vector<1x4xf32>
    %348 = arith.mulf %337, %347 : vector<1x4xf32>
    %349 = arith.addf %346, %348 : vector<1x4xf32>
    %350 = math.tanh %349 : vector<1x4xf32>
    %cst_85 = arith.constant 1.000000e+00 : f32
    %351 = vector.broadcast %cst_85 : f32 to vector<1x4xf32>
    %352 = arith.subf %351, %345 : vector<1x4xf32>
    %353 = arith.mulf %352, %350 : vector<1x4xf32>
    %354 = arith.mulf %345, %295 : vector<1x4xf32>
    %355 = arith.addf %353, %354 : vector<1x4xf32>
    %356 = arith.maximumf %296, %326 : vector<1x4xf32>
    %357 = arith.maximumf %297, %355 : vector<1x4xf32>
    %358 = vector.extract_strided_slice %49 {offsets = [5, 0], sizes = [1, 12], strides = [1, 1]} : vector<8x24xf32> to vector<1x12xf32>
    %cst_86 = arith.constant dense<0.000000e+00> : vector<1x12xf32>
    %359 = tpu.matmul %326, %50, %cst_86 {dimension_numbers = #tpu.dot_dimension_numbers<[1], [0], [0], [1], [0, 0, 1, 1], [], []>, precision = #tpu.contract_precision<fp32>} : vector<1x4xf32>, vector<4x12xf32>, vector<1x12xf32> -> vector<1x12xf32>
    %360 = arith.addf %359, %51 : vector<1x12xf32>
    %361 = vector.extract_strided_slice %358 {offsets = [0, 0], sizes = [1, 4], strides = [1, 1]} : vector<1x12xf32> to vector<1x4xf32>
    %362 = vector.extract_strided_slice %360 {offsets = [0, 0], sizes = [1, 4], strides = [1, 1]} : vector<1x12xf32> to vector<1x4xf32>
    %363 = arith.addf %361, %362 : vector<1x4xf32>
    %364 = arith.negf %363 : vector<1x4xf32>
    %365 = math.exp %364 : vector<1x4xf32>
    %cst_87 = arith.constant 1.000000e+00 : f32
    %366 = vector.broadcast %cst_87 : f32 to vector<1x4xf32>
    %367 = arith.addf %366, %365 : vector<1x4xf32>
    %368 = arith.divf %366, %367 : vector<1x4xf32>
    %369 = vector.extract_strided_slice %358 {offsets = [0, 4], sizes = [1, 4], strides = [1, 1]} : vector<1x12xf32> to vector<1x4xf32>
    %370 = vector.extract_strided_slice %360 {offsets = [0, 4], sizes = [1, 4], strides = [1, 1]} : vector<1x12xf32> to vector<1x4xf32>
    %371 = arith.addf %369, %370 : vector<1x4xf32>
    %372 = arith.negf %371 : vector<1x4xf32>
    %373 = math.exp %372 : vector<1x4xf32>
    %cst_88 = arith.constant 1.000000e+00 : f32
    %374 = vector.broadcast %cst_88 : f32 to vector<1x4xf32>
    %375 = arith.addf %374, %373 : vector<1x4xf32>
    %376 = arith.divf %374, %375 : vector<1x4xf32>
    %377 = vector.extract_strided_slice %358 {offsets = [0, 8], sizes = [1, 4], strides = [1, 1]} : vector<1x12xf32> to vector<1x4xf32>
    %378 = vector.extract_strided_slice %360 {offsets = [0, 8], sizes = [1, 4], strides = [1, 1]} : vector<1x12xf32> to vector<1x4xf32>
    %379 = arith.mulf %368, %378 : vector<1x4xf32>
    %380 = arith.addf %377, %379 : vector<1x4xf32>
    %381 = math.tanh %380 : vector<1x4xf32>
    %cst_89 = arith.constant 1.000000e+00 : f32
    %382 = vector.broadcast %cst_89 : f32 to vector<1x4xf32>
    %383 = arith.subf %382, %376 : vector<1x4xf32>
    %384 = arith.mulf %383, %381 : vector<1x4xf32>
    %385 = arith.mulf %376, %326 : vector<1x4xf32>
    %386 = arith.addf %384, %385 : vector<1x4xf32>
    %387 = vector.extract_strided_slice %49 {offsets = [2, 12], sizes = [1, 12], strides = [1, 1]} : vector<8x24xf32> to vector<1x12xf32>
    %cst_90 = arith.constant dense<0.000000e+00> : vector<1x12xf32>
    %388 = tpu.matmul %355, %52, %cst_90 {dimension_numbers = #tpu.dot_dimension_numbers<[1], [0], [0], [1], [0, 0, 1, 1], [], []>, precision = #tpu.contract_precision<fp32>} : vector<1x4xf32>, vector<4x12xf32>, vector<1x12xf32> -> vector<1x12xf32>
    %389 = arith.addf %388, %53 : vector<1x12xf32>
    %390 = vector.extract_strided_slice %387 {offsets = [0, 0], sizes = [1, 4], strides = [1, 1]} : vector<1x12xf32> to vector<1x4xf32>
    %391 = vector.extract_strided_slice %389 {offsets = [0, 0], sizes = [1, 4], strides = [1, 1]} : vector<1x12xf32> to vector<1x4xf32>
    %392 = arith.addf %390, %391 : vector<1x4xf32>
    %393 = arith.negf %392 : vector<1x4xf32>
    %394 = math.exp %393 : vector<1x4xf32>
    %cst_91 = arith.constant 1.000000e+00 : f32
    %395 = vector.broadcast %cst_91 : f32 to vector<1x4xf32>
    %396 = arith.addf %395, %394 : vector<1x4xf32>
    %397 = arith.divf %395, %396 : vector<1x4xf32>
    %398 = vector.extract_strided_slice %387 {offsets = [0, 4], sizes = [1, 4], strides = [1, 1]} : vector<1x12xf32> to vector<1x4xf32>
    %399 = vector.extract_strided_slice %389 {offsets = [0, 4], sizes = [1, 4], strides = [1, 1]} : vector<1x12xf32> to vector<1x4xf32>
    %400 = arith.addf %398, %399 : vector<1x4xf32>
    %401 = arith.negf %400 : vector<1x4xf32>
    %402 = math.exp %401 : vector<1x4xf32>
    %cst_92 = arith.constant 1.000000e+00 : f32
    %403 = vector.broadcast %cst_92 : f32 to vector<1x4xf32>
    %404 = arith.addf %403, %402 : vector<1x4xf32>
    %405 = arith.divf %403, %404 : vector<1x4xf32>
    %406 = vector.extract_strided_slice %387 {offsets = [0, 8], sizes = [1, 4], strides = [1, 1]} : vector<1x12xf32> to vector<1x4xf32>
    %407 = vector.extract_strided_slice %389 {offsets = [0, 8], sizes = [1, 4], strides = [1, 1]} : vector<1x12xf32> to vector<1x4xf32>
    %408 = arith.mulf %397, %407 : vector<1x4xf32>
    %409 = arith.addf %406, %408 : vector<1x4xf32>
    %410 = math.tanh %409 : vector<1x4xf32>
    %cst_93 = arith.constant 1.000000e+00 : f32
    %411 = vector.broadcast %cst_93 : f32 to vector<1x4xf32>
    %412 = arith.subf %411, %405 : vector<1x4xf32>
    %413 = arith.mulf %412, %410 : vector<1x4xf32>
    %414 = arith.mulf %405, %355 : vector<1x4xf32>
    %415 = arith.addf %413, %414 : vector<1x4xf32>
    %416 = arith.maximumf %356, %386 : vector<1x4xf32>
    %417 = arith.maximumf %357, %415 : vector<1x4xf32>
    %418 = vector.extract_strided_slice %49 {offsets = [6, 0], sizes = [1, 12], strides = [1, 1]} : vector<8x24xf32> to vector<1x12xf32>
    %cst_94 = arith.constant dense<0.000000e+00> : vector<1x12xf32>
    %419 = tpu.matmul %386, %50, %cst_94 {dimension_numbers = #tpu.dot_dimension_numbers<[1], [0], [0], [1], [0, 0, 1, 1], [], []>, precision = #tpu.contract_precision<fp32>} : vector<1x4xf32>, vector<4x12xf32>, vector<1x12xf32> -> vector<1x12xf32>
    %420 = arith.addf %419, %51 : vector<1x12xf32>
    %421 = vector.extract_strided_slice %418 {offsets = [0, 0], sizes = [1, 4], strides = [1, 1]} : vector<1x12xf32> to vector<1x4xf32>
    %422 = vector.extract_strided_slice %420 {offsets = [0, 0], sizes = [1, 4], strides = [1, 1]} : vector<1x12xf32> to vector<1x4xf32>
    %423 = arith.addf %421, %422 : vector<1x4xf32>
    %424 = arith.negf %423 : vector<1x4xf32>
    %425 = math.exp %424 : vector<1x4xf32>
    %cst_95 = arith.constant 1.000000e+00 : f32
    %426 = vector.broadcast %cst_95 : f32 to vector<1x4xf32>
    %427 = arith.addf %426, %425 : vector<1x4xf32>
    %428 = arith.divf %426, %427 : vector<1x4xf32>
    %429 = vector.extract_strided_slice %418 {offsets = [0, 4], sizes = [1, 4], strides = [1, 1]} : vector<1x12xf32> to vector<1x4xf32>
    %430 = vector.extract_strided_slice %420 {offsets = [0, 4], sizes = [1, 4], strides = [1, 1]} : vector<1x12xf32> to vector<1x4xf32>
    %431 = arith.addf %429, %430 : vector<1x4xf32>
    %432 = arith.negf %431 : vector<1x4xf32>
    %433 = math.exp %432 : vector<1x4xf32>
    %cst_96 = arith.constant 1.000000e+00 : f32
    %434 = vector.broadcast %cst_96 : f32 to vector<1x4xf32>
    %435 = arith.addf %434, %433 : vector<1x4xf32>
    %436 = arith.divf %434, %435 : vector<1x4xf32>
    %437 = vector.extract_strided_slice %418 {offsets = [0, 8], sizes = [1, 4], strides = [1, 1]} : vector<1x12xf32> to vector<1x4xf32>
    %438 = vector.extract_strided_slice %420 {offsets = [0, 8], sizes = [1, 4], strides = [1, 1]} : vector<1x12xf32> to vector<1x4xf32>
    %439 = arith.mulf %428, %438 : vector<1x4xf32>
    %440 = arith.addf %437, %439 : vector<1x4xf32>
    %441 = math.tanh %440 : vector<1x4xf32>
    %cst_97 = arith.constant 1.000000e+00 : f32
    %442 = vector.broadcast %cst_97 : f32 to vector<1x4xf32>
    %443 = arith.subf %442, %436 : vector<1x4xf32>
    %444 = arith.mulf %443, %441 : vector<1x4xf32>
    %445 = arith.mulf %436, %386 : vector<1x4xf32>
    %446 = arith.addf %444, %445 : vector<1x4xf32>
    %447 = vector.extract_strided_slice %49 {offsets = [1, 12], sizes = [1, 12], strides = [1, 1]} : vector<8x24xf32> to vector<1x12xf32>
    %cst_98 = arith.constant dense<0.000000e+00> : vector<1x12xf32>
    %448 = tpu.matmul %415, %52, %cst_98 {dimension_numbers = #tpu.dot_dimension_numbers<[1], [0], [0], [1], [0, 0, 1, 1], [], []>, precision = #tpu.contract_precision<fp32>} : vector<1x4xf32>, vector<4x12xf32>, vector<1x12xf32> -> vector<1x12xf32>
    %449 = arith.addf %448, %53 : vector<1x12xf32>
    %450 = vector.extract_strided_slice %447 {offsets = [0, 0], sizes = [1, 4], strides = [1, 1]} : vector<1x12xf32> to vector<1x4xf32>
    %451 = vector.extract_strided_slice %449 {offsets = [0, 0], sizes = [1, 4], strides = [1, 1]} : vector<1x12xf32> to vector<1x4xf32>
    %452 = arith.addf %450, %451 : vector<1x4xf32>
    %453 = arith.negf %452 : vector<1x4xf32>
    %454 = math.exp %453 : vector<1x4xf32>
    %cst_99 = arith.constant 1.000000e+00 : f32
    %455 = vector.broadcast %cst_99 : f32 to vector<1x4xf32>
    %456 = arith.addf %455, %454 : vector<1x4xf32>
    %457 = arith.divf %455, %456 : vector<1x4xf32>
    %458 = vector.extract_strided_slice %447 {offsets = [0, 4], sizes = [1, 4], strides = [1, 1]} : vector<1x12xf32> to vector<1x4xf32>
    %459 = vector.extract_strided_slice %449 {offsets = [0, 4], sizes = [1, 4], strides = [1, 1]} : vector<1x12xf32> to vector<1x4xf32>
    %460 = arith.addf %458, %459 : vector<1x4xf32>
    %461 = arith.negf %460 : vector<1x4xf32>
    %462 = math.exp %461 : vector<1x4xf32>
    %cst_100 = arith.constant 1.000000e+00 : f32
    %463 = vector.broadcast %cst_100 : f32 to vector<1x4xf32>
    %464 = arith.addf %463, %462 : vector<1x4xf32>
    %465 = arith.divf %463, %464 : vector<1x4xf32>
    %466 = vector.extract_strided_slice %447 {offsets = [0, 8], sizes = [1, 4], strides = [1, 1]} : vector<1x12xf32> to vector<1x4xf32>
    %467 = vector.extract_strided_slice %449 {offsets = [0, 8], sizes = [1, 4], strides = [1, 1]} : vector<1x12xf32> to vector<1x4xf32>
    %468 = arith.mulf %457, %467 : vector<1x4xf32>
    %469 = arith.addf %466, %468 : vector<1x4xf32>
    %470 = math.tanh %469 : vector<1x4xf32>
    %cst_101 = arith.constant 1.000000e+00 : f32
    %471 = vector.broadcast %cst_101 : f32 to vector<1x4xf32>
    %472 = arith.subf %471, %465 : vector<1x4xf32>
    %473 = arith.mulf %472, %470 : vector<1x4xf32>
    %474 = arith.mulf %465, %415 : vector<1x4xf32>
    %475 = arith.addf %473, %474 : vector<1x4xf32>
    %476 = arith.maximumf %416, %446 : vector<1x4xf32>
    %477 = arith.maximumf %417, %475 : vector<1x4xf32>
    %478 = vector.extract_strided_slice %49 {offsets = [7, 0], sizes = [1, 12], strides = [1, 1]} : vector<8x24xf32> to vector<1x12xf32>
    %cst_102 = arith.constant dense<0.000000e+00> : vector<1x12xf32>
    %479 = tpu.matmul %446, %50, %cst_102 {dimension_numbers = #tpu.dot_dimension_numbers<[1], [0], [0], [1], [0, 0, 1, 1], [], []>, precision = #tpu.contract_precision<fp32>} : vector<1x4xf32>, vector<4x12xf32>, vector<1x12xf32> -> vector<1x12xf32>
    %480 = arith.addf %479, %51 : vector<1x12xf32>
    %481 = vector.extract_strided_slice %478 {offsets = [0, 0], sizes = [1, 4], strides = [1, 1]} : vector<1x12xf32> to vector<1x4xf32>
    %482 = vector.extract_strided_slice %480 {offsets = [0, 0], sizes = [1, 4], strides = [1, 1]} : vector<1x12xf32> to vector<1x4xf32>
    %483 = arith.addf %481, %482 : vector<1x4xf32>
    %484 = arith.negf %483 : vector<1x4xf32>
    %485 = math.exp %484 : vector<1x4xf32>
    %cst_103 = arith.constant 1.000000e+00 : f32
    %486 = vector.broadcast %cst_103 : f32 to vector<1x4xf32>
    %487 = arith.addf %486, %485 : vector<1x4xf32>
    %488 = arith.divf %486, %487 : vector<1x4xf32>
    %489 = vector.extract_strided_slice %478 {offsets = [0, 4], sizes = [1, 4], strides = [1, 1]} : vector<1x12xf32> to vector<1x4xf32>
    %490 = vector.extract_strided_slice %480 {offsets = [0, 4], sizes = [1, 4], strides = [1, 1]} : vector<1x12xf32> to vector<1x4xf32>
    %491 = arith.addf %489, %490 : vector<1x4xf32>
    %492 = arith.negf %491 : vector<1x4xf32>
    %493 = math.exp %492 : vector<1x4xf32>
    %cst_104 = arith.constant 1.000000e+00 : f32
    %494 = vector.broadcast %cst_104 : f32 to vector<1x4xf32>
    %495 = arith.addf %494, %493 : vector<1x4xf32>
    %496 = arith.divf %494, %495 : vector<1x4xf32>
    %497 = vector.extract_strided_slice %478 {offsets = [0, 8], sizes = [1, 4], strides = [1, 1]} : vector<1x12xf32> to vector<1x4xf32>
    %498 = vector.extract_strided_slice %480 {offsets = [0, 8], sizes = [1, 4], strides = [1, 1]} : vector<1x12xf32> to vector<1x4xf32>
    %499 = arith.mulf %488, %498 : vector<1x4xf32>
    %500 = arith.addf %497, %499 : vector<1x4xf32>
    %501 = math.tanh %500 : vector<1x4xf32>
    %cst_105 = arith.constant 1.000000e+00 : f32
    %502 = vector.broadcast %cst_105 : f32 to vector<1x4xf32>
    %503 = arith.subf %502, %496 : vector<1x4xf32>
    %504 = arith.mulf %503, %501 : vector<1x4xf32>
    %505 = arith.mulf %496, %446 : vector<1x4xf32>
    %506 = arith.addf %504, %505 : vector<1x4xf32>
    %507 = vector.extract_strided_slice %49 {offsets = [0, 12], sizes = [1, 12], strides = [1, 1]} : vector<8x24xf32> to vector<1x12xf32>
    %cst_106 = arith.constant dense<0.000000e+00> : vector<1x12xf32>
    %508 = tpu.matmul %475, %52, %cst_106 {dimension_numbers = #tpu.dot_dimension_numbers<[1], [0], [0], [1], [0, 0, 1, 1], [], []>, precision = #tpu.contract_precision<fp32>} : vector<1x4xf32>, vector<4x12xf32>, vector<1x12xf32> -> vector<1x12xf32>
    %509 = arith.addf %508, %53 : vector<1x12xf32>
    %510 = vector.extract_strided_slice %507 {offsets = [0, 0], sizes = [1, 4], strides = [1, 1]} : vector<1x12xf32> to vector<1x4xf32>
    %511 = vector.extract_strided_slice %509 {offsets = [0, 0], sizes = [1, 4], strides = [1, 1]} : vector<1x12xf32> to vector<1x4xf32>
    %512 = arith.addf %510, %511 : vector<1x4xf32>
    %513 = arith.negf %512 : vector<1x4xf32>
    %514 = math.exp %513 : vector<1x4xf32>
    %cst_107 = arith.constant 1.000000e+00 : f32
    %515 = vector.broadcast %cst_107 : f32 to vector<1x4xf32>
    %516 = arith.addf %515, %514 : vector<1x4xf32>
    %517 = arith.divf %515, %516 : vector<1x4xf32>
    %518 = vector.extract_strided_slice %507 {offsets = [0, 4], sizes = [1, 4], strides = [1, 1]} : vector<1x12xf32> to vector<1x4xf32>
    %519 = vector.extract_strided_slice %509 {offsets = [0, 4], sizes = [1, 4], strides = [1, 1]} : vector<1x12xf32> to vector<1x4xf32>
    %520 = arith.addf %518, %519 : vector<1x4xf32>
    %521 = arith.negf %520 : vector<1x4xf32>
    %522 = math.exp %521 : vector<1x4xf32>
    %cst_108 = arith.constant 1.000000e+00 : f32
    %523 = vector.broadcast %cst_108 : f32 to vector<1x4xf32>
    %524 = arith.addf %523, %522 : vector<1x4xf32>
    %525 = arith.divf %523, %524 : vector<1x4xf32>
    %526 = vector.extract_strided_slice %507 {offsets = [0, 8], sizes = [1, 4], strides = [1, 1]} : vector<1x12xf32> to vector<1x4xf32>
    %527 = vector.extract_strided_slice %509 {offsets = [0, 8], sizes = [1, 4], strides = [1, 1]} : vector<1x12xf32> to vector<1x4xf32>
    %528 = arith.mulf %517, %527 : vector<1x4xf32>
    %529 = arith.addf %526, %528 : vector<1x4xf32>
    %530 = math.tanh %529 : vector<1x4xf32>
    %cst_109 = arith.constant 1.000000e+00 : f32
    %531 = vector.broadcast %cst_109 : f32 to vector<1x4xf32>
    %532 = arith.subf %531, %525 : vector<1x4xf32>
    %533 = arith.mulf %532, %530 : vector<1x4xf32>
    %534 = arith.mulf %525, %475 : vector<1x4xf32>
    %535 = arith.addf %533, %534 : vector<1x4xf32>
    %536 = arith.maximumf %476, %506 : vector<1x4xf32>
    %537 = arith.maximumf %477, %535 : vector<1x4xf32>
    %538 = tpu.concatenate %536, %537 in 1 : vector<1x4xf32>, vector<1x4xf32> -> vector<1x8xf32>
    %c0_110 = arith.constant 0 : index
    %c0_111 = arith.constant 0 : index
    %c0_112 = arith.constant 0 : index
    %539 = vector.load %arg18[%c0_110, %c0_111, %c0_112] : memref<1x1x8xf32, #tpu.memory_space<vmem>>, vector<1x1x8xf32>
    %540 = vector.shape_cast %539 : vector<1x1x8xf32> to vector<1x8xf32>
    %541 = vector.shape_cast %538 : vector<1x8xf32> to vector<1x1x8xf32>
    tpu.vector_store %arg18[%c0_110, %c0_111, %c0_112], %541 {strides = array<i32>} : memref<1x1x8xf32, #tpu.memory_space<vmem>>, vector<1x1x8xf32>,
    return
  }
  func.func @transform_0(%arg0: i32) -> (i32, i32, i32) {
    %c0_i32 = arith.constant 0 : i32
    %c0_i32_0 = arith.constant 0 : i32
    %c0_i32_1 = arith.constant 0 : i32
    return %arg0, %c0_i32, %c0_i32_0 : i32, i32, i32
  }
  func.func @transform_1(%arg0: i32) -> (i32, i32) {
    %c0_i32 = arith.constant 0 : i32
    %c0_i32_0 = arith.constant 0 : i32
    %c0_i32_1 = arith.constant 0 : i32
    return %c0_i32, %c0_i32_0 : i32, i32
  }
  func.func @transform_2(%arg0: i32) -> (i32, i32) {
    %c0_i32 = arith.constant 0 : i32
    %c0_i32_0 = arith.constant 0 : i32
    %c0_i32_1 = arith.constant 0 : i32
    return %c0_i32, %c0_i32_0 : i32, i32
  }
  func.func @transform_3(%arg0: i32) -> (i32, i32) {
    %c0_i32 = arith.constant 0 : i32
    %c0_i32_0 = arith.constant 0 : i32
    %c0_i32_1 = arith.constant 0 : i32
    return %c0_i32, %c0_i32_0 : i32, i32
  }
  func.func @transform_4(%arg0: i32) -> (i32, i32) {
    %c0_i32 = arith.constant 0 : i32
    %c0_i32_0 = arith.constant 0 : i32
    %c0_i32_1 = arith.constant 0 : i32
    return %c0_i32, %c0_i32_0 : i32, i32
  }
  func.func @transform_5(%arg0: i32) -> (i32, i32) {
    %c0_i32 = arith.constant 0 : i32
    %c0_i32_0 = arith.constant 0 : i32
    %c0_i32_1 = arith.constant 0 : i32
    return %c0_i32, %c0_i32_0 : i32, i32
  }
  func.func @transform_6(%arg0: i32) -> (i32, i32) {
    %c0_i32 = arith.constant 0 : i32
    %c0_i32_0 = arith.constant 0 : i32
    %c0_i32_1 = arith.constant 0 : i32
    return %c0_i32, %c0_i32_0 : i32, i32
  }
  func.func @transform_7(%arg0: i32) -> (i32, i32) {
    %c0_i32 = arith.constant 0 : i32
    %c0_i32_0 = arith.constant 0 : i32
    %c0_i32_1 = arith.constant 0 : i32
    return %c0_i32, %c0_i32_0 : i32, i32
  }
  func.func @transform_8(%arg0: i32) -> (i32, i32) {
    %c0_i32 = arith.constant 0 : i32
    %c0_i32_0 = arith.constant 0 : i32
    %c0_i32_1 = arith.constant 0 : i32
    return %c0_i32, %c0_i32_0 : i32, i32
  }
  func.func @transform_9(%arg0: i32) -> (i32, i32) {
    %c0_i32 = arith.constant 0 : i32
    %c0_i32_0 = arith.constant 0 : i32
    %c0_i32_1 = arith.constant 0 : i32
    return %c0_i32, %c0_i32_0 : i32, i32
  }
  func.func @transform_10(%arg0: i32) -> (i32, i32) {
    %c0_i32 = arith.constant 0 : i32
    %c0_i32_0 = arith.constant 0 : i32
    %c0_i32_1 = arith.constant 0 : i32
    return %c0_i32, %c0_i32_0 : i32, i32
  }
  func.func @transform_11(%arg0: i32) -> (i32, i32) {
    %c0_i32 = arith.constant 0 : i32
    %c0_i32_0 = arith.constant 0 : i32
    %c0_i32_1 = arith.constant 0 : i32
    return %c0_i32, %c0_i32_0 : i32, i32
  }
  func.func @transform_12(%arg0: i32) -> (i32, i32) {
    %c0_i32 = arith.constant 0 : i32
    %c0_i32_0 = arith.constant 0 : i32
    %c0_i32_1 = arith.constant 0 : i32
    return %c0_i32, %c0_i32_0 : i32, i32
  }
  func.func @transform_13(%arg0: i32) -> (i32, i32) {
    %c0_i32 = arith.constant 0 : i32
    %c0_i32_0 = arith.constant 0 : i32
    %c0_i32_1 = arith.constant 0 : i32
    return %c0_i32, %c0_i32_0 : i32, i32
  }
  func.func @transform_14(%arg0: i32) -> (i32, i32) {
    %c0_i32 = arith.constant 0 : i32
    %c0_i32_0 = arith.constant 0 : i32
    %c0_i32_1 = arith.constant 0 : i32
    return %c0_i32, %c0_i32_0 : i32, i32
  }
  func.func @transform_15(%arg0: i32) -> (i32, i32) {
    %c0_i32 = arith.constant 0 : i32
    %c0_i32_0 = arith.constant 0 : i32
    %c0_i32_1 = arith.constant 0 : i32
    return %c0_i32, %c0_i32_0 : i32, i32
  }
  func.func @transform_16(%arg0: i32) -> (i32, i32) {
    %c0_i32 = arith.constant 0 : i32
    %c0_i32_0 = arith.constant 0 : i32
    %c0_i32_1 = arith.constant 0 : i32
    return %c0_i32, %c0_i32_0 : i32, i32
  }
  func.func @transform_17(%arg0: i32) -> (i32, i32, i32) {
    %c0_i32 = arith.constant 0 : i32
    %c0_i32_0 = arith.constant 0 : i32
    %c0_i32_1 = arith.constant 0 : i32
    return %arg0, %c0_i32, %c0_i32_0 : i32, i32, i32
  }
}

</mosaic_0001>

<bundles_post_ra>
// kernel: tpu_custom_call.1
= control target key start
LH: loop header
LB: loop body
LE: loop exit
PB: predicated region body
PF: predicated region fallthrough
CT: control target
= control target key end

     0   :  { %s19448_s0 = inlined_call_operand.vmem [shape: f32[2,16,16], index: 0, kind: input, shape index: {}]   ;;  %s19449_s1 = inlined_call_operand.vmem [shape: f32[64,48], index: 1, kind: input, shape index: {}]   ;;  %s19450_s2 = inlined_call_operand.vmem [shape: f32[64,1], index: 2, kind: input, shape index: {}]   ;;  %s19451_s3 = inlined_call_operand.vmem [shape: f32[64,1], index: 3, kind: input, shape index: {}]   ;;  %s19452_s4 = inlined_call_operand.vmem [shape: f32[64,1], index: 4, kind: input, shape index: {}]   ;;  %s19453_s5 = inlined_call_operand.vmem [shape: f32[128,192], index: 5, kind: input, shape index: {}]   ;;  %s19454_s6 = inlined_call_operand.vmem [shape: f32[128,1], index: 6, kind: input, shape index: {}]   ;;  %s19455_s7 = inlined_call_operand.vmem [shape: f32[128,1], index: 7, kind: input, shape index: {}]   ;;  %s19456_s8 = inlined_call_operand.vmem [shape: f32[128,1], index: 8, kind: input, shape index: {}]   ;;  %s19457_s9 = inlined_call_operand.vmem [shape: f32[64,128], index: 9, kind: input, shape index: {}]   ;;  %s19458_s10 = inlined_call_operand.vmem [shape: f32[16,8], index: 10, kind: input, shape index: {}]   ;;  %s19459_s11 = inlined_call_operand.vmem [shape: f32[64,24], index: 11, kind: input, shape index: {}]   ;;  %s19460_s12 = inlined_call_operand.vmem [shape: f32[1,24], index: 12, kind: input, shape index: {}]   ;;  %s19461_s13 = inlined_call_operand.vmem [shape: f32[4,12], index: 13, kind: input, shape index: {}]   ;;  %s19462_s14 = inlined_call_operand.vmem [shape: f32[1,12], index: 14, kind: input, shape index: {}]   ;;  %s19463_s15 = inlined_call_operand.vmem [shape: f32[4,12], index: 15, kind: input, shape index: {}]   ;;  %s19464_s16 = inlined_call_operand.vmem [shape: f32[1,12], index: 16, kind: input, shape index: {}]   ;;  %s19465_s17 = inlined_call_operand.hbm [shape: f32[2,1,8], index: 17, kind: output, shape index: {}]  }
   0x1   :  { %19649 = sst [smem:[#allocation75_spill]] %s19448_s0 }
   0x2   :  { %19650 = sst [smem:[#allocation76_spill]] %s19449_s1 }
   0x3   :  { %19651 = sst [smem:[#allocation77_spill]] %s19450_s2 }
   0x4   :  { %22 = vsyncpa [#allocation3], 0 }
   0x5   :  { %24 = vsyncpa [#allocation3 + $0x1], 0  ;;  %s15849_s24 = smov 0   ;;  %s15851_s25 = smov 0  }
   0x6   :  { %s15853_s26 = smov 0   ;;  %s15855_s27 = smov 0  }
   0x7 LB: > { %19652 = sst [smem:[#allocation5_spill]] %s15731_s24  ;;  %s15870_s28 = sadd.s32 4294967295, %s15743_s27   ;;  %s15743_s27 = sphi %s15855_s27, %s19922_s27   ;;  %s15739_s26 = sphi %s15853_s26, %s19924_s26   ;;  %s15735_s25 = sphi %s15851_s25, %s19926_s25   ;;  %s15731_s24 = sphi %s15849_s24, %s19925_s24  }
   0x8   : > { %19653 = sst [smem:[#allocation6_spill]] %s15739_s26  ;;  %s13872_s29 = sadd.s32 4294967294, %s15743_s27  }
   0x9   : > { %s15874_s0 = sadd.s32 1, %s15743_s27   ;;  %s399_s30 = sadd.s32 1, %s15739_s26 }
   0xa   : > { %19654 = sst [smem:[#allocation7_spill]] %s15874_s0  ;;  %s396_s18 = ssub.s32 %s15743_s27, %s15874_s0 }
   0xb   : > { %p409_p0 = scmp.ne.s32.totalorder %s15739_s26, %s15735_s25  ;;  %p397_p1 = scmp.eq.s32.totalorder %s396_s18, 0 }
   0xc   : > { %p410_p2 = scmp.eq.s32.totalorder %s15870_s28, 1  ;;  %p415_p3 = scmp.ne.s32.totalorder %s15735_s25, %s15731_s24 }
   0xd   : > { %p416_p4 = scmp.eq.s32.totalorder %s13872_s29, 1  ;;  %p13875_p7 = scmp.ge.s32.totalorder %s15743_s27, 1 }
   0xe   : > { %s15885_s19 = scalar_select %p397_p1, %s15739_s26, %s399_s30  }
   0xf   : > { %p15887_p5 = por %p410_p2, %p409_p0  ;;  %p15891_p6 = por %p416_p4, %p415_p3 }
  0x10   : > { %19655 = sst [smem:[#allocation8_spill]] %s15885_s19  ;;  %p490_p8 = scmp.lt.s32.totalorder %s15743_s27, 3 }
  0x11   : > { %s19657_s20 = scalar_select %p15891_p6, 1, 0 }
  0x12   : > { %p491_p9 = pnand %p13875_p7, %p490_p8 }
  0x13   : > { %19658 = sst [smem:[#allocation9_spill]] %s19657_s20 }
  0x14   : > { %494 = sbr.rel (%p491_p9) target bundleno = 7906 (0x1ee2), region = 88 }
  0x19   : > { %p541_p10 = scmp.lt.s32.totalorder %s15870_s28, 1  ;;  %s19659_s30 = sld [smem:[#allocation75_spill]]  ;;  %vm632_vm0 = vcmask 392192   ;;  %vm556_vm1 = vcmask 7168   ;;  %vm559_vm2 = vcmask 138240   ;;  %v15748_v16 = vmov 0  }
  0x1a   : > { %s19475_s19 = smov 1   ;;  %s19660_s20 = sld [smem:[#allocation76_spill]]  ;;  %15584 = vset.pattern.permute.xlu1 %v15748_v16  ;;  %15583 = vset.pattern.permute.xlu0 %v15748_v16  ;;  %v1484_v24 = vld [vmem:[%s19451_s3 + $0x38] sm:$0xff]  ;;  %v1483_v25 = vld [vmem:[%s19451_s3 + $0x30] sm:$0xff]  ;;  %v1482_v27 = vld [vmem:[%s19451_s3 + $0x28] sm:$0xff]  ;;  %vm1821_vm3 = vcmask 523264  }
  0x1b   : > { %s542_s21 = scalar_select %p541_p10, %s15870_s28, 1  ;;  %v1540_v26 = vld [vmem:[%s19452_s4 + $0x38] sm:$0xff]  ;;  %v1539_v28 = vld [vmem:[%s19452_s4 + $0x30] sm:$0xff]  ;;  %v1481_v29 = vld [vmem:[%s19451_s3 + $0x20] sm:$0xff]  ;;  %vm4660_vm4 = vcmask 130048   ;;  %vm15750_vm5 = vmmov 0  }
  0x1c   : > { %s19471_s26 = smov 126   ;;  %s19473_s0 = smov 127   ;;  %v1538_v30 = vld [vmem:[%s19452_s4 + $0x28] sm:$0xff]  ;;  %v1480_v31 = vld [vmem:[%s19451_s3 + $0x18] sm:$0xff]  ;;  %v1537_v32 = vld [vmem:[%s19452_s4 + $0x20] sm:$0xff]  ;;  %vm6040_vm6 = vcmask 1043456  }
  0x1d   : > { %s13898_s22 = sshll.u32 %s542_s21, 4  ;;  %s19661_s2 = sld [smem:[#allocation77_spill]]  ;;  %v1479_v33 = vld [vmem:[%s19451_s3 + $0x10] sm:$0xff]  ;;  %v1536_v34 = vld [vmem:[%s19452_s4 + $0x18] sm:$0xff]  ;;  %v1478_v35 = vld [vmem:[%s19451_s3 + $0x8] sm:$0xff]  ;;  %vm6036_vm7 = vcmask 31744  }
  0x1e   : > { %v1535_v36 = vld [vmem:[%s19452_s4 + $0x10] sm:$0xff]  ;;  %v1477_v37 = vld [vmem:[%s19451_s3] sm:$0xff]  ;;  %v1534_v38 = vld [vmem:[%s19452_s4 + $0x8] sm:$0xff]  ;;  %s19670_s23 = smov 1   ;;  %s19673_s29 = smov 127   ;;  %vm13802_vm8 = vcmask 57344  }
  0x1f   : > { %s545_s18 = scalar_lea.vmem %s19659_s30, %s13898_s22  ;;  %v1533_v40 = vld [vmem:[%s19452_s4] sm:$0xff]  ;;  %s19674_s30 = smov 126  }
  0x20   : > { %v547_v0 = vld [vmem:[%s545_s18 + $0x8] sm:$0xff]  ;;  %v546_v1 = vld [vmem:[%s545_s18] sm:$0xff]  ;;  %v578_v42 = vld [vmem:[%s19660_s20 + $0x10] sm:$0xff]  ;;  %s15754_s18 = smov 8  }
  0x21   : > { %552 = vrot.lane.b32.xlu0 %v547_v0, %s19475_s19  ;;  %v576_v2 = vld [vmem:[%s19660_s20] sm:$0xff]  ;;  %v577_v39 = vld [vmem:[%s19660_s20 + $0x8] sm:$0xff]  ;;  %v579_v44 = vld [vmem:[%s19660_s20 + $0x18] sm:$0xff]  ;;  %v640_v45 = vsel %vm632_vm0, %v578_v42, 0 }
  0x22   : > { %v634_v3 = vsel %vm632_vm0, %v576_v2, 0  ;;  %v637_v41 = vsel %vm632_vm0, %v577_v39, 0  ;;  %v643_v46 = vsel %vm632_vm0, %v579_v44, 0  ;;  %v580_v47 = vld [vmem:[%s19660_s20 + $0x20] sm:$0xff]  ;;  %v16026_v51 = vand.u32 4294901760, %v640_v45  ;;  %v581_v52 = vld [vmem:[%s19660_s20 + $0x28] sm:$0xff] }
  0x23   : > { %v15908_v4 = vand.u32 4294901760, %v634_v3  ;;  %v590_v15 = vld [vmem:[%s19661_s2 + $0x30] sm:$0xff]  ;;  %v591_v17 = vld [vmem:[%s19661_s2 + $0x38] sm:$0xff]  ;;  %v589_v18 = vld [vmem:[%s19661_s2 + $0x28] sm:$0xff]  ;;  %v16013_v43 = vand.u32 4294901760, %v637_v41  ;;  %v16035_v55 = vand.u32 4294901760, %v643_v46 }
  0x24   : > { %v588_v19 = vld [vmem:[%s19661_s2 + $0x20] sm:$0xff]  ;;  %v587_v20 = vld [vmem:[%s19661_s2 + $0x18] sm:$0xff]  ;;  %v586_v21 = vld [vmem:[%s19661_s2 + $0x10] sm:$0xff]  ;;  %v646_v56 = vsel %vm632_vm0, %v580_v47, 0  ;;  %v649_v59 = vsel %vm632_vm0, %v581_v52, 0  ;;  %v16052_v63 = vsub.f32 %v640_v45, %v16026_v51 }
  0x25   : > { %550 = vrot.lane.b32.xlu0 %v546_v1, %s19475_s19  ;;  %v15911_v5 = vsub.f32 %v634_v3, %v15908_v4  ;;  %14469 = vmatprep.mubr.f32.mxu1 %v15908_v4  ;;  %v585_v22 = vld [vmem:[%s19661_s2 + $0x8] sm:$0xff]  ;;  %v584_v23 = vld [vmem:[%s19661_s2] sm:$0xff]  ;;  %v16024_v50 = vsub.f32 %v637_v41, %v16013_v43  ;;  %v16059_v2 = vand.u32 4294901760, %v646_v56  ;;  %v582_v3 = vld [vmem:[%s19660_s20 + $0x30] sm:$0xff]  ;;  %s15751_s19 = smov 12  }
  0x27   : > { %v730_v6 = vand.u32 4294901760, %v15911_v5  ;;  %v740_v62 = vand.u32 4294901760, %v16024_v50 }
  0x29   : > { %v731_v9 = vsub.f32 %v15911_v5, %v730_v6 }
  0x2b   : > { %v732_v11 = vand.u32 4294901760, %v731_v9  ;;  %v16070_v9 = vand.u32 4294901760, %v649_v59 }
  0x2d   : > { %14445 = vmatprep.mubr.f32.mxu0 %v732_v11 }
  0x93   : > { %v553_v7 = vpop.permute.xlu0 %552 }
  0x94   : > { %v558_v8 = vsel %vm556_vm1, 0.0, %v553_v7 }
  0x95   : > { %v15920_v10 = vsel %vm559_vm2, %v558_v8, 0.0  ;;  %v16068_v8 = vsub.f32 %v643_v46, %v16035_v55 }
  0x96   : > { %572 = vrot.lane.b32.xlu1 %v15920_v10, %s19471_s26  ;;  %566 = vrot.lane.b32.xlu0 %v15920_v10, %s19473_s0  ;;  %v16047_v60 = vand.u32 4294901760, %v15920_v10 }
  0x97   : > { %v551_v12 = vpop.permute.xlu0 %550 }
  0x98   : > { %v557_v13 = vsel %vm556_vm1, 0.0, %v551_v12  ;;  %v16086_v16 = vsub.f32 %v15920_v10, %v16047_v60  ;;  %v16101_v10 = vsub.f32 %v646_v56, %v16059_v2 }
  0x99   : > { %v15928_v14 = vsel %vm559_vm2, %v557_v13, 0.0 }
  0x9a   : > { %570 = vrot.lane.b32.xlu1 %v15928_v14, %s19471_s26  ;;  %629 = vperm.xlu0 %15583, %v591_v17   ;;  %v16065_v7 = vand.u32 4294901760, %v15928_v14  ;;  %s15756_s26 = smov 112  }
  0x9e   : > { %564 = vrot.lane.b32.xlu1 %v15928_v14, %s19473_s0  ;;  %614 = vperm.xlu0 %15583, %v588_v19   ;;  %v750_v19 = vand.u32 4294901760, %v16052_v63 }
  0xa2   : > { %624 = vperm.xlu1 %15584, %v590_v15   ;;  %604 = vperm.xlu0 %15583, %v586_v21   ;;  %v583_v15 = vld [vmem:[%s19660_s20 + $0x38] sm:$0xff] }
  0xa6   : > { %619 = vperm.xlu1 %15584, %v589_v18   ;;  %594 = vperm.xlu0 %15583, %v584_v23   ;;  %v741_v18 = vsub.f32 %v16024_v50, %v740_v62 }
  0xaa   : > { %609 = vperm.xlu1 %15584, %v587_v20   ;;  %1517 = vperm.xlu0 %15583, %v1483_v25   ;;  %v652_v20 = vsel %vm632_vm0, %v582_v3, 0  ;;  %v760_v25 = vand.u32 4294901760, %v16068_v8 }
  0xae   : > { %599 = vperm.xlu1 %15584, %v585_v22   ;;  %1512 = vperm.xlu0 %15583, %v1482_v27   ;;  %v655_v27 = vsel %vm632_vm0, %v583_v15, 0 }
  0xb2   : > { %1522 = vperm.xlu1 %15584, %v1484_v24   ;;  %1507 = vperm.xlu0 %15583, %v1481_v29   ;;  %v16105_v24 = vsub.f32 %v15928_v14, %v16065_v7 }
  0xb4   : > { %v16139_v39 = vand.u32 4294901760, %v16105_v24 }
  0xb6   : > { %1578 = vperm.xlu1 %15584, %v1540_v26   ;;  %1502 = vperm.xlu0 %15583, %v1480_v31   ;;  %v16110_v26 = vsub.f32 %v649_v59, %v16070_v9  ;;  %v742_v31 = vand.u32 4294901760, %v741_v18  ;;  %v867_v56 = vsub.f32 %v16105_v24, %v16139_v39 }
  0xb8   : > { %v780_v42 = vand.u32 4294901760, %v16110_v26 }
  0xba   : > { %1573 = vperm.xlu1 %15584, %v1539_v28   ;;  %1497 = vperm.xlu0 %15583, %v1479_v33   ;;  %v16126_v33 = vand.u32 4294901760, %v16086_v16  ;;  %v781_v59 = vsub.f32 %v16110_v26, %v780_v42 }
  0xbc   : > { %v860_v46 = vsub.f32 %v16086_v16, %v16126_v33 }
  0xbe   : > { %1568 = vperm.xlu1 %15584, %v1538_v30   ;;  %1492 = vperm.xlu0 %15583, %v1478_v35   ;;  %v16119_v30 = vand.u32 4294901760, %v652_v20  ;;  %v861_v3 = vand.u32 4294901760, %v860_v46 }
  0xc0   : > { %v16145_v44 = vsub.f32 %v652_v20, %v16119_v30 }
  0xc2   : > { %1563 = vperm.xlu1 %15584, %v1537_v32   ;;  %1487 = vperm.xlu0 %15583, %v1477_v37   ;;  %v751_v32 = vsub.f32 %v16052_v63, %v750_v19  ;;  %v16132_v37 = vand.u32 4294901760, %v655_v27 }
  0xc4   : > { %v752_v45 = vand.u32 4294901760, %v751_v32 }
  0xc6   : > { %1558 = vperm.xlu1 %15584, %v1536_v34   ;;  %1543 = vperm.xlu0 %15583, %v1533_v40  }
  0xca   : > { %1553 = vperm.xlu1 %15584, %v1535_v36   ;;  %v770_v36 = vand.u32 4294901760, %v16101_v10 }
  0xce   : > { %1548 = vperm.xlu1 %15584, %v1534_v38   ;;  %v761_v38 = vsub.f32 %v16068_v8, %v760_v25 }
  0xd0   : > { %v762_v52 = vand.u32 4294901760, %v761_v38 }
 0x108   : > { %v573_v48 = vpop.permute.xlu1 %572  ;;  %v567_v49 = vpop.permute.xlu0 %566 }
 0x109   : > { %v16031_v53 = vand.u32 4294901760, %v573_v48  ;;  %v16033_v54 = vand.u32 4294901760, %v567_v49 }
 0x10b   : > { %v16039_v57 = vsub.f32 %v573_v48, %v16031_v53  ;;  %v16042_v58 = vsub.f32 %v567_v49, %v16033_v54  ;;  %14433 = vmatprep.subr.mxu0 %v16031_v53  ;;  %v771_v48 = vsub.f32 %v16101_v10, %v770_v36  ;;  %v16154_v49 = vsub.f32 %v655_v27, %v16132_v37 }
 0x10c   : > { %14434 = vmatpush3.msra.mxu0 %v16031_v53  ;;  %v571_v61 = vpop.permute.xlu1 %570 }
 0x10d   : > { %v16054_v0 = vand.u32 4294901760, %v571_v61  ;;  %v16057_v1 = vand.u32 4294901760, %v16039_v57  ;;  %v16079_v13 = vand.u32 4294901760, %v16042_v58  ;;  %v800_v15 = vand.u32 4294901760, %v16154_v49 }
 0x10f   : > { %v16073_v11 = vsub.f32 %v571_v61, %v16054_v0  ;;  %14435 = vmatprep.subr.mxu0 %v16054_v0  ;;  %v832_v12 = vsub.f32 %v16039_v57, %v16057_v1  ;;  %v846_v14 = vsub.f32 %v16042_v58, %v16079_v13  ;;  %v790_v61 = vand.u32 4294901760, %v16145_v44 }
 0x110   : > { %14436 = vmatpush3.msra.mxu0 %v16054_v0  ;;  %v565_v17 = vpop.permute.xlu1 %564 }
 0x111   : > { %v16094_v21 = vand.u32 4294901760, %v565_v17  ;;  %14437 = vmatprep.subr.mxu0 %v16033_v54  ;;  %v833_v22 = vand.u32 4294901760, %v832_v12  ;;  %v16098_v23 = vand.u32 4294901760, %v16073_v11  ;;  %v847_v40 = vand.u32 4294901760, %v846_v14 }
 0x112   : > { %14438 = vmatpush3.msra.mxu0 %v16033_v54  ;;  %v772_v12 = vand.u32 4294901760, %v771_v48  ;;  %v791_v18 = vsub.f32 %v16145_v44, %v790_v61 }
 0x113   : > { %v851_v28 = vsub.f32 %v565_v17, %v16094_v21  ;;  %14439 = vmatprep.subr.mxu0 %v16094_v21  ;;  %14457 = vmatprep.subr.mxu1 %v833_v22  ;;  %v839_v29 = vsub.f32 %v16073_v11, %v16098_v23  ;;  %v782_v17 = vand.u32 4294901760, %v781_v59 }
 0x114   : > { %14440 = vmatpush3.msra.mxu0 %v16094_v21  ;;  %14458 = vmatpush3.msra.mxu1 %v833_v22  ;;  %v792_v20 = vand.u32 4294901760, %v791_v18 }
 0x115   : > { %14441 = vmatprep.subr.mxu0 %v16047_v60  ;;  %v840_v34 = vand.u32 4294901760, %v839_v29  ;;  %v16129_v35 = vand.u32 4294901760, %v851_v28 }
 0x116   : > { %14442 = vmatpush3.msra.mxu0 %v16047_v60 }
 0x117   : > { %14443 = vmatprep.subr.mxu0 %v16065_v7  ;;  %14459 = vmatprep.subr.mxu1 %v840_v34  ;;  %v853_v41 = vsub.f32 %v851_v28, %v16129_v35 }
 0x118   : > { %14444 = vmatpush3.msra.mxu0 %v16065_v7  ;;  %14460 = vmatpush3.msra.mxu1 %v840_v34 }
 0x119   : > { %14446 = vmatmul.mubr.f32.vlgmr.msra.gmra.mxu0 %v742_v31  ;;  %14461 = vmatprep.subr.mxu1 %v847_v40  ;;  %v854_v47 = vand.u32 4294901760, %v853_v41 }
 0x11a   : > { %14481 = vmatprep.subr.mxu0 %v16039_v57  ;;  %14462 = vmatpush3.msra.mxu1 %v847_v40 }
 0x11b   : > { %14482 = vmatpush3.msra.mxu0 %v16039_v57  ;;  %14463 = vmatprep.subr.mxu1 %v854_v47  ;;  %v868_v57 = vand.u32 4294901760, %v867_v56 }
 0x11c   : > { %14483 = vmatprep.subr.mxu0 %v16073_v11  ;;  %14448 = vmatprep.mubr.f32.mxu0 %v752_v45 }
 0x11d   : > { %14464 = vmatpush3.msra.mxu1 %v854_v47  ;;  %14484 = vmatpush3.msra.mxu0 %v16073_v11  ;;  %v801_v11 = vsub.f32 %v16154_v49, %v800_v15 }
 0x11e   : > { %14449 = vmatmul.mubr.f32.gmra.mxu0 %v762_v52  ;;  %14465 = vmatprep.subr.mxu1 %v861_v3 }
 0x11f   : > { %14485 = vmatprep.subr.mxu0 %v16042_v58  ;;  %14466 = vmatpush3.msra.mxu1 %v861_v3 }
 0x120   : > { %14486 = vmatpush3.msra.mxu0 %v16042_v58  ;;  %14467 = vmatprep.subr.mxu1 %v868_v57  ;;  %v802_v58 = vand.u32 4294901760, %v801_v11 }
 0x121   : > { %14487 = vmatprep.subr.mxu0 %v851_v28  ;;  %14451 = vmatprep.mubr.f32.mxu0 %v772_v12 }
 0x122   : > { %14468 = vmatpush3.msra.mxu1 %v868_v57  ;;  %14488 = vmatpush3.msra.mxu0 %v851_v28 }
 0x123   : > { %14452 = vmatmul.mubr.f32.gmra.mxu0 %v782_v17  ;;  %14470 = vmatmul.mubr.f32.vlgmr.msra.gmra.mxu1 %v16013_v43 }
 0x124   : > { %14489 = vmatprep.subr.mxu0 %v16086_v16  ;;  %14505 = vmatprep.subr.mxu1 %v16031_v53 }
 0x125   : > { %14490 = vmatpush3.msra.mxu0 %v16086_v16  ;;  %14506 = vmatpush3.msra.mxu1 %v16031_v53 }
 0x126   : > { %14491 = vmatprep.subr.mxu0 %v16105_v24  ;;  %14507 = vmatprep.subr.mxu1 %v16054_v0 }
 0x127   : > { %14454 = vmatprep.mubr.f32.mxu0 %v792_v20  ;;  %14472 = vmatprep.mubr.f32.mxu1 %v16026_v51 }
 0x128   : > { %14492 = vmatpush3.msra.mxu0 %v16105_v24  ;;  %14508 = vmatpush3.msra.mxu1 %v16054_v0 }
 0x129   : > { %14455 = vmatmul.mubr.f32.gmra.mxu0 %v802_v58  ;;  %14473 = vmatmul.mubr.f32.gmra.mxu1 %v16035_v55 }
 0x12a   : > { %14509 = vmatprep.subr.mxu1 %v16033_v54  ;;  %14529 = vmatprep.subr.mxu0 %v16057_v1 }
 0x12b   : > { %14510 = vmatpush3.msra.mxu1 %v16033_v54  ;;  %14475 = vmatprep.mubr.f32.mxu1 %v16059_v2 }
 0x12c   : > { %14511 = vmatprep.subr.mxu1 %v16094_v21  ;;  %14493 = vmatprep.mubr.f32.mxu0 %v15911_v5 }
 0x12d   : > { %14512 = vmatpush3.msra.mxu1 %v16094_v21  ;;  %14494 = vmatmul.mubr.f32.vlgmr.msra.gmra.mxu0 %v16024_v50 }
 0x12e   : > { %14476 = vmatmul.mubr.f32.gmra.mxu1 %v16070_v9  ;;  %14513 = vmatprep.subr.mxu1 %v16047_v60 }
 0x12f   : > { %14530 = vmatpush3.msra.mxu0 %v16057_v1  ;;  %14514 = vmatpush3.msra.mxu1 %v16047_v60 }
 0x130   : > { %14531 = vmatprep.subr.mxu0 %v16098_v23  ;;  %14515 = vmatprep.subr.mxu1 %v16065_v7 }
 0x131   : > { %14532 = vmatpush3.msra.mxu0 %v16098_v23  ;;  %14478 = vmatprep.mubr.f32.mxu1 %v16119_v30 }
 0x132   : > { %14496 = vmatprep.mubr.f32.mxu0 %v16052_v63  ;;  %14516 = vmatpush3.msra.mxu1 %v16065_v7 }
 0x133   : > { %14533 = vmatprep.subr.mxu0 %v16079_v13  ;;  %14479 = vmatmul.mubr.f32.gmra.mxu1 %v16132_v37 }
 0x134   : > { %14497 = vmatmul.mubr.f32.gmra.mxu0 %v16068_v8  ;;  %14553 = vmatprep.subr.mxu1 %v16031_v53 }
 0x135   : > { %14534 = vmatpush3.msra.mxu0 %v16079_v13  ;;  %14499 = vmatprep.mubr.f32.mxu0 %v16101_v10 }
 0x136   : > { %14535 = vmatprep.subr.mxu0 %v16129_v35  ;;  %14517 = vmatprep.mubr.f32.mxu1 %v730_v6 }
 0x137   : > { %14536 = vmatpush3.msra.mxu0 %v16129_v35  ;;  %14518 = vmatmul.mubr.f32.vlgmr.msra.gmra.mxu1 %v740_v62 }
 0x138   : > { %14537 = vmatprep.subr.mxu0 %v16126_v33  ;;  %14500 = vmatmul.mubr.f32.gmra.mxu0 %v16110_v26 }
 0x139   : > { %14538 = vmatpush3.msra.mxu0 %v16126_v33  ;;  %14554 = vmatpush3.msra.mxu1 %v16031_v53  ;;  %v625_v53 = vpop.permute.xlu1 %624 }
 0x13a   : > { %14539 = vmatprep.subr.mxu0 %v16139_v39  ;;  %14555 = vmatprep.subr.mxu1 %v16054_v0 }
 0x13b   : > { %14540 = vmatpush3.msra.mxu0 %v16139_v39  ;;  %14556 = vmatpush3.msra.mxu1 %v16054_v0 }
 0x13c   : > { %14502 = vmatprep.mubr.f32.mxu0 %v16145_v44  ;;  %14520 = vmatprep.mubr.f32.mxu1 %v750_v19 }
 0x13d   : > { %14557 = vmatprep.subr.mxu1 %v16033_v54  ;;  %14503 = vmatmul.mubr.f32.gmra.mxu0 %v16154_v49  ;;  %v620_v0 = vpop.permute.xlu1 %619 }
 0x13e   : > { %14521 = vmatmul.mubr.f32.gmra.mxu1 %v760_v25  ;;  %14541 = vmatprep.mubr.f32.mxu0 %v15908_v4 }
 0x13f   : > { %14558 = vmatpush3.msra.mxu1 %v16033_v54  ;;  %14523 = vmatprep.mubr.f32.mxu1 %v770_v36 }
 0x140   : > { %14559 = vmatprep.subr.mxu1 %v16094_v21 }
 0x141   : > { %14560 = vmatpush3.msra.mxu1 %v16094_v21  ;;  %14542 = vmatmul.mubr.f32.vlgmr.msra.gmra.mxu0 %v16013_v43  ;;  %v610_v19 = vpop.permute.xlu1 %609 }
 0x142   : > { %14561 = vmatprep.subr.mxu1 %v16047_v60  ;;  %14524 = vmatmul.mubr.f32.gmra.mxu1 %v780_v42 }
 0x143   : > { %14562 = vmatpush3.msra.mxu1 %v16047_v60  ;;  %14526 = vmatprep.mubr.f32.mxu1 %v790_v61  ;;  %v630_v60 = vpop.permute.xlu0 %629 }
 0x144   : > { %14563 = vmatprep.subr.mxu1 %v16065_v7  ;;  %14544 = vmatprep.mubr.f32.mxu0 %v16026_v51 }
 0x145   : > { %14564 = vmatpush3.msra.mxu1 %v16065_v7  ;;  %14545 = vmatmul.mubr.f32.gmra.mxu0 %v16035_v55  ;;  %v600_v25 = vpop.permute.xlu1 %599 }
 0x146   : > { %14527 = vmatmul.mubr.f32.gmra.mxu1 %v800_v15  ;;  %14547 = vmatprep.mubr.f32.mxu0 %v16059_v2 }
 0x147   : > { %14565 = vmatprep.mubr.f32.mxu1 %v15908_v4  ;;  %v615_v7 = vpop.permute.xlu0 %614 }
 0x149   : > { %14548 = vmatmul.mubr.f32.gmra.mxu0 %v16070_v9 }
 0x14a   : > { %14566 = vmatmul.mubr.f32.vlgmr.msra.gmra.mxu1 %v16013_v43  ;;  %14550 = vmatprep.mubr.f32.mxu0 %v16119_v30 }
 0x14b   : > { %14568 = vmatprep.mubr.f32.mxu1 %v16026_v51  ;;  %v605_v21 = vpop.permute.xlu0 %604 }
 0x14d   : > { %14551 = vmatmul.mubr.f32.gmra.mxu0 %v16132_v37 }
 0x14e   : > { %14569 = vmatmul.mubr.f32.gmra.mxu1 %v16035_v55 }
 0x14f   : > { %14571 = vmatprep.mubr.f32.mxu1 %v16059_v2  ;;  %v595_v28 = vpop.permute.xlu0 %594 }
 0x152   : > { %14572 = vmatmul.mubr.f32.gmra.mxu1 %v16070_v9 }
 0x153   : > { %14574 = vmatprep.mubr.f32.mxu1 %v16119_v30  ;;  %v16280_v30 = vpop.permute.xlu1 %1522  ;;  %v16282_v33 = vpop.permute.xlu0 %1517 }
 0x156   : > { %14575 = vmatmul.mubr.f32.gmra.mxu1 %v16132_v37 }
 0x157   : > { %v16286_v38 = vpop.permute.xlu1 %1578  ;;  %v16290_v41 = vpop.permute.xlu0 %1512 }
 0x158   : > { %19662 = vst [vmem:[#allocation10_spill] sm:$0xff] %v16286_v38 }
 0x15b   : > { %v16292_v47 = vpop.permute.xlu1 %1573  ;;  %v16296_v56 = vpop.permute.xlu0 %1507 }
 0x15c   : > { %19663 = vst [vmem:[#allocation11_spill] sm:$0xff] %v16292_v47  ;;  %19664 = vst [vmem:[#allocation12_spill] sm:$0xff] %v16296_v56 }
 0x15f   : > { %v16300_v18 = vpop.permute.xlu1 %1568 }
 0x160   : > { %19666 = vst [vmem:[#allocation14_spill] sm:$0xff] %v16300_v18 }
 0x1d9   : > { %v16262_v4 = vpop.f32.mrf.mxu0 }
 0x1db   : > { %v16264_v5 = vpop.f32.mrf.mxu0 }
 0x1de   : > { %v14450_v6 = vpop.f32.mrf.mxu0 }
 0x1df   : > { %v765_v61 = vadd.f32 %v14450_v6, %v610_v19 }
 0x1e0   : > { %v16266_v43 = vpop.f32.mrf.mxu0 }
 0x1e3   : > { %v14453_v50 = vpop.f32.mrf.mxu0  ;;  %v16268_v51 = vpop.f32.mrf.mxu1 }
 0x1e4   : > { %v785_v48 = vadd.f32 %v14453_v50, %v620_v0  ;;  %v745_v50 = vadd.f32 %v16262_v4, %v600_v25  ;;  %v755_v0 = vadd.f32 %v16266_v43, %v605_v21 }
 0x1e5   : > { %v774_v54 = vpop.f32.mrf.mxu0  ;;  %v16270_v55 = vpop.f32.mrf.mxu1 }
 0x1e6   : > { %v775_v15 = vadd.f32 %v774_v54, %v615_v7  ;;  %v1503_v54 = vpop.permute.xlu0 %1502  ;;  %v912_v4 = vadd.f32 %v16268_v51, %v745_v50  ;;  %v19669_v50 = vld [vmem:[#allocation12_spill] sm:$0xff] }
 0x1e9   : > { %v14456_v62 = vpop.f32.mrf.mxu0  ;;  %v14474_v63 = vpop.f32.mrf.mxu1 }
 0x1ea   : > { %v805_v59 = vadd.f32 %v14456_v62, %v630_v60  ;;  %v924_v38 = vadd.f32 %v14474_v63, %v765_v61  ;;  %v1498_v51 = vpop.permute.xlu0 %1497 }
 0x1eb   : > { %v794_v1 = vpop.f32.mrf.mxu0  ;;  %v917_v2 = vpop.f32.mrf.mxu1 }
 0x1ec   : > { %v795_v11 = vadd.f32 %v794_v1, %v625_v53  ;;  %v918_v7 = vadd.f32 %v917_v2, %v755_v0 }
 0x1ed   : > { %v16272_v8 = vpop.f32.mrf.mxu0 }
 0x1ee   : > { %v14477_v9 = vpop.f32.mrf.mxu1 }
 0x1ef   : > { %v16274_v16 = vpop.f32.mrf.mxu0  ;;  %v936_v57 = vadd.f32 %v14477_v9, %v785_v48 }
 0x1f0   : > { %v929_v13 = vpop.f32.mrf.mxu1 }
 0x1f1   : > { %v930_v20 = vadd.f32 %v929_v13, %v775_v15 }
 0x1f3   : > { %v14480_v22 = vpop.f32.mrf.mxu1 }
 0x1f4   : > { %v14498_v23 = vpop.f32.mrf.mxu0  ;;  %v948_v58 = vadd.f32 %v14480_v22, %v805_v59  ;;  %v735_v22 = vadd.f32 %v16264_v5, %v595_v28 }
 0x1f5   : > { %v941_v10 = vpop.f32.mrf.mxu1  ;;  %v1053_v9 = vadd.f32 %v14498_v23, %v924_v38  ;;  %v1564_v23 = vpop.permute.xlu1 %1563 }
 0x1f6   : > { %v1045_v24 = vpop.f32.mrf.mxu0  ;;  %v942_v6 = vadd.f32 %v941_v10, %v795_v11  ;;  %v906_v2 = vadd.f32 %v16270_v55, %v735_v22 }
 0x1f7   : > { %v16276_v26 = vpop.f32.mrf.mxu1  ;;  %v1046_v43 = vadd.f32 %v1045_v24, %v918_v7 }
 0x1f8   : > { %v14501_v27 = vpop.f32.mrf.mxu0  ;;  %v1032_v24 = vadd.f32 %v16274_v16, %v906_v2 }
 0x1f9   : > { %v16278_v14 = vpop.f32.mrf.mxu1  ;;  %v1067_v47 = vadd.f32 %v14501_v27, %v936_v57  ;;  %v1559_v15 = vpop.permute.xlu1 %1558 }
 0x1fa   : > { %v1059_v29 = vpop.f32.mrf.mxu0  ;;  %v1160_v61 = vadd.f32 %v16278_v14, %v1032_v24  ;;  %v1493_v14 = vpop.permute.xlu0 %1492 }
 0x1fb   : > { %v1060_v62 = vadd.f32 %v1059_v29, %v930_v20 }
 0x1fd   : > { %v14504_v31 = vpop.f32.mrf.mxu0 }
 0x1fe   : > { %v14522_v32 = vpop.f32.mrf.mxu1  ;;  %v1081_v19 = vadd.f32 %v14504_v31, %v948_v58 }
 0x1ff   : > { %v1073_v34 = vpop.f32.mrf.mxu0  ;;  %v1184_v63 = vadd.f32 %v14522_v32, %v1053_v9  ;;  %v1488_v9 = vpop.permute.xlu0 %1487 }
 0x200   : > { %v1175_v35 = vpop.f32.mrf.mxu1  ;;  %v1074_v18 = vadd.f32 %v1073_v34, %v942_v6  ;;  %v1039_v34 = vadd.f32 %v16272_v8, %v912_v4 }
 0x201   : > { %v16284_v36 = vpop.f32.mrf.mxu0 }
 0x202   : > { %v14525_v37 = vpop.f32.mrf.mxu1  ;;  %v1168_v32 = vadd.f32 %v16276_v26, %v1039_v34 }
 0x203   : > { %v16288_v39 = vpop.f32.mrf.mxu0  ;;  %v1544_v4 = vpop.permute.xlu0 %1543 }
 0x204   : > { %v1191_v40 = vpop.f32.mrf.mxu1  ;;  %v1311_v8 = vadd.f32 %v16284_v36, %v1168_v32  ;;  %v1305_v16 = vadd.f32 %v16288_v39, %v1160_v61  ;;  %v1694_v61 = vld [vmem:[%s19453_s5 + $0x8] sm:$0xff] }
 0x205   : > { %v14546_v42 = vpop.f32.mrf.mxu0  ;;  %v1192_v53 = vadd.f32 %v1191_v40, %v1060_v62  ;;  %v1554_v62 = vpop.permute.xlu1 %1553 }
 0x206   : > { %v14528_v44 = vpop.f32.mrf.mxu1  ;;  %v1323_v40 = vadd.f32 %v14546_v42, %v1184_v63  ;;  %v19495_v63 = vmov 0.0  }
 0x207   : > { %v1316_v45 = vpop.f32.mrf.mxu0  ;;  %v1216_v1 = vadd.f32 %v14528_v44, %v1081_v19  ;;  %1870 = vmatprep.subr.mxu0 %v19495_v63  ;;  %2199 = vmatprep.subr.mxu1 %v19495_v63 }
 0x208   : > { %v1207_v46 = vpop.f32.mrf.mxu1 }
 0x209   : > { %v14549_v49 = vpop.f32.mrf.mxu0  ;;  %v1208_v10 = vadd.f32 %v1207_v46, %v1074_v18  ;;  %v19667_v18 = vld [vmem:[#allocation10_spill] sm:$0xff] }
 0x20a   : > { %v16294_v52 = vpop.f32.mrf.mxu1 }
 0x20b   : > { %v1328_v3 = vpop.f32.mrf.mxu0  ;;  %v1430_v26 = vadd.f32 %v16294_v52, %v1311_v8  ;;  %v19672_v52 = vld [vmem:[#allocation14_spill] sm:$0xff]  ;;  %v1823_v8 = vsel %vm1821_vm3, %v1694_v61, 0 }
 0x20c   : > { %v16298_v12 = vpop.f32.mrf.mxu1  ;;  %v1329_v27 = vadd.f32 %v1328_v3, %v1192_v53 }
 0x20d   : > { %19665 = vst [vmem:[#allocation13_spill] sm:$0xff] %v16298_v12  ;;  %v14552_v56 = vpop.f32.mrf.mxu0  ;;  %v1200_v12 = vadd.f32 %v14525_v37, %v1067_v47  ;;  %v1176_v37 = vadd.f32 %v1175_v35, %v1046_v43  ;;  %v1470_v39 = vmax.f32 %v1430_v26, 0.0  ;;  %v1738_v26 = vld [vmem:[%s19454_s6 + $0x68] sm:$0xff] }
 0x20e   : > { %v14570_v17 = vpop.f32.mrf.mxu1  ;;  %v1347_v29 = vadd.f32 %v14552_v56, %v1216_v1 }
 0x20f   : > { %v1335_v13 = vadd.f32 %v14549_v49, %v1200_v12  ;;  %v1340_v21 = vpop.f32.mrf.mxu0  ;;  %v1317_v46 = vadd.f32 %v1316_v45, %v1176_v37  ;;  %v1442_v49 = vadd.f32 %v14570_v17, %v1323_v40 }
 0x210   : > { %v1435_v60 = vpop.f32.mrf.mxu1  ;;  %v1341_v44 = vadd.f32 %v1340_v21, %v1208_v10 }
 0x211   : > { %v1436_v35 = vadd.f32 %v1435_v60, %v1317_v46  ;;  %v1472_v45 = vmax.f32 %v1442_v49, 0.0 }
 0x212   : > { %v14573_v48 = vpop.f32.mrf.mxu1 }
 0x213   : > { %v1454_v31 = vadd.f32 %v14573_v48, %v1335_v13  ;;  %v1471_v58 = vmax.f32 %v1436_v35, 0.0  ;;  %v1528_v6 = vmul.f32 %v1503_v54, %v1472_v45  ;;  %v1526_v48 = vmul.f32 %v1493_v14, %v1470_v39  ;;  %v1549_v54 = vpop.permute.xlu1 %1548  ;;  %v1733_v14 = vld [vmem:[%s19454_s6 + $0x40] sm:$0xff]  ;;  %v1730_v39 = vld [vmem:[%s19454_s6 + $0x28] sm:$0xff] }
 0x214   : > { %v1447_v25 = vpop.f32.mrf.mxu1  ;;  %v19668_v20 = vld [vmem:[#allocation13_spill] sm:$0xff]  ;;  %v16396_v35 = vand.u32 4294901760, %v1823_v8 }
 0x215   : > { %v1448_v5 = vadd.f32 %v1447_v25, %v1329_v27  ;;  %v1474_v56 = vmax.f32 %v1454_v31, 0.0  ;;  %v1424_v36 = vadd.f32 %v19668_v20, %v1305_v16  ;;  %v1527_v19 = vmul.f32 %v1498_v51, %v1471_v58  ;;  %v3499_v20 = vld [vmem:[%s19455_s7 + $0x78] sm:$0xff]  ;;  %v3498_v58 = vld [vmem:[%s19455_s7 + $0x70] sm:$0xff] }
 0x216   : > { %v14576_v38 = vpop.f32.mrf.mxu1  ;;  %v1584_v53 = vadd.f32 %v1559_v15, %v1528_v6  ;;  %v1582_v22 = vadd.f32 %v1549_v54, %v1526_v48  ;;  %19675 = vst [vmem:[#allocation10_spill] sm:$0xff] %v16396_v35  ;;  %2384 = vmatprep.mubr.f32.mxu1 %v16396_v35  ;;  %v1739_v15 = vld [vmem:[%s19454_s6 + $0x70] sm:$0xff]  ;;  %v3496_v6 = vld [vmem:[%s19455_s7 + $0x60] sm:$0xff] }
 0x217   : > { %v1466_v28 = vadd.f32 %v14576_v38, %v1347_v29  ;;  %v1473_v42 = vmax.f32 %v1448_v5, 0.0  ;;  %v1530_v57 = vmul.f32 %v16290_v41, %v1474_v56  ;;  %v1583_v13 = vadd.f32 %v1554_v62, %v1527_v19  ;;  %v3495_v62 = vld [vmem:[%s19455_s7 + $0x58] sm:$0xff]  ;;  %v1727_v48 = vld [vmem:[%s19454_s6 + $0x10] sm:$0xff]  ;;  %v3492_v54 = vld [vmem:[%s19455_s7 + $0x40] sm:$0xff] }
 0x218   : > { %v1459_v47 = vpop.f32.mrf.mxu1  ;;  %v1728_v19 = vld [vmem:[%s19454_s6 + $0x18] sm:$0xff] }
 0x219   : > { %v1476_v59 = vmax.f32 %v1466_v28, 0.0  ;;  %v1460_v55 = vadd.f32 %v1459_v47, %v1341_v44  ;;  %v1529_v0 = vmul.f32 %v19669_v50, %v1473_v42  ;;  %v1586_v41 = vadd.f32 %v19672_v52, %v1530_v57  ;;  %v1737_v57 = vld [vmem:[%s19454_s6 + $0x60] sm:$0xff]  ;;  %v3611_v50 = vld [vmem:[%s19456_s8 + $0x78] sm:$0xff]  ;;  %v3609_v52 = vld [vmem:[%s19456_s8 + $0x68] sm:$0xff] }
 0x21a   : > { %v16401_v42 = vsub.f32 %v1823_v8, %v16396_v35  ;;  %v3598_v8 = vld [vmem:[%s19456_s8 + $0x10] sm:$0xff]  ;;  %v19701_v35 = vmov 0.0  }
 0x21b   : > { %v1532_v3 = vmul.f32 %v16280_v30, %v1476_v59  ;;  %v1475_v12 = vmax.f32 %v1460_v55, 0.0  ;;  %v19671_v30 = vld [vmem:[#allocation11_spill] sm:$0xff]  ;;  %v1585_v7 = vadd.f32 %v1564_v23, %v1529_v0 }
 0x21c   : > { %19676 = vst [vmem:[#allocation13_spill] sm:$0xff] %v16401_v42  ;;  %v1731_v0 = vld [vmem:[%s19454_s6 + $0x30] sm:$0xff] }
 0x21d   : > { %v1531_v17 = vmul.f32 %v16282_v33, %v1475_v12  ;;  %v1588_v11 = vadd.f32 %v19667_v18, %v1532_v3  ;;  %v1469_v33 = vmax.f32 %v1424_v36, 0.0  ;;  %v1740_v3 = vld [vmem:[%s19454_s6 + $0x78] sm:$0xff]  ;;  %v19488_v12 = vand.u32 4294901760, %v16401_v42  ;;  %v1735_v18 = vld [vmem:[%s19454_s6 + $0x50] sm:$0xff] }
 0x21e   : > { %v1732_v36 = vld [vmem:[%s19454_s6 + $0x38] sm:$0xff] }
 0x21f   : > { %1611 = vrot.lane.b32.xlu1 %v1588_v11, %s19670_s23  ;;  %v1587_v60 = vadd.f32 %v19671_v30, %v1531_v17  ;;  %v1525_v1 = vmul.f32 %v1488_v9, %v1469_v33  ;;  %v1961_v16 = vsub.f32 %v16401_v42, %v19488_v12  ;;  %v1736_v17 = vld [vmem:[%s19454_s6 + $0x58] sm:$0xff]  ;;  %v1734_v11 = vld [vmem:[%s19454_s6 + $0x48] sm:$0xff]  ;;  %v3608_v33 = vld [vmem:[%s19456_s8 + $0x60] sm:$0xff] }
 0x220   : > { %v3497_v30 = vld [vmem:[%s19455_s7 + $0x68] sm:$0xff]  ;;  %v3607_v9 = vld [vmem:[%s19456_s8 + $0x58] sm:$0xff] }
 0x221   : > { %1609 = vrot.lane.b32.xlu0 %v1587_v60, %s19670_s23  ;;  %v1581_v43 = vadd.f32 %v1544_v4, %v1525_v1  ;;  %v1962_v45 = vand.u32 4294901760, %v1961_v16  ;;  %v3610_v60 = vld [vmem:[%s19456_s8 + $0x70] sm:$0xff]  ;;  %v1725_v4 = vld [vmem:[%s19454_s6] sm:$0xff] }
 0x222   : > { %v3606_v1 = vld [vmem:[%s19456_s8 + $0x50] sm:$0xff] }
 0x223   : > { %1607 = vrot.lane.b32.xlu1 %v1586_v41, %s19670_s23  ;;  %1963 = vmatprep.mubr.f32.mxu0 %v1962_v45  ;;  %v1729_v41 = vld [vmem:[%s19454_s6 + $0x20] sm:$0xff] }
 0x224   : > { %v3484_v45 = vld [vmem:[%s19455_s7] sm:$0xff] }
 0x225   : > { %1605 = vrot.lane.b32.xlu0 %v1585_v7, %s19670_s23  ;;  %v3494_v7 = vld [vmem:[%s19455_s7 + $0x50] sm:$0xff] }
 0x227   : > { %1603 = vrot.lane.b32.xlu1 %v1584_v53, %s19670_s23  ;;  %v3493_v53 = vld [vmem:[%s19455_s7 + $0x48] sm:$0xff] }
 0x229   : > { %1601 = vrot.lane.b32.xlu0 %v1583_v13, %s19670_s23  ;;  %v1726_v13 = vld [vmem:[%s19454_s6 + $0x8] sm:$0xff] }
 0x22b   : > { %1599 = vrot.lane.b32.xlu1 %v1582_v22, %s19670_s23  ;;  %v3605_v22 = vld [vmem:[%s19456_s8 + $0x48] sm:$0xff] }
 0x22d   : > { %1597 = vrot.lane.b32.xlu0 %v1581_v43, %s19670_s23  ;;  %v3491_v43 = vld [vmem:[%s19455_s7 + $0x38] sm:$0xff]  ;;  %s15752_s23 = smov 120  }
 0x291   : > { %v1612_v21 = vpop.permute.xlu1 %1611 }
 0x292   : > { %v1628_v25 = vsel %vm556_vm1, 0.0, %v1612_v21  ;;  %v3604_v21 = vld [vmem:[%s19456_s8 + $0x40] sm:$0xff] }
 0x293   : > { %v16334_v10 = vsel %vm559_vm2, %v1628_v25, 0.0  ;;  %v1610_v27 = vpop.permute.xlu0 %1609  ;;  %v3490_v25 = vld [vmem:[%s19455_s7 + $0x30] sm:$0xff] }
 0x294   : > { %v1627_v29 = vsel %vm556_vm1, 0.0, %v1610_v27  ;;  %1659 = vrot.lane.b32.xlu1 %v16334_v10, %s19673_s29  ;;  %v3603_v27 = vld [vmem:[%s19456_s8 + $0x38] sm:$0xff] }
 0x295   : > { %v16340_v31 = vsel %vm559_vm2, %v1627_v29, 0.0  ;;  %v1608_v2 = vpop.permute.xlu1 %1607  ;;  %v3489_v29 = vld [vmem:[%s19455_s7 + $0x28] sm:$0xff] }
 0x296   : > { %v1626_v23 = vsel %vm556_vm1, 0.0, %v1608_v2  ;;  %1657 = vrot.lane.b32.xlu0 %v16340_v31, %s19673_s29  ;;  %v3602_v2 = vld [vmem:[%s19456_s8 + $0x30] sm:$0xff] }
 0x297   : > { %v16346_v34 = vsel %vm559_vm2, %v1626_v23, 0.0  ;;  %v1606_v37 = vpop.permute.xlu0 %1605  ;;  %v3488_v23 = vld [vmem:[%s19455_s7 + $0x20] sm:$0xff] }
 0x298   : > { %v1625_v38 = vsel %vm556_vm1, 0.0, %v1606_v37  ;;  %1655 = vrot.lane.b32.xlu1 %v16346_v34, %s19673_s29  ;;  %v3601_v37 = vld [vmem:[%s19456_s8 + $0x28] sm:$0xff] }
 0x299   : > { %v16352_v40 = vsel %vm559_vm2, %v1625_v38, 0.0  ;;  %v1604_v44 = vpop.permute.xlu1 %1603  ;;  %v3487_v38 = vld [vmem:[%s19455_s7 + $0x18] sm:$0xff] }
 0x29a   : > { %v1624_v5 = vsel %vm556_vm1, 0.0, %v1604_v44  ;;  %1653 = vrot.lane.b32.xlu0 %v16352_v40, %s19673_s29  ;;  %v3600_v44 = vld [vmem:[%s19456_s8 + $0x20] sm:$0xff] }
 0x29b   : > { %v16358_v28 = vsel %vm559_vm2, %v1624_v5, 0.0  ;;  %v1602_v51 = vpop.permute.xlu0 %1601  ;;  %v3486_v5 = vld [vmem:[%s19455_s7 + $0x10] sm:$0xff] }
 0x29c   : > { %v1623_v24 = vsel %vm556_vm1, 0.0, %v1602_v51  ;;  %1651 = vrot.lane.b32.xlu1 %v16358_v28, %s19673_s29  ;;  %v3599_v51 = vld [vmem:[%s19456_s8 + $0x18] sm:$0xff] }
 0x29d   : > { %v16364_v32 = vsel %vm559_vm2, %v1623_v24, 0.0  ;;  %v1600_v46 = vpop.permute.xlu1 %1599 }
 0x29e   : > { %v1622_v47 = vsel %vm556_vm1, 0.0, %v1600_v46  ;;  %1649 = vrot.lane.b32.xlu0 %v16364_v32, %s19673_s29 }
 0x29f   : > { %v16370_v49 = vsel %vm559_vm2, %v1622_v47, 0.0  ;;  %v1598_v56 = vpop.permute.xlu0 %1597  ;;  %v3485_v47 = vld [vmem:[%s19455_s7 + $0x8] sm:$0xff] }
 0x2a0   : > { %v1621_v59 = vsel %vm556_vm1, 0.0, %v1598_v56  ;;  %1647 = vrot.lane.b32.xlu1 %v16370_v49, %s19673_s29 }
 0x2a1   : > { %v16376_v55 = vsel %vm559_vm2, %v1621_v59, 0.0 }
 0x2a2   : > { %1645 = vrot.lane.b32.xlu0 %v16376_v55, %s19673_s29  ;;  %s15753_s29 = smov 4  }
 0x2a4   : > { %1683 = vrot.lane.b32.xlu1 %v16334_v10, %s19674_s30 }
 0x2a6   : > { %1681 = vrot.lane.b32.xlu0 %v16340_v31, %s19674_s30 }
 0x2a8   : > { %1679 = vrot.lane.b32.xlu1 %v16346_v34, %s19674_s30 }
 0x2aa   : > { %1677 = vrot.lane.b32.xlu0 %v16352_v40, %s19674_s30 }
 0x2ac   : > { %1675 = vrot.lane.b32.xlu1 %v16358_v28, %s19674_s30 }
 0x2ae   : > { %1673 = vrot.lane.b32.xlu0 %v16364_v32, %s19674_s30 }
 0x2b0   : > { %1671 = vrot.lane.b32.xlu1 %v16370_v49, %s19674_s30 }
 0x2b2   : > { %1669 = vrot.lane.b32.xlu0 %v16376_v55, %s19674_s30  ;;  %s15755_s30 = smov 124  }
 0x2b4   : > { %1818 = vperm.xlu1 %15584, %v1740_v3  }
 0x2b6   : > { %1813 = vperm.xlu0 %15583, %v1739_v15  }
 0x2b8   : > { %1808 = vperm.xlu1 %15584, %v1738_v26  }
 0x2ba   : > { %1803 = vperm.xlu0 %15583, %v1737_v57  }
 0x2bc   : > { %1798 = vperm.xlu1 %15584, %v1736_v17  }
 0x2be   : > { %1793 = vperm.xlu0 %15583, %v1735_v18  }
 0x2c0   : > { %1788 = vperm.xlu1 %15584, %v1734_v11  }
 0x2c2   : > { %1783 = vperm.xlu0 %15583, %v1733_v14   ;;  %v3597_v14 = vld [vmem:[%s19456_s8 + $0x8] sm:$0xff] }
 0x2c4   : > { %3577 = vperm.xlu1 %15584, %v3499_v20  }
 0x2c6   : > { %1778 = vperm.xlu0 %15583, %v1732_v36  }
 0x2c8   : > { %3572 = vperm.xlu1 %15584, %v3498_v58  }
 0x2ca   : > { %3689 = vperm.xlu0 %15583, %v3611_v50  }
 0x2cc   : > { %1773 = vperm.xlu1 %15584, %v1731_v0  }
 0x2ce   : > { %3567 = vperm.xlu0 %15583, %v3497_v30  }
 0x2d0   : > { %3684 = vperm.xlu1 %15584, %v3610_v60   ;;  %v3596_v60 = vld [vmem:[%s19456_s8] sm:$0xff] }
 0x2d2   : > { %1768 = vperm.xlu0 %15583, %v1730_v39   ;;  %v16590_v39 = vand.u32 4294901760, %v16334_v10 }
 0x2d4   : > { %3562 = vperm.xlu1 %15584, %v3496_v6  }
 0x2d6   : > { %3679 = vperm.xlu0 %15583, %v3609_v52  }
 0x2d8   : > { %1763 = vperm.xlu1 %15584, %v1729_v41  }
 0x2da   : > { %3557 = vperm.xlu0 %15583, %v3495_v62  }
 0x2dc   : > { %3674 = vperm.xlu1 %15584, %v3608_v33  }
 0x2de   : > { %1758 = vperm.xlu0 %15583, %v1728_v19  }
 0x2e0   : > { %3552 = vperm.xlu1 %15584, %v3494_v7   ;;  %v16607_v7 = vand.u32 4294901760, %v16340_v31 }
 0x2e2   : > { %3669 = vperm.xlu0 %15583, %v3607_v9   ;;  %v16610_v9 = vand.u32 4294901760, %v16346_v34 }
 0x2e4   : > { %1753 = vperm.xlu1 %15584, %v1727_v48  }
 0x2e6   : > { %3547 = vperm.xlu0 %15583, %v3493_v53  }
 0x2e8   : > { %3664 = vperm.xlu1 %15584, %v3606_v1  }
 0x2ea   : > { %1748 = vperm.xlu0 %15583, %v1726_v13  }
 0x2ec   : > { %3542 = vperm.xlu1 %15584, %v3492_v54  }
 0x2ee   : > { %3659 = vperm.xlu0 %15583, %v3605_v22  }
 0x2f0   : > { %1743 = vperm.xlu1 %15584, %v1725_v4   ;;  %v16622_v4 = vsub.f32 %v16334_v10, %v16590_v39 }
 0x2f2   : > { %3537 = vperm.xlu0 %15583, %v3491_v43  }
 0x2f4   : > { %3654 = vperm.xlu1 %15584, %v3604_v21  }
 0x2f6   : > { %3532 = vperm.xlu0 %15583, %v3490_v25  }
 0x2f8   : > { %3649 = vperm.xlu1 %15584, %v3603_v27  }
 0x2fa   : > { %3527 = vperm.xlu0 %15583, %v3489_v29  }
 0x2fc   : > { %3644 = vperm.xlu1 %15584, %v3602_v2   ;;  %v16641_v2 = vsub.f32 %v16340_v31, %v16607_v7 }
 0x2fe   : > { %3522 = vperm.xlu0 %15583, %v3488_v23   ;;  %v16645_v23 = vsub.f32 %v16346_v34, %v16610_v9 }
 0x300   : > { %3639 = vperm.xlu1 %15584, %v3601_v37   ;;  %v16648_v37 = vand.u32 4294901760, %v16352_v40 }
 0x302   : > { %3517 = vperm.xlu0 %15583, %v3487_v38   ;;  %19678 = vst [vmem:[#allocation11_spill] sm:$0xff] %v16648_v37 }
 0x304   : > { %3634 = vperm.xlu1 %15584, %v3600_v44   ;;  %v16652_v44 = vand.u32 4294901760, %v16358_v28 }
 0x306   : > { %v1660_v24 = vpop.permute.xlu1 %1659  ;;  %3512 = vperm.xlu0 %15583, %v3486_v5   ;;  %19679 = vst [vmem:[#allocation14_spill] sm:$0xff] %v16652_v44 }
 0x307   : > { %v16539_v46 = vand.u32 4294901760, %v1660_v24 }
 0x308   : > { %3629 = vperm.xlu1 %15584, %v3599_v51   ;;  %v1658_v56 = vpop.permute.xlu0 %1657 }
 0x309   : > { %v16545_v59 = vsub.f32 %v1660_v24, %v16539_v46  ;;  %v16547_v61 = vand.u32 4294901760, %v1658_v56  ;;  %1872 = vmatpush1.msra.mxu0 %v16539_v46 }
 0x30a   : > { %1873 = vmatprep.subr.mxu0 %v19495_v63  ;;  %v1656_v3 = vpop.permute.xlu1 %1655  ;;  %3507 = vperm.xlu0 %15583, %v3485_v47   ;;  %v19481_v47 = vand.u32 4294901760, %v16622_v4 }
 0x30b   : > { %19677 = vst [vmem:[#allocation12_spill] sm:$0xff] %v16545_v59  ;;  %v19492_v15 = vand.u32 4294901760, %v16545_v59  ;;  %v16556_v16 = vsub.f32 %v1658_v56, %v16547_v61  ;;  %v16558_v26 = vand.u32 4294901760, %v1656_v3  ;;  %1875 = vmatpush1.msra.mxu0 %v16547_v61  ;;  %v16666_v56 = vand.u32 4294901760, %v16364_v32 }
 0x30c   : > { %3624 = vperm.xlu1 %15584, %v3598_v8   ;;  %1876 = vmatprep.subr.mxu0 %v19495_v63  ;;  %v1654_v57 = vpop.permute.xlu0 %1653 }
 0x30d   : > { %v19491_v17 = vand.u32 4294901760, %v16556_v16  ;;  %v16567_v18 = vsub.f32 %v1656_v3, %v16558_v26  ;;  %v16569_v11 = vand.u32 4294901760, %v1654_v57  ;;  %1878 = vmatpush1.msra.mxu0 %v16558_v26  ;;  %v2203_v20 = vsub.f32 %v16545_v59, %v19492_v15  ;;  %19680 = vst [vmem:[#allocation15_spill] sm:$0xff] %v16666_v56 }
 0x30e   : > { %v1652_v36 = vpop.permute.xlu1 %1651  ;;  %3502 = vperm.xlu0 %15583, %v3484_v45   ;;  %1879 = vmatprep.subr.mxu0 %v19495_v63  ;;  %v16676_v45 = vsub.f32 %v16352_v40, %v16648_v37  ;;  %v16688_v40 = vand.u32 4294901760, %v16370_v49 }
 0x30f   : > { %v19490_v58 = vand.u32 4294901760, %v16567_v18  ;;  %v16581_v50 = vsub.f32 %v1654_v57, %v16569_v11  ;;  %v16583_v0 = vand.u32 4294901760, %v1652_v36  ;;  %1881 = vmatpush1.msra.mxu0 %v16569_v11  ;;  %v2204_v30 = vand.u32 4294901760, %v2203_v20 }
 0x310   : > { %3619 = vperm.xlu1 %15584, %v3597_v14   ;;  %1882 = vmatprep.subr.mxu0 %v19495_v63  ;;  %v1650_v6 = vpop.permute.xlu0 %1649  ;;  %v2210_v52 = vsub.f32 %v16556_v16, %v19491_v17  ;;  %v19479_v14 = vand.u32 4294901760, %v16641_v2  ;;  %v16682_v20 = vsub.f32 %v16358_v28, %v16652_v44  ;;  %19681 = vst [vmem:[#allocation16_spill] sm:$0xff] %v16688_v40 }
 0x311   : > { %v19489_v41 = vand.u32 4294901760, %v16581_v50  ;;  %v16598_v62 = vsub.f32 %v1652_v36, %v16583_v0  ;;  %v16600_v33 = vand.u32 4294901760, %v1650_v6  ;;  %1884 = vmatpush1.msra.mxu0 %v16583_v0  ;;  %2205 = vmatpush1.msra.mxu1 %v2204_v30  ;;  %v2217_v19 = vsub.f32 %v16567_v18, %v19490_v58 }
 0x312   : > { %2206 = vmatprep.subr.mxu1 %v19495_v63  ;;  %v1648_v48 = vpop.permute.xlu1 %1647  ;;  %3614 = vperm.xlu0 %15583, %v3596_v60   ;;  %v2211_v53 = vand.u32 4294901760, %v2210_v52  ;;  %v19478_v60 = vand.u32 4294901760, %v16645_v23  ;;  %v2259_v28 = vsub.f32 %v16622_v4, %v19481_v47  ;;  %v16699_v52 = vsub.f32 %v16364_v32, %v16666_v56 }
 0x313   : > { %v19487_v1 = vand.u32 4294901760, %v16598_v62  ;;  %v16615_v13 = vsub.f32 %v1650_v6, %v16600_v33  ;;  %v16617_v54 = vand.u32 4294901760, %v1648_v48  ;;  %1885 = vmatprep.subr.mxu0 %v19495_v63  ;;  %v2218_v22 = vand.u32 4294901760, %v2217_v19 }
 0x314   : > { %1887 = vmatpush1.msra.mxu0 %v16600_v33  ;;  %2212 = vmatpush1.msra.mxu1 %v2211_v53  ;;  %v1646_v43 = vpop.permute.xlu0 %1645  ;;  %v2224_v21 = vsub.f32 %v16581_v50, %v19489_v41  ;;  %v16702_v19 = vand.u32 4294901760, %v16376_v55  ;;  %v2273_v32 = vsub.f32 %v16645_v23, %v19478_v60 }
 0x315   : > { %v19485_v25 = vand.u32 4294901760, %v16615_v13  ;;  %v16630_v27 = vsub.f32 %v1648_v48, %v16617_v54  ;;  %1888 = vmatprep.subr.mxu0 %v19495_v63  ;;  %2213 = vmatprep.subr.mxu1 %v19495_v63  ;;  %v16634_v29 = vand.u32 4294901760, %v1646_v43  ;;  %v2231_v10 = vsub.f32 %v16598_v62, %v19487_v1  ;;  %v1695_v1 = vld [vmem:[%s19453_s5 + $0x10] sm:$0xff] }
 0x316   : > { %1890 = vmatpush1.msra.mxu0 %v16617_v54  ;;  %2219 = vmatpush1.msra.mxu1 %v2218_v22  ;;  %v2225_v38 = vand.u32 4294901760, %v2224_v21  ;;  %v1684_v34 = vpop.permute.xlu1 %1683  ;;  %19682 = vst [vmem:[#allocation17_spill] sm:$0xff] %v16702_v19  ;;  %v2266_v22 = vsub.f32 %v16641_v2, %v19479_v14  ;;  %v19482_v21 = vand.u32 4294901760, %v16682_v20 }
 0x317   : > { %v19484_v5 = vand.u32 4294901760, %v16630_v27  ;;  %v16656_v51 = vsub.f32 %v1646_v43, %v16634_v29  ;;  %1891 = vmatprep.subr.mxu0 %v19495_v63  ;;  %2220 = vmatprep.subr.mxu1 %v19495_v63  ;;  %v2232_v31 = vand.u32 4294901760, %v2231_v10  ;;  %v2238_v24 = vsub.f32 %v16615_v13, %v19485_v25 }
 0x318   : > { %1893 = vmatpush1.msra.mxu0 %v16634_v29  ;;  %2226 = vmatpush1.msra.mxu1 %v2225_v38  ;;  %v1682_v36 = vpop.permute.xlu0 %1681  ;;  %v19480_v43 = vand.u32 4294901760, %v16676_v45  ;;  %v16719_v10 = vsub.f32 %v16370_v49, %v16688_v40  ;;  %v16721_v38 = vand.u32 4294901760, %v1684_v34  ;;  %v1696_v49 = vld [vmem:[%s19453_s5 + $0x18] sm:$0xff]  ;;  %v2287_v60 = vsub.f32 %v16682_v20, %v19482_v21 }
 0x319   : > { %v19483_v8 = vand.u32 4294901760, %v16656_v51  ;;  %1894 = vmatprep.subr.mxu0 %v19495_v63  ;;  %2227 = vmatprep.subr.mxu1 %v19495_v63  ;;  %v2245_v3 = vsub.f32 %v16630_v27, %v19484_v5  ;;  %v2239_v57 = vand.u32 4294901760, %v2238_v24  ;;  %v16726_v24 = vsub.f32 %v16376_v55, %v16702_v19 }
 0x31a   : > { %1896 = vmatpush1.msra.mxu0 %v16590_v39  ;;  %2233 = vmatpush1.msra.mxu1 %v2232_v31  ;;  %v1680_v48 = vpop.permute.xlu1 %1679  ;;  %19683 = vst [vmem:[#allocation18_spill] sm:$0xff] %v16721_v38  ;;  %v2260_v31 = vand.u32 4294901760, %v2259_v28  ;;  %v2280_v55 = vsub.f32 %v16676_v45, %v19480_v43  ;;  %v1693_v28 = vld [vmem:[%s19453_s5] sm:$0xff]  ;;  %v19493_v43 = vand.u32 4294901760, %v16719_v10  ;;  %v1826_v47 = vsel %vm1821_vm3, %v1696_v49, 0 }
 0x31b   : > { %1897 = vmatprep.subr.mxu0 %v19495_v63  ;;  %2234 = vmatprep.subr.mxu1 %v19495_v63  ;;  %v2246_v30 = vand.u32 4294901760, %v2245_v3  ;;  %v2252_v6 = vsub.f32 %v16656_v51, %v19483_v8  ;;  %19684 = vst [vmem:[#allocation19_spill] sm:$0xff] %v16726_v24  ;;  %v16762_v21 = vand.u32 4294901760, %v1693_v28  ;;  %v2288_v25 = vand.u32 4294901760, %v2287_v60 }
 0x31c   : > { %1899 = vmatpush1.msra.mxu0 %v16607_v7  ;;  %2240 = vmatpush1.msra.mxu1 %v2239_v57  ;;  %v1678_v3 = vpop.permute.xlu0 %1677  ;;  %v19486_v57 = vand.u32 4294901760, %v16699_v52  ;;  %v2281_v49 = vand.u32 4294901760, %v2280_v55  ;;  %v2301_v60 = vsub.f32 %v16719_v10, %v19493_v43  ;;  %v16803_v43 = vand.u32 4294901760, %v1695_v1 }
 0x31d   : > { %1900 = vmatprep.subr.mxu0 %v19495_v63  ;;  %2241 = vmatprep.subr.mxu1 %v19495_v63  ;;  %v2253_v53 = vand.u32 4294901760, %v2252_v6  ;;  %v2267_v6 = vand.u32 4294901760, %v2266_v22  ;;  %v16751_v22 = vand.u32 4294901760, %v1680_v48  ;;  %19688 = vst [vmem:[#allocation23_spill] sm:$0xff] %v16762_v21 }
 0x31e   : > { %1902 = vmatpush1.msra.mxu0 %v16610_v9  ;;  %2247 = vmatpush1.msra.mxu1 %v2246_v30  ;;  %v16734_v30 = vand.u32 4294901760, %v1682_v36  ;;  %v1676_v14 = vpop.permute.xlu1 %1675  ;;  %19696 = vst [vmem:[#allocation31_spill] sm:$0xff] %v16803_v43 }
 0x31f   : > { %1903 = vmatprep.subr.mxu0 %v19495_v63  ;;  %2248 = vmatprep.subr.mxu1 %v19495_v63  ;;  %19687 = vst [vmem:[#allocation22_spill] sm:$0xff] %v16751_v22  ;;  %v16782_v55 = vsub.f32 %v1680_v48, %v16751_v22  ;;  %v16796_v48 = vsub.f32 %v1693_v28, %v16762_v21 }
 0x320   : > { %1905 = vmatpush1.msra.mxu0 %v16648_v37  ;;  %2254 = vmatpush1.msra.mxu1 %v2253_v53  ;;  %19685 = vst [vmem:[#allocation20_spill] sm:$0xff] %v16734_v30  ;;  %v2274_v53 = vand.u32 4294901760, %v2273_v32  ;;  %v2294_v32 = vsub.f32 %v16699_v52, %v19486_v57  ;;  %v16765_v8 = vsub.f32 %v1682_v36, %v16734_v30  ;;  %v1674_v5 = vpop.permute.xlu0 %1673  ;;  %v16772_v57 = vand.u32 4294901760, %v1826_v47  ;;  %v1698_v36 = vld [vmem:[%s19453_s5 + $0x28] sm:$0xff] }
 0x321   : > { %1906 = vmatprep.subr.mxu0 %v19495_v63  ;;  %2255 = vmatprep.subr.mxu1 %v19495_v63  ;;  %19692 = vst [vmem:[#allocation27_spill] sm:$0xff] %v16782_v55  ;;  %19694 = vst [vmem:[#allocation29_spill] sm:$0xff] %v16796_v48  ;;  %v16806_v12 = vand.u32 4294901760, %v1674_v5 }
 0x322   : > { %1908 = vmatpush1.msra.mxu0 %v16652_v44  ;;  %2261 = vmatpush1.msra.mxu1 %v2260_v31  ;;  %v16749_v31 = vsub.f32 %v1684_v34, %v16721_v38  ;;  %v19494_v34 = vand.u32 4294901760, %v16726_v24  ;;  %19689 = vst [vmem:[#allocation24_spill] sm:$0xff] %v16765_v8  ;;  %19691 = vst [vmem:[#allocation26_spill] sm:$0xff] %v16772_v57  ;;  %v2295_v41 = vand.u32 4294901760, %v2294_v32  ;;  %v1672_v15 = vpop.permute.xlu1 %1671  ;;  %v1829_v32 = vsel %vm1821_vm3, %v1698_v36, 0 }
 0x323   : > { %1909 = vmatprep.subr.mxu0 %v19495_v63  ;;  %2262 = vmatprep.subr.mxu1 %v19495_v63  ;;  %19697 = vst [vmem:[#allocation32_spill] sm:$0xff] %v16806_v12  ;;  %v16811_v28 = vsub.f32 %v1826_v47, %v16772_v57  ;;  %v1700_v47 = vld [vmem:[%s19453_s5 + $0x38] sm:$0xff] }
 0x324   : > { %19686 = vst [vmem:[#allocation21_spill] sm:$0xff] %v16749_v31  ;;  %1911 = vmatpush1.msra.mxu0 %v16666_v56  ;;  %2268 = vmatpush1.msra.mxu1 %v2267_v6  ;;  %v16767_v6 = vand.u32 4294901760, %v1678_v3  ;;  %v2308_v58 = vsub.f32 %v16726_v24, %v19494_v34  ;;  %v19700_v36 = vand.u32 4294901760, %v16749_v31 }
 0x325   : > { %1912 = vmatprep.subr.mxu0 %v19495_v63  ;;  %2269 = vmatprep.subr.mxu1 %v19495_v63  ;;  %19698 = vst [vmem:[#allocation33_spill] sm:$0xff] %v16811_v28 }
 0x326   : > { %19690 = vst [vmem:[#allocation25_spill] sm:$0xff] %v16767_v6  ;;  %1914 = vmatpush1.msra.mxu0 %v16688_v40  ;;  %2275 = vmatpush1.msra.mxu1 %v2274_v53  ;;  %v16784_v53 = vand.u32 4294901760, %v1676_v14  ;;  %v2331_v17 = vsub.f32 %v16749_v31, %v19700_v36  ;;  %v2309_v42 = vand.u32 4294901760, %v2308_v58  ;;  %v16843_v40 = vsub.f32 %v1674_v5, %v16806_v12 }
 0x327   : > { %1915 = vmatprep.subr.mxu0 %v19495_v63  ;;  %2276 = vmatprep.subr.mxu1 %v19495_v63  ;;  %v1832_v58 = vsel %vm1821_vm3, %v1700_v47, 0  ;;  %v19707_v5 = vand.u32 4294901760, %v16782_v55  ;;  %v19708_v47 = vand.u32 4294901760, %v16796_v48 }
 0x328   : > { %19693 = vst [vmem:[#allocation28_spill] sm:$0xff] %v16784_v53  ;;  %1917 = vmatpush1.msra.mxu0 %v16702_v19  ;;  %2282 = vmatpush1.msra.mxu1 %v2281_v49  ;;  %v16800_v49 = vsub.f32 %v1678_v3, %v16767_v6  ;;  %v16815_v34 = vsub.f32 %v1676_v14, %v16784_v53  ;;  %v16827_v3 = vand.u32 4294901760, %v1672_v15  ;;  %v1670_v14 = vpop.permute.xlu0 %1669 }
 0x329   : > { %1934 = vmatprep.subr.mxu0 %v19495_v63  ;;  %2283 = vmatprep.subr.mxu1 %v19495_v63  ;;  %v16840_v19 = vsub.f32 %v1695_v1, %v16803_v43  ;;  %v2332_v1 = vand.u32 4294901760, %v2331_v17  ;;  %v1967_v36 = vsub.f32 %v16796_v48, %v19708_v47 }
 0x32a   : > { %19695 = vst [vmem:[#allocation30_spill] sm:$0xff] %v16800_v49  ;;  %1936 = vmatpush2.msra.mxu0 %v16721_v38  ;;  %2289 = vmatpush1.msra.mxu1 %v2288_v25  ;;  %19699 = vst [vmem:[#allocation34_spill] sm:$0xff] %v16815_v34  ;;  %v2302_v25 = vand.u32 4294901760, %v2301_v60  ;;  %v16832_v60 = vand.u32 4294901760, %v1829_v32  ;;  %v16859_v56 = vsub.f32 %v1672_v15, %v16827_v3  ;;  %v19710_v17 = vand.u32 4294901760, %v16800_v49 }
 0x32b   : > { %1937 = vmatprep.subr.mxu0 %v19495_v63  ;;  %2290 = vmatprep.subr.mxu1 %v19495_v63  ;;  %v1697_v63 = vld [vmem:[%s19453_s5 + $0x20] sm:$0xff]  ;;  %19704 = vst [vmem:[#allocation36_spill] sm:$0xff] %v16840_v19 }
 0x32c   : > { %1939 = vmatpush2.msra.mxu0 %v16734_v30  ;;  %2296 = vmatpush1.msra.mxu1 %v2295_v41  ;;  %19702 = vst [vmem:[#allocation35_spill] sm:$0xff] %v16832_v60  ;;  %v19703_v30 = vand.u32 4294901760, %v16765_v8  ;;  %v16848_v41 = vand.u32 4294901760, %v1697_v63  ;;  %v2352_v15 = vsub.f32 %v16800_v49, %v19710_v17 }
 0x32d   : > { %1940 = vmatprep.subr.mxu0 %v19701_v35  ;;  %2297 = vmatprep.subr.mxu1 %v19701_v35 }
 0x32e   : > { %1942 = vmatpush2.msra.mxu0 %v16751_v22  ;;  %2303 = vmatpush1.msra.mxu1 %v2302_v25  ;;  %v2338_v38 = vsub.f32 %v16765_v8, %v19703_v30  ;;  %19705 = vst [vmem:[#allocation37_spill] sm:$0xff] %v16848_v41  ;;  %v16852_v22 = vand.u32 4294901760, %v1670_v14  ;;  %v2345_v30 = vsub.f32 %v16782_v55, %v19707_v5  ;;  %v19712_v55 = vand.u32 4294901760, %v16815_v34 }
 0x32f   : > { %1943 = vmatprep.subr.mxu0 %v19701_v35  ;;  %2304 = vmatprep.subr.mxu1 %v19701_v35  ;;  %v16867_v25 = vsub.f32 %v1829_v32, %v16832_v60  ;;  %v16881_v32 = vsub.f32 %v1697_v63, %v16848_v41  ;;  %v19713_v63 = vand.u32 4294901760, %v16811_v28 }
 0x330   : > { %19706 = vst [vmem:[#allocation38_spill] sm:$0xff] %v16852_v22  ;;  %1945 = vmatpush2.msra.mxu0 %v16767_v6  ;;  %2310 = vmatpush1.msra.mxu1 %v2309_v42  ;;  %v2339_v42 = vand.u32 4294901760, %v2338_v38  ;;  %v1699_v6 = vld [vmem:[%s19453_s5 + $0x30] sm:$0xff]  ;;  %v16883_v38 = vand.u32 4294901760, %v1832_v58  ;;  %v16889_v47 = vsub.f32 %v1670_v14, %v16852_v22  ;;  %v2346_v17 = vand.u32 4294901760, %v2345_v30 }
 0x331   : > { %1946 = vmatprep.subr.mxu0 %v19701_v35  ;;  %2327 = vmatprep.subr.mxu1 %v19701_v35  ;;  %19709 = vst [vmem:[#allocation39_spill] sm:$0xff] %v16867_v25  ;;  %v2359_v5 = vsub.f32 %v16815_v34, %v19712_v55  ;;  %v1976_v48 = vsub.f32 %v16811_v28, %v19713_v63  ;;  %v1968_v14 = vand.u32 4294901760, %v1967_v36  ;;  %v2353_v30 = vand.u32 4294901760, %v2352_v15 }
 0x332   : > { %1948 = vmatpush2.msra.mxu0 %v16784_v53  ;;  %2333 = vmatpush2.msra.mxu1 %v2332_v1  ;;  %19711 = vst [vmem:[#allocation40_spill] sm:$0xff] %v16883_v38  ;;  %v1702_v1 = vld [vmem:[%s19453_s5 + $0x48] sm:$0xff]  ;;  %v19715_v55 = vand.u32 4294901760, %v16840_v19  ;;  %v19716_v36 = vand.u32 4294901760, %v16843_v40  ;;  %v16916_v28 = vsub.f32 %v1832_v58, %v16883_v38  ;;  %v19719_v58 = vand.u32 4294901760, %v16867_v25 }
 0x333   : > { %1949 = vmatprep.subr.mxu0 %v19701_v35  ;;  %2334 = vmatprep.subr.mxu1 %v19701_v35  ;;  %v1835_v63 = vsel %vm1821_vm3, %v1702_v1, 0  ;;  %v1977_v1 = vand.u32 4294901760, %v1976_v48  ;;  %v1704_v48 = vld [vmem:[%s19453_s5 + $0x58] sm:$0xff] }
 0x334   : > { %1951 = vmatpush2.msra.mxu0 %v16806_v12  ;;  %2340 = vmatpush2.msra.mxu1 %v2339_v42  ;;  %v16902_v12 = vand.u32 4294901760, %v1699_v6  ;;  %v1982_v42 = vsub.f32 %v16840_v19, %v19715_v55  ;;  %v2366_v49 = vsub.f32 %v16843_v40, %v19716_v36  ;;  %19717 = vst [vmem:[#allocation42_spill] sm:$0xff] %v16916_v28  ;;  %v1701_v55 = vld [vmem:[%s19453_s5 + $0x40] sm:$0xff]  ;;  %v19718_v36 = vand.u32 4294901760, %v16859_v56 }
 0x335   : > { %1952 = vmatprep.subr.mxu0 %v19701_v35  ;;  %2341 = vmatprep.subr.mxu1 %v19701_v35  ;;  %v1991_v15 = vsub.f32 %v16867_v25, %v19719_v58  ;;  %v16945_v25 = vand.u32 4294901760, %v1701_v55 }
 0x336   : > { %19714 = vst [vmem:[#allocation41_spill] sm:$0xff] %v16902_v12  ;;  %1954 = vmatpush2.msra.mxu0 %v16827_v3  ;;  %2347 = vmatpush2.msra.mxu1 %v2346_v17  ;;  %v2360_v17 = vand.u32 4294901760, %v2359_v5  ;;  %v2373_v53 = vsub.f32 %v16859_v56, %v19718_v36  ;;  %v16931_v19 = vsub.f32 %v1699_v6, %v16902_v12  ;;  %v16933_v5 = vand.u32 4294901760, %v1835_v63 }
 0x337   : > { %1955 = vmatprep.subr.mxu0 %v19701_v35  ;;  %2348 = vmatprep.subr.mxu1 %v19701_v35  ;;  %v19721_v36 = vand.u32 4294901760, %v16881_v32  ;;  %19722 = vst [vmem:[#allocation44_spill] sm:$0xff] %v16945_v25 }
 0x338   : > { %1957 = vmatpush2.msra.mxu0 %v16852_v22  ;;  %2354 = vmatpush2.msra.mxu1 %v2353_v30  ;;  %19720 = vst [vmem:[#allocation43_spill] sm:$0xff] %v16933_v5  ;;  %v2367_v30 = vand.u32 4294901760, %v2366_v49  ;;  %v19723_v22 = vand.u32 4294901760, %v16889_v47  ;;  %v2374_v49 = vand.u32 4294901760, %v2373_v53  ;;  %v16955_v58 = vsub.f32 %v1835_v63, %v16933_v5 }
 0x339   : > { %1969 = vmatmul.mubr.f32.vlgmr.msra.gmra.mxu0 %v1968_v14  ;;  %2355 = vmatprep.subr.mxu1 %v19701_v35  ;;  %v1983_v14 = vand.u32 4294901760, %v1982_v42  ;;  %v1997_v6 = vsub.f32 %v16881_v32, %v19721_v36  ;;  %v19536_v36 = vand.u32 4294901760, %v16931_v19 }
 0x33a   : > { %2496 = vmatprep.subr.mxu0 %v19701_v35  ;;  %2361 = vmatpush2.msra.mxu1 %v2360_v17  ;;  %v2380_v42 = vsub.f32 %v16889_v47, %v19723_v22  ;;  %v1838_v17 = vsel %vm1821_vm3, %v1704_v48, 0  ;;  %19724 = vst [vmem:[#allocation45_spill] sm:$0xff] %v16955_v58  ;;  %v19725_v48 = vand.u32 4294901760, %v16916_v28 }
 0x33b   : > { %2499 = vmatpush1.msra.mxu0 %v16545_v59  ;;  %2362 = vmatprep.subr.mxu1 %v19701_v35  ;;  %v1992_v59 = vand.u32 4294901760, %v1991_v15  ;;  %v1998_v22 = vand.u32 4294901760, %v1997_v6  ;;  %v16966_v15 = vsub.f32 %v1701_v55, %v16945_v25  ;;  %v16968_v63 = vand.u32 4294901760, %v1838_v17 }
 0x33c   : > { %2500 = vmatprep.subr.mxu0 %v19701_v35  ;;  %1978 = vmatprep.mubr.f32.mxu0 %v1977_v1  ;;  %v1703_v1 = vld [vmem:[%s19453_s5 + $0x50] sm:$0xff]  ;;  %v2006_v53 = vsub.f32 %v16916_v28, %v19725_v48  ;;  %v2012_v6 = vsub.f32 %v16931_v19, %v19536_v36  ;;  %v19537_v55 = vand.u32 4294901760, %v16955_v58  ;;  %v1708_v36 = vld [vmem:[%s19453_s5 + $0x78] sm:$0xff] }
 0x33d   : > { %2368 = vmatpush2.msra.mxu1 %v2367_v30  ;;  %2503 = vmatpush1.msra.mxu0 %v16556_v16  ;;  %19726 = vst [vmem:[#allocation46_spill] sm:$0xff] %v16966_v15  ;;  %19727 = vst [vmem:[#allocation47_spill] sm:$0xff] %v16968_v63  ;;  %v2381_v30 = vand.u32 4294901760, %v2380_v42  ;;  %v19544_v28 = vand.u32 4294901760, %v16966_v15 }
 0x33e   : > { %1984 = vmatmul.mubr.f32.gmra.mxu0 %v1983_v14  ;;  %2369 = vmatprep.subr.mxu1 %v19701_v35  ;;  %v1706_v14 = vld [vmem:[%s19453_s5 + $0x68] sm:$0xff]  ;;  %v2007_v42 = vand.u32 4294901760, %v2006_v53  ;;  %v2021_v53 = vsub.f32 %v16955_v58, %v19537_v55 }
 0x33f   : > { %2504 = vmatprep.subr.mxu0 %v19701_v35  ;;  %2375 = vmatpush2.msra.mxu1 %v2374_v49  ;;  %v16980_v49 = vand.u32 4294901760, %v1703_v1  ;;  %v1841_v48 = vsel %vm1821_vm3, %v1706_v14, 0 }
 0x340   : > { %2507 = vmatpush1.msra.mxu0 %v16567_v18  ;;  %2376 = vmatprep.subr.mxu1 %v19701_v35  ;;  %v17002_v14 = vand.u32 4294901760, %v1841_v48 }
 0x341   : > { %2508 = vmatprep.subr.mxu0 %v19701_v35  ;;  %1993 = vmatprep.mubr.f32.mxu0 %v1992_v59  ;;  %19728 = vst [vmem:[#allocation48_spill] sm:$0xff] %v16980_v49  ;;  %v16987_v59 = vsub.f32 %v1838_v17, %v16968_v63  ;;  %v17000_v17 = vsub.f32 %v1703_v1, %v16980_v49 }
 0x342   : > { %2382 = vmatpush2.msra.mxu1 %v2381_v30  ;;  %2511 = vmatpush1.msra.mxu0 %v16581_v50  ;;  %v1705_v30 = vld [vmem:[%s19453_s5 + $0x60] sm:$0xff]  ;;  %19731 = vst [vmem:[#allocation51_spill] sm:$0xff] %v17002_v14  ;;  %v17022_v58 = vsub.f32 %v1841_v48, %v17002_v14 }
 0x343   : > { %1999 = vmatmul.mubr.f32.gmra.mxu0 %v1998_v22  ;;  %2386 = vmatmul.mubr.f32.vlgmr.msra.gmra.mxu1 %v16762_v21  ;;  %19729 = vst [vmem:[#allocation49_spill] sm:$0xff] %v16987_v59  ;;  %v2013_v22 = vand.u32 4294901760, %v2012_v6  ;;  %19730 = vst [vmem:[#allocation50_spill] sm:$0xff] %v17000_v17  ;;  %v2027_v6 = vsub.f32 %v16966_v15, %v19544_v28  ;;  %v19545_v1 = vand.u32 4294901760, %v16987_v59  ;;  %v17014_v55 = vand.u32 4294901760, %v1705_v30  ;;  %v1707_v28 = vld [vmem:[%s19453_s5 + $0x70] sm:$0xff] }
 0x344   : > { %2512 = vmatprep.subr.mxu0 %v19701_v35  ;;  %2753 = vmatprep.subr.mxu1 %v19701_v35  ;;  %v1844_v21 = vsel %vm1821_vm3, %v1708_v36, 0  ;;  %19733 = vst [vmem:[#allocation53_spill] sm:$0xff] %v17022_v58 }
 0x345   : > { %2515 = vmatpush1.msra.mxu0 %v16598_v62  ;;  %2755 = vmatpush1.msra.mxu1 %v16539_v46  ;;  %19732 = vst [vmem:[#allocation52_spill] sm:$0xff] %v17014_v55  ;;  %v2028_v36 = vand.u32 4294901760, %v2027_v6  ;;  %v17035_v48 = vsub.f32 %v1705_v30, %v17014_v55  ;;  %v19736_v6 = vand.u32 4294901760, %v17000_v17  ;;  %v19554_v30 = vand.u32 4294901760, %v17022_v58 }
 0x346   : > { %2516 = vmatprep.subr.mxu0 %v19701_v35  ;;  %2756 = vmatprep.subr.mxu1 %v19701_v35 }
 0x347   : > { %2008 = vmatprep.mubr.f32.mxu0 %v2007_v42  ;;  %2391 = vmatprep.mubr.f32.mxu1 %v16772_v57  ;;  %v2022_v42 = vand.u32 4294901760, %v2021_v53  ;;  %19734 = vst [vmem:[#allocation54_spill] sm:$0xff] %v17035_v48  ;;  %v17037_v53 = vand.u32 4294901760, %v1844_v21  ;;  %v1710_v57 = vld [vmem:[%s19453_s5 + $0x88] sm:$0xff] }
 0x348   : > { %2519 = vmatpush1.msra.mxu0 %v16615_v13  ;;  %2758 = vmatpush1.msra.mxu1 %v16547_v61 }
 0x349   : > { %2014 = vmatmul.mubr.f32.gmra.mxu0 %v2013_v22  ;;  %2393 = vmatmul.mubr.f32.gmra.mxu1 %v16803_v43  ;;  %v2036_v22 = vsub.f32 %v16987_v59, %v19545_v1  ;;  %19735 = vst [vmem:[#allocation55_spill] sm:$0xff] %v17037_v53  ;;  %v2042_v1 = vsub.f32 %v17000_v17, %v19736_v6  ;;  %v17049_v43 = vand.u32 4294901760, %v1707_v28  ;;  %v1847_v59 = vsel %vm1821_vm3, %v1710_v57, 0  ;;  %v1709_v6 = vld [vmem:[%s19453_s5 + $0x80] sm:$0xff] }
 0x34a   : > { %2520 = vmatprep.subr.mxu0 %v19701_v35  ;;  %2759 = vmatprep.subr.mxu1 %v19701_v35  ;;  %v17057_v15 = vsub.f32 %v1844_v21, %v17037_v53 }
 0x34b   : > { %2523 = vmatpush1.msra.mxu0 %v16630_v27  ;;  %2761 = vmatpush1.msra.mxu1 %v16558_v26  ;;  %19737 = vst [vmem:[#allocation56_spill] sm:$0xff] %v17049_v43  ;;  %v2043_v57 = vand.u32 4294901760, %v2042_v1  ;;  %v17070_v21 = vsub.f32 %v1707_v28, %v17049_v43  ;;  %v19741_v1 = vand.u32 4294901760, %v17035_v48 }
 0x34c   : > { %2524 = vmatprep.subr.mxu0 %v19701_v35  ;;  %2762 = vmatprep.subr.mxu1 %v19701_v35  ;;  %19738 = vst [vmem:[#allocation57_spill] sm:$0xff] %v17057_v15  ;;  %v19565_v28 = vand.u32 4294901760, %v17057_v15 }
 0x34d   : > { %2023 = vmatprep.mubr.f32.mxu0 %v2022_v42  ;;  %2398 = vmatprep.mubr.f32.mxu1 %v16832_v60  ;;  %v2037_v42 = vand.u32 4294901760, %v2036_v22  ;;  %19739 = vst [vmem:[#allocation58_spill] sm:$0xff] %v17070_v21  ;;  %v17072_v22 = vand.u32 4294901760, %v1847_v59  ;;  %v1712_v60 = vld [vmem:[%s19453_s5 + $0x98] sm:$0xff] }
 0x34e   : > { %2527 = vmatpush1.msra.mxu0 %v16656_v51  ;;  %2764 = vmatpush1.msra.mxu1 %v16569_v11 }
 0x34f   : > { %2029 = vmatmul.mubr.f32.gmra.mxu0 %v2028_v36  ;;  %2400 = vmatmul.mubr.f32.gmra.mxu1 %v16848_v41  ;;  %v2051_v36 = vsub.f32 %v17022_v58, %v19554_v30  ;;  %19740 = vst [vmem:[#allocation59_spill] sm:$0xff] %v17072_v22  ;;  %v2057_v30 = vsub.f32 %v17035_v48, %v19741_v1  ;;  %v17084_v41 = vand.u32 4294901760, %v1709_v6  ;;  %v1850_v58 = vsel %vm1821_vm3, %v1712_v60, 0  ;;  %v1711_v1 = vld [vmem:[%s19453_s5 + $0x90] sm:$0xff] }
 0x350   : > { %2528 = vmatprep.subr.mxu0 %v19701_v35  ;;  %2765 = vmatprep.subr.mxu1 %v19701_v35  ;;  %v17092_v17 = vsub.f32 %v1847_v59, %v17072_v22 }
 0x351   : > { %2531 = vmatpush1.msra.mxu0 %v16622_v4  ;;  %2767 = vmatpush1.msra.mxu1 %v16583_v0  ;;  %19742 = vst [vmem:[#allocation60_spill] sm:$0xff] %v17084_v41  ;;  %v2058_v60 = vand.u32 4294901760, %v2057_v30  ;;  %v17105_v59 = vsub.f32 %v1709_v6, %v17084_v41  ;;  %v19747_v30 = vand.u32 4294901760, %v17070_v21 }
 0x352   : > { %2532 = vmatprep.subr.mxu0 %v19701_v35  ;;  %2768 = vmatprep.subr.mxu1 %v19701_v35  ;;  %19743 = vst [vmem:[#allocation61_spill] sm:$0xff] %v17092_v17 }
 0x353   : > { %2038 = vmatprep.mubr.f32.mxu0 %v2037_v42  ;;  %2405 = vmatprep.mubr.f32.mxu1 %v16883_v38  ;;  %v2052_v42 = vand.u32 4294901760, %v2051_v36  ;;  %19744 = vst [vmem:[#allocation62_spill] sm:$0xff] %v17105_v59  ;;  %v17107_v36 = vand.u32 4294901760, %v1850_v58  ;;  %v1714_v38 = vld [vmem:[%s19453_s5 + $0xa8] sm:$0xff]  ;;  %v2072_v6 = vsub.f32 %v17070_v21, %v19747_v30 }
 0x354   : > { %2535 = vmatpush1.msra.mxu0 %v16641_v2  ;;  %2770 = vmatpush1.msra.mxu1 %v16600_v33 }
 0x355   : > { %2044 = vmatmul.mubr.f32.gmra.mxu0 %v2043_v57  ;;  %2407 = vmatmul.mubr.f32.gmra.mxu1 %v16902_v12  ;;  %v2066_v57 = vsub.f32 %v17057_v15, %v19565_v28  ;;  %19745 = vst [vmem:[#allocation63_spill] sm:$0xff] %v17107_v36  ;;  %v17114_v12 = vand.u32 4294901760, %v1711_v1  ;;  %v19574_v28 = vand.u32 4294901760, %v17092_v17  ;;  %v1853_v15 = vsel %vm1821_vm3, %v1714_v38, 0  ;;  %v1713_v38 = vld [vmem:[%s19453_s5 + $0xa0] sm:$0xff] }
 0x356   : > { %2536 = vmatprep.subr.mxu0 %v19701_v35  ;;  %2771 = vmatprep.subr.mxu1 %v19701_v35 }
 0x357   : > { %2539 = vmatpush1.msra.mxu0 %v16645_v23  ;;  %2773 = vmatpush1.msra.mxu1 %v16617_v54  ;;  %19746 = vst [vmem:[#allocation64_spill] sm:$0xff] %v17114_v12  ;;  %v2067_v48 = vand.u32 4294901760, %v2066_v57  ;;  %v17132_v30 = vsub.f32 %v1711_v1, %v17114_v12  ;;  %v17142_v57 = vand.u32 4294901760, %v1853_v15  ;;  %v1716_v1 = vld [vmem:[%s19453_s5 + $0xb8] sm:$0xff] }
 0x358   : > { %2540 = vmatprep.subr.mxu0 %v19701_v35  ;;  %2774 = vmatprep.subr.mxu1 %v19701_v35  ;;  %v1856_v21 = vsel %vm1821_vm3, %v1716_v1, 0 }
 0x359   : > { %2053 = vmatprep.mubr.f32.mxu0 %v2052_v42  ;;  %2412 = vmatprep.mubr.f32.mxu1 %v16933_v5  ;;  %v19581_v42 = vand.u32 4294901760, %v17105_v59  ;;  %v17127_v5 = vsub.f32 %v1850_v58, %v17107_v36  ;;  %19749 = vst [vmem:[#allocation66_spill] sm:$0xff] %v17132_v30  ;;  %v2081_v58 = vsub.f32 %v17092_v17, %v19574_v28  ;;  %19750 = vst [vmem:[#allocation67_spill] sm:$0xff] %v17142_v57  ;;  %v1718_v17 = vld [vmem:[%s19453_s5 + $0xc8] sm:$0xff] }
 0x35a   : > { %2543 = vmatpush1.msra.mxu0 %v16676_v45  ;;  %2776 = vmatpush1.msra.mxu1 %v16634_v29  ;;  %v17154_v28 = vand.u32 4294901760, %v1713_v38 }
 0x35b   : > { %2059 = vmatmul.mubr.f32.gmra.mxu0 %v2058_v60  ;;  %2414 = vmatmul.mubr.f32.gmra.mxu1 %v16945_v25  ;;  %19748 = vst [vmem:[#allocation65_spill] sm:$0xff] %v17127_v5  ;;  %v2073_v60 = vand.u32 4294901760, %v2072_v6  ;;  %v2087_v6 = vsub.f32 %v17105_v59, %v19581_v42  ;;  %v19584_v25 = vand.u32 4294901760, %v17127_v5  ;;  %v1715_v42 = vld [vmem:[%s19453_s5 + $0xb0] sm:$0xff]  ;;  %v1720_v59 = vld [vmem:[%s19453_s5 + $0xd8] sm:$0xff] }
 0x35c   : > { %2544 = vmatprep.subr.mxu0 %v19701_v35  ;;  %2777 = vmatprep.subr.mxu1 %v19701_v35 }
 0x35d   : > { %2547 = vmatpush1.msra.mxu0 %v16682_v20  ;;  %2779 = vmatpush1.msra.mxu1 %v16590_v39  ;;  %v2088_v1 = vand.u32 4294901760, %v2087_v6 }
 0x35e   : > { %2548 = vmatprep.subr.mxu0 %v19701_v35  ;;  %2780 = vmatprep.subr.mxu1 %v19701_v35 }
 0x35f   : > { %2068 = vmatprep.mubr.f32.mxu0 %v2067_v48  ;;  %2419 = vmatprep.mubr.f32.mxu1 %v16968_v63  ;;  %v2082_v48 = vand.u32 4294901760, %v2081_v58  ;;  %v17162_v63 = vsub.f32 %v1853_v15, %v17142_v57  ;;  %v17175_v15 = vsub.f32 %v1713_v38, %v17154_v28  ;;  %v17177_v58 = vand.u32 4294901760, %v1856_v21 }
 0x360   : > { %2551 = vmatpush1.msra.mxu0 %v16699_v52  ;;  %2782 = vmatpush1.msra.mxu1 %v16607_v7 }
 0x361   : > { %2074 = vmatmul.mubr.f32.gmra.mxu0 %v2073_v60  ;;  %2421 = vmatmul.mubr.f32.gmra.mxu1 %v16980_v49  ;;  %19751 = vst [vmem:[#allocation68_spill] sm:$0xff] %v17162_v63  ;;  %v2096_v60 = vsub.f32 %v17127_v5, %v19584_v25  ;;  %19752 = vst [vmem:[#allocation69_spill] sm:$0xff] %v17175_v15  ;;  %v19753_v49 = vand.u32 4294901760, %v17132_v30  ;;  %v17189_v25 = vand.u32 4294901760, %v1715_v42  ;;  %v1859_v5 = vsel %vm1821_vm3, %v1718_v17, 0  ;;  %v1717_v17 = vld [vmem:[%s19453_s5 + $0xc0] sm:$0xff] }
 0x362   : > { %2552 = vmatprep.subr.mxu0 %v19701_v35  ;;  %2783 = vmatprep.subr.mxu1 %v19701_v35  ;;  %v17200_v38 = vsub.f32 %v1856_v21, %v17177_v58 }
 0x363   : > { %2555 = vmatpush1.msra.mxu0 %v16719_v10  ;;  %2785 = vmatpush1.msra.mxu1 %v16610_v9  ;;  %v2102_v6 = vsub.f32 %v17132_v30, %v19753_v49  ;;  %v2097_v49 = vand.u32 4294901760, %v2096_v60  ;;  %v17213_v21 = vsub.f32 %v1715_v42, %v17189_v25  ;;  %v1722_v42 = vld [vmem:[%s19453_s5 + $0xe8] sm:$0xff] }
 0x364   : > { %2556 = vmatprep.subr.mxu0 %v19701_v35  ;;  %2786 = vmatprep.subr.mxu1 %v19701_v35  ;;  %19754 = vst [vmem:[#allocation70_spill] sm:$0xff] %v17200_v38 }
 0x365   : > { %2083 = vmatprep.mubr.f32.mxu0 %v2082_v48  ;;  %2426 = vmatprep.mubr.f32.mxu1 %v17002_v14  ;;  %v2103_v14 = vand.u32 4294901760, %v2102_v6  ;;  %19756 = vst [vmem:[#allocation71_spill] sm:$0xff] %v17213_v21  ;;  %v17215_v48 = vand.u32 4294901760, %v1859_v5  ;;  %v19757_v6 = vand.u32 4294901760, %v17175_v15 }
 0x366   : > { %2559 = vmatpush1.msra.mxu0 %v16726_v24  ;;  %2788 = vmatpush1.msra.mxu1 %v16648_v37  ;;  %v19766_v37 = vld [vmem:[#allocation30_spill] sm:$0xff] }
 0x367   : > { %2089 = vmatmul.mubr.f32.gmra.mxu0 %v2088_v1  ;;  %2428 = vmatmul.mubr.f32.gmra.mxu1 %v17014_v55  ;;  %v19755_v1 = vand.u32 4294901760, %v17162_v63  ;;  %v1862_v55 = vsel %vm1821_vm3, %v1720_v59, 0  ;;  %v2117_v30 = vsub.f32 %v17175_v15, %v19757_v6  ;;  %v19758_v59 = vld [vmem:[#allocation15_spill] sm:$0xff]  ;;  %v1865_v15 = vsel %vm1821_vm3, %v1722_v42, 0 }
 0x368   : > { %2576 = vmatprep.subr.mxu0 %v19701_v35  ;;  %2789 = vmatprep.subr.mxu1 %v19701_v35 }
 0x369   : > { %2579 = vmatpush2.msra.mxu0 %v16749_v31  ;;  %2791 = vmatpush1.msra.mxu1 %v16652_v44  ;;  %v2111_v60 = vsub.f32 %v17162_v63, %v19755_v1  ;;  %v17225_v63 = vand.u32 4294901760, %v1717_v17  ;;  %v17232_v44 = vand.u32 4294901760, %v1862_v55  ;;  %v19762_v1 = vand.u32 4294901760, %v17200_v38 }
 0x36a   : > { %2580 = vmatprep.subr.mxu0 %v19701_v35  ;;  %2792 = vmatprep.subr.mxu1 %v19701_v35 }
 0x36b   : > { %2098 = vmatprep.mubr.f32.mxu0 %v2097_v49  ;;  %2433 = vmatprep.mubr.f32.mxu1 %v17037_v53  ;;  %v1719_v49 = vld [vmem:[%s19453_s5 + $0xd0] sm:$0xff]  ;;  %v2112_v6 = vand.u32 4294901760, %v2111_v60  ;;  %v17240_v53 = vsub.f32 %v1859_v5, %v17215_v48  ;;  %v2118_v60 = vand.u32 4294901760, %v2117_v30  ;;  %v2126_v5 = vsub.f32 %v17200_v38, %v19762_v1  ;;  %v1721_v30 = vld [vmem:[%s19453_s5 + $0xe0] sm:$0xff] }
 0x36c   : > { %2583 = vmatpush2.msra.mxu0 %v16765_v8  ;;  %2794 = vmatpush1.msra.mxu1 %v19758_v59  ;;  %v1724_v59 = vld [vmem:[%s19453_s5 + $0xf8] sm:$0xff]  ;;  %v19760_v8 = vld [vmem:[#allocation27_spill] sm:$0xff]  ;;  %v17256_v31 = vand.u32 4294901760, %v1719_v49  ;;  %v17261_v42 = vsub.f32 %v1862_v55, %v17232_v44  ;;  %v19765_v1 = vand.u32 4294901760, %v17213_v21 }
 0x36d   : > { %2104 = vmatmul.mubr.f32.gmra.mxu0 %v2103_v14  ;;  %2435 = vmatmul.mubr.f32.gmra.mxu1 %v17049_v43  ;;  %19759 = vst [vmem:[#allocation72_spill] sm:$0xff] %v17240_v53  ;;  %v19761_v14 = vld [vmem:[#allocation16_spill] sm:$0xff]  ;;  %v17254_v43 = vsub.f32 %v1717_v17, %v17225_v63  ;;  %v19767_v55 = vld [vmem:[#allocation17_spill] sm:$0xff] }
 0x36e   : > { %2584 = vmatprep.subr.mxu0 %v19701_v35  ;;  %2795 = vmatprep.subr.mxu1 %v19701_v35  ;;  %19764 = vst [vmem:[#allocation74_spill] sm:$0xff] %v17261_v42  ;;  %v2132_v17 = vsub.f32 %v17213_v21, %v19765_v1  ;;  %v17279_v24 = vsub.f32 %v1719_v49, %v17256_v31  ;;  %v17281_v1 = vand.u32 4294901760, %v1721_v30 }
 0x36f   : > { %2587 = vmatpush2.msra.mxu0 %v19760_v8  ;;  %2797 = vmatpush1.msra.mxu1 %v19761_v14  ;;  %19763 = vst [vmem:[#allocation73_spill] sm:$0xff] %v17254_v43  ;;  %v17271_v14 = vand.u32 4294901760, %v1865_v15  ;;  %v1868_v8 = vsel %vm1821_vm3, %v1724_v59, 0  ;;  %v19770_v59 = vand.u32 4294901760, %v17254_v43 }
 0x370   : > { %2588 = vmatprep.subr.mxu0 %v19701_v35  ;;  %2798 = vmatprep.subr.mxu1 %v19701_v35  ;;  %v17286_v38 = vand.u32 4294901760, %v1868_v8  ;;  %v2133_v49 = vand.u32 4294901760, %v2132_v17  ;;  %v19773_v17 = vld [vmem:[#allocation22_spill] sm:$0xff] }
 0x371   : > { %2113 = vmatprep.mubr.f32.mxu0 %v2112_v6  ;;  %2440 = vmatprep.mubr.f32.mxu1 %v17072_v22  ;;  %v2127_v6 = vand.u32 4294901760, %v2126_v5  ;;  %v19768_v5 = vld [vmem:[#allocation18_spill] sm:$0xff]  ;;  %v19769_v22 = vand.u32 4294901760, %v17240_v53  ;;  %v17297_v21 = vsub.f32 %v1865_v15, %v17271_v14  ;;  %v19771_v15 = vld [vmem:[#allocation20_spill] sm:$0xff] }
 0x372   : > { %2591 = vmatpush2.msra.mxu0 %v19766_v37  ;;  %2800 = vmatpush1.msra.mxu1 %v19767_v55 }
 0x373   : > { %2119 = vmatmul.mubr.f32.gmra.mxu0 %v2118_v60  ;;  %2442 = vmatmul.mubr.f32.gmra.mxu1 %v17084_v41  ;;  %v1723_v60 = vld [vmem:[%s19453_s5 + $0xf0] sm:$0xff]  ;;  %v2141_v41 = vsub.f32 %v17240_v53, %v19769_v22  ;;  %v19772_v53 = vand.u32 4294901760, %v17261_v42 }
 0x374   : > { %2592 = vmatprep.subr.mxu0 %v19701_v35  ;;  %2817 = vmatprep.subr.mxu1 %v19701_v35  ;;  %v17309_v22 = vand.u32 4294901760, %v1723_v60 }
 0x375   : > { %2595 = vmatpush2.msra.mxu0 %v16815_v34  ;;  %2819 = vmatpush2.msra.mxu1 %v19768_v5  ;;  %v2147_v34 = vsub.f32 %v17254_v43, %v19770_v59  ;;  %v17307_v5 = vsub.f32 %v1721_v30, %v17281_v1  ;;  %v2142_v59 = vand.u32 4294901760, %v2141_v41 }
 0x376   : > { %2596 = vmatprep.subr.mxu0 %v19701_v35  ;;  %2820 = vmatprep.subr.mxu1 %v19701_v35 }
 0x377   : > { %2128 = vmatprep.mubr.f32.mxu0 %v2127_v6  ;;  %2447 = vmatprep.mubr.f32.mxu1 %v17107_v36  ;;  %v2156_v6 = vsub.f32 %v17261_v42, %v19772_v53  ;;  %v17317_v36 = vsub.f32 %v1868_v8, %v17286_v38  ;;  %v2148_v43 = vand.u32 4294901760, %v2147_v34  ;;  %v19774_v53 = vand.u32 4294901760, %v17279_v24 }
 0x378   : > { %2599 = vmatpush2.msra.mxu0 %v16843_v40  ;;  %2822 = vmatpush2.msra.mxu1 %v19771_v15  ;;  %v19775_v34 = vand.u32 4294901760, %v17297_v21 }
 0x379   : > { %2134 = vmatmul.mubr.f32.gmra.mxu0 %v2133_v49  ;;  %2449 = vmatmul.mubr.f32.gmra.mxu1 %v17114_v12  ;;  %v2162_v8 = vsub.f32 %v17279_v24, %v19774_v53  ;;  %v19629_v49 = vand.u32 4294901760, %v17307_v5  ;;  %v17330_v12 = vsub.f32 %v1723_v60, %v17309_v22  ;;  %v2157_v41 = vand.u32 4294901760, %v2156_v6  ;;  %v19776_v53 = vld [vmem:[#allocation25_spill] sm:$0xff] }
 0x37a   : > { %2600 = vmatprep.subr.mxu0 %v19701_v35  ;;  %2823 = vmatprep.subr.mxu1 %v19701_v35  ;;  %v19630_v30 = vand.u32 4294901760, %v17317_v36  ;;  %v2171_v42 = vsub.f32 %v17297_v21, %v19775_v34 }
 0x37b   : > { %2603 = vmatpush2.msra.mxu0 %v16859_v56  ;;  %2825 = vmatpush2.msra.mxu1 %v19773_v17  ;;  %v2163_v60 = vand.u32 4294901760, %v2162_v8  ;;  %v2177_v6 = vsub.f32 %v17307_v5, %v19629_v49  ;;  %v19778_v8 = vld [vmem:[#allocation32_spill] sm:$0xff] }
 0x37c   : > { %2604 = vmatprep.subr.mxu0 %v19701_v35  ;;  %2826 = vmatprep.subr.mxu1 %v19701_v35  ;;  %v2186_v34 = vsub.f32 %v17317_v36, %v19630_v30 }
 0x37d   : > { %2143 = vmatprep.mubr.f32.mxu0 %v2142_v59  ;;  %2454 = vmatprep.mubr.f32.mxu1 %v17142_v57  ;;  %v19631_v59 = vand.u32 4294901760, %v17330_v12  ;;  %v19777_v57 = vld [vmem:[#allocation28_spill] sm:$0xff]  ;;  %v2178_v49 = vand.u32 4294901760, %v2177_v6  ;;  %v19780_v6 = vld [vmem:[#allocation13_spill] sm:$0xff] }
 0x37e   : > { %2607 = vmatpush2.msra.mxu0 %v16889_v47  ;;  %2828 = vmatpush2.msra.mxu1 %v19776_v53  ;;  %v2187_v30 = vand.u32 4294901760, %v2186_v34  ;;  %v19781_v34 = vld [vmem:[#allocation29_spill] sm:$0xff] }
 0x37f   : > { %2149 = vmatmul.mubr.f32.gmra.mxu0 %v2148_v43  ;;  %2456 = vmatmul.mubr.f32.gmra.mxu1 %v17154_v28  ;;  %v2172_v43 = vand.u32 4294901760, %v2171_v42  ;;  %v19779_v42 = vld [vmem:[#allocation38_spill] sm:$0xff] }
 0x380   : > { %2829 = vmatprep.subr.mxu1 %v19701_v35  ;;  %2158 = vmatprep.mubr.f32.mxu0 %v2157_v41  ;;  %v2192_v41 = vsub.f32 %v17330_v12, %v19631_v59  ;;  %v19787_v59 = vand.u32 4294901760, %v16567_v18  ;;  %v19792_v18 = vand.u32 4294901760, %v16598_v62  ;;  %v19797_v62 = vand.u32 4294901760, %v16630_v27  ;;  %v19801_v27 = vld [vmem:[#allocation46_spill] sm:$0xff] }
 0x381   : > { %2831 = vmatpush2.msra.mxu1 %v19777_v57  ;;  %2461 = vmatprep.mubr.f32.mxu1 %v17177_v58 }
 0x382   : > { %2832 = vmatprep.subr.mxu1 %v19701_v35  ;;  %3018 = vmatprep.subr.mxu0 %v19701_v35 }
 0x383   : > { %2834 = vmatpush2.msra.mxu1 %v19778_v8  ;;  %2164 = vmatmul.mubr.f32.gmra.mxu0 %v2163_v60  ;;  %v2193_v60 = vand.u32 4294901760, %v2192_v41  ;;  %v19785_v41 = vld [vmem:[#allocation33_spill] sm:$0xff] }
 0x384   : > { %2463 = vmatmul.mubr.f32.gmra.mxu1 %v17189_v25  ;;  %2835 = vmatprep.subr.mxu1 %v19701_v35 }
 0x385   : > { %2837 = vmatpush2.msra.mxu1 %v16827_v3  ;;  %2173 = vmatprep.mubr.f32.mxu0 %v2172_v43 }
 0x386   : > { %2838 = vmatprep.subr.mxu1 %v19701_v35  ;;  %2468 = vmatprep.mubr.f32.mxu1 %v17215_v48 }
 0x387   : > { %2840 = vmatpush2.msra.mxu1 %v19779_v42  ;;  %2179 = vmatmul.mubr.f32.gmra.mxu0 %v2178_v49  ;;  %v19782_v49 = vld [vmem:[#allocation12_spill] sm:$0xff] }
 0x388   : > { %2470 = vmatmul.mubr.f32.gmra.mxu1 %v17225_v63  ;;  %2188 = vmatprep.mubr.f32.mxu0 %v2187_v30  ;;  %v19783_v43 = vand.u32 4294901760, %v19782_v49  ;;  %v19784_v30 = vand.u32 4294901760, %v16556_v16  ;;  %v19788_v49 = vld [vmem:[#allocation39_spill] sm:$0xff]  ;;  %v19790_v16 = vand.u32 4294901760, %v19780_v6 }
 0x389   : > { %2475 = vmatprep.mubr.f32.mxu1 %v17232_v44  ;;  %3267 = vmatprep.subr.mxu1 %v19701_v35 }
 0x38b   : > { %2194 = vmatmul.mubr.f32.gmra.mxu0 %v2193_v60  ;;  %v19786_v60 = vld [vmem:[#allocation36_spill] sm:$0xff] }
 0x38c   : > { %2477 = vmatmul.mubr.f32.gmra.mxu1 %v17256_v31  ;;  %2610 = vmatprep.mubr.f32.mxu0 %v19780_v6  ;;  %v19795_v6 = vand.u32 4294901760, %v19785_v41 }
 0x38d   : > { %2482 = vmatprep.mubr.f32.mxu1 %v17271_v14 }
 0x38f   : > { %2613 = vmatmul.mubr.f32.vlgmr.msra.gmra.mxu0 %v19781_v34 }
 0x390   : > { %2484 = vmatmul.mubr.f32.gmra.mxu1 %v17281_v1  ;;  %3022 = vmatpush1.msra.mxu0 %v19783_v43  ;;  %v19789_v43 = vand.u32 4294901760, %v16581_v50  ;;  %v19793_v50 = vand.u32 4294901760, %v16615_v13  ;;  %v19799_v13 = vld [vmem:[#allocation45_spill] sm:$0xff] }
 0x391   : > { %3023 = vmatprep.subr.mxu0 %v19701_v35  ;;  %2489 = vmatprep.mubr.f32.mxu1 %v17286_v38 }
 0x392   : > { %3027 = vmatpush1.msra.mxu0 %v19784_v30  ;;  %2619 = vmatprep.mubr.f32.mxu0 %v19785_v41  ;;  %v19791_v30 = vand.u32 4294901760, %v19781_v34  ;;  %v19800_v34 = vand.u32 4294901760, %v19788_v49  ;;  %v19803_v41 = vand.u32 4294901760, %v16622_v4  ;;  %v19808_v4 = vand.u32 4294901760, %v16931_v19 }
 0x393   : > { %3028 = vmatprep.subr.mxu0 %v19701_v35  ;;  %2622 = vmatmul.mubr.f32.gmra.mxu0 %v19786_v60 }
 0x394   : > { %2491 = vmatmul.mubr.f32.gmra.mxu1 %v17309_v22  ;;  %3032 = vmatpush1.msra.mxu0 %v19787_v59  ;;  %v19794_v59 = vld [vmem:[#allocation42_spill] sm:$0xff] }
 0x395   : > { %3033 = vmatprep.subr.mxu0 %v19701_v35  ;;  %2628 = vmatprep.mubr.f32.mxu0 %v19788_v49 }
 0x396   : > { %3037 = vmatpush1.msra.mxu0 %v19789_v43  ;;  %2844 = vmatprep.mubr.f32.mxu1 %v19790_v16  ;;  %v19811_v43 = vld [vmem:[#allocation53_spill] sm:$0xff] }
 0x397   : > { %3038 = vmatprep.subr.mxu0 %v19701_v35  ;;  %2631 = vmatmul.mubr.f32.gmra.mxu0 %v16881_v32 }
 0x398   : > { %2848 = vmatmul.mubr.f32.vlgmr.msra.gmra.mxu1 %v19791_v30  ;;  %3042 = vmatpush1.msra.mxu0 %v19792_v18  ;;  %v19817_v30 = vld [vmem:[#allocation57_spill] sm:$0xff] }
 0x399   : > { %3269 = vmatpush1.msra.mxu1 %v16539_v46  ;;  %3043 = vmatprep.subr.mxu0 %v19701_v35  ;;  %v19796_v46 = vand.u32 4294901760, %v19786_v60  ;;  %v19805_v60 = vld [vmem:[#allocation49_spill] sm:$0xff] }
 0x39a   : > { %3270 = vmatprep.subr.mxu1 %v19701_v35  ;;  %3047 = vmatpush1.msra.mxu0 %v19793_v50  ;;  %v19818_v18 = vand.u32 4294901760, %v19805_v60  ;;  %v19822_v50 = vld [vmem:[#allocation19_spill] sm:$0xff] }
 0x39b   : > { %3272 = vmatpush1.msra.mxu1 %v16547_v61  ;;  %2637 = vmatprep.mubr.f32.mxu0 %v19794_v59  ;;  %v19798_v61 = vand.u32 4294901760, %v16656_v51  ;;  %v17433_v51 = vpop.permute.xlu1 %1818 }
 0x39c   : > { %2855 = vmatprep.mubr.f32.mxu1 %v19795_v6  ;;  %3048 = vmatprep.subr.mxu0 %v19701_v35 }
 0x39d   : > { %3273 = vmatprep.subr.mxu1 %v19701_v35  ;;  %2640 = vmatmul.mubr.f32.gmra.mxu0 %v16931_v19  ;;  %v19812_v19 = vand.u32 4294901760, %v19799_v13 }
 0x39e   : > { %2859 = vmatmul.mubr.f32.gmra.mxu1 %v19796_v46  ;;  %3052 = vmatpush1.msra.mxu0 %v19797_v62  ;;  %v19824_v46 = vld [vmem:[#allocation11_spill] sm:$0xff]  ;;  %v19825_v62 = vld [vmem:[#allocation61_spill] sm:$0xff] }
 0x39f   : > { %3275 = vmatpush1.msra.mxu1 %v16558_v26  ;;  %3053 = vmatprep.subr.mxu0 %v19701_v35  ;;  %v19802_v26 = vand.u32 4294901760, %v16881_v32  ;;  %v19806_v32 = vand.u32 4294901760, %v19794_v59  ;;  %v17451_v49 = vpop.permute.xlu1 %1808  ;;  %v19823_v59 = vand.u32 4294901760, %v19822_v50  ;;  %v19849_v50 = vld [vmem:[#allocation18_spill] sm:$0xff] }
 0x3a0   : > { %3276 = vmatprep.subr.mxu1 %v19701_v35  ;;  %3057 = vmatpush1.msra.mxu0 %v19798_v61 }
 0x3a1   : > { %3278 = vmatpush1.msra.mxu1 %v16569_v11  ;;  %2646 = vmatprep.mubr.f32.mxu0 %v19799_v13  ;;  %v19804_v11 = vand.u32 4294901760, %v16641_v2  ;;  %v19809_v2 = vand.u32 4294901760, %v16645_v23  ;;  %v19814_v23 = vand.u32 4294901760, %v19801_v27  ;;  %v19829_v13 = vld [vmem:[#allocation21_spill] sm:$0xff] }
 0x3a2   : > { %2866 = vmatprep.mubr.f32.mxu1 %v19800_v34  ;;  %3058 = vmatprep.subr.mxu0 %v19701_v35  ;;  %v19830_v34 = vand.u32 4294901760, %v19829_v13  ;;  %v19856_v13 = vand.u32 4294901760, %v16889_v47  ;;  %v19861_v47 = vld [vmem:[#allocation74_spill] sm:$0xff] }
 0x3a3   : > { %3279 = vmatprep.subr.mxu1 %v19701_v35  ;;  %2649 = vmatmul.mubr.f32.gmra.mxu0 %v19801_v27  ;;  %v17469_v16 = vpop.permute.xlu1 %1798  ;;  %v19831_v27 = vld [vmem:[#allocation14_spill] sm:$0xff] }
 0x3a4   : > { %2870 = vmatmul.mubr.f32.gmra.mxu1 %v19802_v26  ;;  %3062 = vmatpush1.msra.mxu0 %v19803_v41  ;;  %v19832_v41 = vld [vmem:[#allocation24_spill] sm:$0xff] }
 0x3a5   : > { %3281 = vmatpush1.msra.mxu1 %v16583_v0  ;;  %3063 = vmatprep.subr.mxu0 %v19701_v35  ;;  %v19807_v0 = vld [vmem:[#allocation50_spill] sm:$0xff] }
 0x3a6   : > { %3282 = vmatprep.subr.mxu1 %v19701_v35  ;;  %3067 = vmatpush1.msra.mxu0 %v19804_v11  ;;  %v19833_v11 = vand.u32 4294901760, %v19832_v41 }
 0x3a7   : > { %3284 = vmatpush1.msra.mxu1 %v16600_v33  ;;  %2655 = vmatprep.mubr.f32.mxu0 %v19805_v60  ;;  %v19810_v33 = vand.u32 4294901760, %v16676_v45  ;;  %v19815_v45 = vand.u32 4294901760, %v16682_v20  ;;  %v19820_v20 = vand.u32 4294901760, %v19807_v0  ;;  %v17489_v6 = vpop.permute.xlu1 %1788 }
 0x3a8   : > { %2877 = vmatprep.mubr.f32.mxu1 %v19806_v32  ;;  %3068 = vmatprep.subr.mxu0 %v19701_v35  ;;  %v19834_v32 = vld [vmem:[#allocation15_spill] sm:$0xff] }
 0x3a9   : > { %3285 = vmatprep.subr.mxu1 %v19701_v35  ;;  %2658 = vmatmul.mubr.f32.gmra.mxu0 %v19807_v0  ;;  %v19835_v0 = vld [vmem:[#allocation65_spill] sm:$0xff] }
 0x3aa   : > { %2881 = vmatmul.mubr.f32.gmra.mxu1 %v19808_v4  ;;  %3072 = vmatpush1.msra.mxu0 %v19809_v2  ;;  %v19836_v4 = vand.u32 4294901760, %v19817_v30  ;;  %v19837_v2 = vld [vmem:[#allocation66_spill] sm:$0xff] }
 0x3ab   : > { %3287 = vmatpush1.msra.mxu1 %v16617_v54  ;;  %3073 = vmatprep.subr.mxu0 %v19701_v35  ;;  %v19813_v54 = vld [vmem:[#allocation54_spill] sm:$0xff]  ;;  %v17509_v60 = vpop.permute.xlu1 %3577 }
 0x3ac   : > { %3288 = vmatprep.subr.mxu1 %v19701_v35  ;;  %3077 = vmatpush1.msra.mxu0 %v19810_v33  ;;  %v19828_v61 = vand.u32 4294901760, %v19813_v54 }
 0x3ad   : > { %3290 = vmatpush1.msra.mxu1 %v16634_v29  ;;  %2664 = vmatprep.mubr.f32.mxu0 %v19811_v43  ;;  %v19816_v29 = vand.u32 4294901760, %v16699_v52  ;;  %v19821_v52 = vand.u32 4294901760, %v16719_v10  ;;  %v19826_v10 = vand.u32 4294901760, %v19811_v43  ;;  %v19839_v43 = vld [vmem:[#allocation27_spill] sm:$0xff] }
 0x3ae   : > { %2888 = vmatprep.mubr.f32.mxu1 %v19812_v19  ;;  %3078 = vmatprep.subr.mxu0 %v19701_v35  ;;  %v19840_v19 = vand.u32 4294901760, %v19839_v43  ;;  %v19869_v43 = vand.u32 4294901760, %v17297_v21 }
 0x3af   : > { %3291 = vmatprep.subr.mxu1 %v19701_v35  ;;  %2667 = vmatmul.mubr.f32.gmra.mxu0 %v19813_v54  ;;  %v19841_v54 = vld [vmem:[#allocation16_spill] sm:$0xff] }
 0x3b0   : > { %2892 = vmatmul.mubr.f32.gmra.mxu1 %v19814_v23  ;;  %3082 = vmatpush1.msra.mxu0 %v19815_v45  ;;  %v19842_v45 = vand.u32 4294901760, %v19766_v37  ;;  %v19847_v37 = vld [vmem:[#allocation34_spill] sm:$0xff] }
 0x3b1   : > { %3293 = vmatpush1.msra.mxu1 %v16590_v39  ;;  %3083 = vmatprep.subr.mxu0 %v19701_v35  ;;  %v19819_v39 = vld [vmem:[#allocation58_spill] sm:$0xff] }
 0x3b2   : > { %3294 = vmatprep.subr.mxu1 %v19701_v35  ;;  %3087 = vmatpush1.msra.mxu0 %v19816_v29  ;;  %v19838_v33 = vand.u32 4294901760, %v19819_v39  ;;  %v17529_v29 = vpop.permute.xlu1 %3572 }
 0x3b3   : > { %3296 = vmatpush1.msra.mxu1 %v16607_v7  ;;  %2673 = vmatprep.mubr.f32.mxu0 %v19817_v30  ;;  %v17484_v7 = vpop.permute.xlu0 %1813  ;;  %v19843_v30 = vld [vmem:[#allocation68_spill] sm:$0xff] }
 0x3b4   : > { %2899 = vmatprep.mubr.f32.mxu1 %v19818_v18  ;;  %3088 = vmatprep.subr.mxu0 %v19701_v35  ;;  %v19844_v18 = vand.u32 4294901760, %v19825_v62 }
 0x3b5   : > { %3297 = vmatprep.subr.mxu1 %v19701_v35  ;;  %2676 = vmatmul.mubr.f32.gmra.mxu0 %v19819_v39  ;;  %v19845_v39 = vld [vmem:[#allocation69_spill] sm:$0xff] }
 0x3b6   : > { %2903 = vmatmul.mubr.f32.gmra.mxu1 %v19820_v20  ;;  %3092 = vmatpush1.msra.mxu0 %v19821_v52  ;;  %v19848_v52 = vand.u32 4294901760, %v19847_v37  ;;  %v19860_v41 = vand.u32 4294901760, %v19845_v39  ;;  %v19876_v37 = vld [vmem:[#allocation35_spill] sm:$0xff] }
 0x3b7   : > { %3299 = vmatpush1.msra.mxu1 %v16610_v9  ;;  %3093 = vmatprep.subr.mxu0 %v19701_v35  ;;  %v19827_v9 = vld [vmem:[#allocation62_spill] sm:$0xff]  ;;  %v17504_v26 = vpop.permute.xlu0 %1803 }
 0x3b8   : > { %3300 = vmatprep.subr.mxu1 %v19701_v35  ;;  %3097 = vmatpush1.msra.mxu0 %v19823_v59  ;;  %v19846_v20 = vand.u32 4294901760, %v19827_v9  ;;  %v19850_v59 = vand.u32 4294901760, %v16843_v40  ;;  %v19855_v40 = vand.u32 4294901760, %v16859_v56  ;;  %v19858_v56 = vand.u32 4294901760, %v19843_v30 }
 0x3b9   : > { %3302 = vmatpush1.msra.mxu1 %v19824_v46  ;;  %2682 = vmatprep.mubr.f32.mxu0 %v19825_v62  ;;  %v17549_v46 = vpop.permute.xlu1 %1773  ;;  %v19851_v62 = vld [vmem:[#allocation70_spill] sm:$0xff] }
 0x3ba   : > { %2910 = vmatprep.mubr.f32.mxu1 %v19826_v10  ;;  %3114 = vmatprep.subr.mxu0 %v19701_v35  ;;  %v19852_v10 = vand.u32 4294901760, %v19835_v0 }
 0x3bb   : > { %3303 = vmatprep.subr.mxu1 %v19701_v35  ;;  %2685 = vmatmul.mubr.f32.gmra.mxu0 %v19827_v9  ;;  %v17524_v23 = vpop.permute.xlu0 %1793  ;;  %v19853_v9 = vld [vmem:[#allocation71_spill] sm:$0xff] }
 0x3bc   : > { %2914 = vmatmul.mubr.f32.gmra.mxu1 %v19828_v61  ;;  %3118 = vmatpush2.msra.mxu0 %v19830_v34  ;;  %v19854_v61 = vand.u32 4294901760, %v19837_v2 }
 0x3bd   : > { %3305 = vmatpush1.msra.mxu1 %v19831_v27  ;;  %3119 = vmatprep.subr.mxu0 %v19701_v35  ;;  %v17569_v34 = vpop.permute.xlu1 %3684  ;;  %v19857_v27 = vld [vmem:[#allocation72_spill] sm:$0xff] }
 0x3be   : > { %3306 = vmatprep.subr.mxu1 %v19701_v35  ;;  %3123 = vmatpush2.msra.mxu0 %v19833_v11 }
 0x3bf   : > { %3308 = vmatpush1.msra.mxu1 %v19834_v32  ;;  %2691 = vmatprep.mubr.f32.mxu0 %v19835_v0  ;;  %v19863_v0 = vand.u32 4294901760, %v19853_v9 }
 0x3c0   : > { %2921 = vmatprep.mubr.f32.mxu1 %v19836_v4  ;;  %3124 = vmatprep.subr.mxu0 %v19701_v35 }
 0x3c1   : > { %3309 = vmatprep.subr.mxu1 %v19701_v35  ;;  %2694 = vmatmul.mubr.f32.gmra.mxu0 %v19837_v2  ;;  %v17587_v32 = vpop.permute.xlu1 %3562 }
 0x3c2   : > { %2925 = vmatmul.mubr.f32.gmra.mxu1 %v19838_v33  ;;  %3128 = vmatpush2.msra.mxu0 %v19840_v19  ;;  %v19867_v33 = vand.u32 4294901760, %v17279_v24 }
 0x3c3   : > { %3311 = vmatpush1.msra.mxu1 %v19841_v54  ;;  %3129 = vmatprep.subr.mxu0 %v19701_v35 }
 0x3c4   : > { %3312 = vmatprep.subr.mxu1 %v19701_v35  ;;  %3133 = vmatpush2.msra.mxu0 %v19842_v45  ;;  %v19870_v45 = vld [vmem:[#allocation23_spill] sm:$0xff] }
 0x3c5   : > { %3314 = vmatpush1.msra.mxu1 %v19767_v55  ;;  %2700 = vmatprep.mubr.f32.mxu0 %v19843_v30  ;;  %v17544_v55 = vpop.permute.xlu0 %1783  ;;  %v17605_v2 = vpop.permute.xlu1 %1763  ;;  %v19871_v30 = vand.u32 4294901760, %v17307_v5 }
 0x3c6   : > { %2932 = vmatprep.mubr.f32.mxu1 %v19844_v18  ;;  %3134 = vmatprep.subr.mxu0 %v19701_v35  ;;  %v19872_v18 = vld [vmem:[#allocation26_spill] sm:$0xff] }
 0x3c7   : > { %3331 = vmatprep.subr.mxu1 %v19701_v35  ;;  %2703 = vmatmul.mubr.f32.gmra.mxu0 %v19845_v39  ;;  %v19873_v39 = vand.u32 4294901760, %v17317_v36 }
 0x3c8   : > { %2936 = vmatmul.mubr.f32.gmra.mxu1 %v19846_v20  ;;  %3138 = vmatpush2.msra.mxu0 %v19848_v52 }
 0x3c9   : > { %3333 = vmatpush2.msra.mxu1 %v19849_v50  ;;  %3139 = vmatprep.subr.mxu0 %v19701_v35  ;;  %v17617_v54 = vpop.permute.xlu1 %3674  ;;  %v19878_v50 = vld [vmem:[#allocation40_spill] sm:$0xff] }
 0x3ca   : > { %3334 = vmatprep.subr.mxu1 %v19701_v35  ;;  %3143 = vmatpush2.msra.mxu0 %v19850_v59 }
 0x3cb   : > { %3336 = vmatpush2.msra.mxu1 %v19771_v15  ;;  %2709 = vmatprep.mubr.f32.mxu0 %v19851_v62  ;;  %v17564_v15 = vpop.permute.xlu0 %1778 }
 0x3cc   : > { %2943 = vmatprep.mubr.f32.mxu1 %v19852_v10  ;;  %3144 = vmatprep.subr.mxu0 %v19701_v35  ;;  %v19881_v10 = vld [vmem:[#allocation44_spill] sm:$0xff] }
 0x3cd   : > { %3337 = vmatprep.subr.mxu1 %v19701_v35  ;;  %2712 = vmatmul.mubr.f32.gmra.mxu0 %v19853_v9  ;;  %v17631_v52 = vpop.permute.xlu1 %3552 }
 0x3ce   : > { %2947 = vmatmul.mubr.f32.gmra.mxu1 %v19854_v61  ;;  %3148 = vmatpush2.msra.mxu0 %v19855_v40  ;;  %v19882_v61 = vld [vmem:[#allocation47_spill] sm:$0xff] }
 0x3cf   : > { %3339 = vmatpush2.msra.mxu1 %v19773_v17  ;;  %3149 = vmatprep.subr.mxu0 %v19701_v35  ;;  %v19859_v17 = vld [vmem:[#allocation73_spill] sm:$0xff]  ;;  %v17584_v11 = vpop.permute.xlu0 %3689 }
 0x3d0   : > { %3340 = vmatprep.subr.mxu1 %v19701_v35  ;;  %3153 = vmatpush2.msra.mxu0 %v19856_v13  ;;  %v19865_v4 = vand.u32 4294901760, %v19859_v17  ;;  %v19883_v13 = vld [vmem:[#allocation48_spill] sm:$0xff] }
 0x3d1   : > { %3342 = vmatpush2.msra.mxu1 %v19776_v53  ;;  %2718 = vmatprep.mubr.f32.mxu0 %v19857_v27  ;;  %v19862_v53 = vand.u32 4294901760, %v19851_v62  ;;  %v1754_v59 = vpop.permute.xlu1 %1753  ;;  %v19879_v62 = vld [vmem:[#allocation41_spill] sm:$0xff] }
 0x3d2   : > { %2954 = vmatprep.mubr.f32.mxu1 %v19858_v56  ;;  %3343 = vmatprep.subr.mxu1 %v19701_v35 }
 0x3d3   : > { %2721 = vmatmul.mubr.f32.gmra.mxu0 %v19859_v17  ;;  %2958 = vmatmul.mubr.f32.gmra.mxu1 %v19860_v41 }
 0x3d4   : > { %3345 = vmatpush2.msra.mxu1 %v19777_v57  ;;  %2727 = vmatprep.mubr.f32.mxu0 %v19861_v47  ;;  %v19864_v57 = vand.u32 4294901760, %v19857_v27  ;;  %v19884_v27 = vld [vmem:[#allocation51_spill] sm:$0xff] }
 0x3d5   : > { %3346 = vmatprep.subr.mxu1 %v19701_v35  ;;  %2965 = vmatprep.mubr.f32.mxu1 %v19862_v53  ;;  %v17649_v40 = vpop.permute.xlu1 %3664 }
 0x3d6   : > { %3348 = vmatpush2.msra.mxu1 %v19778_v8  ;;  %v17600_v8 = vpop.permute.xlu0 %3567 }
 0x3d7   : > { %3349 = vmatprep.subr.mxu1 %v19701_v35  ;;  %2730 = vmatmul.mubr.f32.gmra.mxu0 %v17279_v24  ;;  %v19874_v24 = vld [vmem:[#allocation31_spill] sm:$0xff] }
 0x3d8   : > { %2969 = vmatmul.mubr.f32.gmra.mxu1 %v19863_v0  ;;  %2736 = vmatprep.mubr.f32.mxu0 %v17297_v21  ;;  %v19875_v21 = vand.u32 4294901760, %v17330_v12  ;;  %v19886_v0 = vld [vmem:[#allocation55_spill] sm:$0xff] }
 0x3d9   : > { %3351 = vmatpush2.msra.mxu1 %v16827_v3  ;;  %2976 = vmatprep.mubr.f32.mxu1 %v19864_v57  ;;  %v19866_v3 = vand.u32 4294901760, %v19861_v47  ;;  %v17658_v41 = vpop.permute.xlu1 %3542  ;;  %v19885_v47 = vld [vmem:[#allocation52_spill] sm:$0xff] }
 0x3da   : > { %3352 = vmatprep.subr.mxu1 %v19701_v35  ;;  %v17615_v19 = vpop.permute.xlu0 %1768 }
 0x3db   : > { %3354 = vmatpush2.msra.mxu1 %v19779_v42  ;;  %2739 = vmatmul.mubr.f32.gmra.mxu0 %v17307_v5  ;;  %v19868_v42 = vld [vmem:[#allocation10_spill] sm:$0xff]  ;;  %v19877_v5 = vld [vmem:[#allocation37_spill] sm:$0xff] }
 0x3dc   : > { %2980 = vmatmul.mubr.f32.gmra.mxu1 %v19865_v4  ;;  %2745 = vmatprep.mubr.f32.mxu0 %v17317_v36  ;;  %v19887_v4 = vld [vmem:[#allocation56_spill] sm:$0xff] }
 0x3dd   : > { %2987 = vmatprep.mubr.f32.mxu1 %v19866_v3  ;;  %v19888_v3 = vld [vmem:[#allocation59_spill] sm:$0xff] }
 0x3de   : > { %v17626_v20 = vpop.permute.xlu0 %3679 }
 0x3df   : > { %2748 = vmatmul.mubr.f32.gmra.mxu0 %v17330_v12  ;;  %v19880_v12 = vld [vmem:[#allocation43_spill] sm:$0xff] }
 0x3e0   : > { %2991 = vmatmul.mubr.f32.gmra.mxu1 %v19867_v33  ;;  %3155 = vmatprep.mubr.f32.mxu0 %v19868_v42 }
 0x3e1   : > { %2998 = vmatprep.mubr.f32.mxu1 %v19869_v43  ;;  %v1744_v43 = vpop.permute.xlu1 %1743 }
 0x3e2   : > { %v17638_v36 = vpop.permute.xlu0 %3557 }
 0x3e3   : > { %3157 = vmatmul.mubr.f32.vlgmr.msra.gmra.mxu0 %v19870_v45 }
 0x3e4   : > { %3002 = vmatmul.mubr.f32.gmra.mxu1 %v19871_v30  ;;  %3162 = vmatprep.mubr.f32.mxu0 %v19872_v18  ;;  %v19889_v30 = vld [vmem:[#allocation60_spill] sm:$0xff] }
 0x3e5   : > { %3009 = vmatprep.mubr.f32.mxu1 %v19873_v39 }
 0x3e6   : > { %v17645_v9 = vpop.permute.xlu0 %1758 }
 0x3e7   : > { %3164 = vmatmul.mubr.f32.gmra.mxu0 %v19874_v24 }
 0x3e8   : > { %3013 = vmatmul.mubr.f32.gmra.mxu1 %v19875_v21  ;;  %3169 = vmatprep.mubr.f32.mxu0 %v19876_v37 }
 0x3e9   : > { %3356 = vmatprep.mubr.f32.mxu1 %v19868_v42 }
 0x3ea   : > { %v17656_v17 = vpop.permute.xlu0 %3669 }
 0x3eb   : > { %3171 = vmatmul.mubr.f32.gmra.mxu0 %v19877_v5 }
 0x3ec   : > { %3358 = vmatmul.mubr.f32.vlgmr.msra.gmra.mxu1 %v19870_v45  ;;  %3176 = vmatprep.mubr.f32.mxu0 %v19878_v50 }
 0x3ed   : > { %3363 = vmatprep.mubr.f32.mxu1 %v19872_v18 }
 0x3ee   : > { %v17667_v42 = vpop.permute.xlu0 %3547 }
 0x3ef   : > { %3178 = vmatmul.mubr.f32.gmra.mxu0 %v19879_v62 }
 0x3f0   : > { %3365 = vmatmul.mubr.f32.gmra.mxu1 %v19874_v24  ;;  %3183 = vmatprep.mubr.f32.mxu0 %v19880_v12  ;;  %v19890_v24 = vld [vmem:[#allocation63_spill] sm:$0xff] }
 0x3f1   : > { %3370 = vmatprep.mubr.f32.mxu1 %v19876_v37 }
 0x3f3   : > { %3185 = vmatmul.mubr.f32.gmra.mxu0 %v19881_v10 }
 0x3f4   : > { %3372 = vmatmul.mubr.f32.gmra.mxu1 %v19877_v5  ;;  %3190 = vmatprep.mubr.f32.mxu0 %v19882_v61 }
 0x3f5   : > { %3377 = vmatprep.mubr.f32.mxu1 %v19878_v50  ;;  %v1749_v50 = vpop.permute.xlu0 %1748 }
 0x3f7   : > { %3192 = vmatmul.mubr.f32.gmra.mxu0 %v19883_v13 }
 0x3f8   : > { %3379 = vmatmul.mubr.f32.gmra.mxu1 %v19879_v62  ;;  %3197 = vmatprep.mubr.f32.mxu0 %v19884_v27  ;;  %v19891_v62 = vld [vmem:[#allocation64_spill] sm:$0xff] }
 0x3f9   : > { %3384 = vmatprep.mubr.f32.mxu1 %v19880_v12  ;;  %v1970_v56 = vpop.f32.mrf.mxu0  ;;  %v19892_v12 = vld [vmem:[#allocation67_spill] sm:$0xff] }
 0x3fa   : > { %v1971_v45 = vadd.f32 %v1970_v56, %v1744_v43 }
 0x3fb   : > { %3199 = vmatmul.mubr.f32.gmra.mxu0 %v19885_v47  ;;  %v1972_v53 = vpop.f32.mrf.mxu0 }
 0x3fc   : > { %3386 = vmatmul.mubr.f32.gmra.mxu1 %v19881_v10  ;;  %3204 = vmatprep.mubr.f32.mxu0 %v19886_v0 }
 0x3fd   : > { %3391 = vmatprep.mubr.f32.mxu1 %v19882_v61 }
 0x3fe   : > { %v1985_v57 = vpop.f32.mrf.mxu0 }
 0x3ff   : > { %3206 = vmatmul.mubr.f32.gmra.mxu0 %v19887_v4  ;;  %v1986_v10 = vadd.f32 %v1985_v57, %v1749_v50 }
 0x400   : > { %3393 = vmatmul.mubr.f32.gmra.mxu1 %v19883_v13  ;;  %3211 = vmatprep.mubr.f32.mxu0 %v19888_v3  ;;  %v1987_v33 = vpop.f32.mrf.mxu0 }
 0x401   : > { %3398 = vmatprep.mubr.f32.mxu1 %v19884_v27 }
 0x403   : > { %3213 = vmatmul.mubr.f32.gmra.mxu0 %v19889_v30  ;;  %v2000_v18 = vpop.f32.mrf.mxu0  ;;  %v2387_v39 = vpop.f32.mrf.mxu1 }
 0x404   : > { %3400 = vmatmul.mubr.f32.gmra.mxu1 %v19885_v47  ;;  %3218 = vmatprep.mubr.f32.mxu0 %v19890_v24  ;;  %v17673_v21 = vadd.f32 %v2387_v39, %v1971_v45  ;;  %v2001_v53 = vadd.f32 %v2000_v18, %v1754_v59 }
 0x405   : > { %3405 = vmatprep.mubr.f32.mxu1 %v19886_v0  ;;  %v2002_v37 = vpop.f32.mrf.mxu0  ;;  %v2389_v5 = vpop.f32.mrf.mxu1 }
 0x407   : > { %3220 = vmatmul.mubr.f32.gmra.mxu0 %v19891_v62 }
 0x408   : > { %3407 = vmatmul.mubr.f32.gmra.mxu1 %v19887_v4  ;;  %3225 = vmatprep.mubr.f32.mxu0 %v19892_v12 }
 0x409   : > { %3412 = vmatprep.mubr.f32.mxu1 %v19888_v3  ;;  %v2015_v61 = vpop.f32.mrf.mxu0  ;;  %v2394_v13 = vpop.f32.mrf.mxu1 }
 0x40a   : > { %v17680_v27 = vadd.f32 %v2394_v13, %v1986_v10  ;;  %v2016_v59 = vadd.f32 %v2015_v61, %v17645_v9 }
 0x40b   : > { %3227 = vmatmul.mubr.f32.gmra.mxu0 %v17154_v28  ;;  %v2017_v56 = vpop.f32.mrf.mxu0  ;;  %v2396_v47 = vpop.f32.mrf.mxu1 }
 0x40c   : > { %3414 = vmatmul.mubr.f32.gmra.mxu1 %v19889_v30  ;;  %3232 = vmatprep.mubr.f32.mxu0 %v17177_v58 }
 0x40d   : > { %3419 = vmatprep.mubr.f32.mxu1 %v19890_v24 }
 0x40f   : > { %3234 = vmatmul.mubr.f32.gmra.mxu0 %v17189_v25  ;;  %v2030_v0 = vpop.f32.mrf.mxu0  ;;  %v2401_v57 = vpop.f32.mrf.mxu1 }
 0x410   : > { %3421 = vmatmul.mubr.f32.gmra.mxu1 %v19891_v62  ;;  %3239 = vmatprep.mubr.f32.mxu0 %v17215_v48  ;;  %v17689_v4 = vadd.f32 %v2401_v57, %v2001_v53 }
 0x411   : > { %3426 = vmatprep.mubr.f32.mxu1 %v19892_v12  ;;  %v2032_v3 = vpop.f32.mrf.mxu0  ;;  %v2403_v33 = vpop.f32.mrf.mxu1 }
 0x413   : > { %3241 = vmatmul.mubr.f32.gmra.mxu0 %v17225_v63 }
 0x414   : > { %3428 = vmatmul.mubr.f32.gmra.mxu1 %v17154_v28  ;;  %3246 = vmatprep.mubr.f32.mxu0 %v17232_v44  ;;  %v2031_v28 = vadd.f32 %v2030_v0, %v17605_v2 }
 0x415   : > { %3433 = vmatprep.mubr.f32.mxu1 %v17177_v58  ;;  %v2045_v43 = vpop.f32.mrf.mxu0  ;;  %v2408_v45 = vpop.f32.mrf.mxu1 }
 0x416   : > { %v17697_v30 = vadd.f32 %v2408_v45, %v2016_v59 }
 0x417   : > { %3248 = vmatmul.mubr.f32.gmra.mxu0 %v17256_v31  ;;  %v2047_v18 = vpop.f32.mrf.mxu0  ;;  %v2410_v39 = vpop.f32.mrf.mxu1 }
 0x418   : > { %3435 = vmatmul.mubr.f32.gmra.mxu1 %v17189_v25  ;;  %3253 = vmatprep.mubr.f32.mxu0 %v17271_v14 }
 0x419   : > { %3440 = vmatprep.mubr.f32.mxu1 %v17215_v48  ;;  %v2046_v48 = vadd.f32 %v2045_v43, %v17615_v19 }
 0x41b   : > { %3255 = vmatmul.mubr.f32.gmra.mxu0 %v17281_v1  ;;  %v2060_v9 = vpop.f32.mrf.mxu0  ;;  %v2415_v58 = vpop.f32.mrf.mxu1 }
 0x41c   : > { %3442 = vmatmul.mubr.f32.gmra.mxu1 %v17225_v63  ;;  %3260 = vmatprep.mubr.f32.mxu0 %v17286_v38  ;;  %v17707_v24 = vadd.f32 %v2415_v58, %v2031_v28 }
 0x41d   : > { %3447 = vmatprep.mubr.f32.mxu1 %v17232_v44  ;;  %v2062_v37 = vpop.f32.mrf.mxu0  ;;  %v2417_v25 = vpop.f32.mrf.mxu1  ;;  %v2061_v44 = vadd.f32 %v2060_v9, %v17549_v46 }
 0x41f   : > { %3262 = vmatmul.mubr.f32.gmra.mxu0 %v17309_v22 }
 0x420   : > { %3449 = vmatmul.mubr.f32.gmra.mxu1 %v17256_v31 }
 0x421   : > { %3454 = vmatprep.mubr.f32.mxu1 %v17271_v14  ;;  %v2075_v2 = vpop.f32.mrf.mxu0  ;;  %v2422_v5 = vpop.f32.mrf.mxu1 }
 0x422   : > { %v17714_v50 = vadd.f32 %v2422_v5, %v2046_v48  ;;  %v2076_v61 = vadd.f32 %v2075_v2, %v17564_v15 }
 0x423   : > { %v2077_v63 = vpop.f32.mrf.mxu0  ;;  %v2424_v62 = vpop.f32.mrf.mxu1 }
 0x424   : > { %3456 = vmatmul.mubr.f32.gmra.mxu1 %v17281_v1 }
 0x425   : > { %3461 = vmatprep.mubr.f32.mxu1 %v17286_v38 }
 0x427   : > { %v2090_v12 = vpop.f32.mrf.mxu0  ;;  %v2429_v10 = vpop.f32.mrf.mxu1 }
 0x428   : > { %3463 = vmatmul.mubr.f32.gmra.mxu1 %v17309_v22  ;;  %v17720_v31 = vadd.f32 %v2429_v10, %v2061_v44  ;;  %v2091_v38 = vadd.f32 %v2090_v12, %v17544_v55 }
 0x429   : > { %v2092_v19 = vpop.f32.mrf.mxu0  ;;  %v2431_v14 = vpop.f32.mrf.mxu1 }
 0x42d   : > { %v2105_v13 = vpop.f32.mrf.mxu0  ;;  %v2436_v56 = vpop.f32.mrf.mxu1 }
 0x42e   : > { %v17723_v47 = vadd.f32 %v2436_v56, %v2076_v61  ;;  %v2106_v33 = vadd.f32 %v2105_v13, %v17489_v6 }
 0x42f   : > { %v2107_v53 = vpop.f32.mrf.mxu0  ;;  %v2438_v1 = vpop.f32.mrf.mxu1 }
 0x433   : > { %v2120_v0 = vpop.f32.mrf.mxu0  ;;  %v2443_v46 = vpop.f32.mrf.mxu1 }
 0x434   : > { %v17726_v57 = vadd.f32 %v2443_v46, %v2091_v38  ;;  %v2121_v39 = vadd.f32 %v2120_v0, %v17524_v23 }
 0x435   : > { %v2122_v3 = vpop.f32.mrf.mxu0  ;;  %v2445_v22 = vpop.f32.mrf.mxu1 }
 0x439   : > { %v2135_v59 = vpop.f32.mrf.mxu0  ;;  %v2450_v43 = vpop.f32.mrf.mxu1 }
 0x43a   : > { %v17729_v45 = vadd.f32 %v2450_v43, %v2106_v33  ;;  %v2136_v25 = vadd.f32 %v2135_v59, %v17469_v16 }
 0x43b   : > { %v2137_v15 = vpop.f32.mrf.mxu0  ;;  %v2452_v18 = vpop.f32.mrf.mxu1 }
 0x43f   : > { %v2150_v28 = vpop.f32.mrf.mxu0  ;;  %v2457_v9 = vpop.f32.mrf.mxu1 }
 0x440   : > { %v17732_v58 = vadd.f32 %v2457_v9, %v2121_v39  ;;  %v2151_v62 = vadd.f32 %v2150_v28, %v17504_v26 }
 0x441   : > { %v2152_v55 = vpop.f32.mrf.mxu0  ;;  %v2459_v37 = vpop.f32.mrf.mxu1 }
 0x443   : > { %v2165_v48 = vpop.f32.mrf.mxu0 }
 0x444   : > { %v2464_v2 = vpop.f32.mrf.mxu1  ;;  %v2166_v14 = vadd.f32 %v2165_v48, %v17451_v49 }
 0x445   : > { %v17735_v5 = vadd.f32 %v2464_v2, %v2136_v25  ;;  %v2167_v6 = vpop.f32.mrf.mxu0 }
 0x446   : > { %v2466_v63 = vpop.f32.mrf.mxu1 }
 0x447   : > { %v2180_v44 = vpop.f32.mrf.mxu0 }
 0x448   : > { %v2471_v12 = vpop.f32.mrf.mxu1  ;;  %v2181_v1 = vadd.f32 %v2180_v44, %v17484_v7 }
 0x449   : > { %v17738_v10 = vadd.f32 %v2471_v12, %v2151_v62  ;;  %v2182_v23 = vpop.f32.mrf.mxu0 }
 0x44a   : > { %v2473_v19 = vpop.f32.mrf.mxu1 }
 0x44b   : > { %v2195_v61 = vpop.f32.mrf.mxu0 }
 0x44c   : > { %v2478_v13 = vpop.f32.mrf.mxu1  ;;  %v2196_v33 = vadd.f32 %v2195_v61, %v17433_v51 }
 0x44d   : > { %v17741_v56 = vadd.f32 %v2478_v13, %v2166_v14  ;;  %v2197_v16 = vpop.f32.mrf.mxu0 }
 0x44e   : > { %v2480_v53 = vpop.f32.mrf.mxu1 }
 0x44f   : > { %v2614_v38 = vpop.f32.mrf.mxu0 }
 0x450   : > { %v2485_v0 = vpop.f32.mrf.mxu1  ;;  %v2615_v26 = vadd.f32 %v2614_v38, %v17673_v21 }
 0x451   : > { %v17745_v46 = vadd.f32 %v2485_v0, %v2181_v1  ;;  %v2616_v3 = vpop.f32.mrf.mxu0 }
 0x452   : > { %v2487_v22 = vpop.f32.mrf.mxu1 }
 0x453   : > { %v2623_v59 = vpop.f32.mrf.mxu0 }
 0x454   : > { %v2492_v49 = vpop.f32.mrf.mxu1  ;;  %v2624_v43 = vadd.f32 %v2623_v59, %v17680_v27 }
 0x455   : > { %v17749_v15 = vadd.f32 %v2492_v49, %v2196_v33  ;;  %v2625_v18 = vpop.f32.mrf.mxu0 }
 0x456   : > { %v2494_v39 = vpop.f32.mrf.mxu1 }
 0x457   : > { %v2632_v28 = vpop.f32.mrf.mxu0 }
 0x458   : > { %v2633_v7 = vadd.f32 %v2632_v28, %v17689_v4  ;;  %v2849_v9 = vpop.f32.mrf.mxu1 }
 0x459   : > { %v17752_v55 = vadd.f32 %v2849_v9, %v2615_v26  ;;  %v2634_v21 = vpop.f32.mrf.mxu0 }
 0x45a   : > { %v2851_v37 = vpop.f32.mrf.mxu1 }
 0x45d   : > { %v2641_v25 = vpop.f32.mrf.mxu0 }
 0x45e   : > { %v2642_v48 = vadd.f32 %v2641_v25, %v17697_v30  ;;  %v2860_v51 = vpop.f32.mrf.mxu1 }
 0x45f   : > { %v17755_v2 = vadd.f32 %v2860_v51, %v2624_v43  ;;  %v2643_v6 = vpop.f32.mrf.mxu0 }
 0x460   : > { %v2862_v27 = vpop.f32.mrf.mxu1 }
 0x463   : > { %v2650_v63 = vpop.f32.mrf.mxu0 }
 0x464   : > { %v2651_v62 = vadd.f32 %v2650_v63, %v17707_v24  ;;  %v2871_v44 = vpop.f32.mrf.mxu1 }
 0x465   : > { %v17758_v12 = vadd.f32 %v2871_v44, %v2633_v7  ;;  %v2652_v4 = vpop.f32.mrf.mxu0 }
 0x466   : > { %v2873_v23 = vpop.f32.mrf.mxu1 }
 0x469   : > { %v2659_v19 = vpop.f32.mrf.mxu0 }
 0x46a   : > { %v2660_v14 = vadd.f32 %v2659_v19, %v17714_v50  ;;  %v2882_v61 = vpop.f32.mrf.mxu1 }
 0x46b   : > { %v17761_v13 = vadd.f32 %v2882_v61, %v2642_v48  ;;  %v2661_v30 = vpop.f32.mrf.mxu0 }
 0x46c   : > { %v2884_v16 = vpop.f32.mrf.mxu1 }
 0x46f   : > { %v2668_v53 = vpop.f32.mrf.mxu0 }
 0x470   : > { %v2669_v1 = vadd.f32 %v2668_v53, %v17720_v31  ;;  %v2893_v38 = vpop.f32.mrf.mxu1 }
 0x471   : > { %v17764_v0 = vadd.f32 %v2893_v38, %v2651_v62  ;;  %v2670_v24 = vpop.f32.mrf.mxu0  ;;  %v3708_v62 = vld [vmem:[%s19457_s9] sm:$0xff] }
 0x472   : > { %v2895_v26 = vpop.f32.mrf.mxu1  ;;  %v17781_v4 = vand.u32 4294901760, %v3708_v62 }
 0x474   : > { %19893 = vst [vmem:[#allocation30_spill] sm:$0xff] %v17781_v4  ;;  %14653 = vmatprep.mubr.f32.mxu1 %v17781_v4 }
 0x475   : > { %v2677_v3 = vpop.f32.mrf.mxu0 }
 0x476   : > { %v2678_v22 = vadd.f32 %v2677_v3, %v17723_v47  ;;  %v2904_v33 = vpop.f32.mrf.mxu1 }
 0x477   : > { %v17767_v59 = vadd.f32 %v2904_v33, %v2660_v14  ;;  %v2679_v50 = vpop.f32.mrf.mxu0 }
 0x478   : > { %v2906_v49 = vpop.f32.mrf.mxu1 }
 0x47b   : > { %v2686_v43 = vpop.f32.mrf.mxu0 }
 0x47c   : > { %v2687_v18 = vadd.f32 %v2686_v43, %v17726_v57  ;;  %v2915_v39 = vpop.f32.mrf.mxu1 }
 0x47d   : > { %v17770_v28 = vadd.f32 %v2915_v39, %v2669_v1  ;;  %v2688_v31 = vpop.f32.mrf.mxu0 }
 0x47e   : > { %v2917_v7 = vpop.f32.mrf.mxu1 }
 0x481   : > { %v2695_v9 = vpop.f32.mrf.mxu0 }
 0x482   : > { %v2696_v21 = vadd.f32 %v2695_v9, %v17729_v45  ;;  %v2926_v37 = vpop.f32.mrf.mxu1  ;;  %v17784_v45 = vsub.f32 %v3708_v62, %v17781_v4 }
 0x483   : > { %v17773_v25 = vadd.f32 %v2926_v37, %v2678_v22  ;;  %v2697_v47 = vpop.f32.mrf.mxu0 }
 0x484   : > { %v2928_v48 = vpop.f32.mrf.mxu1  ;;  %19894 = vst [vmem:[#allocation17_spill] sm:$0xff] %v17784_v45  ;;  %v19632_v14 = vand.u32 4294901760, %v17784_v45 }
 0x486   : > { %v3800_v53 = vsub.f32 %v17784_v45, %v19632_v14 }
 0x487   : > { %v2704_v51 = vpop.f32.mrf.mxu0 }
 0x488   : > { %v2705_v6 = vadd.f32 %v2704_v51, %v17732_v58  ;;  %v2937_v27 = vpop.f32.mrf.mxu1  ;;  %v3801_v1 = vand.u32 4294901760, %v3800_v53 }
 0x489   : > { %v17776_v63 = vadd.f32 %v2937_v27, %v2687_v18  ;;  %v2706_v57 = vpop.f32.mrf.mxu0 }
 0x48a   : > { %v2939_v44 = vpop.f32.mrf.mxu1  ;;  %14609 = vmatprep.mubr.f32.mxu0 %v3801_v1 }
 0x48d   : > { %v2713_v23 = vpop.f32.mrf.mxu0 }
 0x48e   : > { %v2714_v19 = vadd.f32 %v2713_v23, %v17735_v5  ;;  %v2948_v58 = vpop.f32.mrf.mxu1 }
 0x48f   : > { %v17789_v61 = vadd.f32 %v2948_v58, %v2696_v21  ;;  %v2715_v30 = vpop.f32.mrf.mxu0 }
 0x490   : > { %v2950_v16 = vpop.f32.mrf.mxu1 }
 0x493   : > { %v2722_v38 = vpop.f32.mrf.mxu0  ;;  %v2959_v24 = vpop.f32.mrf.mxu1 }
 0x494   : > { %v2723_v26 = vadd.f32 %v2722_v38, %v17738_v10  ;;  %v17795_v3 = vadd.f32 %v2959_v24, %v2705_v6 }
 0x495   : > { %v2724_v5 = vpop.f32.mrf.mxu0  ;;  %v2961_v22 = vpop.f32.mrf.mxu1 }
 0x497   : > { %v2731_v33 = vpop.f32.mrf.mxu0 }
 0x498   : > { %v2732_v50 = vadd.f32 %v2731_v33, %v17741_v56  ;;  %v2970_v49 = vpop.f32.mrf.mxu1 }
 0x499   : > { %v17798_v43 = vadd.f32 %v2970_v49, %v2714_v19  ;;  %v2733_v18 = vpop.f32.mrf.mxu0 }
 0x49a   : > { %v2972_v39 = vpop.f32.mrf.mxu1 }
 0x49b   : > { %v2740_v31 = vpop.f32.mrf.mxu0 }
 0x49c   : > { %v2741_v7 = vadd.f32 %v2740_v31, %v17745_v46  ;;  %v2981_v9 = vpop.f32.mrf.mxu1 }
 0x49d   : > { %v17801_v21 = vadd.f32 %v2981_v9, %v2723_v26  ;;  %v2742_v10 = vpop.f32.mrf.mxu0 }
 0x49e   : > { %v2983_v37 = vpop.f32.mrf.mxu1 }
 0x49f   : > { %v2749_v47 = vpop.f32.mrf.mxu0 }
 0x4a0   : > { %v17804_v48 = vadd.f32 %v2749_v47, %v17749_v15  ;;  %v2992_v51 = vpop.f32.mrf.mxu1 }
 0x4a1   : > { %v17806_v6 = vadd.f32 %v2992_v51, %v2732_v50  ;;  %v2751_v56 = vpop.f32.mrf.mxu0 }
 0x4a2   : > { %v2994_v27 = vpop.f32.mrf.mxu1 }
 0x4a3   : > { %v3158_v57 = vpop.f32.mrf.mxu0 }
 0x4a4   : > { %v3003_v62 = vpop.f32.mrf.mxu1  ;;  %v3159_v44 = vadd.f32 %v3158_v57, %v17752_v55 }
 0x4a5   : > { %v17809_v23 = vadd.f32 %v3003_v62, %v2741_v7  ;;  %v3160_v46 = vpop.f32.mrf.mxu0 }
 0x4a6   : > { %v3005_v19 = vpop.f32.mrf.mxu1 }
 0x4a7   : > { %v3165_v58 = vpop.f32.mrf.mxu0 }
 0x4a8   : > { %v17811_v30 = vpop.f32.mrf.mxu1  ;;  %v3166_v16 = vadd.f32 %v3165_v58, %v17755_v2 }
 0x4a9   : > { %v3167_v15 = vpop.f32.mrf.mxu0 }
 0x4aa   : > { %v3016_v53 = vpop.f32.mrf.mxu1 }
 0x4ab   : > { %v3172_v1 = vpop.f32.mrf.mxu0 }
 0x4ac   : > { %v3173_v38 = vadd.f32 %v3172_v1, %v17758_v12  ;;  %v3359_v24 = vpop.f32.mrf.mxu1 }
 0x4ad   : > { %v17815_v26 = vadd.f32 %v3359_v24, %v3159_v44  ;;  %v3174_v5 = vpop.f32.mrf.mxu0 }
 0x4ae   : > { %v3361_v22 = vpop.f32.mrf.mxu1 }
 0x4af   : > { %19895 = vst [vmem:[#allocation20_spill] sm:$0xff] %v17815_v26  ;;  %v3179_v55 = vpop.f32.mrf.mxu0 }
 0x4b0   : > { %v3180_v33 = vadd.f32 %v3179_v55, %v17761_v13  ;;  %v3366_v50 = vpop.f32.mrf.mxu1 }
 0x4b1   : > { %v17818_v49 = vadd.f32 %v3366_v50, %v3166_v16  ;;  %v3181_v18 = vpop.f32.mrf.mxu0 }
 0x4b2   : > { %v3368_v39 = vpop.f32.mrf.mxu1 }
 0x4b3   : > { %19896 = vst [vmem:[#allocation22_spill] sm:$0xff] %v17818_v49  ;;  %v3186_v31 = vpop.f32.mrf.mxu0 }
 0x4b4   : > { %v3187_v2 = vadd.f32 %v3186_v31, %v17764_v0  ;;  %v3373_v7 = vpop.f32.mrf.mxu1 }
 0x4b5   : > { %v17821_v9 = vadd.f32 %v3373_v7, %v3173_v38  ;;  %v3188_v12 = vpop.f32.mrf.mxu0 }
 0x4b6   : > { %v3375_v10 = vpop.f32.mrf.mxu1 }
 0x4b7   : > { %19897 = vst [vmem:[#allocation25_spill] sm:$0xff] %v17821_v9  ;;  %v3193_v37 = vpop.f32.mrf.mxu0 }
 0x4b8   : > { %v17824_v47 = vadd.f32 %v3193_v37, %v17767_v59  ;;  %v3380_v51 = vpop.f32.mrf.mxu1 }
 0x4b9   : > { %v17826_v56 = vadd.f32 %v3380_v51, %v3180_v33  ;;  %v3195_v13 = vpop.f32.mrf.mxu0  ;;  %v17840_v33 = vpop.permute.xlu0 %3659 }
 0x4ba   : > { %v3382_v27 = vpop.f32.mrf.mxu1 }
 0x4bb   : > { %v17828_v57 = vpop.f32.mrf.mxu0  ;;  %v17844_v27 = vpop.permute.xlu1 %3654 }
 0x4bc   : > { %v3387_v62 = vpop.f32.mrf.mxu1 }
 0x4bd   : > { %v17830_v44 = vadd.f32 %v3387_v62, %v3187_v2  ;;  %v3202_v0 = vpop.f32.mrf.mxu0  ;;  %v17842_v12 = vpop.permute.xlu0 %3537 }
 0x4be   : > { %v3389_v46 = vpop.f32.mrf.mxu1 }
 0x4bf   : > { %v17832_v19 = vpop.f32.mrf.mxu0 }
 0x4c0   : > { %v17834_v58 = vpop.f32.mrf.mxu1 }
 0x4c1   : > { %v3209_v16 = vpop.f32.mrf.mxu0  ;;  %v17846_v46 = vpop.permute.xlu0 %3532 }
 0x4c2   : > { %v3396_v15 = vpop.f32.mrf.mxu1 }
 0x4c3   : > { %v3214_v59 = vpop.f32.mrf.mxu0 }
 0x4c4   : > { %v17836_v53 = vpop.f32.mrf.mxu1 }
 0x4c5   : > { %v3216_v1 = vpop.f32.mrf.mxu0 }
 0x4c6   : > { %v3403_v38 = vpop.f32.mrf.mxu1 }
 0x4c7   : > { %v3221_v24 = vpop.f32.mrf.mxu0 }
 0x4c8   : > { %v17838_v5 = vpop.f32.mrf.mxu1 }
 0x4c9   : > { %v3223_v22 = vpop.f32.mrf.mxu0 }
 0x4ca   : > { %v3410_v55 = vpop.f32.mrf.mxu1  ;;  %v17848_v22 = vpop.permute.xlu1 %3649 }
 0x4cb   : > { %v3228_v50 = vpop.f32.mrf.mxu0  ;;  %19898 = vst [vmem:[#allocation28_spill] sm:$0xff] %v17848_v22  ;;  %v3222_v22 = vadd.f32 %v3221_v24, %v17789_v61  ;;  %v3208_v61 = vadd.f32 %v17832_v19, %v17773_v25 }
 0x4cc   : > { %v3415_v18 = vpop.f32.mrf.mxu1 }
 0x4cd   : > { %v3230_v39 = vpop.f32.mrf.mxu0 }
 0x4ce   : > { %v3417_v31 = vpop.f32.mrf.mxu1  ;;  %v17855_v26 = vpop.permute.xlu1 %3644 }
 0x4cf   : > { %v3235_v2 = vpop.f32.mrf.mxu0  ;;  %v17850_v31 = vpop.permute.xlu0 %3527 }
 0x4d0   : > { %v3422_v7 = vpop.f32.mrf.mxu1  ;;  %19899 = vst [vmem:[#allocation32_spill] sm:$0xff] %v17850_v31  ;;  %v3236_v35 = vadd.f32 %v3235_v2, %v17798_v43 }
 0x4d1   : > { %v3237_v10 = vpop.f32.mrf.mxu0 }
 0x4d2   : > { %v3424_v37 = vpop.f32.mrf.mxu1 }
 0x4d3   : > { %v3242_v51 = vpop.f32.mrf.mxu0 }
 0x4d4   : > { %v3429_v13 = vpop.f32.mrf.mxu1  ;;  %v3243_v10 = vadd.f32 %v3242_v51, %v17801_v21  ;;  %v17859_v21 = vpop.permute.xlu0 %3522  ;;  %v3215_v51 = vadd.f32 %v3214_v59, %v17776_v63 }
 0x4d5   : > { %v3244_v62 = vpop.f32.mrf.mxu0 }
 0x4d6   : > { %v3431_v0 = vpop.f32.mrf.mxu1  ;;  %v3416_v24 = vadd.f32 %v3415_v18, %v3215_v51 }
 0x4d7   : > { %v3249_v16 = vpop.f32.mrf.mxu0 }
 0x4d8   : > { %v3436_v15 = vpop.f32.mrf.mxu1  ;;  %v3250_v62 = vadd.f32 %v3249_v16, %v17806_v6  ;;  %v3423_v16 = vadd.f32 %v3422_v7, %v3222_v22  ;;  %v3201_v7 = vadd.f32 %v17828_v57, %v17770_v28 }
 0x4d9   : > { %v3251_v1 = vpop.f32.mrf.mxu0 }
 0x4da   : > { %v3438_v38 = vpop.f32.mrf.mxu1  ;;  %v3229_v1 = vadd.f32 %v3228_v50, %v17795_v3  ;;  %v3015_v3 = vadd.f32 %v17811_v30, %v17804_v48  ;;  %v3409_v48 = vadd.f32 %v17838_v5, %v3208_v61  ;;  %v3477_v30 = vmax.f32 %v3423_v16, 0.0 }
 0x4db   : > { %v3256_v55 = vpop.f32.mrf.mxu0  ;;  %v3437_v38 = vadd.f32 %v3436_v15, %v3236_v35  ;;  %v17874_v15 = vpop.permute.xlu0 %3517 }
 0x4dc   : > { %v3443_v39 = vpop.f32.mrf.mxu1  ;;  %v3257_v43 = vadd.f32 %v3256_v55, %v17809_v23 }
 0x4dd   : > { %v3258_v37 = vpop.f32.mrf.mxu0  ;;  %v3444_v0 = vadd.f32 %v3443_v39, %v3243_v10  ;;  %v3479_v35 = vmax.f32 %v3437_v38, 0.0  ;;  %v3395_v10 = vadd.f32 %v17834_v58, %v17824_v47 }
 0x4de   : > { %v3445_v14 = vpop.f32.mrf.mxu1 }
 0x4df   : > { %v3263_v4 = vpop.f32.mrf.mxu0  ;;  %v3430_v14 = vadd.f32 %v3429_v13, %v3229_v1  ;;  %v3480_v2 = vmax.f32 %v3444_v0, 0.0  ;;  %v17868_v13 = vpop.permute.xlu1 %3639  ;;  %v3591_v25 = vmul.f32 %v17638_v36, %v3479_v35  ;;  %v3475_v36 = vmax.f32 %v3409_v48, 0.0 }
 0x4e0   : > { %v3450_v45 = vpop.f32.mrf.mxu1  ;;  %v3264_v63 = vadd.f32 %v3263_v4, %v3015_v3  ;;  %v3476_v4 = vmax.f32 %v3416_v24, 0.0  ;;  %v19901_v3 = vld [vmem:[#allocation28_spill] sm:$0xff] }
 0x4e1   : > { %v3451_v49 = vadd.f32 %v3450_v45, %v3250_v62  ;;  %v3265_v9 = vpop.f32.mrf.mxu0  ;;  %v3478_v23 = vmax.f32 %v3430_v14, 0.0  ;;  %v3587_v58 = vmul.f32 %v17842_v12, %v3475_v36 }
 0x4e2   : > { %v3452_v31 = vpop.f32.mrf.mxu1 }
 0x4e3   : > { %v3481_v6 = vmax.f32 %v3451_v49, 0.0  ;;  %v3592_v49 = vmul.f32 %v17587_v32, %v3480_v2  ;;  %v3402_v32 = vadd.f32 %v17836_v53, %v3201_v7  ;;  %v3590_v31 = vmul.f32 %v17631_v52, %v3478_v23  ;;  %v3635_v37 = vpop.permute.xlu1 %3634 }
 0x4e4   : > { %v3457_v39 = vpop.f32.mrf.mxu1 }
 0x4e5   : > { %v3593_v45 = vmul.f32 %v17600_v8, %v3481_v6  ;;  %v3458_v9 = vadd.f32 %v3457_v39, %v3257_v43  ;;  %v3704_v28 = vadd.f32 %v17617_v54, %v3592_v49  ;;  %v3474_v0 = vmax.f32 %v3402_v32, 0.0  ;;  %v19900_v39 = vld [vmem:[#allocation32_spill] sm:$0xff] }
 0x4e6   : > { %v3459_v50 = vpop.f32.mrf.mxu1  ;;  %v3588_v54 = vmul.f32 %v17658_v41, %v3476_v4  ;;  %v3702_v1 = vadd.f32 %v17649_v40, %v3590_v31  ;;  %v3472_v40 = vmax.f32 %v17830_v44, 0.0  ;;  %v3471_v44 = vmax.f32 %v17826_v56, 0.0  ;;  %v19902_v56 = vld [vmem:[#allocation25_spill] sm:$0xff] }
 0x4e7   : > { %v3482_v59 = vmax.f32 %v3458_v9, 0.0  ;;  %v3705_v19 = vadd.f32 %v17626_v20, %v3593_v45  ;;  %v3589_v20 = vmul.f32 %v17667_v42, %v3477_v30  ;;  %v17894_v38 = vand.u32 4294901760, %v3704_v28  ;;  %v3630_v51 = vpop.permute.xlu1 %3629 }
 0x4e8   : > { %v3464_v8 = vpop.f32.mrf.mxu1  ;;  %v3586_v2 = vmul.f32 %v17846_v46, %v3474_v0  ;;  %v3700_v6 = vadd.f32 %v17844_v27, %v3588_v54  ;;  %v3699_v27 = vadd.f32 %v19901_v3, %v3587_v58  ;;  %v3470_v50 = vmax.f32 %v19902_v56, 0.0 }
 0x4e9   : > { %v3594_v18 = vmul.f32 %v17529_v29, %v3482_v59  ;;  %v3465_v22 = vadd.f32 %v3464_v8, %v3264_v63  ;;  %v3703_v29 = vadd.f32 %v17656_v17, %v3591_v25  ;;  %v17887_v62 = vand.u32 4294901760, %v3705_v19 }
 0x4ea   : > { %v3466_v55 = vpop.f32.mrf.mxu1  ;;  %v3473_v17 = vmax.f32 %v3395_v10, 0.0  ;;  %v3701_v14 = vadd.f32 %v17840_v33, %v3589_v20  ;;  %v17915_v12 = vsub.f32 %v3704_v28, %v17894_v38  ;;  %v3584_v23 = vmul.f32 %v17859_v21, %v3472_v40  ;;  %v19903_v21 = vld [vmem:[#allocation22_spill] sm:$0xff] }
 0x4eb   : > { %v3706_v57 = vadd.f32 %v17569_v34, %v3594_v18  ;;  %v3483_v5 = vmax.f32 %v3465_v22, 0.0  ;;  %v3513_v34 = vpop.permute.xlu0 %3512  ;;  %v17902_v43 = vand.u32 4294901760, %v3703_v29  ;;  %v3698_v49 = vadd.f32 %v17855_v26, %v3586_v2  ;;  %v3625_v18 = vpop.permute.xlu1 %3624 }
 0x4ec   : > { %v3585_v46 = vmul.f32 %v19900_v39, %v3473_v17  ;;  %v17928_v45 = vand.u32 4294901760, %v3701_v14  ;;  %v17943_v63 = vand.u32 4294901760, %v3700_v6  ;;  %v17955_v30 = vand.u32 4294901760, %v17915_v12  ;;  %v3709_v17 = vld [vmem:[%s19457_s9 + $0x8] sm:$0xff] }
 0x4ed   : > { %v17889_v53 = vand.u32 4294901760, %v3706_v57  ;;  %v3595_v52 = vmul.f32 %v17509_v60, %v3483_v5  ;;  %v17905_v60 = vsub.f32 %v3705_v19, %v17887_v62  ;;  %v17931_v9 = vsub.f32 %v3703_v29, %v17902_v43 }
 0x4ee   : > { %v3469_v26 = vmax.f32 %v19903_v21, 0.0  ;;  %v3583_v8 = vmul.f32 %v17874_v15, %v3471_v44  ;;  %v3697_v25 = vadd.f32 %v17868_v13, %v3585_v46  ;;  %v17960_v19 = vand.u32 4294901760, %v3699_v27  ;;  %v19904_v15 = vld [vmem:[#allocation20_spill] sm:$0xff] }
 0x4ef   : > { %v17897_v47 = vsub.f32 %v3706_v57, %v17889_v53  ;;  %v3707_v42 = vadd.f32 %v17584_v11, %v3595_v52  ;;  %v17912_v11 = vand.u32 4294901760, %v3702_v1  ;;  %v3508_v35 = vpop.permute.xlu0 %3507  ;;  %v17938_v24 = vand.u32 4294901760, %v17905_v60  ;;  %v3620_v2 = vpop.permute.xlu1 %3619 }
 0x4f0   : > { %v17964_v22 = vsub.f32 %v3701_v14, %v17928_v45  ;;  %v17970_v55 = vand.u32 4294901760, %v17931_v9  ;;  %v3468_v31 = vmax.f32 %v19904_v15, 0.0  ;;  %v3582_v13 = vmul.f32 %v3513_v34, %v3470_v50 }
 0x4f1   : > { %v17907_v41 = vand.u32 4294901760, %v3707_v42  ;;  %v17922_v16 = vand.u32 4294901760, %v17897_v47  ;;  %v17947_v59 = vsub.f32 %v3702_v1, %v17912_v11  ;;  %v3895_v4 = vsub.f32 %v17905_v60, %v17938_v24 }
 0x4f2   : > { %v3696_v28 = vadd.f32 %v3635_v37, %v3584_v23  ;;  %v17973_v57 = vand.u32 4294901760, %v3698_v49  ;;  %v17977_v10 = vsub.f32 %v3700_v6, %v17943_v63  ;;  %v3902_v20 = vsub.f32 %v17915_v12, %v17955_v30 }
 0x4f3   : > { %v17918_v33 = vsub.f32 %v3707_v42, %v17907_v41  ;;  %14577 = vmatprep.subr.mxu0 %v17907_v41  ;;  %v3888_v48 = vsub.f32 %v17897_v47, %v17922_v16  ;;  %v3503_v5 = vpop.permute.xlu0 %3502  ;;  %v17983_v29 = vand.u32 4294901760, %v17947_v59  ;;  %v3581_v52 = vmul.f32 %v3508_v35, %v3469_v26 }
 0x4f4   : > { %14578 = vmatpush3.msra.mxu0 %v17907_v41  ;;  %v3695_v37 = vadd.f32 %v3630_v51, %v3583_v8  ;;  %v17985_v0 = vand.u32 4294901760, %v3697_v25  ;;  %v17989_v54 = vsub.f32 %v3699_v27, %v17960_v19  ;;  %v3896_v34 = vand.u32 4294901760, %v3895_v4 }
 0x4f5   : > { %14579 = vmatprep.subr.mxu0 %v17889_v53  ;;  %v17935_v61 = vand.u32 4294901760, %v17918_v33  ;;  %v3889_v36 = vand.u32 4294901760, %v3888_v48  ;;  %v3909_v1 = vsub.f32 %v17931_v9, %v17970_v55  ;;  %v17995_v42 = vand.u32 4294901760, %v17964_v22 }
 0x4f6   : > { %14580 = vmatpush3.msra.mxu0 %v17889_v53  ;;  %v3580_v58 = vmul.f32 %v3503_v5, %v3468_v31  ;;  %v3694_v14 = vadd.f32 %v3625_v18, %v3582_v13  ;;  %v18000_v40 = vand.u32 4294901760, %v3696_v28  ;;  %v18004_v6 = vsub.f32 %v3698_v49, %v17973_v57 }
 0x4f7   : > { %14581 = vmatprep.subr.mxu0 %v17887_v62  ;;  %v3881_v7 = vsub.f32 %v17918_v33, %v17935_v61  ;;  %v3903_v51 = vand.u32 4294901760, %v3902_v20  ;;  %v3916_v44 = vsub.f32 %v17947_v59, %v17983_v29  ;;  %v18010_v39 = vand.u32 4294901760, %v17977_v10  ;;  %v3615_v35 = vpop.permute.xlu0 %3614 }
 0x4f8   : > { %14582 = vmatpush3.msra.mxu0 %v17887_v62  ;;  %v3693_v46 = vadd.f32 %v3620_v2, %v3581_v52  ;;  %v18012_v3 = vand.u32 4294901760, %v3695_v37  ;;  %v18015_v27 = vand.u32 4294901760, %v3709_v17  ;;  %v18018_v56 = vsub.f32 %v3697_v25, %v17985_v0 }
 0x4f9   : > { %14583 = vmatprep.subr.mxu0 %v17894_v38  ;;  %v3882_v32 = vand.u32 4294901760, %v3881_v7  ;;  %v3910_v50 = vand.u32 4294901760, %v3909_v1  ;;  %v3923_v23 = vsub.f32 %v17964_v22, %v17995_v42  ;;  %v18024_v49 = vand.u32 4294901760, %v17989_v54 }
 0x4fa   : > { %14584 = vmatpush3.msra.mxu0 %v17894_v38  ;;  %v3692_v7 = vadd.f32 %v3615_v35, %v3580_v58  ;;  %v18026_v48 = vand.u32 4294901760, %v3694_v14  ;;  %v18030_v21 = vsub.f32 %v3696_v28, %v18000_v40  ;;  %v3917_v26 = vand.u32 4294901760, %v3916_v44 }
 0x4fb   : > { %14585 = vmatprep.subr.mxu0 %v17902_v43  ;;  %14621 = vmatprep.subr.mxu1 %v3882_v32  ;;  %v3930_v8 = vsub.f32 %v17977_v10, %v18010_v39  ;;  %v18036_v25 = vand.u32 4294901760, %v18004_v6  ;;  %v18038_v18 = vand.u32 4294901760, %v3693_v46  ;;  %v18045_v4 = vsub.f32 %v3695_v37, %v18012_v3 }
 0x4fc   : > { %14586 = vmatpush3.msra.mxu0 %v17902_v43  ;;  %14622 = vmatpush3.msra.mxu1 %v3882_v32  ;;  %v18042_v32 = vsub.f32 %v3709_v17, %v18015_v27  ;;  %v3924_v15 = vand.u32 4294901760, %v3923_v23  ;;  %v3937_v31 = vsub.f32 %v17989_v54, %v18024_v49  ;;  %v18051_v13 = vand.u32 4294901760, %v18018_v56 }
 0x4fd   : > { %14587 = vmatprep.subr.mxu0 %v17912_v11  ;;  %14623 = vmatprep.subr.mxu1 %v3889_v36  ;;  %v18053_v28 = vand.u32 4294901760, %v3692_v7  ;;  %v18057_v5 = vsub.f32 %v3694_v14, %v18026_v48  ;;  %v3944_v20 = vsub.f32 %v18004_v6, %v18036_v25  ;;  %v18063_v52 = vand.u32 4294901760, %v18030_v21 }
 0x4fe   : > { %14588 = vmatpush3.msra.mxu0 %v17912_v11  ;;  %14624 = vmatpush3.msra.mxu1 %v3889_v36  ;;  %v3931_v36 = vand.u32 4294901760, %v3930_v8  ;;  %v3809_v37 = vand.u32 4294901760, %v18042_v32  ;;  %v3938_v1 = vand.u32 4294901760, %v3937_v31  ;;  %v3951_v17 = vsub.f32 %v18018_v56, %v18051_v13 }
 0x4ff   : > { %14589 = vmatprep.subr.mxu0 %v17928_v45  ;;  %14625 = vmatprep.subr.mxu1 %v3896_v34  ;;  %v18074_v58 = vand.u32 4294901760, %v18045_v4  ;;  %v18078_v14 = vsub.f32 %v3692_v7, %v18053_v28  ;;  %v3945_v2 = vand.u32 4294901760, %v3944_v20  ;;  %v18084_v44 = vand.u32 4294901760, %v18057_v5  ;;  %v3710_v20 = vld [vmem:[%s19457_s9 + $0x10] sm:$0xff] }
 0x500   : > { %14590 = vmatpush3.msra.mxu0 %v17928_v45  ;;  %14626 = vmatpush3.msra.mxu1 %v3896_v34  ;;  %v18068_v34 = vsub.f32 %v3693_v46, %v18038_v18  ;;  %v3810_v46 = vsub.f32 %v18042_v32, %v3809_v37  ;;  %v3952_v35 = vand.u32 4294901760, %v3951_v17 }
 0x501   : > { %14591 = vmatprep.subr.mxu0 %v17943_v63  ;;  %14627 = vmatprep.subr.mxu1 %v3903_v51  ;;  %v18101_v8 = vand.u32 4294901760, %v18078_v14 }
 0x502   : > { %14592 = vmatpush3.msra.mxu0 %v17943_v63  ;;  %14628 = vmatpush3.msra.mxu1 %v3903_v51  ;;  %v3958_v51 = vsub.f32 %v18030_v21, %v18063_v52  ;;  %v18094_v23 = vand.u32 4294901760, %v18068_v34 }
 0x503   : > { %14593 = vmatprep.subr.mxu0 %v17960_v19  ;;  %14629 = vmatprep.subr.mxu1 %v3910_v50 }
 0x504   : > { %14594 = vmatpush3.msra.mxu0 %v17960_v19  ;;  %14630 = vmatpush3.msra.mxu1 %v3910_v50  ;;  %v3965_v50 = vsub.f32 %v18045_v4, %v18074_v58  ;;  %v3959_v7 = vand.u32 4294901760, %v3958_v51  ;;  %v18117_v51 = vand.u32 4294901760, %v3710_v20 }
 0x505   : > { %14595 = vmatprep.subr.mxu0 %v17973_v57  ;;  %14631 = vmatprep.subr.mxu1 %v3917_v26 }
 0x506   : > { %14596 = vmatpush3.msra.mxu0 %v17973_v57  ;;  %14632 = vmatpush3.msra.mxu1 %v3917_v26  ;;  %v3972_v26 = vsub.f32 %v18057_v5, %v18084_v44  ;;  %v3966_v31 = vand.u32 4294901760, %v3965_v50  ;;  %v3712_v50 = vld [vmem:[%s19457_s9 + $0x20] sm:$0xff] }
 0x507   : > { %14597 = vmatprep.subr.mxu0 %v17985_v0  ;;  %14633 = vmatprep.subr.mxu1 %v3924_v15 }
 0x508   : > { %14598 = vmatpush3.msra.mxu0 %v17985_v0  ;;  %14634 = vmatpush3.msra.mxu1 %v3924_v15  ;;  %v3811_v15 = vand.u32 4294901760, %v3810_v46  ;;  %v3973_v17 = vand.u32 4294901760, %v3972_v26  ;;  %v3713_v26 = vld [vmem:[%s19457_s9 + $0x28] sm:$0xff] }
 0x509   : > { %14599 = vmatprep.subr.mxu0 %v18000_v40  ;;  %14635 = vmatprep.subr.mxu1 %v3931_v36 }
 0x50a   : > { %14600 = vmatpush3.msra.mxu0 %v18000_v40  ;;  %14636 = vmatpush3.msra.mxu1 %v3931_v36  ;;  %v3979_v36 = vsub.f32 %v18068_v34, %v18094_v23 }
 0x50b   : > { %14601 = vmatprep.subr.mxu0 %v18012_v3  ;;  %14637 = vmatprep.subr.mxu1 %v3938_v1 }
 0x50c   : > { %14602 = vmatpush3.msra.mxu0 %v18012_v3  ;;  %14638 = vmatpush3.msra.mxu1 %v3938_v1  ;;  %v3711_v1 = vld [vmem:[%s19457_s9 + $0x18] sm:$0xff]  ;;  %v3980_v46 = vand.u32 4294901760, %v3979_v36  ;;  %v3714_v36 = vld [vmem:[%s19457_s9 + $0x30] sm:$0xff] }
 0x50d   : > { %14603 = vmatprep.subr.mxu0 %v18026_v48  ;;  %14639 = vmatprep.subr.mxu1 %v3945_v2 }
 0x50e   : > { %14604 = vmatpush3.msra.mxu0 %v18026_v48  ;;  %14640 = vmatpush3.msra.mxu1 %v3945_v2  ;;  %v3986_v2 = vsub.f32 %v18078_v14, %v18101_v8 }
 0x50f   : > { %14605 = vmatprep.subr.mxu0 %v18038_v18  ;;  %14641 = vmatprep.subr.mxu1 %v3952_v35 }
 0x510   : > { %14606 = vmatpush3.msra.mxu0 %v18038_v18  ;;  %14642 = vmatpush3.msra.mxu1 %v3952_v35  ;;  %v18120_v35 = vand.u32 4294901760, %v3711_v1 }
 0x511   : > { %14607 = vmatprep.subr.mxu0 %v18053_v28  ;;  %14643 = vmatprep.subr.mxu1 %v3959_v7 }
 0x512   : > { %14608 = vmatpush3.msra.mxu0 %v18053_v28  ;;  %14644 = vmatpush3.msra.mxu1 %v3959_v7  ;;  %v3987_v7 = vand.u32 4294901760, %v3986_v2  ;;  %v18165_v2 = vand.u32 4294901760, %v3714_v36 }
 0x513   : > { %14645 = vmatprep.subr.mxu1 %v3966_v31  ;;  %14665 = vmatprep.subr.mxu0 %v17918_v33 }
 0x514   : > { %14610 = vmatmul.mubr.f32.vlgmr.msra.gmra.mxu0 %v3811_v15  ;;  %14646 = vmatpush3.msra.mxu1 %v3966_v31  ;;  %v18136_v15 = vsub.f32 %v3711_v1, %v18120_v35  ;;  %v18138_v31 = vand.u32 4294901760, %v3712_v50  ;;  %v3715_v1 = vld [vmem:[%s19457_s9 + $0x38] sm:$0xff] }
 0x515   : > { %14666 = vmatpush3.msra.mxu0 %v17918_v33  ;;  %14647 = vmatprep.subr.mxu1 %v3973_v17  ;;  %v18132_v33 = vsub.f32 %v3710_v20, %v18117_v51 }
 0x516   : > { %14667 = vmatprep.subr.mxu0 %v17897_v47  ;;  %14648 = vmatpush3.msra.mxu1 %v3973_v17  ;;  %v19638_v20 = vand.u32 4294901760, %v18136_v15 }
 0x517   : > { %14668 = vmatpush3.msra.mxu0 %v17897_v47  ;;  %14649 = vmatprep.subr.mxu1 %v3980_v46  ;;  %v18141_v47 = vand.u32 4294901760, %v3713_v26 }
 0x518   : > { %14669 = vmatprep.subr.mxu0 %v17905_v60  ;;  %14650 = vmatpush3.msra.mxu1 %v3980_v46  ;;  %v18174_v46 = vand.u32 4294901760, %v3715_v1 }
 0x519   : > { %14670 = vmatpush3.msra.mxu0 %v17905_v60  ;;  %14651 = vmatprep.subr.mxu1 %v3987_v7  ;;  %v19639_v60 = vand.u32 4294901760, %v18132_v33  ;;  %v18163_v17 = vsub.f32 %v3713_v26, %v18141_v47  ;;  %v18186_v26 = vsub.f32 %v3714_v36, %v18165_v2 }
 0x51a   : > { %14671 = vmatprep.subr.mxu0 %v17915_v12  ;;  %14652 = vmatpush3.msra.mxu1 %v3987_v7 }
 0x51b   : > { %14672 = vmatpush3.msra.mxu0 %v17915_v12  ;;  %14709 = vmatprep.subr.mxu1 %v17907_v41  ;;  %v18155_v12 = vsub.f32 %v3712_v50, %v18138_v31  ;;  %v3849_v7 = vand.u32 4294901760, %v18163_v17 }
 0x51c   : > { %14673 = vmatprep.subr.mxu0 %v17931_v9  ;;  %14654 = vmatmul.mubr.f32.vlgmr.msra.gmra.mxu1 %v18015_v27 }
 0x51d   : > { %14674 = vmatpush3.msra.mxu0 %v17931_v9  ;;  %14710 = vmatpush3.msra.mxu1 %v17907_v41  ;;  %v3820_v9 = vsub.f32 %v18132_v33, %v19639_v60  ;;  %v3839_v50 = vand.u32 4294901760, %v18155_v12 }
 0x51e   : > { %14675 = vmatprep.subr.mxu0 %v17947_v59  ;;  %14711 = vmatprep.subr.mxu1 %v17889_v53 }
 0x51f   : > { %14676 = vmatpush3.msra.mxu0 %v17947_v59  ;;  %14712 = vmatpush3.msra.mxu1 %v17889_v53  ;;  %v3830_v59 = vsub.f32 %v18136_v15, %v19638_v20  ;;  %v18193_v20 = vsub.f32 %v3715_v1, %v18174_v46  ;;  %v3840_v36 = vsub.f32 %v18155_v12, %v3839_v50  ;;  %v3859_v1 = vand.u32 4294901760, %v18186_v26 }
 0x520   : > { %14677 = vmatprep.subr.mxu0 %v17964_v22  ;;  %14713 = vmatprep.subr.mxu1 %v17887_v62 }
 0x521   : > { %14678 = vmatpush3.msra.mxu0 %v17964_v22  ;;  %14714 = vmatpush3.msra.mxu1 %v17887_v62  ;;  %v3821_v22 = vand.u32 4294901760, %v3820_v9  ;;  %v3831_v60 = vand.u32 4294901760, %v3830_v59  ;;  %v3841_v9 = vand.u32 4294901760, %v3840_v36 }
 0x522   : > { %14679 = vmatprep.subr.mxu0 %v17977_v10  ;;  %14715 = vmatprep.subr.mxu1 %v17894_v38 }
 0x523   : > { %14680 = vmatpush3.msra.mxu0 %v17977_v10  ;;  %14716 = vmatpush3.msra.mxu1 %v17894_v38  ;;  %v3850_v10 = vsub.f32 %v18163_v17, %v3849_v7 }
 0x524   : > { %14681 = vmatprep.subr.mxu0 %v17989_v54  ;;  %14717 = vmatprep.subr.mxu1 %v17902_v43 }
 0x525   : > { %14682 = vmatpush3.msra.mxu0 %v17989_v54  ;;  %14718 = vmatpush3.msra.mxu1 %v17902_v43  ;;  %v3869_v54 = vand.u32 4294901760, %v18193_v20  ;;  %v3851_v59 = vand.u32 4294901760, %v3850_v10 }
 0x526   : > { %14683 = vmatprep.subr.mxu0 %v18004_v6  ;;  %14719 = vmatprep.subr.mxu1 %v17912_v11 }
 0x527   : > { %14684 = vmatpush3.msra.mxu0 %v18004_v6  ;;  %14720 = vmatpush3.msra.mxu1 %v17912_v11  ;;  %v3860_v6 = vsub.f32 %v18186_v26, %v3859_v1 }
 0x528   : > { %14612 = vmatprep.mubr.f32.mxu0 %v3821_v22  ;;  %14685 = vmatprep.subr.mxu0 %v18018_v56 }
 0x529   : > { %14721 = vmatprep.subr.mxu1 %v17928_v45  ;;  %14613 = vmatmul.mubr.f32.gmra.mxu0 %v3831_v60  ;;  %v3870_v60 = vsub.f32 %v18193_v20, %v3869_v54 }
 0x52a   : > { %14686 = vmatpush3.msra.mxu0 %v18018_v56  ;;  %14722 = vmatpush3.msra.mxu1 %v17928_v45  ;;  %v3861_v56 = vand.u32 4294901760, %v3860_v6 }
 0x52b   : > { %14687 = vmatprep.subr.mxu0 %v18030_v21  ;;  %14723 = vmatprep.subr.mxu1 %v17943_v63 }
 0x52c   : > { %14688 = vmatpush3.msra.mxu0 %v18030_v21  ;;  %14724 = vmatpush3.msra.mxu1 %v17943_v63  ;;  %v3871_v21 = vand.u32 4294901760, %v3870_v60 }
 0x52d   : > { %14615 = vmatprep.mubr.f32.mxu0 %v3841_v9  ;;  %14689 = vmatprep.subr.mxu0 %v18045_v4 }
 0x52e   : > { %14725 = vmatprep.subr.mxu1 %v17960_v19  ;;  %14616 = vmatmul.mubr.f32.gmra.mxu0 %v3851_v59 }
 0x52f   : > { %14690 = vmatpush3.msra.mxu0 %v18045_v4  ;;  %14726 = vmatpush3.msra.mxu1 %v17960_v19  ;;  %v19905_v4 = vld [vmem:[#allocation17_spill] sm:$0xff] }
 0x530   : > { %14691 = vmatprep.subr.mxu0 %v18057_v5  ;;  %14727 = vmatprep.subr.mxu1 %v17973_v57 }
 0x531   : > { %14656 = vmatprep.mubr.f32.mxu1 %v18117_v51  ;;  %14692 = vmatpush3.msra.mxu0 %v18057_v5 }
 0x532   : > { %14728 = vmatpush3.msra.mxu1 %v17973_v57  ;;  %14618 = vmatprep.mubr.f32.mxu0 %v3861_v56 }
 0x533   : > { %14657 = vmatmul.mubr.f32.gmra.mxu1 %v18120_v35  ;;  %14693 = vmatprep.subr.mxu0 %v18068_v34 }
 0x534   : > { %14729 = vmatprep.subr.mxu1 %v17985_v0  ;;  %14619 = vmatmul.mubr.f32.gmra.mxu0 %v3871_v21 }
 0x535   : > { %14694 = vmatpush3.msra.mxu0 %v18068_v34  ;;  %14730 = vmatpush3.msra.mxu1 %v17985_v0 }
 0x536   : > { %14695 = vmatprep.subr.mxu0 %v18078_v14  ;;  %14731 = vmatprep.subr.mxu1 %v18000_v40 }
 0x537   : > { %14659 = vmatprep.mubr.f32.mxu1 %v18138_v31  ;;  %14696 = vmatpush3.msra.mxu0 %v18078_v14 }
 0x538   : > { %14732 = vmatpush3.msra.mxu1 %v18000_v40  ;;  %14697 = vmatprep.mubr.f32.mxu0 %v19905_v4 }
 0x539   : > { %14660 = vmatmul.mubr.f32.gmra.mxu1 %v18141_v47  ;;  %14733 = vmatprep.subr.mxu1 %v18012_v3 }
 0x53a   : > { %14753 = vmatprep.subr.mxu0 %v17935_v61  ;;  %14698 = vmatmul.mubr.f32.vlgmr.msra.gmra.mxu0 %v18042_v32 }
 0x53b   : > { %14734 = vmatpush3.msra.mxu1 %v18012_v3  ;;  %14754 = vmatpush3.msra.mxu0 %v17935_v61  ;;  %v19906_v61 = vand.u32 4294901760, %v19905_v4 }
 0x53c   : > { %14735 = vmatprep.subr.mxu1 %v18026_v48  ;;  %14755 = vmatprep.subr.mxu0 %v17922_v16 }
 0x53d   : > { %14662 = vmatprep.mubr.f32.mxu1 %v18165_v2  ;;  %14736 = vmatpush3.msra.mxu1 %v18026_v48 }
 0x53e   : > { %14756 = vmatpush3.msra.mxu0 %v17922_v16  ;;  %14663 = vmatmul.mubr.f32.gmra.mxu1 %v18174_v46 }
 0x53f   : > { %14737 = vmatprep.subr.mxu1 %v18038_v18  ;;  %14757 = vmatprep.subr.mxu0 %v17938_v24 }
 0x540   : > { %14738 = vmatpush3.msra.mxu1 %v18038_v18  ;;  %14758 = vmatpush3.msra.mxu0 %v17938_v24 }
 0x541   : > { %14739 = vmatprep.subr.mxu1 %v18053_v28  ;;  %14759 = vmatprep.subr.mxu0 %v17955_v30 }
 0x542   : > { %14740 = vmatpush3.msra.mxu1 %v18053_v28  ;;  %14741 = vmatprep.mubr.f32.mxu1 %v19906_v61 }
 0x543   : > { %14760 = vmatpush3.msra.mxu0 %v17955_v30  ;;  %14742 = vmatmul.mubr.f32.vlgmr.msra.gmra.mxu1 %v3809_v37 }
 0x544   : > { %14761 = vmatprep.subr.mxu0 %v17970_v55  ;;  %14797 = vmatprep.subr.mxu1 %v17907_v41 }
 0x545   : > { %14762 = vmatpush3.msra.mxu0 %v17970_v55  ;;  %14798 = vmatpush3.msra.mxu1 %v17907_v41 }
 0x546   : > { %14763 = vmatprep.subr.mxu0 %v17983_v29  ;;  %14799 = vmatprep.subr.mxu1 %v17889_v53 }
 0x547   : > { %14764 = vmatpush3.msra.mxu0 %v17983_v29  ;;  %14800 = vmatpush3.msra.mxu1 %v17889_v53  ;;  %v19908_v53 = vand.u32 4294901760, %v18136_v15 }
 0x548   : > { %14765 = vmatprep.subr.mxu0 %v17995_v42  ;;  %14801 = vmatprep.subr.mxu1 %v17887_v62 }
 0x549   : > { %14766 = vmatpush3.msra.mxu0 %v17995_v42  ;;  %14802 = vmatpush3.msra.mxu1 %v17887_v62  ;;  %v19907_v62 = vand.u32 4294901760, %v18132_v33 }
 0x54a   : > { %14767 = vmatprep.subr.mxu0 %v18010_v39  ;;  %14803 = vmatprep.subr.mxu1 %v17894_v38 }
 0x54b   : > { %14768 = vmatpush3.msra.mxu0 %v18010_v39  ;;  %14804 = vmatpush3.msra.mxu1 %v17894_v38  ;;  %v19909_v38 = vld [vmem:[#allocation30_spill] sm:$0xff] }
 0x54c   : > { %14769 = vmatprep.subr.mxu0 %v18024_v49  ;;  %14805 = vmatprep.subr.mxu1 %v17902_v43 }
 0x54d   : > { %14770 = vmatpush3.msra.mxu0 %v18024_v49  ;;  %14806 = vmatpush3.msra.mxu1 %v17902_v43  ;;  %v4659_v43 = vld [vmem:[%s19458_s10 + $0x8] sm:$0xff] }
 0x54e   : > { %14771 = vmatprep.subr.mxu0 %v18036_v25  ;;  %14807 = vmatprep.subr.mxu1 %v17912_v11  ;;  %v18360_v41 = vand.u32 4294901760, %v4659_v43 }
 0x54f   : > { %14700 = vmatprep.mubr.f32.mxu0 %v18132_v33  ;;  %14772 = vmatpush3.msra.mxu0 %v18036_v25 }
 0x550   : > { %14808 = vmatpush3.msra.mxu1 %v17912_v11  ;;  %14701 = vmatmul.mubr.f32.gmra.mxu0 %v18136_v15  ;;  %v4658_v11 = vld [vmem:[%s19458_s10] sm:$0xff]  ;;  %v18366_v16 = vsub.f32 %v4659_v43, %v18360_v41 }
 0x551   : > { %14773 = vmatprep.subr.mxu0 %v18051_v13  ;;  %14809 = vmatprep.subr.mxu1 %v17928_v45 }
 0x552   : > { %14774 = vmatpush3.msra.mxu0 %v18051_v13  ;;  %14810 = vmatpush3.msra.mxu1 %v17928_v45  ;;  %v18368_v45 = vand.u32 4294901760, %v4658_v11  ;;  %v18373_v24 = vand.u32 4294901760, %v18366_v16 }
 0x553   : > { %14775 = vmatprep.subr.mxu0 %v18063_v52  ;;  %14811 = vmatprep.subr.mxu1 %v17943_v63 }
 0x554   : > { %14703 = vmatprep.mubr.f32.mxu0 %v18155_v12  ;;  %14776 = vmatpush3.msra.mxu0 %v18063_v52  ;;  %v4864_v30 = vsub.f32 %v18366_v16, %v18373_v24 }
 0x555   : > { %14812 = vmatpush3.msra.mxu1 %v17943_v63  ;;  %14704 = vmatmul.mubr.f32.gmra.mxu0 %v18163_v17  ;;  %v18376_v63 = vsub.f32 %v4658_v11, %v18368_v45 }
 0x556   : > { %14777 = vmatprep.subr.mxu0 %v18074_v58  ;;  %14813 = vmatprep.subr.mxu1 %v17960_v19  ;;  %v4865_v55 = vand.u32 4294901760, %v4864_v30 }
 0x557   : > { %14778 = vmatpush3.msra.mxu0 %v18074_v58  ;;  %14814 = vmatpush3.msra.mxu1 %v17960_v19  ;;  %v18383_v19 = vand.u32 4294901760, %v18376_v63 }
 0x558   : > { %14779 = vmatprep.subr.mxu0 %v18084_v44  ;;  %14815 = vmatprep.subr.mxu1 %v17973_v57 }
 0x559   : > { %14706 = vmatprep.mubr.f32.mxu0 %v18186_v26  ;;  %14744 = vmatprep.mubr.f32.mxu1 %v19907_v62 }
 0x55a   : > { %14780 = vmatpush3.msra.mxu0 %v18084_v44  ;;  %14816 = vmatpush3.msra.mxu1 %v17973_v57  ;;  %v4871_v57 = vsub.f32 %v18376_v63, %v18383_v19 }
 0x55b   : > { %14707 = vmatmul.mubr.f32.gmra.mxu0 %v18193_v20  ;;  %14745 = vmatmul.mubr.f32.gmra.mxu1 %v19908_v53 }
 0x55c   : > { %14781 = vmatprep.subr.mxu0 %v18094_v23  ;;  %14817 = vmatprep.subr.mxu1 %v17985_v0  ;;  %v4872_v29 = vand.u32 4294901760, %v4871_v57 }
 0x55d   : > { %14782 = vmatpush3.msra.mxu0 %v18094_v23  ;;  %14818 = vmatpush3.msra.mxu1 %v17985_v0 }
 0x55e   : > { %14783 = vmatprep.subr.mxu0 %v18101_v8  ;;  %14819 = vmatprep.subr.mxu1 %v18000_v40 }
 0x55f   : > { %14747 = vmatprep.mubr.f32.mxu1 %v3839_v50  ;;  %14784 = vmatpush3.msra.mxu0 %v18101_v8 }
 0x560   : > { %14785 = vmatprep.mubr.f32.mxu0 %v19909_v38  ;;  %14820 = vmatpush3.msra.mxu1 %v18000_v40 }
 0x561   : > { %14748 = vmatmul.mubr.f32.gmra.mxu1 %v3849_v7  ;;  %14786 = vmatmul.mubr.f32.vlgmr.msra.gmra.mxu0 %v18015_v27 }
 0x562   : > { %14821 = vmatprep.subr.mxu1 %v18012_v3  ;;  %14750 = vmatprep.mubr.f32.mxu1 %v3859_v1 }
 0x563   : > { %14822 = vmatpush3.msra.mxu1 %v18012_v3  ;;  %14788 = vmatprep.mubr.f32.mxu0 %v18117_v51 }
 0x564   : > { %14823 = vmatprep.subr.mxu1 %v18026_v48  ;;  %14841 = vmatprep.subr.mxu0 %v18360_v41 }
 0x565   : > { %14824 = vmatpush3.msra.mxu1 %v18026_v48  ;;  %14789 = vmatmul.mubr.f32.gmra.mxu0 %v18120_v35 }
 0x566   : > { %14751 = vmatmul.mubr.f32.gmra.mxu1 %v3869_v54  ;;  %14825 = vmatprep.subr.mxu1 %v18038_v18 }
 0x567   : > { %14826 = vmatpush3.msra.mxu1 %v18038_v18  ;;  %14791 = vmatprep.mubr.f32.mxu0 %v18138_v31 }
 0x568   : > { %14827 = vmatprep.subr.mxu1 %v18053_v28  ;;  %14829 = vmatprep.mubr.f32.mxu1 %v19909_v38 }
 0x569   : > { %14828 = vmatpush3.msra.mxu1 %v18053_v28  ;;  %14792 = vmatmul.mubr.f32.gmra.mxu0 %v18141_v47 }
 0x56a   : > { %14830 = vmatmul.mubr.f32.vlgmr.msra.gmra.mxu1 %v18015_v27  ;;  %14794 = vmatprep.mubr.f32.mxu0 %v18165_v2 }
 0x56b   : > { %14832 = vmatprep.mubr.f32.mxu1 %v18117_v51  ;;  %14842 = vmatpush3.msra.mxu0 %v18360_v41 }
 0x56c   : > { %14843 = vmatprep.subr.mxu0 %v18368_v45  ;;  %14857 = vmatprep.subr.mxu1 %v4865_v55 }
 0x56d   : > { %14795 = vmatmul.mubr.f32.gmra.mxu0 %v18174_v46  ;;  %14858 = vmatpush3.msra.mxu1 %v4865_v55 }
 0x56e   : > { %14833 = vmatmul.mubr.f32.gmra.mxu1 %v18120_v35  ;;  %14844 = vmatpush3.msra.mxu0 %v18368_v45 }
 0x56f   : > { %14835 = vmatprep.mubr.f32.mxu1 %v18138_v31  ;;  %14873 = vmatprep.subr.mxu0 %v18366_v16 }
 0x570   : > { %14859 = vmatprep.subr.mxu1 %v4872_v29 }
 0x571   : > { %14860 = vmatpush3.msra.mxu1 %v4872_v29 }
 0x572   : > { %14836 = vmatmul.mubr.f32.gmra.mxu1 %v18141_v47  ;;  %14889 = vmatprep.subr.mxu1 %v18360_v41 }
 0x573   : > { %14838 = vmatprep.mubr.f32.mxu1 %v18165_v2 }
 0x576   : > { %14839 = vmatmul.mubr.f32.gmra.mxu1 %v18174_v46 }
 0x5d4   : > { %v14611_v0 = vpop.f32.mrf.mxu0 }
 0x5d6   : > { %v3803_v42 = vpop.f32.mrf.mxu0 }
 0x5dc   : > { %v14655_v3 = vpop.f32.mrf.mxu1 }
 0x5dd   : > { %v4031_v17 = vadd.f32 %v14655_v3, %v14611_v0 }
 0x5de   : > { %v4024_v49 = vpop.f32.mrf.mxu1 }
 0x5df   : > { %v4025_v50 = vadd.f32 %v4024_v49, %v3803_v42 }
 0x5e9   : > { %v14614_v40 = vpop.f32.mrf.mxu0 }
 0x5eb   : > { %v3823_v39 = vpop.f32.mrf.mxu0 }
 0x5ee   : > { %v14617_v27 = vpop.f32.mrf.mxu0 }
 0x5f0   : > { %v3843_v48 = vpop.f32.mrf.mxu0 }
 0x5f3   : > { %v14658_v25 = vpop.f32.mrf.mxu1 }
 0x5f4   : > { %v14620_v18 = vpop.f32.mrf.mxu0  ;;  %v4043_v36 = vadd.f32 %v14658_v25, %v14614_v40 }
 0x5f5   : > { %v4036_v32 = vpop.f32.mrf.mxu1 }
 0x5f6   : > { %v3863_v13 = vpop.f32.mrf.mxu0  ;;  %v4037_v59 = vadd.f32 %v4036_v32, %v3823_v39 }
 0x5f9   : > { %v14661_v28 = vpop.f32.mrf.mxu1 }
 0x5fa   : > { %v14699_v5 = vpop.f32.mrf.mxu0  ;;  %v4055_v4 = vadd.f32 %v14661_v28, %v14617_v27 }
 0x5fb   : > { %v4048_v52 = vpop.f32.mrf.mxu1  ;;  %v4178_v7 = vadd.f32 %v14699_v5, %v4031_v17 }
 0x5fc   : > { %v4170_v37 = vpop.f32.mrf.mxu0  ;;  %v4049_v11 = vadd.f32 %v4048_v52, %v3843_v48 }
 0x5fd   : > { %v4171_v10 = vadd.f32 %v4170_v37, %v4025_v50 }
 0x5fe   : > { %v14664_v34 = vpop.f32.mrf.mxu1 }
 0x5ff   : > { %v4067_v39 = vadd.f32 %v14664_v34, %v14620_v18 }
 0x600   : > { %v4060_v14 = vpop.f32.mrf.mxu1 }
 0x601   : > { %v4061_v37 = vadd.f32 %v4060_v14, %v3863_v13 }
 0x603   : > { %v14743_v23 = vpop.f32.mrf.mxu1 }
 0x604   : > { %v4317_v1 = vadd.f32 %v14743_v23, %v4178_v7 }
 0x605   : > { %v4308_v51 = vpop.f32.mrf.mxu1 }
 0x606   : > { %v4309_v6 = vadd.f32 %v4308_v51, %v4171_v10 }
 0x610   : > { %v14702_v58 = vpop.f32.mrf.mxu0 }
 0x611   : > { %v4192_v60 = vadd.f32 %v14702_v58, %v4043_v36 }
 0x612   : > { %v4184_v44 = vpop.f32.mrf.mxu0 }
 0x613   : > { %v4185_v62 = vadd.f32 %v4184_v44, %v4037_v59 }
 0x615   : > { %v14705_v8 = vpop.f32.mrf.mxu0 }
 0x616   : > { %v4206_v30 = vadd.f32 %v14705_v8, %v4055_v4 }
 0x617   : > { %v4198_v35 = vpop.f32.mrf.mxu0 }
 0x618   : > { %v4199_v3 = vadd.f32 %v4198_v35, %v4049_v11 }
 0x61b   : > { %v14708_v33 = vpop.f32.mrf.mxu0  ;;  %v14746_v15 = vpop.f32.mrf.mxu1 }
 0x61c   : > { %v4333_v53 = vadd.f32 %v14746_v15, %v4192_v60  ;;  %v4220_v48 = vadd.f32 %v14708_v33, %v4067_v39 }
 0x61d   : > { %v4324_v31 = vpop.f32.mrf.mxu1  ;;  %v4212_v47 = vpop.f32.mrf.mxu0 }
 0x61e   : > { %v4325_v29 = vadd.f32 %v4324_v31, %v4185_v62  ;;  %v4213_v35 = vadd.f32 %v4212_v47, %v4061_v37 }
 0x621   : > { %v14749_v20 = vpop.f32.mrf.mxu1  ;;  %v14787_v12 = vpop.f32.mrf.mxu0 }
 0x622   : > { %v4490_v56 = vadd.f32 %v14787_v12, %v4317_v1  ;;  %v4349_v25 = vadd.f32 %v14749_v20, %v4206_v30 }
 0x623   : > { %v4340_v2 = vpop.f32.mrf.mxu1  ;;  %v4483_v46 = vpop.f32.mrf.mxu0 }
 0x624   : > { %v4484_v38 = vadd.f32 %v4483_v46, %v4309_v6  ;;  %v4341_v8 = vadd.f32 %v4340_v2, %v4199_v3 }
 0x625   : > { %v14790_v26 = vpop.f32.mrf.mxu0 }
 0x626   : > { %v14752_v22 = vpop.f32.mrf.mxu1  ;;  %v4502_v0 = vadd.f32 %v14790_v26, %v4333_v53 }
 0x627   : > { %v4495_v54 = vpop.f32.mrf.mxu0  ;;  %v4365_v33 = vadd.f32 %v14752_v22, %v4220_v48 }
 0x628   : > { %v4356_v9 = vpop.f32.mrf.mxu1  ;;  %v4496_v32 = vadd.f32 %v4495_v54, %v4325_v29 }
 0x629   : > { %v14793_v21 = vpop.f32.mrf.mxu0  ;;  %v4357_v22 = vadd.f32 %v4356_v9, %v4213_v35 }
 0x62a   : > { %v14831_v61 = vpop.f32.mrf.mxu1  ;;  %v4514_v18 = vadd.f32 %v14793_v21, %v4349_v25 }
 0x62b   : > { %v4619_v43 = vadd.f32 %v14831_v61, %v4490_v56  ;;  %v4507_v55 = vpop.f32.mrf.mxu0 }
 0x62c   : > { %v4612_v57 = vpop.f32.mrf.mxu1  ;;  %v4508_v20 = vadd.f32 %v4507_v55, %v4341_v8 }
 0x62d   : > { %v4665_v42 = vsel %vm4660_vm4, %v4619_v43, 0  ;;  %v4613_v40 = vadd.f32 %v4612_v57, %v4484_v38  ;;  %v14796_v44 = vpop.f32.mrf.mxu0 }
 0x62e   : > { %v18390_v49 = vand.u32 4294901760, %v4665_v42  ;;  %v14834_v27 = vpop.f32.mrf.mxu1  ;;  %v4526_v36 = vadd.f32 %v14796_v44, %v4365_v33 }
 0x62f   : > { %v4662_v28 = vsel %vm4660_vm4, %v4613_v40, 0  ;;  %v4631_v5 = vadd.f32 %v14834_v27, %v4502_v0  ;;  %v4519_v46 = vpop.f32.mrf.mxu0 }
 0x630   : > { %v18394_v52 = vsub.f32 %v4665_v42, %v18390_v49  ;;  %v18396_v58 = vand.u32 4294901760, %v4662_v28  ;;  %v4624_v23 = vpop.f32.mrf.mxu1  ;;  %v4520_v56 = vadd.f32 %v4519_v46, %v4357_v22 }
 0x631   : > { %v4671_v34 = vsel %vm4660_vm4, %v4631_v5, 0  ;;  %v4625_v51 = vadd.f32 %v4624_v23, %v4496_v32 }
 0x632   : > { %v4764_v15 = vand.u32 4294901760, %v18394_v52  ;;  %v18401_v31 = vsub.f32 %v4662_v28, %v18396_v58  ;;  %v18403_v13 = vand.u32 4294901760, %v4671_v34  ;;  %v14837_v14 = vpop.f32.mrf.mxu1  ;;  %14861 = vmatprep.mubr.f32.mxu1 %v18396_v58 }
 0x633   : > { %v4668_v12 = vsel %vm4660_vm4, %v4625_v51, 0  ;;  %v4643_v17 = vadd.f32 %v14837_v14, %v4514_v18  ;;  %14862 = vmatmul.mubr.f32.vlgmr.msra.gmra.mxu1 %v18390_v49 }
 0x634   : > { %v4765_v47 = vsub.f32 %v18394_v52, %v4764_v15  ;;  %v18412_v2 = vsub.f32 %v4671_v34, %v18403_v13  ;;  %v18414_v50 = vand.u32 4294901760, %v4668_v12  ;;  %v4636_v7 = vpop.f32.mrf.mxu1  ;;  %v4754_v26 = vand.u32 4294901760, %v18401_v31  ;;  %14890 = vmatpush3.msra.mxu1 %v18360_v41 }
 0x635   : > { %v4677_v10 = vsel %vm4660_vm4, %v4643_v17, 0  ;;  %v4637_v1 = vadd.f32 %v4636_v7, %v4508_v20  ;;  %14891 = vmatprep.subr.mxu1 %v18368_v45  ;;  %v5478_v20 = vld [vmem:[%s19459_s11 + $0x8] sm:$0xff] }
 0x636   : > { %v4784_v54 = vand.u32 4294901760, %v18412_v2  ;;  %v18422_v59 = vsub.f32 %v4668_v12, %v18414_v50  ;;  %v18424_v6 = vand.u32 4294901760, %v4677_v10  ;;  %v14840_v60 = vpop.f32.mrf.mxu1  ;;  %14864 = vmatprep.mubr.f32.mxu1 %v18414_v50  ;;  %14892 = vmatpush3.msra.mxu1 %v18368_v45  ;;  %v4755_v4 = vsub.f32 %v18401_v31, %v4754_v26 }
 0x637   : > { %v4674_v9 = vsel %vm4660_vm4, %v4637_v1, 0  ;;  %v4655_v21 = vadd.f32 %v14840_v60, %v4526_v36  ;;  %14865 = vmatmul.mubr.f32.gmra.mxu1 %v18403_v13  ;;  %14921 = vmatprep.subr.mxu1 %v18360_v41  ;;  %v4766_v61 = vand.u32 4294901760, %v4765_v47 }
 0x638   : > { %v18433_v62 = vsub.f32 %v4677_v10, %v18424_v6  ;;  %v18435_v53 = vand.u32 4294901760, %v4674_v9  ;;  %v4648_v38 = vpop.f32.mrf.mxu1  ;;  %v4774_v43 = vand.u32 4294901760, %v18422_v59  ;;  %v4756_v55 = vand.u32 4294901760, %v4755_v4 }
 0x639   : > { %v4683_v11 = vsel %vm4660_vm4, %v4655_v21, 0  ;;  %v4649_v30 = vadd.f32 %v4648_v38, %v4520_v56  ;;  %v4785_v57 = vsub.f32 %v18412_v2, %v4784_v54 }
 0x63a   : > { %v4804_v29 = vand.u32 4294901760, %v18433_v62  ;;  %v4793_v0 = vsub.f32 %v4674_v9, %v18435_v53  ;;  %v18442_v42 = vand.u32 4294901760, %v4683_v11  ;;  %14867 = vmatprep.mubr.f32.mxu1 %v18435_v53  ;;  %v4775_v40 = vsub.f32 %v18422_v59, %v4774_v43  ;;  %14845 = vmatprep.mubr.f32.mxu0 %v4756_v55 }
 0x63b   : > { %v4680_v39 = vsel %vm4660_vm4, %v4649_v30, 0  ;;  %14868 = vmatmul.mubr.f32.gmra.mxu1 %v18424_v6  ;;  %14846 = vmatmul.mubr.f32.vlgmr.msra.gmra.mxu0 %v4766_v61  ;;  %v4786_v28 = vand.u32 4294901760, %v4785_v57 }
 0x63c   : > { %v4823_v3 = vsub.f32 %v4683_v11, %v18442_v42  ;;  %v18449_v27 = vand.u32 4294901760, %v4680_v39  ;;  %v4776_v25 = vand.u32 4294901760, %v4775_v40  ;;  %v4794_v32 = vand.u32 4294901760, %v4793_v0  ;;  %14874 = vmatpush3.msra.mxu0 %v18366_v16 }
 0x63d   : > { %v4805_v44 = vsub.f32 %v18433_v62, %v4804_v29  ;;  %14875 = vmatprep.subr.mxu0 %v18376_v63 }
 0x63e   : > { %v4824_v5 = vand.u32 4294901760, %v4823_v3  ;;  %v4813_v37 = vsub.f32 %v4680_v39, %v18449_v27  ;;  %14848 = vmatprep.mubr.f32.mxu0 %v4776_v25  ;;  %14870 = vmatprep.mubr.f32.mxu1 %v18449_v27  ;;  %v4795_v48 = vsub.f32 %v4793_v0, %v4794_v32 }
 0x63f   : > { %14871 = vmatmul.mubr.f32.gmra.mxu1 %v18442_v42  ;;  %14849 = vmatmul.mubr.f32.gmra.mxu0 %v4786_v28  ;;  %v4806_v16 = vand.u32 4294901760, %v4805_v44 }
 0x640   : > { %14893 = vmatprep.mubr.f32.mxu1 %v4754_v26  ;;  %v4796_v23 = vand.u32 4294901760, %v4795_v48  ;;  %v4814_v8 = vand.u32 4294901760, %v4813_v37  ;;  %14876 = vmatpush3.msra.mxu0 %v18376_v63  ;;  %v4825_v34 = vsub.f32 %v4823_v3, %v4824_v5  ;;  %v19910_v63 = vmov 0.0  }
 0x641   : > { %14905 = vmatprep.subr.mxu0 %v18373_v24 }
 0x642   : > { %14851 = vmatprep.mubr.f32.mxu0 %v4796_v23  ;;  %v4815_v18 = vsub.f32 %v4813_v37, %v4814_v8  ;;  %v4826_v35 = vand.u32 4294901760, %v4825_v34 }
 0x643   : > { %14894 = vmatmul.mubr.f32.vlgmr.msra.gmra.mxu1 %v4764_v15  ;;  %14852 = vmatmul.mubr.f32.gmra.mxu0 %v4806_v16  ;;  %v5480_v15 = vld [vmem:[%s19459_s11 + $0x18] sm:$0xff] }
 0x644   : > { %14896 = vmatprep.mubr.f32.mxu1 %v4774_v43  ;;  %v4816_v51 = vand.u32 4294901760, %v4815_v18  ;;  %14922 = vmatpush3.msra.mxu1 %v18360_v41  ;;  %v5484_v41 = vld [vmem:[%s19459_s11 + $0x38] sm:$0xff]  ;;  %v18516_v14 = vand.u32 4294901760, %v5480_v15 }
 0x645   : > { %14923 = vmatprep.subr.mxu1 %v18368_v45 }
 0x646   : > { %14854 = vmatprep.mubr.f32.mxu0 %v4816_v51  ;;  %14924 = vmatpush3.msra.mxu1 %v18368_v45  ;;  %v5483_v45 = vld [vmem:[%s19459_s11 + $0x30] sm:$0xff] }
 0x647   : > { %14897 = vmatmul.mubr.f32.gmra.mxu1 %v4784_v54  ;;  %14855 = vmatmul.mubr.f32.gmra.mxu0 %v4826_v35 }
 0x648   : > { %14899 = vmatprep.mubr.f32.mxu1 %v4794_v32  ;;  %14877 = vmatprep.mubr.f32.mxu0 %v18401_v31  ;;  %v5479_v31 = vld [vmem:[%s19459_s11 + $0x10] sm:$0xff] }
 0x649   : > { %14956 = vmatprep.subr.mxu1 %v19910_v63  ;;  %v18518_v33 = vand.u32 4294901760, %v5479_v31 }
 0x64b   : > { %14900 = vmatmul.mubr.f32.gmra.mxu1 %v4804_v29  ;;  %14878 = vmatmul.mubr.f32.vlgmr.msra.gmra.mxu0 %v18394_v52  ;;  %v18547_v36 = vsub.f32 %v5479_v31, %v18518_v33 }
 0x64c   : > { %14902 = vmatprep.mubr.f32.mxu1 %v4814_v8  ;;  %14880 = vmatprep.mubr.f32.mxu0 %v18422_v59 }
 0x64d   : > { %14906 = vmatpush3.msra.mxu0 %v18373_v24  ;;  %v5482_v24 = vld [vmem:[%s19459_s11 + $0x28] sm:$0xff]  ;;  %v19641_v4 = vand.u32 4294901760, %v18547_v36 }
 0x64e   : > { %14907 = vmatprep.subr.mxu0 %v18383_v19  ;;  %v18503_v52 = vand.u32 4294901760, %v5482_v24 }
 0x64f   : > { %14903 = vmatmul.mubr.f32.gmra.mxu1 %v4824_v5  ;;  %14908 = vmatpush3.msra.mxu0 %v18383_v19  ;;  %v18499_v19 = vand.u32 4294901760, %v5484_v41  ;;  %v5633_v43 = vsub.f32 %v18547_v36, %v19641_v4 }
 0x650   : > { %14881 = vmatmul.mubr.f32.gmra.mxu0 %v18412_v2  ;;  %14925 = vmatprep.mubr.f32.mxu1 %v18396_v58  ;;  %v18530_v47 = vsub.f32 %v5482_v24, %v18503_v52  ;;  %v18533_v2 = vand.u32 4294901760, %v5478_v20 }
 0x651   : > { %14883 = vmatprep.mubr.f32.mxu0 %v4793_v0  ;;  %14937 = vmatprep.subr.mxu0 %v19910_v63  ;;  %v18524_v12 = vsub.f32 %v5484_v41, %v18499_v19  ;;  %v5634_v55 = vand.u32 4294901760, %v5633_v43 }
 0x652   : > { %v19644_v22 = vand.u32 4294901760, %v18530_v47  ;;  %v18552_v1 = vsub.f32 %v5478_v20, %v18533_v2 }
 0x653   : > { %14926 = vmatmul.mubr.f32.vlgmr.msra.gmra.mxu1 %v18390_v49  ;;  %v19646_v7 = vand.u32 4294901760, %v18524_v12 }
 0x654   : > { %14884 = vmatmul.mubr.f32.gmra.mxu0 %v18433_v62  ;;  %14928 = vmatprep.mubr.f32.mxu1 %v18414_v50  ;;  %19911 = vst [vmem:[#allocation38_spill] sm:$0xff] %v18552_v1 }
 0x655   : > { %14886 = vmatprep.mubr.f32.mxu0 %v4813_v37  ;;  %v5598_v54 = vsub.f32 %v18524_v12, %v19646_v7 }
 0x657   : > { %14929 = vmatmul.mubr.f32.gmra.mxu1 %v18403_v13  ;;  %v5599_v56 = vand.u32 4294901760, %v5598_v54 }
 0x658   : > { %14887 = vmatmul.mubr.f32.gmra.mxu0 %v4823_v3  ;;  %14931 = vmatprep.mubr.f32.mxu1 %v18435_v53 }
 0x659   : > { %14909 = vmatprep.mubr.f32.mxu0 %v18396_v58  ;;  %v5481_v58 = vld [vmem:[%s19459_s11 + $0x20] sm:$0xff]  ;;  %14957 = vmatpush3.msra.mxu1 %v5599_v56 }
 0x65a   : > { %14958 = vmatprep.subr.mxu1 %v19910_v63 }
 0x65b   : > { %14932 = vmatmul.mubr.f32.gmra.mxu1 %v18424_v6 }
 0x65c   : > { %14910 = vmatmul.mubr.f32.vlgmr.msra.gmra.mxu0 %v18390_v49  ;;  %14934 = vmatprep.mubr.f32.mxu1 %v18449_v27  ;;  %v18501_v49 = vand.u32 4294901760, %v5483_v45 }
 0x65d   : > { %14912 = vmatprep.mubr.f32.mxu0 %v18414_v50  ;;  %14938 = vmatpush3.msra.mxu0 %v18499_v19  ;;  %v18539_v50 = vsub.f32 %v5480_v15, %v18516_v14 }
 0x65e   : > { %v18527_v17 = vsub.f32 %v5483_v45, %v18501_v49  ;;  %14939 = vmatprep.subr.mxu0 %v19910_v63 }
 0x65f   : > { %14935 = vmatmul.mubr.f32.gmra.mxu1 %v18442_v42  ;;  %14940 = vmatpush3.msra.mxu0 %v18501_v49  ;;  %v19642_v60 = vand.u32 4294901760, %v18539_v50 }
 0x660   : > { %14913 = vmatmul.mubr.f32.gmra.mxu0 %v18403_v13  ;;  %v18514_v13 = vand.u32 4294901760, %v5481_v58  ;;  %v19645_v26 = vand.u32 4294901760, %v18527_v17  ;;  %14941 = vmatprep.subr.mxu0 %v19910_v63 }
 0x661   : > { %14915 = vmatprep.mubr.f32.mxu0 %v18435_v53  ;;  %14942 = vmatpush3.msra.mxu0 %v18503_v52  ;;  %v5626_v62 = vsub.f32 %v18539_v50, %v19642_v60  ;;  %v19640_v53 = vand.u32 4294901760, %v18552_v1 }
 0x662   : > { %v18536_v46 = vsub.f32 %v5481_v58, %v18514_v13  ;;  %v5605_v59 = vsub.f32 %v18527_v17, %v19645_v26  ;;  %14943 = vmatprep.subr.mxu0 %v19910_v63  ;;  %14972 = vmatprep.mubr.msk.f32.mxu1 %vm15750_vm5, %v19910_v63 }
 0x663   : > { %14944 = vmatpush3.msra.mxu0 %v18514_v13  ;;  %v5627_v11 = vand.u32 4294901760, %v5626_v62  ;;  %v5640_v30 = vsub.f32 %v18552_v1, %v19640_v53 }
 0x664   : > { %14916 = vmatmul.mubr.f32.gmra.mxu0 %v18424_v6  ;;  %v19643_v10 = vand.u32 4294901760, %v18536_v46  ;;  %v5612_v6 = vsub.f32 %v18530_v47, %v19644_v22  ;;  %v5606_v9 = vand.u32 4294901760, %v5605_v59  ;;  %14945 = vmatprep.subr.mxu0 %v19910_v63 }
 0x665   : > { %14918 = vmatprep.mubr.f32.mxu0 %v18449_v27  ;;  %14946 = vmatpush3.msra.mxu0 %v18516_v14  ;;  %v5641_v57 = vand.u32 4294901760, %v5640_v30 }
 0x666   : > { %v5619_v21 = vsub.f32 %v18536_v46, %v19643_v10  ;;  %v5613_v61 = vand.u32 4294901760, %v5612_v6  ;;  %14947 = vmatprep.subr.mxu0 %v19910_v63  ;;  %14959 = vmatpush3.msra.mxu1 %v5606_v9 }
 0x667   : > { %14948 = vmatpush3.msra.mxu0 %v18518_v33  ;;  %14960 = vmatprep.subr.mxu1 %v19910_v63 }
 0x668   : > { %14919 = vmatmul.mubr.f32.gmra.mxu0 %v18442_v42  ;;  %v5620_v38 = vand.u32 4294901760, %v5619_v21  ;;  %14949 = vmatprep.subr.mxu0 %v19910_v63 }
 0x669   : > { %14961 = vmatpush3.msra.mxu1 %v5613_v61  ;;  %14950 = vmatpush3.msra.mxu0 %v18533_v2 }
 0x66a   : > { %14962 = vmatprep.subr.mxu1 %v19910_v63  ;;  %14951 = vmatprep.subr.mxu0 %v19910_v63 }
 0x66b   : > { %14963 = vmatpush3.msra.mxu1 %v5620_v38  ;;  %14953 = vmatprep.mubr.msk.f32.mxu0 %vm15750_vm5, %v19910_v63 }
 0x66c   : > { %14964 = vmatprep.subr.mxu1 %v19910_v63 }
 0x66d   : > { %14965 = vmatpush3.msra.mxu1 %v5627_v11 }
 0x66e   : > { %14966 = vmatprep.subr.mxu1 %v19910_v63 }
 0x66f   : > { %14967 = vmatpush3.msra.mxu1 %v5634_v55 }
 0x670   : > { %14968 = vmatprep.subr.mxu1 %v19910_v63 }
 0x671   : > { %14969 = vmatpush3.msra.mxu1 %v5641_v57 }
 0x672   : > { %14970 = vmatprep.subr.mxu1 %v19910_v63 }
 0x6f3   : > { %v14863_v29 = vpop.f32.mrf.mxu1 }
 0x6f5   : > { %v4909_v0 = vpop.f32.mrf.mxu1 }
 0x6f7   : > { %v14866_v42 = vpop.f32.mrf.mxu1 }
 0x6f9   : > { %v4921_v40 = vpop.f32.mrf.mxu1 }
 0x6fb   : > { %v14869_v39 = vpop.f32.mrf.mxu1  ;;  %v14847_v3 = vpop.f32.mrf.mxu0 }
 0x6fc   : > { %v4916_v9 = vadd.f32 %v14863_v29, %v14847_v3 }
 0x6fd   : > { %v4933_v27 = vpop.f32.mrf.mxu1  ;;  %v4758_v25 = vpop.f32.mrf.mxu0 }
 0x6fe   : > { %v4910_v59 = vadd.f32 %v4909_v0, %v4758_v25 }
 0x6ff   : > { %v18595_v32 = vpop.f32.mrf.mxu1  ;;  %v14850_v28 = vpop.f32.mrf.mxu0 }
 0x700   : > { %v4928_v22 = vadd.f32 %v14866_v42, %v14850_v28 }
 0x701   : > { %v18597_v5 = vpop.f32.mrf.mxu1  ;;  %v4778_v37 = vpop.f32.mrf.mxu0 }
 0x702   : > { %v4922_v11 = vadd.f32 %v4921_v40, %v4778_v37  ;;  %v5477_v40 = vld [vmem:[%s19459_s11] sm:$0xff] }
 0x703   : > { %v14895_v48 = vpop.f32.mrf.mxu1  ;;  %v14853_v44 = vpop.f32.mrf.mxu0 }
 0x705   : > { %v5151_v23 = vpop.f32.mrf.mxu1  ;;  %v4798_v8 = vpop.f32.mrf.mxu0 }
 0x706   : > { %v4934_v3 = vadd.f32 %v4933_v27, %v4798_v8 }
 0x707   : > { %v14898_v16 = vpop.f32.mrf.mxu1  ;;  %v18599_v18 = vpop.f32.mrf.mxu0 }
 0x709   : > { %v5167_v34 = vpop.f32.mrf.mxu1  ;;  %v4818_v51 = vpop.f32.mrf.mxu0 }
 0x70b   : > { %v14879_v35 = vpop.f32.mrf.mxu0  ;;  %v18601_v41 = vpop.f32.mrf.mxu1 }
 0x70c   : > { %v5035_v62 = vadd.f32 %v14879_v35, %v4916_v9 }
 0x70d   : > { %v5027_v45 = vpop.f32.mrf.mxu0  ;;  %v5183_v24 = vpop.f32.mrf.mxu1 }
 0x70e   : > { %v5028_v21 = vadd.f32 %v5027_v45, %v4910_v59  ;;  %v5160_v53 = vadd.f32 %v14895_v48, %v5035_v62  ;;  %v18612_v48 = vand.u32 4294901760, %v5477_v40 }
 0x70f   : > { %v18603_v31 = vpop.f32.mrf.mxu1 }
 0x710   : > { %v14882_v58 = vpop.f32.mrf.mxu0  ;;  %v5152_v30 = vadd.f32 %v5151_v23, %v5028_v21  ;;  %14952 = vmatpush3.msra.mxu0 %v18612_v48 }
 0x711   : > { %v18605_v6 = vpop.f32.mrf.mxu1  ;;  %v5049_v7 = vadd.f32 %v14882_v58, %v4928_v22  ;;  %v4940_v22 = vadd.f32 %v14869_v39, %v14853_v44  ;;  %14975 = vmatprep.subr.mxu0 %v19910_v63  ;;  %v4946_v39 = vadd.f32 %v18597_v5, %v4818_v51 }
 0x712   : > { %v5041_v15 = vpop.f32.mrf.mxu0 }
 0x713   : > { %v14927_v38 = vpop.f32.mrf.mxu1  ;;  %v5042_v57 = vadd.f32 %v5041_v15, %v4922_v11  ;;  %v5176_v15 = vadd.f32 %v14898_v16, %v5049_v7 }
 0x714   : > { %v14885_v20 = vpop.f32.mrf.mxu0 }
 0x715   : > { %v5399_v60 = vpop.f32.mrf.mxu1  ;;  %v5168_v1 = vadd.f32 %v5167_v34, %v5042_v57  ;;  %v5063_v7 = vadd.f32 %v14885_v20, %v4940_v22 }
 0x716   : > { %v5055_v54 = vpop.f32.mrf.mxu0 }
 0x717   : > { %v14930_v29 = vpop.f32.mrf.mxu1  ;;  %v5056_v23 = vadd.f32 %v5055_v54, %v4934_v3  ;;  %v5192_v54 = vadd.f32 %v18601_v41, %v5063_v7 }
 0x718   : > { %v18607_v56 = vpop.f32.mrf.mxu0 }
 0x719   : > { %v5184_v27 = vadd.f32 %v5183_v24, %v5056_v23  ;;  %v4952_v24 = vadd.f32 %v18595_v32, %v18599_v18 }
 0x71a   : > { %v5069_v61 = vpop.f32.mrf.mxu0 }
 0x71b   : > { %v5070_v58 = vadd.f32 %v5069_v61, %v4946_v39  ;;  %v5077_v5 = vadd.f32 %v18607_v56, %v4952_v24 }
 0x71c   : > { %v14911_v43 = vpop.f32.mrf.mxu0 }
 0x71d   : > { %v5291_v0 = vadd.f32 %v14911_v43, %v5160_v53  ;;  %v5411_v53 = vpop.f32.mrf.mxu1  ;;  %v5200_v51 = vadd.f32 %v18605_v6, %v5070_v58  ;;  %v5208_v41 = vadd.f32 %v18603_v31, %v5077_v5 }
 0x71e   : > { %v5284_v55 = vpop.f32.mrf.mxu0 }
 0x71f   : > { %v5285_v4 = vadd.f32 %v5284_v55, %v5152_v30  ;;  %v5406_v35 = vadd.f32 %v14927_v38, %v5291_v0  ;;  %v14933_v28 = vpop.f32.mrf.mxu1 }
 0x720   : > { %v14914_v10 = vpop.f32.mrf.mxu0 }
 0x721   : > { %v5400_v25 = vadd.f32 %v5399_v60, %v5285_v4  ;;  %v18615_v60 = vsub.f32 %v5477_v40, %v18612_v48  ;;  %v5303_v4 = vadd.f32 %v14914_v10, %v5176_v15  ;;  %v5423_v59 = vpop.f32.mrf.mxu1  ;;  %v19914_v40 = vand.u32 4294901760, %v18527_v17 }
 0x722   : > { %v5296_v26 = vpop.f32.mrf.mxu0 }
 0x723   : > { %5445 = vxpose.xlu1.b32.start [1/8] (short) (narrow) %v5400_v25, 8  ;;  %v5297_v45 = vadd.f32 %v5296_v26, %v5168_v1  ;;  %v5646_v1 = vand.u32 4294901760, %v18615_v60  ;;  %v5418_v44 = vadd.f32 %v14930_v29, %v5303_v4  ;;  %v14936_v62 = vpop.f32.mrf.mxu1  ;;  %v6032_v25 = vld [vmem:[%s19461_s13] sm:$0xf] }
 0x724   : > { %v14917_v37 = vpop.f32.mrf.mxu0  ;;  %v6042_v29 = vsel %vm6040_vm6, %v6032_v25, 0 }
 0x725   : > { %v5412_v42 = vadd.f32 %v5411_v53, %v5297_v45  ;;  %v5647_v10 = vsub.f32 %v18615_v60, %v5646_v1  ;;  %v5315_v20 = vadd.f32 %v14917_v37, %v5192_v54  ;;  %v5435_v43 = vpop.f32.mrf.mxu1  ;;  %v18671_v3 = vand.u32 4294901760, %v6042_v29 }
 0x726   : > { %v5308_v26 = vpop.f32.mrf.mxu0 }
 0x727   : > { %5446 = vxpose.xlu1.b32.cont [2/8] (short) (narrow) %v5406_v35, 8  ;;  %v5309_v8 = vadd.f32 %v5308_v26, %v5184_v27  ;;  %v5648_v34 = vand.u32 4294901760, %v5647_v10  ;;  %v5430_v61 = vadd.f32 %v14933_v28, %v5315_v20  ;;  %v19912_v35 = vld [vmem:[#allocation38_spill] sm:$0xff]  ;;  %v18682_v45 = vsub.f32 %v6042_v29, %v18671_v3 }
 0x728   : > { %v14920_v16 = vpop.f32.mrf.mxu0 }
 0x729   : > { %14971 = vmatpush3.msra.mxu1 %v5648_v34  ;;  %v5424_v9 = vadd.f32 %v5423_v59, %v5309_v8  ;;  %v5327_v11 = vadd.f32 %v14920_v16, %v5208_v41 }
 0x72a   : > { %14994 = vmatprep.subr.mxu1 %v19910_v63  ;;  %v5320_v21 = vpop.f32.mrf.mxu0 }
 0x72b   : > { %5447 = vxpose.xlu1.b32.cont [3/8] (short) (narrow) %v5412_v42, 8  ;;  %v5321_v38 = vadd.f32 %v5320_v21, %v5200_v51  ;;  %v5442_v32 = vadd.f32 %v14936_v62, %v5327_v11 }
 0x72d   : > { %v5436_v30 = vadd.f32 %v5435_v43, %v5321_v38  ;;  %v18830_v38 = vld [vmem:[%s19462_s14] sm:$0x1] }
 0x72f   : > { %5448 = vxpose.xlu1.b32.cont [4/8] (short) (narrow) %v5418_v44, 8 }
 0x733   : > { %5449 = vxpose.xlu1.b32.cont [5/8] (short) (narrow) %v5424_v9, 8 }
 0x737   : > { %5450 = vxpose.xlu1.b32.cont [6/8] (short) (narrow) %v5430_v61, 8 }
 0x73b   : > { %5451 = vxpose.xlu1.b32.cont [7/8] (short) (narrow) %v5436_v30, 8 }
 0x73f   : > { %5452 = vxpose.xlu1.b32.end [8/8] (short) (narrow) %v5442_v32, 8 }
 0x79f   : > { %v5461_v18 = vpop.trf.xlu1 }
 0x7a0   : > { %v5493_v55 = vsel %vm1821_vm3, %v5461_v18, 0 }
 0x7a1   : > { %v18636_v57 = vand.u32 4294901760, %v5493_v55 }
 0x7a3   : > { %v5569_v6 = vsub.f32 %v5493_v55, %v18636_v57  ;;  %14973 = vmatmul.mubr.f32.vlgmr.msra.gmra.mxu1 %v18636_v57  ;;  %v18836_v55 = vld [vmem:[%s19464_s16] sm:$0x1] }
 0x7a4   : > { %14995 = vmatpush3.msra.mxu1 %v18499_v19  ;;  %15010 = vmatprep.mubr.msk.f32.mxu1 %vm15750_vm5, %v19910_v63 }
 0x7a5   : > { %v5570_v31 = vand.u32 4294901760, %v5569_v6  ;;  %14996 = vmatprep.subr.mxu1 %v19910_v63 }
 0x7a6   : > { %14997 = vmatpush3.msra.mxu1 %v18501_v49 }
 0x7a7   : > { %v5571_v56 = vsub.f32 %v5569_v6, %v5570_v31  ;;  %14998 = vmatprep.subr.mxu1 %v19910_v63 }
 0x7a8   : > { %14999 = vmatpush3.msra.mxu1 %v18503_v52 }
 0x7a9   : > { %v5572_v0 = vand.u32 4294901760, %v5571_v56  ;;  %15000 = vmatprep.subr.mxu1 %v19910_v63 }
 0x7aa   : > { %15001 = vmatpush3.msra.mxu1 %v18514_v13 }
 0x7ab   : > { %15002 = vmatprep.subr.mxu1 %v19910_v63  ;;  %14954 = vmatmul.mubr.f32.vlgmr.msra.gmra.mxu0 %v5572_v0 }
 0x7ac   : > { %14976 = vmatpush3.msra.mxu0 %v18524_v12  ;;  %15003 = vmatpush3.msra.mxu1 %v18516_v14 }
 0x7ad   : > { %14977 = vmatprep.subr.mxu0 %v19910_v63  ;;  %15004 = vmatprep.subr.mxu1 %v19910_v63 }
 0x7ae   : > { %14978 = vmatpush3.msra.mxu0 %v18527_v17  ;;  %15005 = vmatpush3.msra.mxu1 %v18518_v33 }
 0x7af   : > { %14979 = vmatprep.subr.mxu0 %v19910_v63  ;;  %15006 = vmatprep.subr.mxu1 %v19910_v63 }
 0x7b0   : > { %14980 = vmatpush3.msra.mxu0 %v18530_v47  ;;  %15007 = vmatpush3.msra.mxu1 %v18533_v2 }
 0x7b1   : > { %14981 = vmatprep.subr.mxu0 %v19910_v63  ;;  %15008 = vmatprep.subr.mxu1 %v19910_v63 }
 0x7b2   : > { %14982 = vmatpush3.msra.mxu0 %v18536_v46  ;;  %15009 = vmatpush3.msra.mxu1 %v18612_v48 }
 0x7b3   : > { %14983 = vmatprep.subr.mxu0 %v19910_v63  ;;  %15032 = vmatprep.subr.mxu1 %v19910_v63 }
 0x7b4   : > { %14984 = vmatpush3.msra.mxu0 %v18539_v50  ;;  %15011 = vmatmul.mubr.f32.vlgmr.msra.gmra.mxu1 %v5570_v31 }
 0x7b5   : > { %15033 = vmatpush3.msra.mxu1 %v18499_v19  ;;  %14985 = vmatprep.subr.mxu0 %v19910_v63  ;;  %v6034_v19 = vld [vmem:[%s19463_s15] sm:$0xf] }
 0x7b6   : > { %15034 = vmatprep.subr.mxu1 %v19910_v63  ;;  %14986 = vmatpush3.msra.mxu0 %v18547_v36 }
 0x7b7   : > { %15035 = vmatpush3.msra.mxu1 %v18501_v49  ;;  %14987 = vmatprep.subr.mxu0 %v19910_v63  ;;  %v18697_v49 = vand.u32 4294901760, %v18682_v45 }
 0x7b8   : > { %15036 = vmatprep.subr.mxu1 %v19910_v63  ;;  %14988 = vmatpush3.msra.mxu0 %v19912_v35 }
 0x7b9   : > { %15037 = vmatpush3.msra.mxu1 %v18503_v52  ;;  %14989 = vmatprep.subr.mxu0 %v19910_v63  ;;  %v19913_v52 = vand.u32 4294901760, %v18524_v12  ;;  %v6154_v37 = vsub.f32 %v18682_v45, %v18697_v49  ;;  %v19915_v12 = vand.u32 4294901760, %v18530_v47 }
 0x7ba   : > { %15038 = vmatprep.subr.mxu1 %v19910_v63  ;;  %14990 = vmatpush3.msra.mxu0 %v18615_v60  ;;  %v13878_v60 = vld [vmem:[%s19460_s12] ss:$0 sm:$0xff] }
 0x7bb   : > { %15039 = vmatpush3.msra.mxu1 %v18514_v13  ;;  %14991 = vmatprep.mubr.msk.f32.mxu0 %vm15750_vm5, %v19910_v63  ;;  %v6517_v13 = vsel %vm6040_vm6, %v6034_v19, 0  ;;  %v18724_v17 = vand.u32 4294901760, %v6154_v37 }
 0x7bc   : > { %15013 = vmatprep.subr.mxu0 %v19910_v63  ;;  %15040 = vmatprep.subr.mxu1 %v19910_v63 }
 0x7bd   : > { %14992 = vmatmul.mubr.f32.vlgmr.msra.gmra.mxu0 %v5569_v6  ;;  %15041 = vmatpush3.msra.mxu1 %v18516_v14  ;;  %v18713_v14 = vand.u32 4294901760, %v6517_v13 }
 0x7be   : > { %15014 = vmatpush3.msra.mxu0 %v19913_v52  ;;  %15042 = vmatprep.subr.mxu1 %v19910_v63 }
 0x7bf   : > { %15015 = vmatprep.subr.mxu0 %v19910_v63  ;;  %15043 = vmatpush3.msra.mxu1 %v18518_v33  ;;  %v19916_v33 = vand.u32 4294901760, %v18536_v46  ;;  %v18729_v47 = vsub.f32 %v6517_v13, %v18713_v14  ;;  %v19918_v46 = vand.u32 4294901760, %v18547_v36 }
 0x7c0   : > { %15016 = vmatpush3.msra.mxu0 %v19914_v40  ;;  %15044 = vmatprep.subr.mxu1 %v19910_v63 }
 0x7c1   : > { %15017 = vmatprep.subr.mxu0 %v19910_v63  ;;  %15045 = vmatpush3.msra.mxu1 %v18533_v2  ;;  %v19917_v2 = vand.u32 4294901760, %v18539_v50  ;;  %v18744_v50 = vand.u32 4294901760, %v18729_v47 }
 0x7c2   : > { %15018 = vmatpush3.msra.mxu0 %v19915_v12  ;;  %15046 = vmatprep.subr.mxu1 %v19910_v63 }
 0x7c3   : > { %15019 = vmatprep.subr.mxu0 %v19910_v63  ;;  %15047 = vmatpush3.msra.mxu1 %v18612_v48  ;;  %v19919_v48 = vand.u32 4294901760, %v19912_v35  ;;  %v6629_v36 = vsub.f32 %v18729_v47, %v18744_v50 }
 0x7c4   : > { %15020 = vmatpush3.msra.mxu0 %v19916_v33  ;;  %15048 = vmatprep.mubr.msk.f32.mxu1 %vm15750_vm5, %v19910_v63 }
 0x7c5   : > { %15021 = vmatprep.subr.mxu0 %v19910_v63  ;;  %15049 = vmatmul.mubr.f32.vlgmr.msra.gmra.mxu1 %v18636_v57  ;;  %v18768_v23 = vand.u32 4294901760, %v6629_v36 }
 0x7c6   : > { %15022 = vmatpush3.msra.mxu0 %v19917_v2  ;;  %15029 = vmatprep.mubr.msk.f32.mxu0 %vm15750_vm5, %v19910_v63 }
 0x7c7   : > { %15023 = vmatprep.subr.mxu0 %v19910_v63  ;;  %15056 = vmatprep.subr.mxu1 %v19910_v63 }
 0x7c8   : > { %15024 = vmatpush3.msra.mxu0 %v19918_v46  ;;  %15057 = vmatpush3.msra.mxu1 %v18724_v17 }
 0x7c9   : > { %15025 = vmatprep.subr.mxu0 %v19910_v63  ;;  %15058 = vmatprep.mubr.msk.f32.mxu1 %vm15750_vm5, %v19910_v63 }
 0x7ca   : > { %15026 = vmatpush3.msra.mxu0 %v19919_v48  ;;  %15059 = vmatmul.mubr.f32.vlgmr.msra.gmra.mxu1 %v19910_v63 }
 0x7cb   : > { %15027 = vmatprep.subr.mxu0 %v19910_v63  ;;  %15066 = vmatprep.subr.mxu1 %v19910_v63 }
 0x7cc   : > { %15028 = vmatpush3.msra.mxu0 %v5646_v1  ;;  %15067 = vmatpush3.msra.mxu1 %v18671_v3 }
 0x7cd   : > { %15030 = vmatmul.mubr.f32.vlgmr.msra.gmra.mxu0 %v18636_v57  ;;  %15051 = vmatprep.subr.mxu0 %v19910_v63 }
 0x7ce   : > { %15052 = vmatpush3.msra.mxu0 %v18671_v3  ;;  %15053 = vmatprep.mubr.msk.f32.mxu0 %vm15750_vm5, %v19910_v63 }
 0x7cf   : > { %15061 = vmatprep.subr.mxu0 %v19910_v63  ;;  %15068 = vmatprep.mubr.msk.f32.mxu1 %vm15750_vm5, %v19910_v63 }
 0x7d0   : > { %15069 = vmatmul.mubr.f32.vlgmr.msra.gmra.mxu1 %v19910_v63  ;;  %15076 = vmatprep.subr.mxu1 %v19910_v63 }
 0x7d1   : > { %15054 = vmatmul.mubr.f32.vlgmr.msra.gmra.mxu0 %v19910_v63  ;;  %15077 = vmatpush3.msra.mxu1 %v18671_v3 }
 0x7d2   : > { %15062 = vmatpush3.msra.mxu0 %v18682_v45  ;;  %15063 = vmatprep.mubr.msk.f32.mxu0 %vm15750_vm5, %v19910_v63 }
 0x7d3   : > { %15071 = vmatprep.subr.mxu0 %v19910_v63  ;;  %15078 = vmatprep.mubr.msk.f32.mxu1 %vm15750_vm5, %v19910_v63 }
 0x7d4   : > { %15079 = vmatmul.mubr.f32.vlgmr.msra.gmra.mxu1 %v19910_v63  ;;  %15086 = vmatprep.subr.mxu1 %v19910_v63 }
 0x7d5   : > { %15064 = vmatmul.mubr.f32.vlgmr.msra.gmra.mxu0 %v19910_v63  ;;  %15087 = vmatpush3.msra.mxu1 %v18768_v23 }
 0x7d6   : > { %15072 = vmatpush3.msra.mxu0 %v18697_v49  ;;  %15073 = vmatprep.mubr.msk.f32.mxu0 %vm15750_vm5, %v19910_v63 }
 0x7d7   : > { %15081 = vmatprep.subr.mxu0 %v19910_v63  ;;  %15088 = vmatprep.mubr.msk.f32.mxu1 %vm15750_vm5, %v19910_v63 }
 0x7d8   : > { %15089 = vmatmul.mubr.f32.vlgmr.msra.gmra.mxu1 %v19910_v63  ;;  %15096 = vmatprep.subr.mxu1 %v19910_v63 }
 0x7d9   : > { %15074 = vmatmul.mubr.f32.vlgmr.msra.gmra.mxu0 %v19910_v63  ;;  %15097 = vmatpush3.msra.mxu1 %v18713_v14 }
 0x7da   : > { %15082 = vmatpush3.msra.mxu0 %v18713_v14  ;;  %15083 = vmatprep.mubr.msk.f32.mxu0 %vm15750_vm5, %v19910_v63 }
 0x7db   : > { %15091 = vmatprep.subr.mxu0 %v19910_v63  ;;  %15098 = vmatprep.mubr.msk.f32.mxu1 %vm15750_vm5, %v19910_v63 }
 0x7dc   : > { %15099 = vmatmul.mubr.f32.vlgmr.msra.gmra.mxu1 %v19910_v63  ;;  %15106 = vmatprep.subr.mxu1 %v19910_v63 }
 0x7dd   : > { %15084 = vmatmul.mubr.f32.vlgmr.msra.gmra.mxu0 %v19910_v63  ;;  %15107 = vmatpush3.msra.mxu1 %v18713_v14 }
 0x7de   : > { %15092 = vmatpush3.msra.mxu0 %v18729_v47  ;;  %15093 = vmatprep.mubr.msk.f32.mxu0 %vm15750_vm5, %v19910_v63 }
 0x7df   : > { %15101 = vmatprep.subr.mxu0 %v19910_v63  ;;  %15108 = vmatprep.mubr.msk.f32.mxu1 %vm15750_vm5, %v19910_v63 }
 0x7e0   : > { %15109 = vmatmul.mubr.f32.vlgmr.msra.gmra.mxu1 %v19910_v63  ;;  %15116 = vmatprep.subr.mxu1 %v19910_v63 }
 0x7e1   : > { %15094 = vmatmul.mubr.f32.vlgmr.msra.gmra.mxu0 %v19910_v63  ;;  %15117 = vmatpush3.msra.mxu1 %v18724_v17 }
 0x7e2   : > { %15102 = vmatpush3.msra.mxu0 %v18744_v50  ;;  %15103 = vmatprep.mubr.msk.f32.mxu0 %vm15750_vm5, %v19910_v63 }
 0x7e3   : > { %15118 = vmatprep.mubr.msk.f32.mxu1 %vm15750_vm5, %v19910_v63  ;;  %15126 = vmatprep.subr.mxu1 %v19910_v63 }
 0x7e4   : > { %15111 = vmatprep.subr.mxu0 %v19910_v63 }
 0x7e5   : > { %15104 = vmatmul.mubr.f32.vlgmr.msra.gmra.mxu0 %v19910_v63 }
 0x7e6   : > { %15112 = vmatpush3.msra.mxu0 %v18671_v3  ;;  %15113 = vmatprep.mubr.msk.f32.mxu0 %vm15750_vm5, %v19910_v63 }
 0x7e7   : > { %15121 = vmatprep.subr.mxu0 %v19910_v63 }
 0x863   : > { %v5685_v15 = vpop.f32.mrf.mxu1 }
 0x865   : > { %v14974_v53 = vpop.f32.mrf.mxu1 }
 0x86b   : > { %v5574_v22 = vpop.f32.mrf.mxu0 }
 0x86c   : > { %v5575_v4 = vadd.f32 %v13878_v60, %v5574_v22 }
 0x86d   : > { %v14955_v42 = vpop.f32.mrf.mxu0 }
 0x86e   : > { %v5686_v26 = vadd.f32 %v5685_v15, %v5575_v4 }
 0x874   : > { %v5854_v1 = vpop.f32.mrf.mxu1 }
 0x876   : > { %v15012_v7 = vpop.f32.mrf.mxu1 }
 0x87d   : > { %v5773_v27 = vpop.f32.mrf.mxu0 }
 0x87e   : > { %v5774_v28 = vadd.f32 %v5773_v27, %v5686_v26 }
 0x87f   : > { %v14993_v10 = vpop.f32.mrf.mxu0 }
 0x880   : > { %v5855_v39 = vadd.f32 %v5854_v1, %v5774_v28 }
 0x885   : > { %v6028_v44 = vpop.f32.mrf.mxu1 }
 0x887   : > { %v15050_v8 = vpop.f32.mrf.mxu1 }
 0x88a   : > { %v6192_v16 = vpop.f32.mrf.mxu1 }
 0x88c   : > { %v15060_v34 = vpop.f32.mrf.mxu1 }
 0x88d   : > { %v5949_v58 = vpop.f32.mrf.mxu0 }
 0x88e   : > { %v5950_v54 = vadd.f32 %v5949_v58, %v5855_v39 }
 0x88f   : > { %v15031_v59 = vpop.f32.mrf.mxu0 }
 0x890   : > { %v18825_v24 = vadd.f32 %v6028_v44, %v5950_v54  ;;  %v6340_v20 = vpop.f32.mrf.mxu1 }
 0x891   : > { %v6116_v9 = vpop.f32.mrf.mxu0 }
 0x892   : > { %v15070_v21 = vpop.f32.mrf.mxu1  ;;  %v6117_v30 = vadd.f32 %v6116_v9, %v18830_v38 }
 0x893   : > { %v15055_v5 = vpop.f32.mrf.mxu0 }
 0x894   : > { %v6486_v51 = vpop.f32.mrf.mxu1  ;;  %v6193_v31 = vadd.f32 %v6192_v16, %v6117_v30 }
 0x895   : > { %v6266_v62 = vpop.f32.mrf.mxu0 }
 0x896   : > { %v15080_v61 = vpop.f32.mrf.mxu1  ;;  %v6267_v52 = vadd.f32 %v6266_v62, %v6193_v31 }
 0x897   : > { %v15065_v41 = vpop.f32.mrf.mxu0 }
 0x898   : > { %v6667_v43 = vpop.f32.mrf.mxu1  ;;  %v6341_v2 = vadd.f32 %v6340_v20, %v6267_v52 }
 0x899   : > { %v6414_v11 = vpop.f32.mrf.mxu0 }
 0x89a   : > { %v15090_v32 = vpop.f32.mrf.mxu1  ;;  %v6415_v15 = vadd.f32 %v6414_v11, %v6341_v2 }
 0x89b   : > { %v15075_v18 = vpop.f32.mrf.mxu0 }
 0x89c   : > { %v6815_v57 = vpop.f32.mrf.mxu1  ;;  %v6487_v60 = vadd.f32 %v6486_v51, %v6415_v15 }
 0x89d   : > { %v6591_v6 = vpop.f32.mrf.mxu0 }
 0x89e   : > { %v6592_v56 = vadd.f32 %v6591_v6, %v18836_v55  ;;  %v15100_v0 = vpop.f32.mrf.mxu1  ;;  %v6490_v22 = vadd.f32 %v6487_v60, %v18825_v24 }
 0x89f   : > { %v15085_v25 = vpop.f32.mrf.mxu0 }
 0x8a0   : > { %v6668_v29 = vadd.f32 %v6667_v43, %v6592_v56  ;;  %v6961_v35 = vpop.f32.mrf.mxu1  ;;  %v13879_v4 = vmul.f32 -1.442695, %v6490_v22 }
 0x8a1   : > { %v6741_v19 = vpop.f32.mrf.mxu0 }
 0x8a2   : > { %v6742_v13 = vadd.f32 %v6741_v19, %v6668_v29  ;;  %v15110_v40 = vpop.f32.mrf.mxu1  ;;  %15585 = vpow2.f32 %v13879_v4 }
 0x8a3   : > { %v15095_v37 = vpop.f32.mrf.mxu0 }
 0x8a4   : > { %v6816_v12 = vadd.f32 %v6815_v57, %v6742_v13 }
 0x8a5   : > { %v6889_v33 = vpop.f32.mrf.mxu0 }
 0x8a6   : > { %v6890_v46 = vadd.f32 %v6889_v33, %v6816_v12 }
 0x8a7   : > { %v15105_v48 = vpop.f32.mrf.mxu0 }
 0x8a8   : > { %v6962_v36 = vadd.f32 %v6961_v35, %v6890_v46 }
 0x8aa   : > { %v6966_v53 = vrot.slane %v6962_v36, 1 }
 0x8ac   : > { %6967 = vrot.lane.b32.xlu0 %v6966_v53, %s15751_s19 }
 0x8af   : > { %v15586_v42 = vpop.eup %15585 }
 0x8b0   : > { %6498 = vrot.lane.b32.xlu0 %v6487_v60, %s15752_s23  ;;  %v6494_v26 = vadd.f32 1.0, %v15586_v42 }
 0x8b2   : > { %15587 = vrcp.f32 %v6494_v26 }
 0x8b4   : > { %6977 = vrot.lane.b32.xlu0 %v6966_v53, %s15753_s29 }
 0x8bf   : > { %v15588_v28 = vpop.eup %15587 }
 0x8c0   : > { %v6508_v51 = vsub.f32 1.0, %v15588_v28  ;;  %v6514_v61 = vmul.f32 0.0, %v15588_v28 }
 0x91e   : > { %v6968_v1 = vpop.permute.xlu0 %6967 }
 0x91f   : > { %v6970_v7 = vadd.f32 %v6968_v1, %v18825_v24 }
 0x921   : > { %v13880_v27 = vmul.f32 -1.442695, %v6970_v7 }
 0x922   : > { %v6499_v10 = vpop.permute.xlu0 %6498 }
 0x923   : > { %15589 = vpow2.f32 %v13880_v27  ;;  %v6501_v39 = vmul.f32 %v15588_v28, %v6499_v10 }
 0x925   : > { %6503 = vrot.lane.b32.xlu0 %v6501_v39, %s15754_s18 }
 0x926   : > { %v6978_v34 = vpop.permute.xlu0 %6977 }
 0x930   : > { %v15590_v44 = vpop.eup %15589 }
 0x931   : > { %v6974_v8 = vadd.f32 1.0, %v15590_v44 }
 0x933   : > { %15591 = vrcp.f32 %v6974_v8 }
 0x940   : > { %v15592_v16 = vpop.eup %15591 }
 0x941   : > { %v6980_v58 = vmul.f32 %v15592_v16, %v6978_v34  ;;  %v6987_v11 = vsub.f32 1.0, %v15592_v16  ;;  %v6993_v32 = vmul.f32 0.0, %v15592_v16 }
 0x943   : > { %6982 = vrot.lane.b32.xlu0 %v6980_v58, %s15754_s18 }
 0x997   : > { %v6504_v54 = vpop.permute.xlu0 %6503 }
 0x998   : > { %v6506_v59 = vadd.f32 %v6504_v54, %v18825_v24 }
 0x99a   : > { %15593 = vtanh.f32 %v6506_v59 }
 0x9a7   : > { %v15594_v20 = vpop.eup %15593 }
 0x9a8   : > { %6510 = vrot.lane.b32.xlu0 %v15594_v20, %s15755_s30 }
 0x9b5   : > { %v6983_v9 = vpop.permute.xlu0 %6982 }
 0x9b6   : > { %v6985_v21 = vadd.f32 %v6983_v9, %v18825_v24 }
 0x9b8   : > { %15595 = vtanh.f32 %v6985_v21 }
 0x9c5   : > { %v15596_v5 = vpop.eup %15595 }
 0x9c6   : > { %6989 = vrot.lane.b32.xlu0 %v15596_v5, %s15755_s30 }
 0xa1a   : > { %v6511_v62 = vpop.permute.xlu0 %6510 }
 0xa1b   : > { %v6513_v41 = vmul.f32 %v6511_v62, %v6508_v51 }
 0xa1d   : > { %v18850_v43 = vadd.f32 %v6514_v61, %v6513_v41 }
 0xa1f   : > { %6996 = vrot.lane.b32.xlu0 %v18850_v43, %s15755_s30 }
 0xa38   : > { %v6990_v30 = vpop.permute.xlu0 %6989 }
 0xa39   : > { %v6992_v18 = vmul.f32 %v6990_v30, %v6987_v11 }
 0xa3b   : > { %v18854_v57 = vadd.f32 %v6993_v32, %v6992_v18 }
 0xa3d   : > { %v7477_v6 = vrot.slane %v18854_v57, 7 }
 0xa3f   : > { %7478 = vrot.lane.b32.xlu0 %v7477_v6, %s15756_s26 }
 0xa91   : > { %v6997_v31 = vpop.permute.xlu0 %6996 }
 0xa92   : > { %v6998_v56 = vsel %vm6036_vm7, %v6997_v31, 0 }
 0xa93   : > { %v7066_v0 = vand.u32 4294901760, %v6998_v56 }
 0xa95   : > { %v7067_v25 = vsub.f32 %v6998_v56, %v7066_v0  ;;  %15119 = vmatmul.mubr.f32.vlgmr.msra.gmra.mxu1 %v7066_v0 }
 0xa96   : > { %15127 = vmatpush3.msra.mxu1 %v18671_v3  ;;  %15128 = vmatprep.mubr.msk.f32.mxu1 %vm15750_vm5, %v19910_v63 }
 0xa97   : > { %v7068_v29 = vand.u32 4294901760, %v7067_v25  ;;  %15136 = vmatprep.subr.mxu1 %v19910_v63 }
 0xa99   : > { %v7069_v35 = vsub.f32 %v7067_v25, %v7068_v29  ;;  %15129 = vmatmul.mubr.f32.vlgmr.msra.gmra.mxu1 %v7068_v29 }
 0xa9a   : > { %15137 = vmatpush3.msra.mxu1 %v18671_v3  ;;  %15138 = vmatprep.mubr.msk.f32.mxu1 %vm15750_vm5, %v19910_v63 }
 0xa9b   : > { %v7070_v19 = vand.u32 4294901760, %v7069_v35  ;;  %15146 = vmatprep.subr.mxu1 %v19910_v63 }
 0xa9d   : > { %15114 = vmatmul.mubr.f32.vlgmr.msra.gmra.mxu0 %v7070_v19  ;;  %15139 = vmatmul.mubr.f32.vlgmr.msra.gmra.mxu1 %v7066_v0 }
 0xa9e   : > { %15122 = vmatpush3.msra.mxu0 %v18682_v45  ;;  %15123 = vmatprep.mubr.msk.f32.mxu0 %vm15750_vm5, %v19910_v63 }
 0xa9f   : > { %15131 = vmatprep.subr.mxu0 %v19910_v63  ;;  %15147 = vmatpush3.msra.mxu1 %v18768_v23 }
 0xaa0   : > { %15148 = vmatprep.mubr.msk.f32.mxu1 %vm15750_vm5, %v19910_v63  ;;  %15156 = vmatprep.subr.mxu1 %v19910_v63 }
 0xaa1   : > { %15124 = vmatmul.mubr.f32.vlgmr.msra.gmra.mxu0 %v7067_v25 }
 0xaa2   : > { %15132 = vmatpush3.msra.mxu0 %v18697_v49  ;;  %15133 = vmatprep.mubr.msk.f32.mxu0 %vm15750_vm5, %v19910_v63 }
 0xaa3   : > { %15141 = vmatprep.subr.mxu0 %v19910_v63 }
 0xaa5   : > { %15134 = vmatmul.mubr.f32.vlgmr.msra.gmra.mxu0 %v7066_v0 }
 0xaa6   : > { %15142 = vmatpush3.msra.mxu0 %v18713_v14  ;;  %15143 = vmatprep.mubr.msk.f32.mxu0 %vm15750_vm5, %v19910_v63 }
 0xaa7   : > { %15151 = vmatprep.subr.mxu0 %v19910_v63 }
 0xab1   : > { %v7479_v52 = vpop.permute.xlu0 %7478 }
 0xab2   : > { %v7480_v13 = vsel %vm6036_vm7, %v7479_v52, 0 }
 0xab3   : > { %v7548_v40 = vand.u32 4294901760, %v7480_v13 }
 0xab5   : > { %v7549_v37 = vsub.f32 %v7480_v13, %v7548_v40  ;;  %15149 = vmatmul.mubr.f32.vlgmr.msra.gmra.mxu1 %v7548_v40 }
 0xab6   : > { %15157 = vmatpush3.msra.mxu1 %v18713_v14  ;;  %15158 = vmatprep.mubr.msk.f32.mxu1 %vm15750_vm5, %v19910_v63 }
 0xab7   : > { %v7550_v12 = vand.u32 4294901760, %v7549_v37  ;;  %15166 = vmatprep.subr.mxu1 %v19910_v63 }
 0xab9   : > { %v7551_v33 = vsub.f32 %v7549_v37, %v7550_v12  ;;  %15159 = vmatmul.mubr.f32.vlgmr.msra.gmra.mxu1 %v7550_v12 }
 0xaba   : > { %15167 = vmatpush3.msra.mxu1 %v18713_v14  ;;  %15168 = vmatprep.mubr.msk.f32.mxu1 %vm15750_vm5, %v19910_v63 }
 0xabb   : > { %v7552_v2 = vand.u32 4294901760, %v7551_v33  ;;  %15176 = vmatprep.subr.mxu1 %v19910_v63 }
 0xabd   : > { %15144 = vmatmul.mubr.f32.vlgmr.msra.gmra.mxu0 %v7552_v2  ;;  %15169 = vmatmul.mubr.f32.vlgmr.msra.gmra.mxu1 %v7548_v40 }
 0xabe   : > { %15152 = vmatpush3.msra.mxu0 %v18729_v47  ;;  %15153 = vmatprep.mubr.msk.f32.mxu0 %vm15750_vm5, %v19910_v63 }
 0xabf   : > { %15161 = vmatprep.subr.mxu0 %v19910_v63  ;;  %15177 = vmatpush3.msra.mxu1 %v18724_v17 }
 0xac0   : > { %15178 = vmatprep.mubr.msk.f32.mxu1 %vm15750_vm5, %v19910_v63  ;;  %15186 = vmatprep.subr.mxu1 %v19910_v63 }
 0xac1   : > { %15154 = vmatmul.mubr.f32.vlgmr.msra.gmra.mxu0 %v7549_v37 }
 0xac2   : > { %15162 = vmatpush3.msra.mxu0 %v18744_v50  ;;  %15163 = vmatprep.mubr.msk.f32.mxu0 %vm15750_vm5, %v19910_v63 }
 0xac3   : > { %15171 = vmatprep.subr.mxu0 %v19910_v63 }
 0xac5   : > { %15164 = vmatmul.mubr.f32.vlgmr.msra.gmra.mxu0 %v7548_v40 }
 0xac6   : > { %15172 = vmatpush3.msra.mxu0 %v18671_v3  ;;  %15173 = vmatprep.mubr.msk.f32.mxu0 %vm15750_vm5, %v19910_v63 }
 0xac7   : > { %15181 = vmatprep.subr.mxu0 %v19910_v63 }
 0xb55   : > { %v7148_v46 = vpop.f32.mrf.mxu1 }
 0xb57   : > { %v15120_v48 = vpop.f32.mrf.mxu1 }
 0xb59   : > { %v7296_v36 = vpop.f32.mrf.mxu1 }
 0xb5b   : > { %v15130_v15 = vpop.f32.mrf.mxu1 }
 0xb5d   : > { %v7072_v53 = vpop.f32.mrf.mxu0  ;;  %v7442_v60 = vpop.f32.mrf.mxu1 }
 0xb5e   : > { %v7073_v28 = vadd.f32 %v7072_v53, %v18830_v38 }
 0xb5f   : > { %v15115_v22 = vpop.f32.mrf.mxu0  ;;  %v15140_v4 = vpop.f32.mrf.mxu1 }
 0xb60   : > { %v7149_v44 = vadd.f32 %v7148_v46, %v7073_v28 }
 0xb61   : > { %v7222_v42 = vpop.f32.mrf.mxu0 }
 0xb62   : > { %v7223_v58 = vadd.f32 %v7222_v42, %v7149_v44 }
 0xb63   : > { %v15125_v26 = vpop.f32.mrf.mxu0 }
 0xb64   : > { %v7297_v5 = vadd.f32 %v7296_v36, %v7223_v58 }
 0xb65   : > { %v7370_v1 = vpop.f32.mrf.mxu0 }
 0xb66   : > { %v7371_v11 = vadd.f32 %v7370_v1, %v7297_v5  ;;  %v7472_v1 = vrot.slane %v18850_v43, 7 }
 0xb67   : > { %v15135_v7 = vpop.f32.mrf.mxu0 }
 0xb68   : > { %v7443_v6 = vadd.f32 %v7442_v60, %v7371_v11 }
 0xb6a   : > { %v7447_v56 = vrot.slane %v7443_v6, 7 }
 0xb6c   : > { %v7449_v0 = vadd.f32 %v7447_v56, %v18825_v24 }
 0xb6e   : > { %v13881_v25 = vmul.f32 -1.442695, %v7449_v0 }
 0xb70   : > { %15597 = vpow2.f32 %v13881_v25 }
 0xb75   : > { %v7630_v27 = vpop.f32.mrf.mxu1 }
 0xb77   : > { %v15150_v10 = vpop.f32.mrf.mxu1 }
 0xb79   : > { %v7778_v39 = vpop.f32.mrf.mxu1 }
 0xb7b   : > { %v15160_v8 = vpop.f32.mrf.mxu1 }
 0xb7c   : > { %v7956_v8 = vrot.slane %v18854_v57, 1 }
 0xb7d   : > { %v7554_v16 = vpop.f32.mrf.mxu0  ;;  %v7924_v34 = vpop.f32.mrf.mxu1 }
 0xb7e   : > { %v7555_v54 = vadd.f32 %v7554_v16, %v18836_v55  ;;  %v15598_v29 = vpop.eup %15597 }
 0xb7f   : > { %v15145_v59 = vpop.f32.mrf.mxu0  ;;  %v15170_v20 = vpop.f32.mrf.mxu1  ;;  %v7453_v35 = vadd.f32 1.0, %v15598_v29 }
 0xb80   : > { %v7631_v9 = vadd.f32 %v7630_v27, %v7555_v54 }
 0xb81   : > { %v7704_v21 = vpop.f32.mrf.mxu0  ;;  %15599 = vrcp.f32 %v7453_v35 }
 0xb82   : > { %v7705_v51 = vadd.f32 %v7704_v21, %v7631_v9 }
 0xb83   : > { %v15155_v62 = vpop.f32.mrf.mxu0 }
 0xb84   : > { %v7779_v61 = vadd.f32 %v7778_v39, %v7705_v51 }
 0xb85   : > { %v7852_v41 = vpop.f32.mrf.mxu0 }
 0xb86   : > { %v7853_v30 = vadd.f32 %v7852_v41, %v7779_v61 }
 0xb87   : > { %v15165_v32 = vpop.f32.mrf.mxu0 }
 0xb88   : > { %v7925_v18 = vadd.f32 %v7924_v34, %v7853_v30 }
 0xb8a   : > { %v7929_v31 = vrot.slane %v7925_v18, 2 }
 0xb8c   : > { %7930 = vrot.lane.b32.xlu0 %v7929_v31, %s15751_s19 }
 0xb8e   : > { %v15600_v40 = vpop.eup %15599 }
 0xb8f   : > { %v7466_v26 = vsub.f32 1.0, %v15600_v40  ;;  %v7474_v27 = vmul.f32 %v15600_v40, %v7472_v1 }
 0xb90   : > { %7456 = vrot.lane.b32.xlu0 %v7447_v56, %s15752_s23 }
 0xb94   : > { %7940 = vrot.lane.b32.xlu0 %v7929_v31, %s15753_s29 }
 0xbfe   : > { %v7931_v19 = vpop.permute.xlu0 %7930 }
 0xbff   : > { %v7933_v52 = vadd.f32 %v7931_v19, %v18825_v24 }
 0xc01   : > { %v13882_v13 = vmul.f32 -1.442695, %v7933_v52 }
 0xc02   : > { %v7457_v37 = vpop.permute.xlu0 %7456 }
 0xc03   : > { %15601 = vpow2.f32 %v13882_v13  ;;  %v7459_v12 = vmul.f32 %v15600_v40, %v7457_v37 }
 0xc05   : > { %7461 = vrot.lane.b32.xlu0 %v7459_v12, %s15754_s18 }
 0xc06   : > { %v7941_v48 = vpop.permute.xlu0 %7940 }
 0xc10   : > { %v15602_v33 = vpop.eup %15601 }
 0xc11   : > { %v7937_v2 = vadd.f32 1.0, %v15602_v33 }
 0xc13   : > { %15603 = vrcp.f32 %v7937_v2 }
 0xc20   : > { %v15604_v46 = vpop.eup %15603 }
 0xc21   : > { %v7943_v36 = vmul.f32 %v15604_v46, %v7941_v48  ;;  %v7950_v44 = vsub.f32 1.0, %v15604_v46  ;;  %v7958_v34 = vmul.f32 %v15604_v46, %v7956_v8 }
 0xc23   : > { %7945 = vrot.lane.b32.xlu0 %v7943_v36, %s15754_s18 }
 0xc77   : > { %v7462_v15 = vpop.permute.xlu0 %7461 }
 0xc78   : > { %v7464_v53 = vadd.f32 %v7462_v15, %v18825_v24 }
 0xc7a   : > { %15605 = vtanh.f32 %v7464_v53 }
 0xc87   : > { %v15606_v60 = vpop.eup %15605 }
 0xc88   : > { %7468 = vrot.lane.b32.xlu0 %v15606_v60, %s15755_s30 }
 0xc95   : > { %v7946_v22 = vpop.permute.xlu0 %7945 }
 0xc96   : > { %v7948_v4 = vadd.f32 %v7946_v22, %v18825_v24 }
 0xc98   : > { %15607 = vtanh.f32 %v7948_v4 }
 0xca5   : > { %v15608_v42 = vpop.eup %15607 }
 0xca6   : > { %7952 = vrot.lane.b32.xlu0 %v15608_v42, %s15755_s30 }
 0xcfa   : > { %v7469_v7 = vpop.permute.xlu0 %7468 }
 0xcfb   : > { %v7471_v28 = vmul.f32 %v7469_v7, %v7466_v26 }
 0xcfd   : > { %v18922_v10 = vadd.f32 %v7474_v27, %v7471_v28 }
 0xcff   : > { %v7961_v39 = vrot.slane %v18922_v10, 1 }
 0xd01   : > { %7968 = vrot.lane.b32.xlu0 %v7961_v39, %s15755_s30 }
 0xd18   : > { %v7953_v16 = vpop.permute.xlu0 %7952 }
 0xd19   : > { %v7955_v58 = vmul.f32 %v7953_v16, %v7950_v44 }
 0xd1b   : > { %v18929_v54 = vadd.f32 %v7958_v34, %v7955_v58 }
 0xd1d   : > { %v8448_v59 = vrot.slane %v18929_v54, 6 }
 0xd1f   : > { %8449 = vrot.lane.b32.xlu1 %v8448_v59, %s15756_s26 }
 0xd73   : > { %v7969_v20 = vpop.permute.xlu0 %7968 }
 0xd74   : > { %v7970_v9 = vsel %vm6036_vm7, %v7969_v20, 0 }
 0xd75   : > { %v8038_v21 = vand.u32 4294901760, %v7970_v9 }
 0xd77   : > { %v8039_v5 = vsub.f32 %v7970_v9, %v8038_v21  ;;  %15179 = vmatmul.mubr.f32.vlgmr.msra.gmra.mxu1 %v8038_v21 }
 0xd78   : > { %15187 = vmatpush3.msra.mxu1 %v18671_v3  ;;  %15188 = vmatprep.mubr.msk.f32.mxu1 %vm15750_vm5, %v19910_v63 }
 0xd79   : > { %v8040_v51 = vand.u32 4294901760, %v8039_v5  ;;  %15196 = vmatprep.subr.mxu1 %v19910_v63 }
 0xd7b   : > { %v8041_v62 = vsub.f32 %v8039_v5, %v8040_v51  ;;  %15189 = vmatmul.mubr.f32.vlgmr.msra.gmra.mxu1 %v8040_v51 }
 0xd7c   : > { %15197 = vmatpush3.msra.mxu1 %v18671_v3  ;;  %15198 = vmatprep.mubr.msk.f32.mxu1 %vm15750_vm5, %v19910_v63 }
 0xd7d   : > { %v8042_v61 = vand.u32 4294901760, %v8041_v62  ;;  %15206 = vmatprep.subr.mxu1 %v19910_v63 }
 0xd7f   : > { %15174 = vmatmul.mubr.f32.vlgmr.msra.gmra.mxu0 %v8042_v61  ;;  %15199 = vmatmul.mubr.f32.vlgmr.msra.gmra.mxu1 %v8038_v21 }
 0xd80   : > { %15182 = vmatpush3.msra.mxu0 %v18682_v45  ;;  %15183 = vmatprep.mubr.msk.f32.mxu0 %vm15750_vm5, %v19910_v63 }
 0xd81   : > { %15191 = vmatprep.subr.mxu0 %v19910_v63  ;;  %15207 = vmatpush3.msra.mxu1 %v18768_v23 }
 0xd82   : > { %15208 = vmatprep.mubr.msk.f32.mxu1 %vm15750_vm5, %v19910_v63  ;;  %15216 = vmatprep.subr.mxu1 %v19910_v63 }
 0xd83   : > { %15184 = vmatmul.mubr.f32.vlgmr.msra.gmra.mxu0 %v8039_v5 }
 0xd84   : > { %15192 = vmatpush3.msra.mxu0 %v18697_v49  ;;  %15193 = vmatprep.mubr.msk.f32.mxu0 %vm15750_vm5, %v19910_v63 }
 0xd85   : > { %15201 = vmatprep.subr.mxu0 %v19910_v63 }
 0xd87   : > { %15194 = vmatmul.mubr.f32.vlgmr.msra.gmra.mxu0 %v8038_v21 }
 0xd88   : > { %15202 = vmatpush3.msra.mxu0 %v18713_v14  ;;  %15203 = vmatprep.mubr.msk.f32.mxu0 %vm15750_vm5, %v19910_v63 }
 0xd89   : > { %15211 = vmatprep.subr.mxu0 %v19910_v63 }
 0xd91   : > { %v8450_v41 = vpop.permute.xlu1 %8449 }
 0xd92   : > { %v8451_v11 = vsel %vm6036_vm7, %v8450_v41, 0 }
 0xd93   : > { %v8519_v30 = vand.u32 4294901760, %v8451_v11 }
 0xd95   : > { %v8520_v32 = vsub.f32 %v8451_v11, %v8519_v30  ;;  %15209 = vmatmul.mubr.f32.vlgmr.msra.gmra.mxu1 %v8519_v30 }
 0xd96   : > { %15217 = vmatpush3.msra.mxu1 %v18713_v14  ;;  %15218 = vmatprep.mubr.msk.f32.mxu1 %vm15750_vm5, %v19910_v63 }
 0xd97   : > { %v8521_v18 = vand.u32 4294901760, %v8520_v32  ;;  %15226 = vmatprep.subr.mxu1 %v19910_v63 }
 0xd99   : > { %v8522_v6 = vsub.f32 %v8520_v32, %v8521_v18  ;;  %15219 = vmatmul.mubr.f32.vlgmr.msra.gmra.mxu1 %v8521_v18 }
 0xd9a   : > { %15227 = vmatpush3.msra.mxu1 %v18713_v14  ;;  %15228 = vmatprep.mubr.msk.f32.mxu1 %vm15750_vm5, %v19910_v63 }
 0xd9b   : > { %v8523_v31 = vand.u32 4294901760, %v8522_v6  ;;  %15236 = vmatprep.subr.mxu1 %v19910_v63 }
 0xd9d   : > { %15204 = vmatmul.mubr.f32.vlgmr.msra.gmra.mxu0 %v8523_v31  ;;  %15229 = vmatmul.mubr.f32.vlgmr.msra.gmra.mxu1 %v8519_v30 }
 0xd9e   : > { %15212 = vmatpush3.msra.mxu0 %v18729_v47  ;;  %15213 = vmatprep.mubr.msk.f32.mxu0 %vm15750_vm5, %v19910_v63 }
 0xd9f   : > { %15221 = vmatprep.subr.mxu0 %v19910_v63  ;;  %15237 = vmatpush3.msra.mxu1 %v18724_v17 }
 0xda0   : > { %15238 = vmatprep.mubr.msk.f32.mxu1 %vm15750_vm5, %v19910_v63  ;;  %15246 = vmatprep.subr.mxu1 %v19910_v63 }
 0xda1   : > { %15214 = vmatmul.mubr.f32.vlgmr.msra.gmra.mxu0 %v8520_v32 }
 0xda2   : > { %15222 = vmatpush3.msra.mxu0 %v18744_v50  ;;  %15223 = vmatprep.mubr.msk.f32.mxu0 %vm15750_vm5, %v19910_v63 }
 0xda3   : > { %15231 = vmatprep.subr.mxu0 %v19910_v63 }
 0xda5   : > { %15224 = vmatmul.mubr.f32.vlgmr.msra.gmra.mxu0 %v8519_v30 }
 0xda6   : > { %15232 = vmatpush3.msra.mxu0 %v18671_v3  ;;  %15233 = vmatprep.mubr.msk.f32.mxu0 %vm15750_vm5, %v19910_v63 }
 0xda7   : > { %15241 = vmatprep.subr.mxu0 %v19910_v63 }
 0xe37   : > { %v8120_v56 = vpop.f32.mrf.mxu1 }
 0xe39   : > { %v15180_v0 = vpop.f32.mrf.mxu1 }
 0xe3b   : > { %v8268_v25 = vpop.f32.mrf.mxu1 }
 0xe3d   : > { %v15190_v29 = vpop.f32.mrf.mxu1 }
 0xe3e   : > { %v8927_v29 = vrot.slane %v18929_v54, 1 }
 0xe3f   : > { %v8044_v35 = vpop.f32.mrf.mxu0  ;;  %v8414_v19 = vpop.f32.mrf.mxu1 }
 0xe40   : > { %v8045_v46 = vadd.f32 %v8044_v35, %v18830_v38 }
 0xe41   : > { %v15175_v52 = vpop.f32.mrf.mxu0  ;;  %v15200_v13 = vpop.f32.mrf.mxu1 }
 0xe42   : > { %v8121_v15 = vadd.f32 %v8120_v56, %v8045_v46 }
 0xe43   : > { %v8194_v40 = vpop.f32.mrf.mxu0 }
 0xe44   : > { %v8195_v4 = vadd.f32 %v8194_v40, %v8121_v15 }
 0xe45   : > { %v15185_v37 = vpop.f32.mrf.mxu0 }
 0xe46   : > { %v8269_v28 = vadd.f32 %v8268_v25, %v8195_v4  ;;  %v7963_v4 = vmax.f32 %v18850_v43, %v7961_v39 }
 0xe47   : > { %v8342_v12 = vpop.f32.mrf.mxu0 }
 0xe48   : > { %v8343_v58 = vadd.f32 %v8342_v12, %v8269_v28 }
 0xe49   : > { %v15195_v33 = vpop.f32.mrf.mxu0 }
 0xe4a   : > { %v8415_v21 = vadd.f32 %v8414_v19, %v8343_v58 }
 0xe4c   : > { %v8419_v51 = vrot.slane %v8415_v21, 6 }
 0xe4e   : > { %v8421_v62 = vadd.f32 %v8419_v51, %v18825_v24 }
 0xe50   : > { %v13883_v61 = vmul.f32 -1.442695, %v8421_v62 }
 0xe52   : > { %15609 = vpow2.f32 %v13883_v61 }
 0xe55   : > { %v8601_v2 = vpop.f32.mrf.mxu1 }
 0xe57   : > { %v15210_v48 = vpop.f32.mrf.mxu1 }
 0xe58   : > { %v8444_v48 = vrot.slane %v18922_v10, 7 }
 0xe59   : > { %v8749_v36 = vpop.f32.mrf.mxu1 }
 0xe5b   : > { %v15220_v53 = vpop.f32.mrf.mxu1 }
 0xe5d   : > { %v8525_v60 = vpop.f32.mrf.mxu0  ;;  %v8895_v22 = vpop.f32.mrf.mxu1 }
 0xe5e   : > { %v8526_v42 = vadd.f32 %v8525_v60, %v18836_v55 }
 0xe5f   : > { %v15205_v26 = vpop.f32.mrf.mxu0  ;;  %v15230_v1 = vpop.f32.mrf.mxu1 }
 0xe60   : > { %v8602_v7 = vadd.f32 %v8601_v2, %v8526_v42  ;;  %v15610_v41 = vpop.eup %15609 }
 0xe61   : > { %v8675_v27 = vpop.f32.mrf.mxu0  ;;  %v8425_v11 = vadd.f32 1.0, %v15610_v41 }
 0xe62   : > { %v8676_v44 = vadd.f32 %v8675_v27, %v8602_v7  ;;  %v7965_v27 = vrot.slane %v18929_v54, 7 }
 0xe63   : > { %v15215_v8 = vpop.f32.mrf.mxu0  ;;  %15611 = vrcp.f32 %v8425_v11 }
 0xe64   : > { %v8750_v16 = vadd.f32 %v8749_v36, %v8676_v44  ;;  %v7967_v8 = vmax.f32 %v18854_v57, %v7965_v27 }
 0xe65   : > { %v8823_v34 = vpop.f32.mrf.mxu0 }
 0xe66   : > { %v8824_v59 = vadd.f32 %v8823_v34, %v8750_v16 }
 0xe67   : > { %v15225_v20 = vpop.f32.mrf.mxu0 }
 0xe68   : > { %v8896_v9 = vadd.f32 %v8895_v22, %v8824_v59 }
 0xe6a   : > { %v8900_v5 = vrot.slane %v8896_v9, 3 }
 0xe6c   : > { %8901 = vrot.lane.b32.xlu0 %v8900_v5, %s15751_s19 }
 0xe70   : > { %8428 = vrot.lane.b32.xlu0 %v8419_v51, %s15752_s23  ;;  %v15612_v6 = vpop.eup %15611 }
 0xe71   : > { %v8438_v36 = vsub.f32 1.0, %v15612_v6  ;;  %v8446_v53 = vmul.f32 %v15612_v6, %v8444_v48 }
 0xe74   : > { %8911 = vrot.lane.b32.xlu0 %v8900_v5, %s15753_s29 }
 0xede   : > { %v8902_v30 = vpop.permute.xlu0 %8901 }
 0xedf   : > { %v8904_v32 = vadd.f32 %v8902_v30, %v18825_v24 }
 0xee1   : > { %v13884_v18 = vmul.f32 -1.442695, %v8904_v32 }
 0xee2   : > { %v8429_v31 = vpop.permute.xlu0 %8428 }
 0xee3   : > { %15613 = vpow2.f32 %v13884_v18  ;;  %v8431_v56 = vmul.f32 %v15612_v6, %v8429_v31 }
 0xee5   : > { %8433 = vrot.lane.b32.xlu0 %v8431_v56, %s15754_s18 }
 0xee6   : > { %v8912_v19 = vpop.permute.xlu0 %8911 }
 0xef0   : > { %v15614_v0 = vpop.eup %15613 }
 0xef1   : > { %v8908_v25 = vadd.f32 1.0, %v15614_v0 }
 0xef3   : > { %15615 = vrcp.f32 %v8908_v25 }
 0xf00   : > { %v15616_v35 = vpop.eup %15615 }
 0xf01   : > { %v8914_v52 = vmul.f32 %v15616_v35, %v8912_v19  ;;  %v8929_v13 = vmul.f32 %v15616_v35, %v8927_v29  ;;  %v8921_v1 = vsub.f32 1.0, %v15616_v35 }
 0xf03   : > { %8916 = vrot.lane.b32.xlu0 %v8914_v52, %s15754_s18 }
 0xf57   : > { %v8434_v40 = vpop.permute.xlu0 %8433 }
 0xf58   : > { %v8436_v37 = vadd.f32 %v8434_v40, %v18825_v24 }
 0xf5a   : > { %15617 = vtanh.f32 %v8436_v37 }
 0xf67   : > { %v15618_v12 = vpop.eup %15617 }
 0xf68   : > { %8440 = vrot.lane.b32.xlu0 %v15618_v12, %s15755_s30 }
 0xf75   : > { %v8917_v33 = vpop.permute.xlu0 %8916 }
 0xf76   : > { %v8919_v2 = vadd.f32 %v8917_v33, %v18825_v24 }
 0xf78   : > { %15619 = vtanh.f32 %v8919_v2 }
 0xf85   : > { %v15620_v46 = vpop.eup %15619 }
 0xf86   : > { %8923 = vrot.lane.b32.xlu0 %v15620_v46, %s15755_s30 }
 0xfda   : > { %v8441_v15 = vpop.permute.xlu0 %8440 }
 0xfdb   : > { %v8443_v60 = vmul.f32 %v8441_v15, %v8438_v36 }
 0xfdd   : > { %v18998_v22 = vadd.f32 %v8446_v53, %v8443_v60 }
 0xfdf   : > { %v8932_v42 = vrot.slane %v18998_v22, 2 }
 0xfe1   : > { %v19004_v26 = vmax.f32 %v7963_v4, %v8932_v42  ;;  %8939 = vrot.lane.b32.xlu1 %v8932_v42, %s15755_s30 }
 0xff8   : > { %v8924_v7 = vpop.permute.xlu0 %8923 }
 0xff9   : > { %v8926_v28 = vmul.f32 %v8924_v7, %v8921_v1 }
 0xffb   : > { %v19008_v44 = vadd.f32 %v8929_v13, %v8926_v28 }
 0xffd   : > { %v8936_v16 = vrot.slane %v19008_v44, 6  ;;  %v9419_v10 = vrot.slane %v19008_v44, 5 }
 0xfff   : > { %v19013_v43 = vmax.f32 %v7967_v8, %v8936_v16  ;;  %9420 = vrot.lane.b32.xlu0 %v9419_v10, %s15756_s26 }
0x1053   : > { %v8940_v39 = vpop.permute.xlu1 %8939 }
0x1054   : > { %v8941_v34 = vsel %vm6036_vm7, %v8940_v39, 0 }
0x1055   : > { %v9009_v58 = vand.u32 4294901760, %v8941_v34 }
0x1057   : > { %v9010_v59 = vsub.f32 %v8941_v34, %v9009_v58  ;;  %15239 = vmatmul.mubr.f32.vlgmr.msra.gmra.mxu1 %v9009_v58 }
0x1058   : > { %15247 = vmatpush3.msra.mxu1 %v18671_v3  ;;  %15248 = vmatprep.mubr.msk.f32.mxu1 %vm15750_vm5, %v19910_v63 }
0x1059   : > { %v9011_v57 = vand.u32 4294901760, %v9010_v59  ;;  %15256 = vmatprep.subr.mxu1 %v19910_v63 }
0x105b   : > { %v9012_v54 = vsub.f32 %v9010_v59, %v9011_v57  ;;  %15249 = vmatmul.mubr.f32.vlgmr.msra.gmra.mxu1 %v9011_v57 }
0x105c   : > { %15257 = vmatpush3.msra.mxu1 %v18671_v3  ;;  %15258 = vmatprep.mubr.msk.f32.mxu1 %vm15750_vm5, %v19910_v63 }
0x105d   : > { %v9013_v20 = vand.u32 4294901760, %v9012_v54  ;;  %15266 = vmatprep.subr.mxu1 %v19910_v63 }
0x105f   : > { %15234 = vmatmul.mubr.f32.vlgmr.msra.gmra.mxu0 %v9013_v20  ;;  %15259 = vmatmul.mubr.f32.vlgmr.msra.gmra.mxu1 %v9009_v58 }
0x1060   : > { %15242 = vmatpush3.msra.mxu0 %v18682_v45  ;;  %15243 = vmatprep.mubr.msk.f32.mxu0 %vm15750_vm5, %v19910_v63 }
0x1061   : > { %15251 = vmatprep.subr.mxu0 %v19910_v63  ;;  %15267 = vmatpush3.msra.mxu1 %v18768_v23 }
0x1062   : > { %15268 = vmatprep.mubr.msk.f32.mxu1 %vm15750_vm5, %v19910_v63  ;;  %15276 = vmatprep.subr.mxu1 %v19910_v63 }
0x1063   : > { %15244 = vmatmul.mubr.f32.vlgmr.msra.gmra.mxu0 %v9010_v59 }
0x1064   : > { %15252 = vmatpush3.msra.mxu0 %v18697_v49  ;;  %15253 = vmatprep.mubr.msk.f32.mxu0 %vm15750_vm5, %v19910_v63 }
0x1065   : > { %15261 = vmatprep.subr.mxu0 %v19910_v63 }
0x1067   : > { %15254 = vmatmul.mubr.f32.vlgmr.msra.gmra.mxu0 %v9009_v58 }
0x1068   : > { %15262 = vmatpush3.msra.mxu0 %v18713_v14  ;;  %15263 = vmatprep.mubr.msk.f32.mxu0 %vm15750_vm5, %v19910_v63 }
0x1069   : > { %15271 = vmatprep.subr.mxu0 %v19910_v63 }
0x1071   : > { %v9421_v9 = vpop.permute.xlu0 %9420 }
0x1072   : > { %v9422_v21 = vsel %vm6036_vm7, %v9421_v9, 0 }
0x1073   : > { %v9490_v5 = vand.u32 4294901760, %v9422_v21 }
0x1075   : > { %v9491_v51 = vsub.f32 %v9422_v21, %v9490_v5  ;;  %15269 = vmatmul.mubr.f32.vlgmr.msra.gmra.mxu1 %v9490_v5 }
0x1076   : > { %15277 = vmatpush3.msra.mxu1 %v18713_v14  ;;  %15278 = vmatprep.mubr.msk.f32.mxu1 %vm15750_vm5, %v19910_v63 }
0x1077   : > { %v9492_v62 = vand.u32 4294901760, %v9491_v51  ;;  %15286 = vmatprep.subr.mxu1 %v19910_v63 }
0x1079   : > { %v9493_v61 = vsub.f32 %v9491_v51, %v9492_v62  ;;  %15279 = vmatmul.mubr.f32.vlgmr.msra.gmra.mxu1 %v9492_v62 }
0x107a   : > { %15287 = vmatpush3.msra.mxu1 %v18713_v14  ;;  %15288 = vmatprep.mubr.msk.f32.mxu1 %vm15750_vm5, %v19910_v63 }
0x107b   : > { %v9494_v41 = vand.u32 4294901760, %v9493_v61  ;;  %15296 = vmatprep.subr.mxu1 %v19910_v63 }
0x107d   : > { %15264 = vmatmul.mubr.f32.vlgmr.msra.gmra.mxu0 %v9494_v41  ;;  %15289 = vmatmul.mubr.f32.vlgmr.msra.gmra.mxu1 %v9490_v5 }
0x107e   : > { %15272 = vmatpush3.msra.mxu0 %v18729_v47  ;;  %15273 = vmatprep.mubr.msk.f32.mxu0 %vm15750_vm5, %v19910_v63 }
0x107f   : > { %15281 = vmatprep.subr.mxu0 %v19910_v63  ;;  %15297 = vmatpush3.msra.mxu1 %v18724_v17 }
0x1080   : > { %15298 = vmatprep.mubr.msk.f32.mxu1 %vm15750_vm5, %v19910_v63  ;;  %15306 = vmatprep.subr.mxu1 %v19910_v63 }
0x1081   : > { %15274 = vmatmul.mubr.f32.vlgmr.msra.gmra.mxu0 %v9491_v51 }
0x1082   : > { %15282 = vmatpush3.msra.mxu0 %v18744_v50  ;;  %15283 = vmatprep.mubr.msk.f32.mxu0 %vm15750_vm5, %v19910_v63 }
0x1083   : > { %15291 = vmatprep.subr.mxu0 %v19910_v63 }
0x1085   : > { %15284 = vmatmul.mubr.f32.vlgmr.msra.gmra.mxu0 %v9490_v5 }
0x1086   : > { %15292 = vmatpush3.msra.mxu0 %v18671_v3  ;;  %15293 = vmatprep.mubr.msk.f32.mxu0 %vm15750_vm5, %v19910_v63 }
0x1087   : > { %15301 = vmatprep.subr.mxu0 %v19910_v63 }
0x1117   : > { %v9091_v11 = vpop.f32.mrf.mxu1 }
0x1119   : > { %v15240_v30 = vpop.f32.mrf.mxu1 }
0x111b   : > { %v9239_v32 = vpop.f32.mrf.mxu1 }
0x111d   : > { %v15250_v18 = vpop.f32.mrf.mxu1 }
0x111f   : > { %v9015_v6 = vpop.f32.mrf.mxu0  ;;  %v9385_v31 = vpop.f32.mrf.mxu1 }
0x1120   : > { %v9016_v56 = vadd.f32 %v9015_v6, %v18830_v38 }
0x1121   : > { %v15235_v0 = vpop.f32.mrf.mxu0  ;;  %v15260_v25 = vpop.f32.mrf.mxu1 }
0x1122   : > { %v9092_v29 = vadd.f32 %v9091_v11, %v9016_v56  ;;  %v9898_v11 = vrot.slane %v19008_v44, 1  ;;  %v9415_v44 = vrot.slane %v18998_v22, 7 }
0x1123   : > { %v9165_v35 = vpop.f32.mrf.mxu0 }
0x1124   : > { %v9166_v19 = vadd.f32 %v9165_v35, %v9092_v29 }
0x1125   : > { %v15245_v52 = vpop.f32.mrf.mxu0 }
0x1126   : > { %v9240_v13 = vadd.f32 %v9239_v32, %v9166_v19 }
0x1127   : > { %v9313_v40 = vpop.f32.mrf.mxu0 }
0x1128   : > { %v9314_v37 = vadd.f32 %v9313_v40, %v9240_v13 }
0x1129   : > { %v15255_v12 = vpop.f32.mrf.mxu0 }
0x112a   : > { %v9386_v33 = vadd.f32 %v9385_v31, %v9314_v37 }
0x112c   : > { %v9390_v2 = vrot.slane %v9386_v33, 5 }
0x112e   : > { %9399 = vrot.lane.b32.xlu0 %v9390_v2, %s15752_s23  ;;  %v9392_v59 = vadd.f32 %v9390_v2, %v18825_v24 }
0x1130   : > { %v13885_v57 = vmul.f32 -1.442695, %v9392_v59 }
0x1132   : > { %15621 = vpow2.f32 %v13885_v57 }
0x1135   : > { %v9572_v46 = vpop.f32.mrf.mxu1 }
0x1137   : > { %v15270_v48 = vpop.f32.mrf.mxu1 }
0x1139   : > { %v9720_v36 = vpop.f32.mrf.mxu1 }
0x113b   : > { %v15280_v15 = vpop.f32.mrf.mxu1 }
0x113d   : > { %v9496_v53 = vpop.f32.mrf.mxu0  ;;  %v9866_v38 = vpop.f32.mrf.mxu1 }
0x113e   : > { %v9497_v60 = vadd.f32 %v9496_v53, %v18836_v55 }
0x113f   : > { %v15265_v4 = vpop.f32.mrf.mxu0  ;;  %v15290_v42 = vpop.f32.mrf.mxu1 }
0x1140   : > { %v9573_v1 = vadd.f32 %v9572_v46, %v9497_v60  ;;  %v15622_v55 = vpop.eup %15621 }
0x1141   : > { %v9646_v7 = vpop.f32.mrf.mxu0  ;;  %v9396_v54 = vadd.f32 1.0, %v15622_v55 }
0x1142   : > { %v9647_v27 = vadd.f32 %v9646_v7, %v9573_v1 }
0x1143   : > { %v15275_v28 = vpop.f32.mrf.mxu0  ;;  %15623 = vrcp.f32 %v9396_v54 }
0x1144   : > { %v9721_v8 = vadd.f32 %v9720_v36, %v9647_v27 }
0x1145   : > { %v9794_v16 = vpop.f32.mrf.mxu0 }
0x1146   : > { %v9795_v10 = vadd.f32 %v9794_v16, %v9721_v8 }
0x1147   : > { %v15285_v39 = vpop.f32.mrf.mxu0 }
0x1148   : > { %v9867_v34 = vadd.f32 %v9866_v38, %v9795_v10 }
0x114a   : > { %v9871_v58 = vrot.slane %v9867_v34, 4 }
0x114c   : > { %9872 = vrot.lane.b32.xlu1 %v9871_v58, %s15751_s19 }
0x1150   : > { %9882 = vrot.lane.b32.xlu1 %v9871_v58, %s15753_s29  ;;  %v15624_v20 = vpop.eup %15623 }
0x1151   : > { %v9409_v19 = vsub.f32 1.0, %v15624_v20  ;;  %v9417_v13 = vmul.f32 %v15624_v20, %v9415_v44 }
0x11a0   : > { %v9400_v9 = vpop.permute.xlu0 %9399 }
0x11a1   : > { %v9402_v21 = vmul.f32 %v15624_v20, %v9400_v9  ;;  %v19149_v20 = vld [vmem:[%s19462_s14] sm:$0x1] }
0x11a3   : > { %9404 = vrot.lane.b32.xlu0 %v9402_v21, %s15754_s18 }
0x11be   : > { %v9873_v5 = vpop.permute.xlu1 %9872 }
0x11bf   : > { %v9875_v51 = vadd.f32 %v9873_v5, %v18825_v24 }
0x11c1   : > { %v13886_v62 = vmul.f32 -1.442695, %v9875_v51 }
0x11c2   : > { %v9883_v32 = vpop.permute.xlu1 %9882 }
0x11c3   : > { %15625 = vpow2.f32 %v13886_v62 }
0x11d0   : > { %v15626_v61 = vpop.eup %15625 }
0x11d1   : > { %v9879_v41 = vadd.f32 1.0, %v15626_v61 }
0x11d3   : > { %15627 = vrcp.f32 %v9879_v41 }
0x11e0   : > { %v15628_v30 = vpop.eup %15627 }
0x11e1   : > { %v9885_v18 = vmul.f32 %v15628_v30, %v9883_v32  ;;  %v9900_v6 = vmul.f32 %v15628_v30, %v9898_v11  ;;  %v9892_v2 = vsub.f32 1.0, %v15628_v30 }
0x11e3   : > { %9887 = vrot.lane.b32.xlu1 %v9885_v18, %s15754_s18 }
0x1215   : > { %v9405_v31 = vpop.permute.xlu0 %9404 }
0x1216   : > { %v9407_v56 = vadd.f32 %v9405_v31, %v18825_v24 }
0x1218   : > { %15629 = vtanh.f32 %v9407_v56 }
0x1225   : > { %v15630_v0 = vpop.eup %15629 }
0x1226   : > { %9411 = vrot.lane.b32.xlu0 %v15630_v0, %s15755_s30 }
0x1255   : > { %v9888_v25 = vpop.permute.xlu1 %9887 }
0x1256   : > { %v9890_v29 = vadd.f32 %v9888_v25, %v18825_v24 }
0x1258   : > { %15631 = vtanh.f32 %v9890_v29 }
0x1265   : > { %v15632_v35 = vpop.eup %15631 }
0x1266   : > { %9894 = vrot.lane.b32.xlu1 %v15632_v35, %s15755_s30 }
0x1298   : > { %v9412_v52 = vpop.permute.xlu0 %9411 }
0x1299   : > { %v9414_v40 = vmul.f32 %v9412_v52, %v9409_v19  ;;  %v19156_v19 = vld [vmem:[%s19464_s16] sm:$0x1] }
0x129b   : > { %v19081_v37 = vadd.f32 %v9417_v13, %v9414_v40 }
0x129d   : > { %v9903_v12 = vrot.slane %v19081_v37, 3 }
0x129f   : > { %v19085_v33 = vmax.f32 %v19004_v26, %v9903_v12  ;;  %9910 = vrot.lane.b32.xlu0 %v9903_v12, %s15755_s30 }
0x12d8   : > { %v9895_v46 = vpop.permute.xlu1 %9894 }
0x12d9   : > { %v9897_v48 = vmul.f32 %v9895_v46, %v9892_v2 }
0x12db   : > { %v19088_v36 = vadd.f32 %v9900_v6, %v9897_v48 }
0x12dd   : > { %v9907_v22 = vrot.slane %v19088_v36, 5  ;;  %v10390_v15 = vrot.slane %v19088_v36, 4 }
0x12df   : > { %v19093_v53 = vmax.f32 %v19013_v43, %v9907_v22  ;;  %10391 = vrot.lane.b32.xlu1 %v10390_v15, %s15756_s26 }
0x1311   : > { %v9911_v38 = vpop.permute.xlu0 %9910 }
0x1312   : > { %v9912_v26 = vsel %vm6036_vm7, %v9911_v38, 0 }
0x1313   : > { %v9980_v60 = vand.u32 4294901760, %v9912_v26 }
0x1315   : > { %v9981_v4 = vsub.f32 %v9912_v26, %v9980_v60  ;;  %15299 = vmatmul.mubr.f32.vlgmr.msra.gmra.mxu1 %v9980_v60 }
0x1316   : > { %15307 = vmatpush3.msra.mxu1 %v18671_v3  ;;  %15308 = vmatprep.mubr.msk.f32.mxu1 %vm15750_vm5, %v19910_v63 }
0x1317   : > { %v9982_v42 = vand.u32 4294901760, %v9981_v4  ;;  %15316 = vmatprep.subr.mxu1 %v19910_v63 }
0x1319   : > { %v9983_v1 = vsub.f32 %v9981_v4, %v9982_v42  ;;  %15309 = vmatmul.mubr.f32.vlgmr.msra.gmra.mxu1 %v9982_v42 }
0x131a   : > { %15317 = vmatpush3.msra.mxu1 %v18671_v3  ;;  %15318 = vmatprep.mubr.msk.f32.mxu1 %vm15750_vm5, %v19910_v63 }
0x131b   : > { %v9984_v43 = vand.u32 4294901760, %v9983_v1  ;;  %15326 = vmatprep.subr.mxu1 %v19910_v63 }
0x131d   : > { %15294 = vmatmul.mubr.f32.vlgmr.msra.gmra.mxu0 %v9984_v43  ;;  %15319 = vmatmul.mubr.f32.vlgmr.msra.gmra.mxu1 %v9980_v60 }
0x131e   : > { %15302 = vmatpush3.msra.mxu0 %v18682_v45  ;;  %15303 = vmatprep.mubr.msk.f32.mxu0 %vm15750_vm5, %v19910_v63 }
0x131f   : > { %15311 = vmatprep.subr.mxu0 %v19910_v63  ;;  %15327 = vmatpush3.msra.mxu1 %v18768_v23 }
0x1320   : > { %15328 = vmatprep.mubr.msk.f32.mxu1 %vm15750_vm5, %v19910_v63  ;;  %15336 = vmatprep.subr.mxu1 %v19910_v63 }
0x1321   : > { %15304 = vmatmul.mubr.f32.vlgmr.msra.gmra.mxu0 %v9981_v4 }
0x1322   : > { %15312 = vmatpush3.msra.mxu0 %v18697_v49  ;;  %15313 = vmatprep.mubr.msk.f32.mxu0 %vm15750_vm5, %v19910_v63 }
0x1323   : > { %15321 = vmatprep.subr.mxu0 %v19910_v63 }
0x1325   : > { %15314 = vmatmul.mubr.f32.vlgmr.msra.gmra.mxu0 %v9980_v60 }
0x1326   : > { %15322 = vmatpush3.msra.mxu0 %v18713_v14  ;;  %15323 = vmatprep.mubr.msk.f32.mxu0 %vm15750_vm5, %v19910_v63 }
0x1327   : > { %15331 = vmatprep.subr.mxu0 %v19910_v63 }
0x1351   : > { %v10392_v7 = vpop.permute.xlu1 %10391 }
0x1352   : > { %v10393_v27 = vsel %vm6036_vm7, %v10392_v7, 0 }
0x1353   : > { %v10461_v28 = vand.u32 4294901760, %v10393_v27 }
0x1355   : > { %v10462_v8 = vsub.f32 %v10393_v27, %v10461_v28  ;;  %15329 = vmatmul.mubr.f32.vlgmr.msra.gmra.mxu1 %v10461_v28 }
0x1356   : > { %15337 = vmatpush3.msra.mxu1 %v18713_v14  ;;  %15338 = vmatprep.mubr.msk.f32.mxu1 %vm15750_vm5, %v19910_v63 }
0x1357   : > { %v10463_v16 = vand.u32 4294901760, %v10462_v8  ;;  %15346 = vmatprep.subr.mxu1 %v19910_v63 }
0x1359   : > { %v10464_v10 = vsub.f32 %v10462_v8, %v10463_v16  ;;  %15339 = vmatmul.mubr.f32.vlgmr.msra.gmra.mxu1 %v10463_v16 }
0x135a   : > { %15347 = vmatpush3.msra.mxu1 %v18713_v14  ;;  %15348 = vmatprep.mubr.msk.f32.mxu1 %vm15750_vm5, %v19910_v63 }
0x135b   : > { %v10465_v39 = vand.u32 4294901760, %v10464_v10  ;;  %15356 = vmatprep.subr.mxu1 %v19910_v63 }
0x135d   : > { %15324 = vmatmul.mubr.f32.vlgmr.msra.gmra.mxu0 %v10465_v39  ;;  %15349 = vmatmul.mubr.f32.vlgmr.msra.gmra.mxu1 %v10461_v28 }
0x135e   : > { %15332 = vmatpush3.msra.mxu0 %v18729_v47  ;;  %15333 = vmatprep.mubr.msk.f32.mxu0 %vm15750_vm5, %v19910_v63 }
0x135f   : > { %15341 = vmatprep.subr.mxu0 %v19910_v63  ;;  %15357 = vmatpush3.msra.mxu1 %v18724_v17 }
0x1360   : > { %15358 = vmatprep.mubr.msk.f32.mxu1 %vm15750_vm5, %v19910_v63  ;;  %15366 = vmatprep.subr.mxu1 %v19910_v63 }
0x1361   : > { %15334 = vmatmul.mubr.f32.vlgmr.msra.gmra.mxu0 %v10462_v8 }
0x1362   : > { %15342 = vmatpush3.msra.mxu0 %v18744_v50  ;;  %15343 = vmatprep.mubr.msk.f32.mxu0 %vm15750_vm5, %v19910_v63 }
0x1363   : > { %15351 = vmatprep.subr.mxu0 %v19910_v63 }
0x1365   : > { %15344 = vmatmul.mubr.f32.vlgmr.msra.gmra.mxu0 %v10461_v28 }
0x1366   : > { %15352 = vmatpush3.msra.mxu0 %v18671_v3  ;;  %15353 = vmatprep.mubr.msk.f32.mxu0 %vm15750_vm5, %v19910_v63 }
0x1367   : > { %15361 = vmatprep.subr.mxu0 %v19910_v63 }
0x13d5   : > { %v10062_v34 = vpop.f32.mrf.mxu1 }
0x13d7   : > { %v15300_v58 = vpop.f32.mrf.mxu1 }
0x13d9   : > { %v10210_v59 = vpop.f32.mrf.mxu1 }
0x13db   : > { %v15310_v57 = vpop.f32.mrf.mxu1 }
0x13dd   : > { %v9986_v55 = vpop.f32.mrf.mxu0  ;;  %v10356_v54 = vpop.f32.mrf.mxu1 }
0x13de   : > { %v9987_v9 = vadd.f32 %v19149_v20, %v9986_v55 }
0x13df   : > { %v15295_v21 = vpop.f32.mrf.mxu0  ;;  %v15320_v5 = vpop.f32.mrf.mxu1 }
0x13e0   : > { %v10063_v51 = vadd.f32 %v10062_v34, %v9987_v9 }
0x13e1   : > { %v10136_v62 = vpop.f32.mrf.mxu0 }
0x13e2   : > { %v10137_v61 = vadd.f32 %v10136_v62, %v10063_v51 }
0x13e3   : > { %v15305_v41 = vpop.f32.mrf.mxu0 }
0x13e4   : > { %v10211_v11 = vadd.f32 %v10210_v59, %v10137_v61  ;;  %v10869_v59 = vrot.slane %v19088_v36, 1  ;;  %v10386_v36 = vrot.slane %v19081_v37, 7 }
0x13e5   : > { %v10284_v30 = vpop.f32.mrf.mxu0 }
0x13e6   : > { %v10285_v32 = vadd.f32 %v10284_v30, %v10211_v11 }
0x13e7   : > { %v15315_v18 = vpop.f32.mrf.mxu0 }
0x13e8   : > { %v10357_v6 = vadd.f32 %v10356_v54, %v10285_v32 }
0x13ea   : > { %v10361_v31 = vrot.slane %v10357_v6, 4 }
0x13ec   : > { %10370 = vrot.lane.b32.xlu1 %v10361_v31, %s15752_s23  ;;  %v10363_v42 = vadd.f32 %v10361_v31, %v18825_v24 }
0x13ee   : > { %v13887_v1 = vmul.f32 -1.442695, %v10363_v42 }
0x13f0   : > { %15633 = vpow2.f32 %v13887_v1 }
0x13fd   : > { %v15634_v43 = vpop.eup %15633 }
0x13fe   : > { %v10367_v7 = vadd.f32 1.0, %v15634_v43 }
0x1400   : > { %15635 = vrcp.f32 %v10367_v7 }
0x140d   : > { %v15636_v27 = vpop.eup %15635 }
0x140e   : > { %v10380_v11 = vsub.f32 1.0, %v15636_v27  ;;  %v10388_v32 = vmul.f32 %v15636_v27, %v10386_v36 }
0x1415   : > { %v10543_v56 = vpop.f32.mrf.mxu1 }
0x1417   : > { %v15330_v0 = vpop.f32.mrf.mxu1 }
0x1419   : > { %v10691_v25 = vpop.f32.mrf.mxu1 }
0x141b   : > { %v15340_v29 = vpop.f32.mrf.mxu1 }
0x141d   : > { %v10467_v35 = vpop.f32.mrf.mxu0  ;;  %v10837_v44 = vpop.f32.mrf.mxu1 }
0x141e   : > { %v10468_v52 = vadd.f32 %v19156_v19, %v10467_v35 }
0x141f   : > { %v15325_v13 = vpop.f32.mrf.mxu0  ;;  %v15350_v40 = vpop.f32.mrf.mxu1 }
0x1420   : > { %v10544_v12 = vadd.f32 %v10543_v56, %v10468_v52 }
0x1421   : > { %v10617_v2 = vpop.f32.mrf.mxu0 }
0x1422   : > { %v10618_v46 = vadd.f32 %v10617_v2, %v10544_v12 }
0x1423   : > { %v15335_v48 = vpop.f32.mrf.mxu0 }
0x1424   : > { %v10692_v22 = vadd.f32 %v10691_v25, %v10618_v46 }
0x1425   : > { %v10765_v15 = vpop.f32.mrf.mxu0 }
0x1426   : > { %v10766_v38 = vadd.f32 %v10765_v15, %v10692_v22 }
0x1427   : > { %v15345_v26 = vpop.f32.mrf.mxu0 }
0x1428   : > { %v10838_v60 = vadd.f32 %v10837_v44, %v10766_v38 }
0x142a   : > { %v10842_v4 = vrot.slane %v10838_v60, 5 }
0x142c   : > { %10843 = vrot.lane.b32.xlu0 %v10842_v4, %s15751_s19 }
0x1430   : > { %10853 = vrot.lane.b32.xlu0 %v10842_v4, %s15753_s29 }
0x145e   : > { %v10371_v28 = vpop.permute.xlu1 %10370 }
0x145f   : > { %v10373_v8 = vmul.f32 %v15636_v27, %v10371_v28 }
0x1461   : > { %10375 = vrot.lane.b32.xlu1 %v10373_v8, %s15754_s18 }
0x149e   : > { %v10844_v16 = vpop.permute.xlu0 %10843 }
0x149f   : > { %v10846_v10 = vadd.f32 %v10844_v16, %v18825_v24 }
0x14a1   : > { %v13888_v39 = vmul.f32 -1.442695, %v10846_v10 }
0x14a2   : > { %v10854_v55 = vpop.permute.xlu0 %10853 }
0x14a3   : > { %15637 = vpow2.f32 %v13888_v39 }
0x14b0   : > { %v15638_v34 = vpop.eup %15637 }
0x14b1   : > { %v10850_v58 = vadd.f32 1.0, %v15638_v34 }
0x14b3   : > { %15639 = vrcp.f32 %v10850_v58 }
0x14c0   : > { %v15640_v57 = vpop.eup %15639 }
0x14c1   : > { %v10856_v54 = vmul.f32 %v15640_v57, %v10854_v55  ;;  %v10871_v9 = vmul.f32 %v15640_v57, %v10869_v59  ;;  %v10863_v0 = vsub.f32 1.0, %v15640_v57 }
0x14c3   : > { %10858 = vrot.lane.b32.xlu0 %v10856_v54, %s15754_s18 }
0x14d3   : > { %v10376_v21 = vpop.permute.xlu1 %10375 }
0x14d4   : > { %v10378_v5 = vadd.f32 %v10376_v21, %v18825_v24 }
0x14d6   : > { %15641 = vtanh.f32 %v10378_v5 }
0x14e3   : > { %v15642_v51 = vpop.eup %15641 }
0x14e4   : > { %10382 = vrot.lane.b32.xlu1 %v15642_v51, %s15755_s30 }
0x1535   : > { %v10859_v62 = vpop.permute.xlu0 %10858 }
0x1536   : > { %v10861_v61 = vadd.f32 %v10859_v62, %v18825_v24 }
0x1538   : > { %15643 = vtanh.f32 %v10861_v61 }
0x1545   : > { %v15644_v41 = vpop.eup %15643 }
0x1546   : > { %10865 = vrot.lane.b32.xlu0 %v15644_v41, %s15755_s30 }
0x1556   : > { %v10383_v30 = vpop.permute.xlu1 %10382 }
0x1557   : > { %v10385_v18 = vmul.f32 %v10383_v30, %v10380_v11 }
0x1559   : > { %v19171_v6 = vadd.f32 %v10388_v32, %v10385_v18 }
0x155b   : > { %v10874_v31 = vrot.slane %v19171_v6, 4 }
0x155d   : > { %v19175_v56 = vmax.f32 %v19085_v33, %v10874_v31  ;;  %10881 = vrot.lane.b32.xlu1 %v10874_v31, %s15755_s30 }
0x15b8   : > { %v10866_v25 = vpop.permute.xlu0 %10865 }
0x15b9   : > { %v10868_v29 = vmul.f32 %v10866_v25, %v10863_v0 }
0x15bb   : > { %v19178_v35 = vadd.f32 %v10871_v9, %v10868_v29 }
0x15bd   : > { %v10878_v37 = vrot.slane %v19178_v35, 4  ;;  %v11361_v44 = vrot.slane %v19178_v35, 3 }
0x15bf   : > { %v19183_v52 = vmax.f32 %v19093_v53, %v10878_v37  ;;  %11362 = vrot.lane.b32.xlu0 %v11361_v44, %s15756_s26 }
0x15cf   : > { %v10882_v13 = vpop.permute.xlu1 %10881 }
0x15d0   : > { %v10883_v33 = vsel %vm6036_vm7, %v10882_v13, 0 }
0x15d1   : > { %v10951_v40 = vand.u32 4294901760, %v10883_v33 }
0x15d3   : > { %v10952_v12 = vsub.f32 %v10883_v33, %v10951_v40  ;;  %15359 = vmatmul.mubr.f32.vlgmr.msra.gmra.mxu1 %v10951_v40 }
0x15d4   : > { %15367 = vmatpush3.msra.mxu1 %v18671_v3  ;;  %15368 = vmatprep.mubr.msk.f32.mxu1 %vm15750_vm5, %v19910_v63 }
0x15d5   : > { %v10953_v2 = vand.u32 4294901760, %v10952_v12  ;;  %15376 = vmatprep.subr.mxu1 %v19910_v63 }
0x15d7   : > { %v10954_v46 = vsub.f32 %v10952_v12, %v10953_v2  ;;  %15369 = vmatmul.mubr.f32.vlgmr.msra.gmra.mxu1 %v10953_v2 }
0x15d8   : > { %15377 = vmatpush3.msra.mxu1 %v18671_v3  ;;  %15378 = vmatprep.mubr.msk.f32.mxu1 %vm15750_vm5, %v19910_v63 }
0x15d9   : > { %v10955_v53 = vand.u32 4294901760, %v10954_v46  ;;  %15386 = vmatprep.subr.mxu1 %v19910_v63 }
0x15db   : > { %15354 = vmatmul.mubr.f32.vlgmr.msra.gmra.mxu0 %v10955_v53  ;;  %15379 = vmatmul.mubr.f32.vlgmr.msra.gmra.mxu1 %v10951_v40 }
0x15dc   : > { %15362 = vmatpush3.msra.mxu0 %v18682_v45  ;;  %15363 = vmatprep.mubr.msk.f32.mxu0 %vm15750_vm5, %v19910_v63 }
0x15dd   : > { %15371 = vmatprep.subr.mxu0 %v19910_v63  ;;  %15387 = vmatpush3.msra.mxu1 %v18768_v23 }
0x15de   : > { %15388 = vmatprep.mubr.msk.f32.mxu1 %vm15750_vm5, %v19910_v63  ;;  %15396 = vmatprep.subr.mxu1 %v19910_v63 }
0x15df   : > { %15364 = vmatmul.mubr.f32.vlgmr.msra.gmra.mxu0 %v10952_v12 }
0x15e0   : > { %15372 = vmatpush3.msra.mxu0 %v18697_v49  ;;  %15373 = vmatprep.mubr.msk.f32.mxu0 %vm15750_vm5, %v19910_v63 }
0x15e1   : > { %15381 = vmatprep.subr.mxu0 %v19910_v63 }
0x15e3   : > { %15374 = vmatmul.mubr.f32.vlgmr.msra.gmra.mxu0 %v10951_v40 }
0x15e4   : > { %15382 = vmatpush3.msra.mxu0 %v18713_v14  ;;  %15383 = vmatprep.mubr.msk.f32.mxu0 %vm15750_vm5, %v19910_v63 }
0x15e5   : > { %15391 = vmatprep.subr.mxu0 %v19910_v63 }
0x1631   : > { %v11363_v48 = vpop.permute.xlu0 %11362 }
0x1632   : > { %v11364_v22 = vsel %vm6036_vm7, %v11363_v48, 0 }
0x1633   : > { %v11432_v15 = vand.u32 4294901760, %v11364_v22 }
0x1635   : > { %v11433_v38 = vsub.f32 %v11364_v22, %v11432_v15  ;;  %15389 = vmatmul.mubr.f32.vlgmr.msra.gmra.mxu1 %v11432_v15 }
0x1636   : > { %15397 = vmatpush3.msra.mxu1 %v18713_v14  ;;  %15398 = vmatprep.mubr.msk.f32.mxu1 %vm15750_vm5, %v19910_v63 }
0x1637   : > { %v11434_v26 = vand.u32 4294901760, %v11433_v38  ;;  %15406 = vmatprep.subr.mxu1 %v19910_v63 }
0x1639   : > { %v11435_v60 = vsub.f32 %v11433_v38, %v11434_v26  ;;  %15399 = vmatmul.mubr.f32.vlgmr.msra.gmra.mxu1 %v11434_v26 }
0x163a   : > { %15407 = vmatpush3.msra.mxu1 %v18713_v14  ;;  %15408 = vmatprep.mubr.msk.f32.mxu1 %vm15750_vm5, %v19910_v63 }
0x163b   : > { %v11436_v4 = vand.u32 4294901760, %v11435_v60  ;;  %15416 = vmatprep.subr.mxu1 %v19910_v63 }
0x163d   : > { %15384 = vmatmul.mubr.f32.vlgmr.msra.gmra.mxu0 %v11436_v4  ;;  %15409 = vmatmul.mubr.f32.vlgmr.msra.gmra.mxu1 %v11432_v15 }
0x163e   : > { %15392 = vmatpush3.msra.mxu0 %v18729_v47  ;;  %15393 = vmatprep.mubr.msk.f32.mxu0 %vm15750_vm5, %v19910_v63 }
0x163f   : > { %15401 = vmatprep.subr.mxu0 %v19910_v63  ;;  %15417 = vmatpush3.msra.mxu1 %v18724_v17 }
0x1640   : > { %15418 = vmatprep.mubr.msk.f32.mxu1 %vm15750_vm5, %v19910_v63  ;;  %15426 = vmatprep.subr.mxu1 %v19910_v63 }
0x1641   : > { %15394 = vmatmul.mubr.f32.vlgmr.msra.gmra.mxu0 %v11433_v38 }
0x1642   : > { %15402 = vmatpush3.msra.mxu0 %v18744_v50  ;;  %15403 = vmatprep.mubr.msk.f32.mxu0 %vm15750_vm5, %v19910_v63 }
0x1643   : > { %15411 = vmatprep.subr.mxu0 %v19910_v63 }
0x1645   : > { %15404 = vmatmul.mubr.f32.vlgmr.msra.gmra.mxu0 %v11432_v15 }
0x1646   : > { %15412 = vmatpush3.msra.mxu0 %v18671_v3  ;;  %15413 = vmatprep.mubr.msk.f32.mxu0 %vm15750_vm5, %v19910_v63 }
0x1647   : > { %15421 = vmatprep.subr.mxu0 %v19910_v63 }
0x1693   : > { %v11033_v42 = vpop.f32.mrf.mxu1 }
0x1695   : > { %v15360_v1 = vpop.f32.mrf.mxu1 }
0x1697   : > { %v11181_v43 = vpop.f32.mrf.mxu1 }
0x1699   : > { %v15370_v7 = vpop.f32.mrf.mxu1 }
0x169b   : > { %v10957_v27 = vpop.f32.mrf.mxu0  ;;  %v11327_v28 = vpop.f32.mrf.mxu1 }
0x169c   : > { %v10958_v8 = vadd.f32 %v19149_v20, %v10957_v27  ;;  %v11840_v27 = vrot.slane %v19178_v35, 1 }
0x169d   : > { %v15355_v16 = vpop.f32.mrf.mxu0  ;;  %v15380_v10 = vpop.f32.mrf.mxu1 }
0x169e   : > { %v11034_v39 = vadd.f32 %v11033_v42, %v10958_v8 }
0x169f   : > { %v11107_v34 = vpop.f32.mrf.mxu0 }
0x16a0   : > { %v11108_v58 = vadd.f32 %v11107_v34, %v11034_v39  ;;  %v11357_v34 = vrot.slane %v19171_v6, 7 }
0x16a1   : > { %v15365_v59 = vpop.f32.mrf.mxu0 }
0x16a2   : > { %v11182_v57 = vadd.f32 %v11181_v43, %v11108_v58 }
0x16a3   : > { %v11255_v55 = vpop.f32.mrf.mxu0 }
0x16a4   : > { %v11256_v54 = vadd.f32 %v11255_v55, %v11182_v57 }
0x16a5   : > { %v15375_v9 = vpop.f32.mrf.mxu0 }
0x16a6   : > { %v11328_v21 = vadd.f32 %v11327_v28, %v11256_v54 }
0x16a8   : > { %v11332_v5 = vrot.slane %v11328_v21, 3 }
0x16aa   : > { %11341 = vrot.lane.b32.xlu0 %v11332_v5, %s15752_s23  ;;  %v11334_v51 = vadd.f32 %v11332_v5, %v18825_v24 }
0x16ac   : > { %v13889_v61 = vmul.f32 -1.442695, %v11334_v51 }
0x16ae   : > { %15645 = vpow2.f32 %v13889_v61 }
0x16bb   : > { %v15646_v2 = vpop.eup %15645 }
0x16bc   : > { %v11338_v48 = vadd.f32 1.0, %v15646_v2 }
0x16be   : > { %15647 = vrcp.f32 %v11338_v48 }
0x16cb   : > { %v15648_v22 = vpop.eup %15647 }
0x16cc   : > { %v11351_v58 = vsub.f32 1.0, %v15648_v22  ;;  %v11359_v57 = vmul.f32 %v15648_v22, %v11357_v34 }
0x16f5   : > { %v11514_v62 = vpop.f32.mrf.mxu1 }
0x16f7   : > { %v15390_v41 = vpop.f32.mrf.mxu1 }
0x16f9   : > { %v11662_v36 = vpop.f32.mrf.mxu1 }
0x16fb   : > { %v15400_v11 = vpop.f32.mrf.mxu1 }
0x16fd   : > { %v11438_v30 = vpop.f32.mrf.mxu0  ;;  %v11808_v32 = vpop.f32.mrf.mxu1 }
0x16fe   : > { %v11439_v18 = vadd.f32 %v19156_v19, %v11438_v30 }
0x16ff   : > { %v15385_v31 = vpop.f32.mrf.mxu0  ;;  %v15410_v0 = vpop.f32.mrf.mxu1 }
0x1700   : > { %v11515_v25 = vadd.f32 %v11514_v62, %v11439_v18 }
0x1701   : > { %v11588_v29 = vpop.f32.mrf.mxu0 }
0x1702   : > { %v11589_v37 = vadd.f32 %v11588_v29, %v11515_v25 }
0x1703   : > { %v15395_v44 = vpop.f32.mrf.mxu0 }
0x1704   : > { %v11663_v13 = vadd.f32 %v11662_v36, %v11589_v37 }
0x1705   : > { %v11736_v33 = vpop.f32.mrf.mxu0 }
0x1706   : > { %v11737_v40 = vadd.f32 %v11736_v33, %v11663_v13 }
0x1707   : > { %v15405_v12 = vpop.f32.mrf.mxu0 }
0x1708   : > { %v11809_v46 = vadd.f32 %v11808_v32, %v11737_v40 }
0x170a   : > { %v11813_v53 = vrot.slane %v11809_v46, 6 }
0x170c   : > { %11814 = vrot.lane.b32.xlu1 %v11813_v53, %s15751_s19 }
0x1710   : > { %11824 = vrot.lane.b32.xlu1 %v11813_v53, %s15753_s29 }
0x171c   : > { %v11342_v15 = vpop.permute.xlu0 %11341 }
0x171d   : > { %v11344_v38 = vmul.f32 %v15648_v22, %v11342_v15 }
0x171f   : > { %11346 = vrot.lane.b32.xlu0 %v11344_v38, %s15754_s18 }
0x177e   : > { %v11815_v26 = vpop.permute.xlu1 %11814 }
0x177f   : > { %v11817_v60 = vadd.f32 %v11815_v26, %v18825_v24 }
0x1781   : > { %v13890_v4 = vmul.f32 -1.442695, %v11817_v60 }
0x1782   : > { %v11825_v8 = vpop.permute.xlu1 %11824 }
0x1783   : > { %15649 = vpow2.f32 %v13890_v4 }
0x1790   : > { %v15650_v42 = vpop.eup %15649 }
0x1791   : > { %v11821_v1 = vadd.f32 1.0, %v15650_v42  ;;  %v11347_v43 = vpop.permute.xlu0 %11346 }
0x1792   : > { %v11349_v7 = vadd.f32 %v11347_v43, %v18825_v24 }
0x1793   : > { %15651 = vrcp.f32 %v11821_v1 }
0x1794   : > { %15653 = vtanh.f32 %v11349_v7 }
0x17a0   : > { %v15652_v28 = vpop.eup %15651 }
0x17a1   : > { %v15654_v16 = vpop.eup %15653  ;;  %v11827_v10 = vmul.f32 %v15652_v28, %v11825_v8  ;;  %v11842_v39 = vmul.f32 %v15652_v28, %v11840_v27  ;;  %v11834_v30 = vsub.f32 1.0, %v15652_v28 }
0x17a2   : > { %11353 = vrot.lane.b32.xlu0 %v15654_v16, %s15755_s30 }
0x17a3   : > { %11829 = vrot.lane.b32.xlu1 %v11827_v10, %s15754_s18 }
0x1814   : > { %v11354_v59 = vpop.permute.xlu0 %11353 }
0x1815   : > { %v11356_v55 = vmul.f32 %v11354_v59, %v11351_v58  ;;  %v11830_v54 = vpop.permute.xlu1 %11829 }
0x1816   : > { %v11832_v9 = vadd.f32 %v11830_v54, %v18825_v24 }
0x1817   : > { %v19250_v21 = vadd.f32 %v11359_v57, %v11356_v55 }
0x1818   : > { %15655 = vtanh.f32 %v11832_v9 }
0x1819   : > { %v11845_v35 = vrot.slane %v19250_v21, 5 }
0x181b   : > { %v19254_v5 = vmax.f32 %v19175_v56, %v11845_v35  ;;  %11852 = vrot.lane.b32.xlu0 %v11845_v35, %s15755_s30 }
0x1825   : > { %v15656_v51 = vpop.eup %15655 }
0x1826   : > { %11836 = vrot.lane.b32.xlu1 %v15656_v51, %s15755_s30 }
0x188d   : > { %v11853_v6 = vpop.permute.xlu0 %11852 }
0x188e   : > { %v11854_v62 = vsel %vm6036_vm7, %v11853_v6, 0 }
0x188f   : > { %v11922_v61 = vand.u32 4294901760, %v11854_v62 }
0x1891   : > { %v11923_v41 = vsub.f32 %v11854_v62, %v11922_v61  ;;  %15419 = vmatmul.mubr.f32.vlgmr.msra.gmra.mxu1 %v11922_v61 }
0x1892   : > { %15427 = vmatpush3.msra.mxu1 %v18671_v3  ;;  %15428 = vmatprep.mubr.msk.f32.mxu1 %vm15750_vm5, %v19910_v63 }
0x1893   : > { %v11924_v36 = vand.u32 4294901760, %v11923_v41  ;;  %15436 = vmatprep.subr.mxu1 %v19910_v63 }
0x1895   : > { %v11925_v56 = vsub.f32 %v11923_v41, %v11924_v36  ;;  %15429 = vmatmul.mubr.f32.vlgmr.msra.gmra.mxu1 %v11924_v36 }
0x1896   : > { %15437 = vmatpush3.msra.mxu1 %v18671_v3  ;;  %15438 = vmatprep.mubr.msk.f32.mxu1 %vm15750_vm5, %v19910_v63 }
0x1897   : > { %v11926_v11 = vand.u32 4294901760, %v11925_v56  ;;  %15446 = vmatprep.subr.mxu1 %v19910_v63 }
0x1898   : > { %v11837_v32 = vpop.permute.xlu1 %11836 }
0x1899   : > { %v11839_v18 = vmul.f32 %v11837_v32, %v11834_v30  ;;  %15414 = vmatmul.mubr.f32.vlgmr.msra.gmra.mxu0 %v11926_v11  ;;  %15439 = vmatmul.mubr.f32.vlgmr.msra.gmra.mxu1 %v11922_v61 }
0x189a   : > { %15422 = vmatpush3.msra.mxu0 %v18682_v45  ;;  %15423 = vmatprep.mubr.msk.f32.mxu0 %vm15750_vm5, %v19910_v63 }
0x189b   : > { %v19270_v31 = vadd.f32 %v11842_v39, %v11839_v18  ;;  %15431 = vmatprep.subr.mxu0 %v19910_v63  ;;  %15447 = vmatpush3.msra.mxu1 %v18768_v23 }
0x189c   : > { %15448 = vmatprep.mubr.msk.f32.mxu1 %vm15750_vm5, %v19910_v63  ;;  %15456 = vmatprep.subr.mxu1 %v19910_v63 }
0x189d   : > { %v11849_v0 = vrot.slane %v19270_v31, 3  ;;  %v12332_v25 = vrot.slane %v19270_v31, 2  ;;  %15424 = vmatmul.mubr.f32.vlgmr.msra.gmra.mxu0 %v11923_v41 }
0x189e   : > { %15432 = vmatpush3.msra.mxu0 %v18697_v49  ;;  %15433 = vmatprep.mubr.msk.f32.mxu0 %vm15750_vm5, %v19910_v63 }
0x189f   : > { %12333 = vrot.lane.b32.xlu1 %v12332_v25, %s15756_s26  ;;  %15441 = vmatprep.subr.mxu0 %v19910_v63  ;;  %v19285_v29 = vmax.f32 %v19183_v52, %v11849_v0 }
0x18a1   : > { %15434 = vmatmul.mubr.f32.vlgmr.msra.gmra.mxu0 %v11922_v61 }
0x18a2   : > { %15442 = vmatpush3.msra.mxu0 %v18713_v14  ;;  %15443 = vmatprep.mubr.msk.f32.mxu0 %vm15750_vm5, %v19910_v63 }
0x18a3   : > { %15451 = vmatprep.subr.mxu0 %v19910_v63 }
0x1911   : > { %v12334_v37 = vpop.permute.xlu1 %12333 }
0x1912   : > { %v12335_v44 = vsel %vm6036_vm7, %v12334_v37, 0 }
0x1913   : > { %v12403_v13 = vand.u32 4294901760, %v12335_v44 }
0x1915   : > { %v12404_v33 = vsub.f32 %v12335_v44, %v12403_v13  ;;  %15449 = vmatmul.mubr.f32.vlgmr.msra.gmra.mxu1 %v12403_v13 }
0x1916   : > { %15457 = vmatpush3.msra.mxu1 %v18713_v14  ;;  %15458 = vmatprep.mubr.msk.f32.mxu1 %vm15750_vm5, %v19910_v63 }
0x1917   : > { %v12405_v52 = vand.u32 4294901760, %v12404_v33  ;;  %15466 = vmatprep.subr.mxu1 %v19910_v63 }
0x1919   : > { %v12406_v40 = vsub.f32 %v12404_v33, %v12405_v52  ;;  %15459 = vmatmul.mubr.f32.vlgmr.msra.gmra.mxu1 %v12405_v52 }
0x191a   : > { %15467 = vmatpush3.msra.mxu1 %v18713_v14  ;;  %15468 = vmatprep.mubr.msk.f32.mxu1 %vm15750_vm5, %v19910_v63 }
0x191b   : > { %v12407_v12 = vand.u32 4294901760, %v12406_v40  ;;  %15476 = vmatprep.subr.mxu1 %v19910_v63 }
0x191d   : > { %15444 = vmatmul.mubr.f32.vlgmr.msra.gmra.mxu0 %v12407_v12  ;;  %15469 = vmatmul.mubr.f32.vlgmr.msra.gmra.mxu1 %v12403_v13 }
0x191e   : > { %15452 = vmatpush3.msra.mxu0 %v18729_v47  ;;  %15453 = vmatprep.mubr.msk.f32.mxu0 %vm15750_vm5, %v19910_v63 }
0x191f   : > { %15461 = vmatprep.subr.mxu0 %v19910_v63  ;;  %15477 = vmatpush3.msra.mxu1 %v18724_v17 }
0x1920   : > { %15478 = vmatprep.mubr.msk.f32.mxu1 %vm15750_vm5, %v19910_v63  ;;  %15486 = vmatprep.subr.mxu1 %v19910_v63 }
0x1921   : > { %15454 = vmatmul.mubr.f32.vlgmr.msra.gmra.mxu0 %v12404_v33 }
0x1922   : > { %15462 = vmatpush3.msra.mxu0 %v18744_v50  ;;  %15463 = vmatprep.mubr.msk.f32.mxu0 %vm15750_vm5, %v19910_v63 }
0x1923   : > { %15471 = vmatprep.subr.mxu0 %v19910_v63 }
0x1925   : > { %15464 = vmatmul.mubr.f32.vlgmr.msra.gmra.mxu0 %v12403_v13 }
0x1926   : > { %15472 = vmatpush3.msra.mxu0 %v18671_v3  ;;  %15473 = vmatprep.mubr.msk.f32.mxu0 %vm15750_vm5, %v19910_v63 }
0x1927   : > { %15481 = vmatprep.subr.mxu0 %v19910_v63 }
0x1951   : > { %v12004_v17 = vpop.f32.mrf.mxu1 }
0x1953   : > { %v15420_v2 = vpop.f32.mrf.mxu1 }
0x1955   : > { %v12152_v46 = vpop.f32.mrf.mxu1 }
0x1957   : > { %v15430_v53 = vpop.f32.mrf.mxu1 }
0x1959   : > { %v11928_v48 = vpop.f32.mrf.mxu0  ;;  %v12298_v22 = vpop.f32.mrf.mxu1 }
0x195a   : > { %v11929_v15 = vadd.f32 %v19149_v20, %v11928_v48  ;;  %v12811_v48 = vrot.slane %v19270_v31, 1 }
0x195b   : > { %v15415_v38 = vpop.f32.mrf.mxu0  ;;  %v15440_v26 = vpop.f32.mrf.mxu1 }
0x195c   : > { %v12005_v60 = vadd.f32 %v12004_v17, %v11929_v15 }
0x195d   : > { %v12078_v4 = vpop.f32.mrf.mxu0 }
0x195e   : > { %v12079_v42 = vadd.f32 %v12078_v4, %v12005_v60  ;;  %v12328_v60 = vrot.slane %v19250_v21, 7 }
0x195f   : > { %v15425_v1 = vpop.f32.mrf.mxu0 }
0x1960   : > { %v12153_v43 = vadd.f32 %v12152_v46, %v12079_v42 }
0x1961   : > { %v12226_v7 = vpop.f32.mrf.mxu0 }
0x1962   : > { %v12227_v27 = vadd.f32 %v12226_v7, %v12153_v43 }
0x1963   : > { %v15435_v28 = vpop.f32.mrf.mxu0 }
0x1964   : > { %v12299_v8 = vadd.f32 %v12298_v22, %v12227_v27 }
0x1966   : > { %v12303_v16 = vrot.slane %v12299_v8, 2 }
0x1968   : > { %12312 = vrot.lane.b32.xlu1 %v12303_v16, %s15752_s23  ;;  %v12305_v10 = vadd.f32 %v12303_v16, %v18825_v24 }
0x196a   : > { %v13891_v39 = vmul.f32 -1.442695, %v12305_v10 }
0x196c   : > { %15657 = vpow2.f32 %v13891_v39 }
0x1979   : > { %v15658_v34 = vpop.eup %15657 }
0x197a   : > { %v12309_v58 = vadd.f32 1.0, %v15658_v34 }
0x197c   : > { %15659 = vrcp.f32 %v12309_v58 }
0x1989   : > { %v15660_v54 = vpop.eup %15659 }
0x198a   : > { %v12322_v4 = vsub.f32 1.0, %v15660_v54  ;;  %v12330_v1 = vmul.f32 %v15660_v54, %v12328_v60 }
0x19d5   : > { %v12485_v59 = vpop.f32.mrf.mxu1 }
0x19d7   : > { %v15450_v57 = vpop.f32.mrf.mxu1 }
0x19d9   : > { %v12633_v55 = vpop.f32.mrf.mxu1 }
0x19da   : > { %v12313_v9 = vpop.permute.xlu1 %12312 }
0x19db   : > { %v12315_v35 = vmul.f32 %v15660_v54, %v12313_v9  ;;  %v15460_v51 = vpop.f32.mrf.mxu1 }
0x19dd   : > { %v12779_v6 = vpop.f32.mrf.mxu1  ;;  %12317 = vrot.lane.b32.xlu1 %v12315_v35, %s15754_s18  ;;  %v12409_v62 = vpop.f32.mrf.mxu0 }
0x19de   : > { %v12410_v61 = vadd.f32 %v19156_v19, %v12409_v62 }
0x19df   : > { %v15445_v41 = vpop.f32.mrf.mxu0  ;;  %v15470_v36 = vpop.f32.mrf.mxu1 }
0x19e0   : > { %v12486_v56 = vadd.f32 %v12485_v59, %v12410_v61 }
0x19e1   : > { %v12559_v11 = vpop.f32.mrf.mxu0 }
0x19e2   : > { %v12560_v30 = vadd.f32 %v12559_v11, %v12486_v56 }
0x19e3   : > { %v15455_v32 = vpop.f32.mrf.mxu0 }
0x19e4   : > { %v12634_v18 = vadd.f32 %v12633_v55, %v12560_v30 }
0x19e5   : > { %v12707_v0 = vpop.f32.mrf.mxu0 }
0x19e6   : > { %v12708_v25 = vadd.f32 %v12707_v0, %v12634_v18 }
0x19e7   : > { %v15465_v37 = vpop.f32.mrf.mxu0 }
0x19e8   : > { %v12780_v44 = vadd.f32 %v12779_v6, %v12708_v25 }
0x19ea   : > { %v12784_v13 = vrot.slane %v12780_v44, 7 }
0x19ec   : > { %12785 = vrot.lane.b32.xlu0 %v12784_v13, %s15751_s19 }
0x19f0   : > { %12795 = vrot.lane.b32.xlu0 %v12784_v13, %s15753_s29 }
0x1a4f   : > { %v12318_v33 = vpop.permute.xlu1 %12317 }
0x1a50   : > { %v12320_v52 = vadd.f32 %v12318_v33, %v18825_v24 }
0x1a52   : > { %15661 = vtanh.f32 %v12320_v52 }
0x1a5e   : > { %v12786_v40 = vpop.permute.xlu0 %12785 }
0x1a5f   : > { %v15662_v12 = vpop.eup %15661  ;;  %v12788_v17 = vadd.f32 %v12786_v40, %v18825_v24 }
0x1a60   : > { %12324 = vrot.lane.b32.xlu1 %v15662_v12, %s15755_s30 }
0x1a61   : > { %v13892_v2 = vmul.f32 -1.442695, %v12788_v17 }
0x1a62   : > { %v12796_v15 = vpop.permute.xlu0 %12795 }
0x1a63   : > { %15663 = vpow2.f32 %v13892_v2 }
0x1a70   : > { %v15664_v46 = vpop.eup %15663 }
0x1a71   : > { %v12792_v53 = vadd.f32 1.0, %v15664_v46 }
0x1a73   : > { %15665 = vrcp.f32 %v12792_v53 }
0x1a80   : > { %v15666_v22 = vpop.eup %15665 }
0x1a81   : > { %v12798_v38 = vmul.f32 %v15666_v22, %v12796_v15  ;;  %v12813_v26 = vmul.f32 %v15666_v22, %v12811_v48 }
0x1a83   : > { %12800 = vrot.lane.b32.xlu0 %v12798_v38, %s15754_s18 }
0x1ad2   : > { %v12325_v42 = vpop.permute.xlu1 %12324 }
0x1ad3   : > { %v12327_v43 = vmul.f32 %v12325_v42, %v12322_v4 }
0x1ad5   : > { %v19329_v7 = vadd.f32 %v12330_v1, %v12327_v43 }
0x1ad7   : > { %v12816_v27 = vrot.slane %v19329_v7, 6 }
0x1ad9   : > { %v19333_v28 = vmax.f32 %v19254_v5, %v12816_v27  ;;  %12823 = vrot.lane.b32.xlu1 %v12816_v27, %s15755_s30 }
0x1af5   : > { %v12801_v31 = vpop.permute.xlu0 %12800 }
0x1af6   : > { %v12803_v8 = vadd.f32 %v12801_v31, %v18825_v24 }
0x1af8   : > { %15667 = vtanh.f32 %v12803_v8 }
0x1b05   : > { %v15668_v16 = vpop.eup %15667 }
0x1b06   : > { %12807 = vrot.lane.b32.xlu0 %v15668_v16, %s15755_s30 }
0x1b4b   : > { %v12824_v21 = vpop.permute.xlu1 %12823 }
0x1b4c   : > { %v12825_v10 = vsel %vm6036_vm7, %v12824_v21, 0 }
0x1b4d   : > { %v12893_v39 = vand.u32 4294901760, %v12825_v10 }
0x1b4f   : > { %v12894_v34 = vsub.f32 %v12825_v10, %v12893_v39  ;;  %15479 = vmatmul.mubr.f32.vlgmr.msra.gmra.mxu1 %v12893_v39 }
0x1b50   : > { %15487 = vmatpush3.msra.mxu1 %v18671_v3  ;;  %15488 = vmatprep.mubr.msk.f32.mxu1 %vm15750_vm5, %v19910_v63 }
0x1b51   : > { %v12895_v5 = vand.u32 4294901760, %v12894_v34  ;;  %15496 = vmatprep.subr.mxu1 %v19910_v63 }
0x1b53   : > { %v12896_v58 = vsub.f32 %v12894_v34, %v12895_v5  ;;  %15489 = vmatmul.mubr.f32.vlgmr.msra.gmra.mxu1 %v12895_v5 }
0x1b54   : > { %15497 = vmatpush3.msra.mxu1 %v18671_v3  ;;  %15498 = vmatprep.mubr.msk.f32.mxu1 %vm15750_vm5, %v19910_v63  ;;  %v12805_v3 = vsub.f32 1.0, %v15666_v22 }
0x1b55   : > { %v12897_v59 = vand.u32 4294901760, %v12896_v58  ;;  %15506 = vmatprep.subr.mxu1 %v19910_v63 }
0x1b57   : > { %15474 = vmatmul.mubr.f32.vlgmr.msra.gmra.mxu0 %v12897_v59  ;;  %15499 = vmatmul.mubr.f32.vlgmr.msra.gmra.mxu1 %v12893_v39 }
0x1b58   : > { %15482 = vmatpush3.msra.mxu0 %v18682_v45  ;;  %15483 = vmatprep.mubr.msk.f32.mxu0 %vm15750_vm5, %v19910_v63 }
0x1b59   : > { %15491 = vmatprep.subr.mxu0 %v19910_v63  ;;  %15507 = vmatpush3.msra.mxu1 %v18768_v23 }
0x1b5a   : > { %15508 = vmatprep.mubr.msk.f32.mxu1 %vm15750_vm5, %v19910_v63  ;;  %15516 = vmatprep.subr.mxu1 %v19910_v63 }
0x1b5b   : > { %15484 = vmatmul.mubr.f32.vlgmr.msra.gmra.mxu0 %v12894_v34 }
0x1b5c   : > { %15492 = vmatpush3.msra.mxu0 %v18697_v49  ;;  %15493 = vmatprep.mubr.msk.f32.mxu0 %vm15750_vm5, %v19910_v63 }
0x1b5d   : > { %15501 = vmatprep.subr.mxu0 %v19910_v63 }
0x1b5f   : > { %15494 = vmatmul.mubr.f32.vlgmr.msra.gmra.mxu0 %v12893_v39 }
0x1b60   : > { %15502 = vmatpush3.msra.mxu0 %v18713_v14  ;;  %15503 = vmatprep.mubr.msk.f32.mxu0 %vm15750_vm5, %v19910_v63 }
0x1b61   : > { %15511 = vmatprep.subr.mxu0 %v19910_v63 }
0x1b78   : > { %v12808_v45 = vpop.permute.xlu0 %12807 }
0x1b79   : > { %v12810_v23 = vmul.f32 %v12808_v45, %v12805_v3 }
0x1b7b   : > { %v19363_v57 = vadd.f32 %v12813_v26, %v12810_v23 }
0x1b7d   : > { %v12820_v49 = vrot.slane %v19363_v57, 2  ;;  %v13303_v55 = vrot.slane %v19363_v57, 1 }
0x1b7f   : > { %v19368_v54 = vmax.f32 %v19285_v29, %v12820_v49  ;;  %13304 = vrot.lane.b32.xlu0 %v13303_v55, %s15756_s26 }
0x1bf1   : > { %v13305_v9 = vpop.permute.xlu0 %13304 }
0x1bf2   : > { %v13306_v35 = vsel %vm6036_vm7, %v13305_v9, 0 }
0x1bf3   : > { %v13374_v51 = vand.u32 4294901760, %v13306_v35 }
0x1bf5   : > { %v13375_v6 = vsub.f32 %v13306_v35, %v13374_v51  ;;  %15509 = vmatmul.mubr.f32.vlgmr.msra.gmra.mxu1 %v13374_v51 }
0x1bf6   : > { %15517 = vmatpush3.msra.mxu1 %v18713_v14  ;;  %15518 = vmatprep.mubr.msk.f32.mxu1 %vm15750_vm5, %v19910_v63 }
0x1bf7   : > { %v13376_v62 = vand.u32 4294901760, %v13375_v6  ;;  %15526 = vmatprep.subr.mxu1 %v19910_v63 }
0x1bf9   : > { %v13377_v29 = vsub.f32 %v13375_v6, %v13376_v62  ;;  %15519 = vmatmul.mubr.f32.vlgmr.msra.gmra.mxu1 %v13376_v62 }
0x1bfa   : > { %15527 = vmatpush3.msra.mxu1 %v18713_v14  ;;  %15528 = vmatprep.mubr.msk.f32.mxu1 %vm15750_vm5, %v19910_v63 }
0x1bfb   : > { %v13378_v61 = vand.u32 4294901760, %v13377_v29 }
0x1bfd   : > { %15504 = vmatmul.mubr.f32.vlgmr.msra.gmra.mxu0 %v13378_v61  ;;  %15529 = vmatmul.mubr.f32.vlgmr.msra.gmra.mxu1 %v13374_v51 }
0x1bfe   : > { %15512 = vmatpush3.msra.mxu0 %v18729_v47  ;;  %15513 = vmatprep.mubr.msk.f32.mxu0 %vm15750_vm5, %v19910_v63 }
0x1bff   : > { %15521 = vmatprep.subr.mxu0 %v19910_v63 }
0x1c01   : > { %15514 = vmatmul.mubr.f32.vlgmr.msra.gmra.mxu0 %v13375_v6 }
0x1c02   : > { %15522 = vmatpush3.msra.mxu0 %v18744_v50  ;;  %15523 = vmatprep.mubr.msk.f32.mxu0 %vm15750_vm5, %v19910_v63 }
0x1c05   : > { %15524 = vmatmul.mubr.f32.vlgmr.msra.gmra.mxu0 %v13374_v51 }
0x1c0f   : > { %v12975_v14 = vpop.f32.mrf.mxu1 }
0x1c11   : > { %v15480_v41 = vpop.f32.mrf.mxu1 }
0x1c13   : > { %v13123_v36 = vpop.f32.mrf.mxu1 }
0x1c15   : > { %v15490_v56 = vpop.f32.mrf.mxu1 }
0x1c17   : > { %v12899_v11 = vpop.f32.mrf.mxu0  ;;  %v13269_v30 = vpop.f32.mrf.mxu1 }
0x1c18   : > { %v12900_v47 = vadd.f32 %v19149_v20, %v12899_v11 }
0x1c19   : > { %v15475_v32 = vpop.f32.mrf.mxu0  ;;  %v15500_v18 = vpop.f32.mrf.mxu1 }
0x1c1a   : > { %v12976_v0 = vadd.f32 %v12975_v14, %v12900_v47  ;;  %v13299_v14 = vrot.slane %v19329_v7, 7 }
0x1c1b   : > { %v13049_v25 = vpop.f32.mrf.mxu0 }
0x1c1c   : > { %v13050_v37 = vadd.f32 %v13049_v25, %v12976_v0 }
0x1c1d   : > { %v15485_v44 = vpop.f32.mrf.mxu0 }
0x1c1e   : > { %v13124_v13 = vadd.f32 %v13123_v36, %v13050_v37 }
0x1c1f   : > { %v13197_v50 = vpop.f32.mrf.mxu0 }
0x1c20   : > { %v13198_v33 = vadd.f32 %v13197_v50, %v13124_v13 }
0x1c21   : > { %v15495_v52 = vpop.f32.mrf.mxu0 }
0x1c22   : > { %v13270_v63 = vadd.f32 %v13269_v30, %v13198_v33 }
0x1c24   : > { %v13274_v31 = vrot.slane %v13270_v63, 1 }
0x1cb5   : > { %v13456_v40 = vpop.f32.mrf.mxu1 }
0x1cb7   : > { %v15510_v12 = vpop.f32.mrf.mxu1 }
0x1cb9   : > { %v13604_v17 = vpop.f32.mrf.mxu1 }
0x1cbb   : > { %v15520_v2 = vpop.f32.mrf.mxu1 }
0x1cbd   : > { %v13380_v46 = vpop.f32.mrf.mxu0  ;;  %v13750_v53 = vpop.f32.mrf.mxu1 }
0x1cbe   : > { %v13381_v48 = vadd.f32 %v19156_v19, %v13380_v46  ;;  %v13276_v19 = vadd.f32 %v13274_v31, %v18825_v24 }
0x1cbf   : > { %v15505_v20 = vpop.f32.mrf.mxu0  ;;  %v15530_v22 = vpop.f32.mrf.mxu1 }
0x1cc0   : > { %v13457_v15 = vadd.f32 %v13456_v40, %v13381_v48  ;;  %v13893_v8 = vmul.f32 -1.442695, %v13276_v19 }
0x1cc1   : > { %v13530_v38 = vpop.f32.mrf.mxu0 }
0x1cc2   : > { %v13531_v26 = vadd.f32 %v13530_v38, %v13457_v15  ;;  %15669 = vpow2.f32 %v13893_v8 }
0x1cc3   : > { %v15515_v60 = vpop.f32.mrf.mxu0 }
0x1cc4   : > { %v13605_v4 = vadd.f32 %v13604_v17, %v13531_v26 }
0x1cc5   : > { %v13678_v42 = vpop.f32.mrf.mxu0 }
0x1cc6   : > { %v13679_v1 = vadd.f32 %v13678_v42, %v13605_v4 }
0x1cc7   : > { %v15525_v43 = vpop.f32.mrf.mxu0 }
0x1cc8   : > { %v13751_v27 = vadd.f32 %v13750_v53, %v13679_v1 }
0x1cca   : > { %13765 = vrot.lane.b32.xlu0 %v13751_v27, %s15753_s29  ;;  %13755 = vrot.lane.b32.xlu1 %v13751_v27, %s15751_s19  ;;  %s15757_s19 = smov 116   ;;  %s13895_s29 = sshll.u32 %s15870_s28, 4 }
0x1ccb   : > { %s19412_s21 = scalar_lea.hbm %s19465_s17, %s13895_s29  ;;  %s15758_s28 = smov [#allocation2]  }
0x1cce   : > { %13283 = vrot.lane.b32.xlu1 %v13274_v31, %s15752_s23  ;;  %s539_s23 = sand.u32 1, %s15735_s25  }
0x1ccf   : > { %v15670_v16 = vpop.eup %15669  ;;  %s13805_s22 = scalar_lea.sflag [#allocation3], %s539_s23 }
0x1cd0   : > { %v13280_v21 = vadd.f32 1.0, %v15670_v16 }
0x1cd2   : > { %15671 = vrcp.f32 %v13280_v21 }
0x1cdf   : > { %v15672_v5 = vpop.eup %15671 }
0x1ce0   : > { %v13293_v41 = vsub.f32 1.0, %v15672_v5  ;;  %v13301_v56 = vmul.f32 %v15672_v5, %v13299_v14 }
0x1d3c   : > { %v13756_v10 = vpop.permute.xlu1 %13755  ;;  %v13766_v49 = vpop.permute.xlu0 %13765 }
0x1d3d   : > { %v13758_v39 = vadd.f32 %v13756_v10, %v18825_v24 }
0x1d3f   : > { %v13894_v34 = vmul.f32 -1.442695, %v13758_v39 }
0x1d40   : > { %v13284_v58 = vpop.permute.xlu1 %13283 }
0x1d41   : > { %15673 = vpow2.f32 %v13894_v34  ;;  %v13286_v59 = vmul.f32 %v15672_v5, %v13284_v58 }
0x1d43   : > { %13288 = vrot.lane.b32.xlu1 %v13286_v59, %s15754_s18 }
0x1d4e   : > { %v15674_v3 = vpop.eup %15673 }
0x1d4f   : > { %v13762_v45 = vadd.f32 1.0, %v15674_v3 }
0x1d51   : > { %15675 = vrcp.f32 %v13762_v45 }
0x1d5e   : > { %v15676_v23 = vpop.eup %15675 }
0x1d5f   : > { %v13768_v9 = vmul.f32 %v15676_v23, %v13766_v49  ;;  %v13775_v18 = vsub.f32 1.0, %v15676_v23  ;;  %v13782_v0 = vmul.f32 %v15676_v23, %v13303_v55 }
0x1d61   : > { %13770 = vrot.lane.b32.xlu0 %v13768_v9, %s15754_s18  ;;  %s540_s18 = scalar_lea.vmem [#allocation2], %s539_s23 }
0x1d62   : > { %s13817_s26 = sshll.u32 %s540_s18, 4  ;;  %s13818_s26 = int_to_ptr.vmem [resolvable:$true] %s13817_s26 }
0x1d63   : > { %s15683_s24 = scalar_lea.vmem %s13818_s26, 16 }
0x1d64   : > { %p15684_p11 = scmp.ne.s32.totalorder %s13818_s26, %s15683_s24 }
0x1d66   : > { %p15685_p12 = pnand %p15684_p11, %p15887_p5 }
0x1d68   : > { %p15686_p13 = pneg %p15685_p12 }
0x1db5   : > { %v13289_v35 = vpop.permute.xlu1 %13288 }
0x1db6   : > { %v13291_v51 = vadd.f32 %v13289_v35, %v18825_v24 }
0x1db8   : > { %15677 = vtanh.f32 %v13291_v51 }
0x1dc5   : > { %v15678_v6 = vpop.eup %15677 }
0x1dc6   : > { %13295 = vrot.lane.b32.xlu1 %v15678_v6, %s15755_s30 }
0x1dd3   : > { %v13771_v62 = vpop.permute.xlu0 %13770 }
0x1dd4   : > { %v13773_v29 = vadd.f32 %v13771_v62, %v18825_v24 }
0x1dd6   : > { %15679 = vtanh.f32 %v13773_v29 }
0x1de3   : > { %v15680_v61 = vpop.eup %15679 }
0x1de4   : > { %13777 = vrot.lane.b32.xlu0 %v15680_v61, %s15755_s30 }
0x1e38   : > { %v13296_v36 = vpop.permute.xlu1 %13295 }
0x1e39   : > { %v13298_v11 = vmul.f32 %v13296_v36, %v13293_v41 }
0x1e3b   : > { %v13302_v30 = vadd.f32 %v13301_v56, %v13298_v11 }
0x1e3d   : > { %v13785_v47 = vrot.slane %v13302_v30, 7 }
0x1e3f   : > { %v13787_v32 = vmax.f32 %v19333_v28, %v13785_v47 }
0x1e41   : > { %13793 = vrot.lane.b32.xlu0 %v13787_v32, %s15755_s30 }
0x1e56   : > { %v13778_v24 = vpop.permute.xlu0 %13777 }
0x1e57   : > { %v13780_v25 = vmul.f32 %v13778_v24, %v13775_v18 }
0x1e59   : > { %v13783_v37 = vadd.f32 %v13782_v0, %v13780_v25 }
0x1e5b   : > { %v13789_v7 = vrot.slane %v13783_v37, 1 }
0x1e5d   : > { %v13791_v44 = vmax.f32 %v19368_v54, %v13789_v7 }
0x1e5f   : > { %v13797_v13 = vrot.slane %v13791_v44, 7 }
0x1e61   : > { %13798 = vrot.lane.b32.xlu1 %v13797_v13, %s15757_s19  ;;  %s15687_s19 = sshll.u32 %s15758_s28, 4  ;;  %s15688_s19 = int_to_ptr.vmem [resolvable:$false] %s15687_s19 }
0x1e62   : > { %s15689_s2 = scalar_lea.vmem %s15688_s19, 32  ;;  %p15690_p0 = scmp.lt.s32.totalorder %s13818_s26, %s15688_s19 }
0x1e63   : > { %p15691_p1 = scmp.lt.s32.totalorder %s15689_s2, %s15683_s24 }
0x1e65   : > { %p15692_p2 = por %p15691_p1, %p15690_p0 }
0x1e67   : > { %p15693_p3 = pnand %p15692_p2, %p15686_p13 }
0x1eb3   : > { %v13794_v28 = vpop.permute.xlu0 %13793 }
0x1ed3   : > { %v13799_v50 = vpop.permute.xlu1 %13798 }
0x1ed4   : > { %v13801_v57 = vsel %vm6036_vm7, %v13794_v28, %v13799_v50 }
0x1ed5   : > { %13803 = vst.msk [vmem:[%s540_s18] sm:$0x1] %vm13802_vm8, %v13801_v57 }
0x1ed6   : > { %15696 = shalt.err (!%p15693_p3)
}
0x1ed7   : > { %s15697_s29 = scalar_lea.hbm %s19412_s21, 16  ;;  %s15701_s30 = scalar_lea.hbm %s19465_s17, 32 }
0x1ed8   : > { %p15698_p4 = scmp.ne.s32.totalorder %s19412_s21, %s15697_s29  ;;  %p15702_p9 = scmp.lt.s32.totalorder %s19412_s21, %s19465_s17 }
0x1ed9   : > { %p15703_p10 = scmp.lt.s32.totalorder %s15701_s30, %s15697_s29 }
0x1eda   : > { %p15699_p7 = pnand %p15698_p4, %p15887_p5 }
0x1edb   : > { %p15704_p11 = por %p15703_p10, %p15702_p9 }
0x1edc   : > { %p15700_p8 = pneg %p15699_p7 }
0x1ede   : > { %p15705_p12 = pnand %p15704_p11, %p15700_p8 }
0x1ee0   : > { %15708 = shalt.err (!%p15705_p12)
}
0x1ee1   : > { %15531 = dma.vmem_to_hbm [thread:$0]  (%p15887_p5), %s13818_s26, 16, %s19412_s21, %s13805_s22  }
0x1ee2 PF: > { %s19920_s2 = sld [smem:[#allocation5_spill]]  ;;  %p15537_p13 = scmp.ge.s32.totalorder %s15743_s27, 2 }
0x1ee4   : > { %p15534_p0 = pnand %p15537_p13, %p15891_p6 }
0x1ee6   : > { %p15535_p1 = pneg %p15534_p0 }
0x1ee8   : > { %s13829_s19 = sand.u32 1, %s19920_s2  }
0x1ee9   : > { %s13830_s23 = scalar_lea.sflag [#allocation3], %s13829_s19 }
0x1eea   : > { %15726 = dma.done.wait (%p15535_p1), %s13830_s23, 16  }
0x1eeb   : > { %15728 = vsyncadd (%p15535_p1), %s13830_s23, 4294967280  ;;  %s19922_s27 = sld [smem:[#allocation7_spill]]  ;;  %s19925_s24 = smov %s15735_s25 }
0x1eec   : > { %s19923_s29 = sld [smem:[#allocation6_spill]] }
0x1eed   : > { %s19924_s26 = sld [smem:[#allocation8_spill]] }
0x1ef1   : > { %p27_p2 = scmp.ge.s32.totalorder %s19922_s27, 4  }
0x1ef2   : > { %s19926_s25 = smov %s19923_s29 }
0x1ef3   :  { %29 = sbr.rel (!%p27_p2) target bundleno = 7 (0x7), region = 123 }
0x1ef8   :  { %13834 = vsyncpa [#allocation3], 1 }
0x1ef9   :  { %13836 = vsyncpa [#allocation3 + $0x1], 1 }

</bundles_post_ra>
